<compile_context>
chip_gen: v6e
topology: v6e:2x2x1
jax: 0.10.0
libtpu: 0.0.40
codegen_flags: <defaults>
</compile_context>

<pallas_src>
import functools

import numpy as np
import jax
import jax.numpy as jnp
from jax.experimental import pallas as pl
from jax.experimental.pallas import tpu as pltpu

# ------------------------- deterministic "cfg" -------------------------------
CFG = {
    'spec_loss_weight': 1.0,
    'amplitude_loss_weight': 0.5,
    'angle_loss_weight': 0.25,
    'time_loss_weight': 1.0,
    'energy_loss_weight': 0.1,
    'multistft_loss_weight': 0.75,
}

# auraloss.freq.MultiResolutionSTFTLoss(w_lin_mag=1, ...) configuration
_FFT_SIZES = (512, 256, 128, 64)
_WIN_LENGTHS = (300, 150, 75, 30)
_HOP_SIZES = (60, 30, 8, 4)


# ------------------------- small helpers --------------------------------------
def _pad128(n):
    return ((n + 127) // 128) * 128


def _full_vmem(shape):
    nd = len(shape)
    return pl.BlockSpec(shape, lambda i, _nd=nd: (0,) * _nd)


def _smem_out(n):
    return pl.BlockSpec((n,), lambda i: (0,),
                        memory_space=pltpu.MemorySpace.SMEM)


# ------------------------- Pallas kernels ------------------------------------
def _irfft_loss_kernel(ox_ref, px_ref, c_ref, ot_ref, pt_ref, s_ref, *, fpad):
    """Fused irfft for both signals + complex/amplitude/angle/time L1 sums.

    ox/px are [B, 2*fpad] = [real | imag] (zero padded to 128-multiples),
    c is [2*fpad, N] with the Cr/Ci blocks stacked along rows so the irfft is
    a single f32 matmul per signal."""
    ox = ox_ref[...]
    px = px_ref[...]
    c = c_ref[...]
    ot = jnp.dot(ox, c, preferred_element_type=jnp.float32)
    pt = jnp.dot(px, c, preferred_element_type=jnp.float32)
    ot_ref[...] = ot
    pt_ref[...] = pt

    o_r, o_i = ox[:, :fpad], ox[:, fpad:]
    p_r, p_i = px[:, :fpad], px[:, fpad:]
    p_abs = jnp.sqrt(p_r * p_r + p_i * p_i)
    o_abs = jnp.sqrt(o_r * o_r + o_i * o_i)
    tiny = jnp.float32(1e-30)
    p_inv = 1.0 / jnp.maximum(p_abs, tiny)
    o_inv = 1.0 / jnp.maximum(o_abs, tiny)
    # padded lanes are zero in both signals -> contribute exactly 0 everywhere.
    s_ref[0] = jnp.sum(jnp.abs(p_r - o_r))                     # L1 real
    s_ref[1] = jnp.sum(jnp.abs(p_i - o_i))                     # L1 imag
    s_ref[2] = jnp.sum(jnp.abs(p_abs - o_abs))                 # L1 abs
    s_ref[3] = jnp.sum(jnp.abs(p_r * p_inv - o_r * o_inv))     # L1 cos(angle)
    s_ref[4] = jnp.sum(jnp.abs(p_i * p_inv - o_i * o_inv))     # L1 sin(angle)
    s_ref[5] = jnp.sum(jnp.abs(ot - pt))                       # time-domain L1


def _stft_energy_kernel(of_ref, pf_ref, d_ref, eo_ref, ep_ref):
    """Per-frame spectral energy sum_k |STFT|^2 for both signals.

    d is the fused [n_fft, 2*fpad] (cos | -sin) DFT matrix (bf16), padded
    columns are zero so sum(z*z) over all lanes equals sum over real bins."""
    d = d_ref[...]
    zo = jnp.dot(of_ref[...], d, preferred_element_type=jnp.float32)
    zp = jnp.dot(pf_ref[...], d, preferred_element_type=jnp.float32)
    eo_ref[...] = jnp.sum(zo * zo, axis=-1, keepdims=True)
    ep_ref[...] = jnp.sum(zp * zp, axis=-1, keepdims=True)


def _stft_stats_kernel(of_ref, pf_ref, d_ref, s_ref, *, fpad, n_freq, eps):
    """Fused |STFT| + auraloss STFTLoss statistics (one resolution).

    x = ori magnitude (auraloss input), y = pred magnitude (auraloss target).
    Padded freq lanes produce identical x == y == sqrt(eps) so they contribute
    0 to the L1/Frobenius diffs; only the ||y||^2 term needs a lane mask."""
    d = d_ref[...]
    zo = jnp.dot(of_ref[...], d, preferred_element_type=jnp.float32)
    zp = jnp.dot(pf_ref[...], d, preferred_element_type=jnp.float32)
    x = jnp.sqrt(jnp.maximum(zo[:, :fpad] * zo[:, :fpad]
                             + zo[:, fpad:] * zo[:, fpad:], eps))
    y = jnp.sqrt(jnp.maximum(zp[:, :fpad] * zp[:, :fpad]
                             + zp[:, fpad:] * zp[:, fpad:], eps))
    diff = y - x
    lane = jax.lax.broadcasted_iota(jnp.int32, y.shape, 1)
    yy = jnp.where(lane < n_freq, y * y, 0.0)
    s_ref[0] = jnp.sum(jnp.abs(diff))                          # lin-mag L1 sum
    s_ref[1] = jnp.sum(jnp.abs(jnp.log(x) - jnp.log(y)))       # log-mag L1 sum
    s_ref[2] = jnp.sum(diff * diff)                            # ||y - x||_F^2
    s_ref[3] = jnp.sum(yy)                                     # ||y||_F^2


# ------------------------- host-constant builders ------------------------------
def _irfft_matrix(F, fpad, N):
    # torch.fft.irfft as a real matmul; DC/Nyquist imag parts multiply sin=0.
    k = np.arange(F, dtype=np.float64)[:, None]
    n = np.arange(N, dtype=np.float64)[None, :]
    ang = 2.0 * np.pi * k * n / N
    w = np.where((k == 0) | (k == F - 1), 1.0, 2.0) / N
    C = np.zeros((2 * fpad, N), np.float32)
    C[:F, :] = (w * np.cos(ang)).astype(np.float32)
    C[fpad:fpad + F, :] = (-w * np.sin(ang)).astype(np.float32)
    return jnp.asarray(C)


def _stft_dft_matrix(n_fft, fpad):
    # fused (cos | -sin) forward-DFT matrix, freq padded to 128 multiple.
    n_freq = n_fft // 2 + 1
    n = np.arange(n_fft, dtype=np.float64)[:, None]
    k = np.arange(n_freq, dtype=np.float64)[None, :]
    ang = 2.0 * np.pi * n * k / n_fft
    D = np.zeros((n_fft, 2 * fpad), np.float32)
    D[:, :n_freq] = np.cos(ang)
    D[:, fpad:fpad + n_freq] = -np.sin(ang)
    return jnp.asarray(D, dtype=jnp.bfloat16)


def _hann_padded(win_length, n_fft):
    # torch.hann_window (periodic), centered-padded to n_fft like torch.stft.
    n = np.arange(win_length, dtype=np.float64)
    w = 0.5 - 0.5 * np.cos(2.0 * np.pi * n / win_length)
    left = (n_fft - win_length) // 2
    out = np.zeros((n_fft,), np.float32)
    out[left:left + win_length] = w.astype(np.float32)
    return out


def _frames(x, n_fft, hop, window_np, out_dtype):
    """torch.stft framing: reflect pad + overlapping windows -> [B*nf, n_fft]."""
    B, T = x.shape
    pad = n_fft // 2
    xp = jnp.pad(x, ((0, 0), (pad, pad)), mode='reflect')
    n_frames = 1 + (T + 2 * pad - n_fft) // hop
    idx = np.arange(n_frames)[:, None] * hop + np.arange(n_fft)[None, :]
    fr = xp[:, idx]
    if window_np is not None:
        fr = fr * jnp.asarray(window_np)[None, None, :]
    return fr.reshape(B * n_frames, n_fft).astype(out_dtype), n_frames


# ------------------------- fused pallas_call wrappers --------------------------
def _irfft_and_l1(ori_r, ori_i, pred_r, pred_i):
    B, F = ori_r.shape
    N = 2 * (F - 1)
    fpad = _pad128(F)

    def cat(r, i):
        x = jnp.zeros((B, 2 * fpad), jnp.float32)
        return x.at[:, :F].set(r).at[:, fpad:fpad + F].set(i)

    ox = cat(ori_r, ori_i)
    px = cat(pred_r, pred_i)
    C = _irfft_matrix(F, fpad, N)
    ot, pt, s = pl.pallas_call(
        functools.partial(_irfft_loss_kernel, fpad=fpad),
        out_shape=(jax.ShapeDtypeStruct((B, N), jnp.float32),
                   jax.ShapeDtypeStruct((B, N), jnp.float32),
                   jax.ShapeDtypeStruct((6,), jnp.float32)),
        grid=(1,),
        in_specs=[_full_vmem((B, 2 * fpad)), _full_vmem((B, 2 * fpad)),
                  _full_vmem((2 * fpad, N))],
        out_specs=(_full_vmem((B, N)), _full_vmem((B, N)), _smem_out(6)),
    )(ox, px, C)
    return ot, pt, s


def _spec_energy(ori_time, pred_time):
    # torch.stft(x, n_fft=256): hop=64, rectangular window, center/reflect.
    n_fft, hop = 256, 64
    B = ori_time.shape[0]
    fpad = _pad128(n_fft // 2 + 1)                       # 129 -> 256
    of, n_frames = _frames(ori_time, n_fft, hop, None, jnp.bfloat16)
    pf, _ = _frames(pred_time, n_fft, hop, None, jnp.bfloat16)
    D = _stft_dft_matrix(n_fft, fpad)
    Mh = of.shape[0]
    eo, ep = pl.pallas_call(
        _stft_energy_kernel,
        out_shape=(jax.ShapeDtypeStruct((Mh, 1), jnp.float32),
                   jax.ShapeDtypeStruct((Mh, 1), jnp.float32)),
        grid=(1,),
        in_specs=[_full_vmem((Mh, n_fft)), _full_vmem((Mh, n_fft)),
                  _full_vmem((n_fft, 2 * fpad))],
        out_specs=(_full_vmem((Mh, 1)), _full_vmem((Mh, 1))),
    )(of, pf, D)
    return eo.reshape(B, n_frames), ep.reshape(B, n_frames)


def _mrstft_res_stats(ori_time, pred_time, n_fft, win_length, hop):
    n_freq = n_fft // 2 + 1
    fpad = _pad128(n_freq)
    win = _hann_padded(win_length, n_fft)
    of, _ = _frames(ori_time, n_fft, hop, win, jnp.bfloat16)
    pf, _ = _frames(pred_time, n_fft, hop, win, jnp.bfloat16)
    D = _stft_dft_matrix(n_fft, fpad)
    Mh = of.shape[0]
    s = pl.pallas_call(
        functools.partial(_stft_stats_kernel, fpad=fpad, n_freq=n_freq,
                          eps=1e-8),
        out_shape=jax.ShapeDtypeStruct((4,), jnp.float32),
        grid=(1,),
        in_specs=[_full_vmem((Mh, n_fft)), _full_vmem((Mh, n_fft)),
                  _full_vmem((n_fft, 2 * fpad))],
        out_specs=_smem_out(4),
    )(of, pf, D)
    return s, Mh * n_freq


# ------------------------- Criterion forward ----------------------------------
def criterion_forward(pred_r, pred_i, ori_r, ori_i):
    B, F = pred_r.shape
    N = 2 * (F - 1)

    # fused irfft (both signals) + complex/amplitude/angle/time L1 sums
    ori_time, pred_time, csum = _irfft_and_l1(ori_r, ori_i, pred_r, pred_i)

    n_el = jnp.float32(B * F)
    real_loss = csum[0] / n_el
    imag_loss = csum[1] / n_el
    spec_loss = (real_loss + imag_loss) * CFG['spec_loss_weight']
    amplitude_loss = (csum[2] / n_el) * CFG['amplitude_loss_weight']
    angle_loss = ((csum[3] + csum[4]) / n_el) * CFG['angle_loss_weight']
    time_loss = (csum[5] / jnp.float32(B * N)) * CFG['time_loss_weight']

    # energy loss (per-frame energies from one fused STFT kernel; the tiny
    # [B, n_frames] reversed-cumsum/log10 curve stays in plain JAX).
    eo, ep = _spec_energy(ori_time, pred_time)

    def energy_curve(e):
        rc = jnp.flip(jnp.cumsum(jnp.flip(e, -1) ** 2, axis=-1), -1)
        en = jnp.log10(rc + 1e-9)
        return en - en[:, :1]

    ori_energy = energy_curve(eo)
    predict_energy = energy_curve(ep)
    energy_loss = (jnp.mean(jnp.abs(ori_energy - predict_energy))
                   * CFG['energy_loss_weight'])

    # auraloss MultiResolutionSTFTLoss (w_sc=1, w_log_mag=1, w_lin_mag=1),
    # input = ori_time, target = pred_time (matches mrft_loss(ori, pred)).
    mr_loss = jnp.float32(0.0)
    for nf, wl, hp in zip(_FFT_SIZES, _WIN_LENGTHS, _HOP_SIZES):
        s, numel = _mrstft_res_stats(ori_time, pred_time, nf, wl, hp)
        sc_loss = jnp.sqrt(s[2]) / jnp.sqrt(s[3])        # spectral convergence
        log_loss = s[1] / jnp.float32(numel)             # log-mag L1 mean
        lin_loss = s[0] / jnp.float32(numel)             # lin-mag L1 mean
        mr_loss = mr_loss + sc_loss + log_loss + lin_loss
    multi_stft_loss = (mr_loss / len(_FFT_SIZES)) * CFG['multistft_loss_weight']

    return (spec_loss, amplitude_loss, angle_loss, time_loss,
            energy_loss, multi_stft_loss, ori_time, pred_time)


# ------------------------- main ------------------------------------------------
if __name__ == "__main__":
    key = jax.random.PRNGKey(0)
    k1, k2, k3, k4 = jax.random.split(key, 4)
    # pred_sig / ori_sig: complex [B, F] rfft spectra (passed as real/imag
    # pairs).  F = 257 -> irfft time length T = 512 (>= largest fft_size=512,
    # so the reflect padding is valid, matching the PyTorch module).
    B, F = 2, 257
    pred_r = jax.random.normal(k1, (B, F), jnp.float32)
    pred_i = jax.random.normal(k2, (B, F), jnp.float32)
    ori_r = jax.random.normal(k3, (B, F), jnp.float32)
    ori_i = jax.random.normal(k4, (B, F), jnp.float32)

    fn = jax.jit(criterion_forward)
    outs = fn(pred_r, pred_i, ori_r, ori_i)
    outs = jax.block_until_ready(outs)
    print("KERNEL_OK")
</pallas_src>

<mosaic_0001>
module attributes {stable_mosaic.version = 11 : i64} {
  func.func @_irfft_loss_kernel(%arg0: i32, %arg1: memref<2x768xf32, #tpu.memory_space<vmem>>, %arg2: memref<2x768xf32, #tpu.memory_space<vmem>>, %arg3: memref<768x512xf32, #tpu.memory_space<vmem>>, %arg4: memref<2x512xf32, #tpu.memory_space<vmem>>, %arg5: memref<2x512xf32, #tpu.memory_space<vmem>>, %arg6: memref<6xf32, #tpu.memory_space<smem>>) attributes {dimension_semantics = [#tpu.dimension_semantics<arbitrary>], iteration_bounds = array<i64: 1>, scalar_prefetch = 0 : i64, scratch_operands = 0 : i64, tpu.core_type = #tpu.core_type<tc>, window_params = [{pipeline_mode = #tpu.pipeline_mode<synchronous>, transform_indices = @transform_0, window_bounds = array<i64: 2, 768>}, {pipeline_mode = #tpu.pipeline_mode<synchronous>, transform_indices = @transform_1, window_bounds = array<i64: 2, 768>}, {pipeline_mode = #tpu.pipeline_mode<synchronous>, transform_indices = @transform_2, window_bounds = array<i64: 768, 512>}, {pipeline_mode = #tpu.pipeline_mode<synchronous>, transform_indices = @transform_3, window_bounds = array<i64: 2, 512>}, {pipeline_mode = #tpu.pipeline_mode<synchronous>, transform_indices = @transform_4, window_bounds = array<i64: 2, 512>}, {transform_indices = @transform_5, window_bounds = array<i64: 6>}]} {
    %c0 = arith.constant 0 : index
    %c0_0 = arith.constant 0 : index
    %0 = vector.load %arg1[%c0, %c0_0] : memref<2x768xf32, #tpu.memory_space<vmem>>, vector<2x768xf32>
    %c0_1 = arith.constant 0 : index
    %c0_2 = arith.constant 0 : index
    %1 = vector.load %arg2[%c0_1, %c0_2] : memref<2x768xf32, #tpu.memory_space<vmem>>, vector<2x768xf32>
    %c0_3 = arith.constant 0 : index
    %c0_4 = arith.constant 0 : index
    %2 = vector.load %arg3[%c0_3, %c0_4] : memref<768x512xf32, #tpu.memory_space<vmem>>, vector<768x512xf32>
    %cst = arith.constant dense<0.000000e+00> : vector<2x512xf32>
    %3 = tpu.matmul %0, %2, %cst {dimension_numbers = #tpu.dot_dimension_numbers<[1], [0], [0], [1], [0, 0, 1, 1], [], []>} : vector<2x768xf32>, vector<768x512xf32>, vector<2x512xf32> -> vector<2x512xf32>
    %cst_5 = arith.constant dense<0.000000e+00> : vector<2x512xf32>
    %4 = tpu.matmul %1, %2, %cst_5 {dimension_numbers = #tpu.dot_dimension_numbers<[1], [0], [0], [1], [0, 0, 1, 1], [], []>} : vector<2x768xf32>, vector<768x512xf32>, vector<2x512xf32> -> vector<2x512xf32>
    %c0_6 = arith.constant 0 : index
    %c0_7 = arith.constant 0 : index
    %5 = vector.load %arg4[%c0_6, %c0_7] : memref<2x512xf32, #tpu.memory_space<vmem>>, vector<2x512xf32>
    tpu.vector_store %arg4[%c0_6, %c0_7], %3 {strides = array<i32>} : memref<2x512xf32, #tpu.memory_space<vmem>>, vector<2x512xf32>,
    %c0_8 = arith.constant 0 : index
    %c0_9 = arith.constant 0 : index
    %6 = vector.load %arg5[%c0_8, %c0_9] : memref<2x512xf32, #tpu.memory_space<vmem>>, vector<2x512xf32>
    tpu.vector_store %arg5[%c0_8, %c0_9], %4 {strides = array<i32>} : memref<2x512xf32, #tpu.memory_space<vmem>>, vector<2x512xf32>,
    %7 = vector.extract_strided_slice %0 {offsets = [0, 0], sizes = [2, 384], strides = [1, 1]} : vector<2x768xf32> to vector<2x384xf32>
    %8 = vector.extract_strided_slice %0 {offsets = [0, 384], sizes = [2, 384], strides = [1, 1]} : vector<2x768xf32> to vector<2x384xf32>
    %9 = vector.extract_strided_slice %1 {offsets = [0, 0], sizes = [2, 384], strides = [1, 1]} : vector<2x768xf32> to vector<2x384xf32>
    %10 = vector.extract_strided_slice %1 {offsets = [0, 384], sizes = [2, 384], strides = [1, 1]} : vector<2x768xf32> to vector<2x384xf32>
    %11 = arith.mulf %9, %9 : vector<2x384xf32>
    %12 = arith.mulf %10, %10 : vector<2x384xf32>
    %13 = arith.addf %11, %12 : vector<2x384xf32>
    %14 = math.sqrt %13 : vector<2x384xf32>
    %15 = arith.mulf %7, %7 : vector<2x384xf32>
    %16 = arith.mulf %8, %8 : vector<2x384xf32>
    %17 = arith.addf %15, %16 : vector<2x384xf32>
    %18 = math.sqrt %17 : vector<2x384xf32>
    %cst_10 = arith.constant 1.000000e-30 : f32
    %19 = vector.broadcast %cst_10 : f32 to vector<2x384xf32>
    %20 = arith.maximumf %14, %19 : vector<2x384xf32>
    %cst_11 = arith.constant 1.000000e+00 : f32
    %21 = vector.broadcast %cst_11 : f32 to vector<2x384xf32>
    %22 = arith.divf %21, %20 : vector<2x384xf32>
    %cst_12 = arith.constant 1.000000e-30 : f32
    %23 = vector.broadcast %cst_12 : f32 to vector<2x384xf32>
    %24 = arith.maximumf %18, %23 : vector<2x384xf32>
    %cst_13 = arith.constant 1.000000e+00 : f32
    %25 = vector.broadcast %cst_13 : f32 to vector<2x384xf32>
    %26 = arith.divf %25, %24 : vector<2x384xf32>
    %27 = arith.subf %9, %7 : vector<2x384xf32>
    %28 = math.absf %27 : vector<2x384xf32>
    %29 = vector.shape_cast %28 : vector<2x384xf32> to vector<1x2x384xf32>
    %cst_14 = arith.constant dense<0.000000e+00> : vector<1xf32>
    %30 = vector.multi_reduction <add>, %29, %cst_14 [1, 2] : vector<1x2x384xf32> to vector<1xf32>
    %31 = vector.shape_cast %30 : vector<1xf32> to vector<1x1x1xf32>
    %32 = vector.extract %31[0, 0, 0] : f32 from vector<1x1x1xf32>
    %c0_15 = arith.constant 0 : index
    %33 = memref.load %arg6[%c0_15] : memref<6xf32, #tpu.memory_space<smem>>
    memref.store %32, %arg6[%c0_15] : memref<6xf32, #tpu.memory_space<smem>>
    %34 = arith.subf %10, %8 : vector<2x384xf32>
    %35 = math.absf %34 : vector<2x384xf32>
    %36 = vector.shape_cast %35 : vector<2x384xf32> to vector<1x2x384xf32>
    %cst_16 = arith.constant dense<0.000000e+00> : vector<1xf32>
    %37 = vector.multi_reduction <add>, %36, %cst_16 [1, 2] : vector<1x2x384xf32> to vector<1xf32>
    %38 = vector.shape_cast %37 : vector<1xf32> to vector<1x1x1xf32>
    %39 = vector.extract %38[0, 0, 0] : f32 from vector<1x1x1xf32>
    %c1 = arith.constant 1 : index
    %40 = memref.load %arg6[%c1] : memref<6xf32, #tpu.memory_space<smem>>
    memref.store %39, %arg6[%c1] : memref<6xf32, #tpu.memory_space<smem>>
    %41 = arith.subf %14, %18 : vector<2x384xf32>
    %42 = math.absf %41 : vector<2x384xf32>
    %43 = vector.shape_cast %42 : vector<2x384xf32> to vector<1x2x384xf32>
    %cst_17 = arith.constant dense<0.000000e+00> : vector<1xf32>
    %44 = vector.multi_reduction <add>, %43, %cst_17 [1, 2] : vector<1x2x384xf32> to vector<1xf32>
    %45 = vector.shape_cast %44 : vector<1xf32> to vector<1x1x1xf32>
    %46 = vector.extract %45[0, 0, 0] : f32 from vector<1x1x1xf32>
    %c2 = arith.constant 2 : index
    %47 = memref.load %arg6[%c2] : memref<6xf32, #tpu.memory_space<smem>>
    memref.store %46, %arg6[%c2] : memref<6xf32, #tpu.memory_space<smem>>
    %48 = arith.mulf %9, %22 : vector<2x384xf32>
    %49 = arith.mulf %7, %26 : vector<2x384xf32>
    %50 = arith.subf %48, %49 : vector<2x384xf32>
    %51 = math.absf %50 : vector<2x384xf32>
    %52 = vector.shape_cast %51 : vector<2x384xf32> to vector<1x2x384xf32>
    %cst_18 = arith.constant dense<0.000000e+00> : vector<1xf32>
    %53 = vector.multi_reduction <add>, %52, %cst_18 [1, 2] : vector<1x2x384xf32> to vector<1xf32>
    %54 = vector.shape_cast %53 : vector<1xf32> to vector<1x1x1xf32>
    %55 = vector.extract %54[0, 0, 0] : f32 from vector<1x1x1xf32>
    %c3 = arith.constant 3 : index
    %56 = memref.load %arg6[%c3] : memref<6xf32, #tpu.memory_space<smem>>
    memref.store %55, %arg6[%c3] : memref<6xf32, #tpu.memory_space<smem>>
    %57 = arith.mulf %10, %22 : vector<2x384xf32>
    %58 = arith.mulf %8, %26 : vector<2x384xf32>
    %59 = arith.subf %57, %58 : vector<2x384xf32>
    %60 = math.absf %59 : vector<2x384xf32>
    %61 = vector.shape_cast %60 : vector<2x384xf32> to vector<1x2x384xf32>
    %cst_19 = arith.constant dense<0.000000e+00> : vector<1xf32>
    %62 = vector.multi_reduction <add>, %61, %cst_19 [1, 2] : vector<1x2x384xf32> to vector<1xf32>
    %63 = vector.shape_cast %62 : vector<1xf32> to vector<1x1x1xf32>
    %64 = vector.extract %63[0, 0, 0] : f32 from vector<1x1x1xf32>
    %c4 = arith.constant 4 : index
    %65 = memref.load %arg6[%c4] : memref<6xf32, #tpu.memory_space<smem>>
    memref.store %64, %arg6[%c4] : memref<6xf32, #tpu.memory_space<smem>>
    %66 = arith.subf %3, %4 : vector<2x512xf32>
    %67 = math.absf %66 : vector<2x512xf32>
    %68 = vector.shape_cast %67 : vector<2x512xf32> to vector<1x2x512xf32>
    %cst_20 = arith.constant dense<0.000000e+00> : vector<1xf32>
    %69 = vector.multi_reduction <add>, %68, %cst_20 [1, 2] : vector<1x2x512xf32> to vector<1xf32>
    %70 = vector.shape_cast %69 : vector<1xf32> to vector<1x1x1xf32>
    %71 = vector.extract %70[0, 0, 0] : f32 from vector<1x1x1xf32>
    %c5 = arith.constant 5 : index
    %72 = memref.load %arg6[%c5] : memref<6xf32, #tpu.memory_space<smem>>
    memref.store %71, %arg6[%c5] : memref<6xf32, #tpu.memory_space<smem>>
    return
  }
  func.func @transform_0(%arg0: i32) -> (i32, i32) {
    %c0_i32 = arith.constant 0 : i32
    %c0_i32_0 = arith.constant 0 : i32
    %c0_i32_1 = arith.constant 0 : i32
    return %c0_i32, %c0_i32_0 : i32, i32
  }
  func.func @transform_1(%arg0: i32) -> (i32, i32) {
    %c0_i32 = arith.constant 0 : i32
    %c0_i32_0 = arith.constant 0 : i32
    %c0_i32_1 = arith.constant 0 : i32
    return %c0_i32, %c0_i32_0 : i32, i32
  }
  func.func @transform_2(%arg0: i32) -> (i32, i32) {
    %c0_i32 = arith.constant 0 : i32
    %c0_i32_0 = arith.constant 0 : i32
    %c0_i32_1 = arith.constant 0 : i32
    return %c0_i32, %c0_i32_0 : i32, i32
  }
  func.func @transform_3(%arg0: i32) -> (i32, i32) {
    %c0_i32 = arith.constant 0 : i32
    %c0_i32_0 = arith.constant 0 : i32
    %c0_i32_1 = arith.constant 0 : i32
    return %c0_i32, %c0_i32_0 : i32, i32
  }
  func.func @transform_4(%arg0: i32) -> (i32, i32) {
    %c0_i32 = arith.constant 0 : i32
    %c0_i32_0 = arith.constant 0 : i32
    %c0_i32_1 = arith.constant 0 : i32
    return %c0_i32, %c0_i32_0 : i32, i32
  }
  func.func @transform_5(%arg0: i32) -> i32 {
    %c0_i32 = arith.constant 0 : i32
    %c0_i32_0 = arith.constant 0 : i32
    return %c0_i32 : i32
  }
}

module attributes {stable_mosaic.version = 11 : i64} {
  func.func @_stft_stats_kernel(%arg0: i32, %arg1: memref<258x64xbf16, #tpu.memory_space<vmem>>, %arg2: memref<258x64xbf16, #tpu.memory_space<vmem>>, %arg3: memref<64x256xbf16, #tpu.memory_space<vmem>>, %arg4: memref<4xf32, #tpu.memory_space<smem>>) attributes {dimension_semantics = [#tpu.dimension_semantics<arbitrary>], iteration_bounds = array<i64: 1>, scalar_prefetch = 0 : i64, scratch_operands = 0 : i64, tpu.core_type = #tpu.core_type<tc>, window_params = [{pipeline_mode = #tpu.pipeline_mode<synchronous>, transform_indices = @transform_0, window_bounds = array<i64: 258, 64>}, {pipeline_mode = #tpu.pipeline_mode<synchronous>, transform_indices = @transform_1, window_bounds = array<i64: 258, 64>}, {pipeline_mode = #tpu.pipeline_mode<synchronous>, transform_indices = @transform_2, window_bounds = array<i64: 64, 256>}, {transform_indices = @transform_3, window_bounds = array<i64: 4>}]} {
    %c0 = arith.constant 0 : index
    %c0_0 = arith.constant 0 : index
    %0 = vector.load %arg3[%c0, %c0_0] : memref<64x256xbf16, #tpu.memory_space<vmem>>, vector<64x256xbf16>
    %c0_1 = arith.constant 0 : index
    %c0_2 = arith.constant 0 : index
    %1 = vector.load %arg1[%c0_1, %c0_2] : memref<258x64xbf16, #tpu.memory_space<vmem>>, vector<258x64xbf16>
    %cst = arith.constant dense<0.000000e+00> : vector<258x256xf32>
    %2 = tpu.matmul %1, %0, %cst {dimension_numbers = #tpu.dot_dimension_numbers<[1], [0], [0], [1], [0, 0, 1, 1], [], []>} : vector<258x64xbf16>, vector<64x256xbf16>, vector<258x256xf32> -> vector<258x256xf32>
    %c0_3 = arith.constant 0 : index
    %c0_4 = arith.constant 0 : index
    %3 = vector.load %arg2[%c0_3, %c0_4] : memref<258x64xbf16, #tpu.memory_space<vmem>>, vector<258x64xbf16>
    %cst_5 = arith.constant dense<0.000000e+00> : vector<258x256xf32>
    %4 = tpu.matmul %3, %0, %cst_5 {dimension_numbers = #tpu.dot_dimension_numbers<[1], [0], [0], [1], [0, 0, 1, 1], [], []>} : vector<258x64xbf16>, vector<64x256xbf16>, vector<258x256xf32> -> vector<258x256xf32>
    %5 = vector.extract_strided_slice %2 {offsets = [0, 0], sizes = [258, 128], strides = [1, 1]} : vector<258x256xf32> to vector<258x128xf32>
    %6 = vector.extract_strided_slice %2 {offsets = [0, 0], sizes = [258, 128], strides = [1, 1]} : vector<258x256xf32> to vector<258x128xf32>
    %7 = arith.mulf %5, %6 : vector<258x128xf32>
    %8 = vector.extract_strided_slice %2 {offsets = [0, 128], sizes = [258, 128], strides = [1, 1]} : vector<258x256xf32> to vector<258x128xf32>
    %9 = vector.extract_strided_slice %2 {offsets = [0, 128], sizes = [258, 128], strides = [1, 1]} : vector<258x256xf32> to vector<258x128xf32>
    %10 = arith.mulf %8, %9 : vector<258x128xf32>
    %11 = arith.addf %7, %10 : vector<258x128xf32>
    %cst_6 = arith.constant 9.99999993E-9 : f32
    %12 = vector.broadcast %cst_6 : f32 to vector<258x128xf32>
    %13 = arith.maximumf %11, %12 : vector<258x128xf32>
    %14 = math.sqrt %13 : vector<258x128xf32>
    %15 = vector.extract_strided_slice %4 {offsets = [0, 0], sizes = [258, 128], strides = [1, 1]} : vector<258x256xf32> to vector<258x128xf32>
    %16 = vector.extract_strided_slice %4 {offsets = [0, 0], sizes = [258, 128], strides = [1, 1]} : vector<258x256xf32> to vector<258x128xf32>
    %17 = arith.mulf %15, %16 : vector<258x128xf32>
    %18 = vector.extract_strided_slice %4 {offsets = [0, 128], sizes = [258, 128], strides = [1, 1]} : vector<258x256xf32> to vector<258x128xf32>
    %19 = vector.extract_strided_slice %4 {offsets = [0, 128], sizes = [258, 128], strides = [1, 1]} : vector<258x256xf32> to vector<258x128xf32>
    %20 = arith.mulf %18, %19 : vector<258x128xf32>
    %21 = arith.addf %17, %20 : vector<258x128xf32>
    %cst_7 = arith.constant 9.99999993E-9 : f32
    %22 = vector.broadcast %cst_7 : f32 to vector<258x128xf32>
    %23 = arith.maximumf %21, %22 : vector<258x128xf32>
    %24 = math.sqrt %23 : vector<258x128xf32>
    %25 = arith.subf %24, %14 : vector<258x128xf32>
    %26 = tpu.iota {dimensions = array<i32: 1>} : vector<258x128xi32>
    %c33_i32 = arith.constant 33 : i32
    %27 = vector.broadcast %c33_i32 : i32 to vector<258x128xi32>
    %28 = arith.cmpi slt, %26, %27 : vector<258x128xi32>
    %29 = arith.mulf %24, %24 : vector<258x128xf32>
    %cst_8 = arith.constant 0.000000e+00 : f32
    %30 = vector.broadcast %cst_8 : f32 to vector<258x128xf32>
    %31 = arith.select %28, %29, %30 : vector<258x128xi1>, vector<258x128xf32>
    %32 = math.absf %25 : vector<258x128xf32>
    %33 = vector.shape_cast %32 : vector<258x128xf32> to vector<1x258x128xf32>
    %cst_9 = arith.constant dense<0.000000e+00> : vector<1xf32>
    %34 = vector.multi_reduction <add>, %33, %cst_9 [1, 2] : vector<1x258x128xf32> to vector<1xf32>
    %35 = vector.shape_cast %34 : vector<1xf32> to vector<1x1x1xf32>
    %36 = vector.extract %35[0, 0, 0] : f32 from vector<1x1x1xf32>
    %c0_10 = arith.constant 0 : index
    %37 = memref.load %arg4[%c0_10] : memref<4xf32, #tpu.memory_space<smem>>
    memref.store %36, %arg4[%c0_10] : memref<4xf32, #tpu.memory_space<smem>>
    %38 = math.log %14 : vector<258x128xf32>
    %39 = math.log %24 : vector<258x128xf32>
    %40 = arith.subf %38, %39 : vector<258x128xf32>
    %41 = math.absf %40 : vector<258x128xf32>
    %42 = vector.shape_cast %41 : vector<258x128xf32> to vector<1x258x128xf32>
    %cst_11 = arith.constant dense<0.000000e+00> : vector<1xf32>
    %43 = vector.multi_reduction <add>, %42, %cst_11 [1, 2] : vector<1x258x128xf32> to vector<1xf32>
    %44 = vector.shape_cast %43 : vector<1xf32> to vector<1x1x1xf32>
    %45 = vector.extract %44[0, 0, 0] : f32 from vector<1x1x1xf32>
    %c1 = arith.constant 1 : index
    %46 = memref.load %arg4[%c1] : memref<4xf32, #tpu.memory_space<smem>>
    memref.store %45, %arg4[%c1] : memref<4xf32, #tpu.memory_space<smem>>
    %47 = arith.mulf %25, %25 : vector<258x128xf32>
    %48 = vector.shape_cast %47 : vector<258x128xf32> to vector<1x258x128xf32>
    %cst_12 = arith.constant dense<0.000000e+00> : vector<1xf32>
    %49 = vector.multi_reduction <add>, %48, %cst_12 [1, 2] : vector<1x258x128xf32> to vector<1xf32>
    %50 = vector.shape_cast %49 : vector<1xf32> to vector<1x1x1xf32>
    %51 = vector.extract %50[0, 0, 0] : f32 from vector<1x1x1xf32>
    %c2 = arith.constant 2 : index
    %52 = memref.load %arg4[%c2] : memref<4xf32, #tpu.memory_space<smem>>
    memref.store %51, %arg4[%c2] : memref<4xf32, #tpu.memory_space<smem>>
    %53 = vector.shape_cast %31 : vector<258x128xf32> to vector<1x258x128xf32>
    %cst_13 = arith.constant dense<0.000000e+00> : vector<1xf32>
    %54 = vector.multi_reduction <add>, %53, %cst_13 [1, 2] : vector<1x258x128xf32> to vector<1xf32>
    %55 = vector.shape_cast %54 : vector<1xf32> to vector<1x1x1xf32>
    %56 = vector.extract %55[0, 0, 0] : f32 from vector<1x1x1xf32>
    %c3 = arith.constant 3 : index
    %57 = memref.load %arg4[%c3] : memref<4xf32, #tpu.memory_space<smem>>
    memref.store %56, %arg4[%c3] : memref<4xf32, #tpu.memory_space<smem>>
    return
  }
  func.func @transform_0(%arg0: i32) -> (i32, i32) {
    %c0_i32 = arith.constant 0 : i32
    %c0_i32_0 = arith.constant 0 : i32
    %c0_i32_1 = arith.constant 0 : i32
    return %c0_i32, %c0_i32_0 : i32, i32
  }
  func.func @transform_1(%arg0: i32) -> (i32, i32) {
    %c0_i32 = arith.constant 0 : i32
    %c0_i32_0 = arith.constant 0 : i32
    %c0_i32_1 = arith.constant 0 : i32
    return %c0_i32, %c0_i32_0 : i32, i32
  }
  func.func @transform_2(%arg0: i32) -> (i32, i32) {
    %c0_i32 = arith.constant 0 : i32
    %c0_i32_0 = arith.constant 0 : i32
    %c0_i32_1 = arith.constant 0 : i32
    return %c0_i32, %c0_i32_0 : i32, i32
  }
  func.func @transform_3(%arg0: i32) -> i32 {
    %c0_i32 = arith.constant 0 : i32
    %c0_i32_0 = arith.constant 0 : i32
    return %c0_i32 : i32
  }
}

module attributes {stable_mosaic.version = 11 : i64} {
  func.func @_stft_stats_kernel(%arg0: i32, %arg1: memref<130x128xbf16, #tpu.memory_space<vmem>>, %arg2: memref<130x128xbf16, #tpu.memory_space<vmem>>, %arg3: memref<128x256xbf16, #tpu.memory_space<vmem>>, %arg4: memref<4xf32, #tpu.memory_space<smem>>) attributes {dimension_semantics = [#tpu.dimension_semantics<arbitrary>], iteration_bounds = array<i64: 1>, scalar_prefetch = 0 : i64, scratch_operands = 0 : i64, tpu.core_type = #tpu.core_type<tc>, window_params = [{pipeline_mode = #tpu.pipeline_mode<synchronous>, transform_indices = @transform_0, window_bounds = array<i64: 130, 128>}, {pipeline_mode = #tpu.pipeline_mode<synchronous>, transform_indices = @transform_1, window_bounds = array<i64: 130, 128>}, {pipeline_mode = #tpu.pipeline_mode<synchronous>, transform_indices = @transform_2, window_bounds = array<i64: 128, 256>}, {transform_indices = @transform_3, window_bounds = array<i64: 4>}]} {
    %c0 = arith.constant 0 : index
    %c0_0 = arith.constant 0 : index
    %0 = vector.load %arg3[%c0, %c0_0] : memref<128x256xbf16, #tpu.memory_space<vmem>>, vector<128x256xbf16>
    %c0_1 = arith.constant 0 : index
    %c0_2 = arith.constant 0 : index
    %1 = vector.load %arg1[%c0_1, %c0_2] : memref<130x128xbf16, #tpu.memory_space<vmem>>, vector<130x128xbf16>
    %cst = arith.constant dense<0.000000e+00> : vector<130x256xf32>
    %2 = tpu.matmul %1, %0, %cst {dimension_numbers = #tpu.dot_dimension_numbers<[1], [0], [0], [1], [0, 0, 1, 1], [], []>} : vector<130x128xbf16>, vector<128x256xbf16>, vector<130x256xf32> -> vector<130x256xf32>
    %c0_3 = arith.constant 0 : index
    %c0_4 = arith.constant 0 : index
    %3 = vector.load %arg2[%c0_3, %c0_4] : memref<130x128xbf16, #tpu.memory_space<vmem>>, vector<130x128xbf16>
    %cst_5 = arith.constant dense<0.000000e+00> : vector<130x256xf32>
    %4 = tpu.matmul %3, %0, %cst_5 {dimension_numbers = #tpu.dot_dimension_numbers<[1], [0], [0], [1], [0, 0, 1, 1], [], []>} : vector<130x128xbf16>, vector<128x256xbf16>, vector<130x256xf32> -> vector<130x256xf32>
    %5 = vector.extract_strided_slice %2 {offsets = [0, 0], sizes = [130, 128], strides = [1, 1]} : vector<130x256xf32> to vector<130x128xf32>
    %6 = vector.extract_strided_slice %2 {offsets = [0, 0], sizes = [130, 128], strides = [1, 1]} : vector<130x256xf32> to vector<130x128xf32>
    %7 = arith.mulf %5, %6 : vector<130x128xf32>
    %8 = vector.extract_strided_slice %2 {offsets = [0, 128], sizes = [130, 128], strides = [1, 1]} : vector<130x256xf32> to vector<130x128xf32>
    %9 = vector.extract_strided_slice %2 {offsets = [0, 128], sizes = [130, 128], strides = [1, 1]} : vector<130x256xf32> to vector<130x128xf32>
    %10 = arith.mulf %8, %9 : vector<130x128xf32>
    %11 = arith.addf %7, %10 : vector<130x128xf32>
    %cst_6 = arith.constant 9.99999993E-9 : f32
    %12 = vector.broadcast %cst_6 : f32 to vector<130x128xf32>
    %13 = arith.maximumf %11, %12 : vector<130x128xf32>
    %14 = math.sqrt %13 : vector<130x128xf32>
    %15 = vector.extract_strided_slice %4 {offsets = [0, 0], sizes = [130, 128], strides = [1, 1]} : vector<130x256xf32> to vector<130x128xf32>
    %16 = vector.extract_strided_slice %4 {offsets = [0, 0], sizes = [130, 128], strides = [1, 1]} : vector<130x256xf32> to vector<130x128xf32>
    %17 = arith.mulf %15, %16 : vector<130x128xf32>
    %18 = vector.extract_strided_slice %4 {offsets = [0, 128], sizes = [130, 128], strides = [1, 1]} : vector<130x256xf32> to vector<130x128xf32>
    %19 = vector.extract_strided_slice %4 {offsets = [0, 128], sizes = [130, 128], strides = [1, 1]} : vector<130x256xf32> to vector<130x128xf32>
    %20 = arith.mulf %18, %19 : vector<130x128xf32>
    %21 = arith.addf %17, %20 : vector<130x128xf32>
    %cst_7 = arith.constant 9.99999993E-9 : f32
    %22 = vector.broadcast %cst_7 : f32 to vector<130x128xf32>
    %23 = arith.maximumf %21, %22 : vector<130x128xf32>
    %24 = math.sqrt %23 : vector<130x128xf32>
    %25 = arith.subf %24, %14 : vector<130x128xf32>
    %26 = tpu.iota {dimensions = array<i32: 1>} : vector<130x128xi32>
    %c65_i32 = arith.constant 65 : i32
    %27 = vector.broadcast %c65_i32 : i32 to vector<130x128xi32>
    %28 = arith.cmpi slt, %26, %27 : vector<130x128xi32>
    %29 = arith.mulf %24, %24 : vector<130x128xf32>
    %cst_8 = arith.constant 0.000000e+00 : f32
    %30 = vector.broadcast %cst_8 : f32 to vector<130x128xf32>
    %31 = arith.select %28, %29, %30 : vector<130x128xi1>, vector<130x128xf32>
    %32 = math.absf %25 : vector<130x128xf32>
    %33 = vector.shape_cast %32 : vector<130x128xf32> to vector<1x130x128xf32>
    %cst_9 = arith.constant dense<0.000000e+00> : vector<1xf32>
    %34 = vector.multi_reduction <add>, %33, %cst_9 [1, 2] : vector<1x130x128xf32> to vector<1xf32>
    %35 = vector.shape_cast %34 : vector<1xf32> to vector<1x1x1xf32>
    %36 = vector.extract %35[0, 0, 0] : f32 from vector<1x1x1xf32>
    %c0_10 = arith.constant 0 : index
    %37 = memref.load %arg4[%c0_10] : memref<4xf32, #tpu.memory_space<smem>>
    memref.store %36, %arg4[%c0_10] : memref<4xf32, #tpu.memory_space<smem>>
    %38 = math.log %14 : vector<130x128xf32>
    %39 = math.log %24 : vector<130x128xf32>
    %40 = arith.subf %38, %39 : vector<130x128xf32>
    %41 = math.absf %40 : vector<130x128xf32>
    %42 = vector.shape_cast %41 : vector<130x128xf32> to vector<1x130x128xf32>
    %cst_11 = arith.constant dense<0.000000e+00> : vector<1xf32>
    %43 = vector.multi_reduction <add>, %42, %cst_11 [1, 2] : vector<1x130x128xf32> to vector<1xf32>
    %44 = vector.shape_cast %43 : vector<1xf32> to vector<1x1x1xf32>
    %45 = vector.extract %44[0, 0, 0] : f32 from vector<1x1x1xf32>
    %c1 = arith.constant 1 : index
    %46 = memref.load %arg4[%c1] : memref<4xf32, #tpu.memory_space<smem>>
    memref.store %45, %arg4[%c1] : memref<4xf32, #tpu.memory_space<smem>>
    %47 = arith.mulf %25, %25 : vector<130x128xf32>
    %48 = vector.shape_cast %47 : vector<130x128xf32> to vector<1x130x128xf32>
    %cst_12 = arith.constant dense<0.000000e+00> : vector<1xf32>
    %49 = vector.multi_reduction <add>, %48, %cst_12 [1, 2] : vector<1x130x128xf32> to vector<1xf32>
    %50 = vector.shape_cast %49 : vector<1xf32> to vector<1x1x1xf32>
    %51 = vector.extract %50[0, 0, 0] : f32 from vector<1x1x1xf32>
    %c2 = arith.constant 2 : index
    %52 = memref.load %arg4[%c2] : memref<4xf32, #tpu.memory_space<smem>>
    memref.store %51, %arg4[%c2] : memref<4xf32, #tpu.memory_space<smem>>
    %53 = vector.shape_cast %31 : vector<130x128xf32> to vector<1x130x128xf32>
    %cst_13 = arith.constant dense<0.000000e+00> : vector<1xf32>
    %54 = vector.multi_reduction <add>, %53, %cst_13 [1, 2] : vector<1x130x128xf32> to vector<1xf32>
    %55 = vector.shape_cast %54 : vector<1xf32> to vector<1x1x1xf32>
    %56 = vector.extract %55[0, 0, 0] : f32 from vector<1x1x1xf32>
    %c3 = arith.constant 3 : index
    %57 = memref.load %arg4[%c3] : memref<4xf32, #tpu.memory_space<smem>>
    memref.store %56, %arg4[%c3] : memref<4xf32, #tpu.memory_space<smem>>
    return
  }
  func.func @transform_0(%arg0: i32) -> (i32, i32) {
    %c0_i32 = arith.constant 0 : i32
    %c0_i32_0 = arith.constant 0 : i32
    %c0_i32_1 = arith.constant 0 : i32
    return %c0_i32, %c0_i32_0 : i32, i32
  }
  func.func @transform_1(%arg0: i32) -> (i32, i32) {
    %c0_i32 = arith.constant 0 : i32
    %c0_i32_0 = arith.constant 0 : i32
    %c0_i32_1 = arith.constant 0 : i32
    return %c0_i32, %c0_i32_0 : i32, i32
  }
  func.func @transform_2(%arg0: i32) -> (i32, i32) {
    %c0_i32 = arith.constant 0 : i32
    %c0_i32_0 = arith.constant 0 : i32
    %c0_i32_1 = arith.constant 0 : i32
    return %c0_i32, %c0_i32_0 : i32, i32
  }
  func.func @transform_3(%arg0: i32) -> i32 {
    %c0_i32 = arith.constant 0 : i32
    %c0_i32_0 = arith.constant 0 : i32
    return %c0_i32 : i32
  }
}

module attributes {stable_mosaic.version = 11 : i64} {
  func.func @_stft_stats_kernel(%arg0: i32, %arg1: memref<36x256xbf16, #tpu.memory_space<vmem>>, %arg2: memref<36x256xbf16, #tpu.memory_space<vmem>>, %arg3: memref<256x512xbf16, #tpu.memory_space<vmem>>, %arg4: memref<4xf32, #tpu.memory_space<smem>>) attributes {dimension_semantics = [#tpu.dimension_semantics<arbitrary>], iteration_bounds = array<i64: 1>, scalar_prefetch = 0 : i64, scratch_operands = 0 : i64, tpu.core_type = #tpu.core_type<tc>, window_params = [{pipeline_mode = #tpu.pipeline_mode<synchronous>, transform_indices = @transform_0, window_bounds = array<i64: 36, 256>}, {pipeline_mode = #tpu.pipeline_mode<synchronous>, transform_indices = @transform_1, window_bounds = array<i64: 36, 256>}, {pipeline_mode = #tpu.pipeline_mode<synchronous>, transform_indices = @transform_2, window_bounds = array<i64: 256, 512>}, {transform_indices = @transform_3, window_bounds = array<i64: 4>}]} {
    %c0 = arith.constant 0 : index
    %c0_0 = arith.constant 0 : index
    %0 = vector.load %arg3[%c0, %c0_0] : memref<256x512xbf16, #tpu.memory_space<vmem>>, vector<256x512xbf16>
    %c0_1 = arith.constant 0 : index
    %c0_2 = arith.constant 0 : index
    %1 = vector.load %arg1[%c0_1, %c0_2] : memref<36x256xbf16, #tpu.memory_space<vmem>>, vector<36x256xbf16>
    %cst = arith.constant dense<0.000000e+00> : vector<36x512xf32>
    %2 = tpu.matmul %1, %0, %cst {dimension_numbers = #tpu.dot_dimension_numbers<[1], [0], [0], [1], [0, 0, 1, 1], [], []>} : vector<36x256xbf16>, vector<256x512xbf16>, vector<36x512xf32> -> vector<36x512xf32>
    %c0_3 = arith.constant 0 : index
    %c0_4 = arith.constant 0 : index
    %3 = vector.load %arg2[%c0_3, %c0_4] : memref<36x256xbf16, #tpu.memory_space<vmem>>, vector<36x256xbf16>
    %cst_5 = arith.constant dense<0.000000e+00> : vector<36x512xf32>
    %4 = tpu.matmul %3, %0, %cst_5 {dimension_numbers = #tpu.dot_dimension_numbers<[1], [0], [0], [1], [0, 0, 1, 1], [], []>} : vector<36x256xbf16>, vector<256x512xbf16>, vector<36x512xf32> -> vector<36x512xf32>
    %5 = vector.extract_strided_slice %2 {offsets = [0, 0], sizes = [36, 256], strides = [1, 1]} : vector<36x512xf32> to vector<36x256xf32>
    %6 = vector.extract_strided_slice %2 {offsets = [0, 0], sizes = [36, 256], strides = [1, 1]} : vector<36x512xf32> to vector<36x256xf32>
    %7 = arith.mulf %5, %6 : vector<36x256xf32>
    %8 = vector.extract_strided_slice %2 {offsets = [0, 256], sizes = [36, 256], strides = [1, 1]} : vector<36x512xf32> to vector<36x256xf32>
    %9 = vector.extract_strided_slice %2 {offsets = [0, 256], sizes = [36, 256], strides = [1, 1]} : vector<36x512xf32> to vector<36x256xf32>
    %10 = arith.mulf %8, %9 : vector<36x256xf32>
    %11 = arith.addf %7, %10 : vector<36x256xf32>
    %cst_6 = arith.constant 9.99999993E-9 : f32
    %12 = vector.broadcast %cst_6 : f32 to vector<36x256xf32>
    %13 = arith.maximumf %11, %12 : vector<36x256xf32>
    %14 = math.sqrt %13 : vector<36x256xf32>
    %15 = vector.extract_strided_slice %4 {offsets = [0, 0], sizes = [36, 256], strides = [1, 1]} : vector<36x512xf32> to vector<36x256xf32>
    %16 = vector.extract_strided_slice %4 {offsets = [0, 0], sizes = [36, 256], strides = [1, 1]} : vector<36x512xf32> to vector<36x256xf32>
    %17 = arith.mulf %15, %16 : vector<36x256xf32>
    %18 = vector.extract_strided_slice %4 {offsets = [0, 256], sizes = [36, 256], strides = [1, 1]} : vector<36x512xf32> to vector<36x256xf32>
    %19 = vector.extract_strided_slice %4 {offsets = [0, 256], sizes = [36, 256], strides = [1, 1]} : vector<36x512xf32> to vector<36x256xf32>
    %20 = arith.mulf %18, %19 : vector<36x256xf32>
    %21 = arith.addf %17, %20 : vector<36x256xf32>
    %cst_7 = arith.constant 9.99999993E-9 : f32
    %22 = vector.broadcast %cst_7 : f32 to vector<36x256xf32>
    %23 = arith.maximumf %21, %22 : vector<36x256xf32>
    %24 = math.sqrt %23 : vector<36x256xf32>
    %25 = arith.subf %24, %14 : vector<36x256xf32>
    %26 = tpu.iota {dimensions = array<i32: 1>} : vector<36x256xi32>
    %c129_i32 = arith.constant 129 : i32
    %27 = vector.broadcast %c129_i32 : i32 to vector<36x256xi32>
    %28 = arith.cmpi slt, %26, %27 : vector<36x256xi32>
    %29 = arith.mulf %24, %24 : vector<36x256xf32>
    %cst_8 = arith.constant 0.000000e+00 : f32
    %30 = vector.broadcast %cst_8 : f32 to vector<36x256xf32>
    %31 = arith.select %28, %29, %30 : vector<36x256xi1>, vector<36x256xf32>
    %32 = math.absf %25 : vector<36x256xf32>
    %33 = vector.shape_cast %32 : vector<36x256xf32> to vector<1x36x256xf32>
    %cst_9 = arith.constant dense<0.000000e+00> : vector<1xf32>
    %34 = vector.multi_reduction <add>, %33, %cst_9 [1, 2] : vector<1x36x256xf32> to vector<1xf32>
    %35 = vector.shape_cast %34 : vector<1xf32> to vector<1x1x1xf32>
    %36 = vector.extract %35[0, 0, 0] : f32 from vector<1x1x1xf32>
    %c0_10 = arith.constant 0 : index
    %37 = memref.load %arg4[%c0_10] : memref<4xf32, #tpu.memory_space<smem>>
    memref.store %36, %arg4[%c0_10] : memref<4xf32, #tpu.memory_space<smem>>
    %38 = math.log %14 : vector<36x256xf32>
    %39 = math.log %24 : vector<36x256xf32>
    %40 = arith.subf %38, %39 : vector<36x256xf32>
    %41 = math.absf %40 : vector<36x256xf32>
    %42 = vector.shape_cast %41 : vector<36x256xf32> to vector<1x36x256xf32>
    %cst_11 = arith.constant dense<0.000000e+00> : vector<1xf32>
    %43 = vector.multi_reduction <add>, %42, %cst_11 [1, 2] : vector<1x36x256xf32> to vector<1xf32>
    %44 = vector.shape_cast %43 : vector<1xf32> to vector<1x1x1xf32>
    %45 = vector.extract %44[0, 0, 0] : f32 from vector<1x1x1xf32>
    %c1 = arith.constant 1 : index
    %46 = memref.load %arg4[%c1] : memref<4xf32, #tpu.memory_space<smem>>
    memref.store %45, %arg4[%c1] : memref<4xf32, #tpu.memory_space<smem>>
    %47 = arith.mulf %25, %25 : vector<36x256xf32>
    %48 = vector.shape_cast %47 : vector<36x256xf32> to vector<1x36x256xf32>
    %cst_12 = arith.constant dense<0.000000e+00> : vector<1xf32>
    %49 = vector.multi_reduction <add>, %48, %cst_12 [1, 2] : vector<1x36x256xf32> to vector<1xf32>
    %50 = vector.shape_cast %49 : vector<1xf32> to vector<1x1x1xf32>
    %51 = vector.extract %50[0, 0, 0] : f32 from vector<1x1x1xf32>
    %c2 = arith.constant 2 : index
    %52 = memref.load %arg4[%c2] : memref<4xf32, #tpu.memory_space<smem>>
    memref.store %51, %arg4[%c2] : memref<4xf32, #tpu.memory_space<smem>>
    %53 = vector.shape_cast %31 : vector<36x256xf32> to vector<1x36x256xf32>
    %cst_13 = arith.constant dense<0.000000e+00> : vector<1xf32>
    %54 = vector.multi_reduction <add>, %53, %cst_13 [1, 2] : vector<1x36x256xf32> to vector<1xf32>
    %55 = vector.shape_cast %54 : vector<1xf32> to vector<1x1x1xf32>
    %56 = vector.extract %55[0, 0, 0] : f32 from vector<1x1x1xf32>
    %c3 = arith.constant 3 : index
    %57 = memref.load %arg4[%c3] : memref<4xf32, #tpu.memory_space<smem>>
    memref.store %56, %arg4[%c3] : memref<4xf32, #tpu.memory_space<smem>>
    return
  }
  func.func @transform_0(%arg0: i32) -> (i32, i32) {
    %c0_i32 = arith.constant 0 : i32
    %c0_i32_0 = arith.constant 0 : i32
    %c0_i32_1 = arith.constant 0 : i32
    return %c0_i32, %c0_i32_0 : i32, i32
  }
  func.func @transform_1(%arg0: i32) -> (i32, i32) {
    %c0_i32 = arith.constant 0 : i32
    %c0_i32_0 = arith.constant 0 : i32
    %c0_i32_1 = arith.constant 0 : i32
    return %c0_i32, %c0_i32_0 : i32, i32
  }
  func.func @transform_2(%arg0: i32) -> (i32, i32) {
    %c0_i32 = arith.constant 0 : i32
    %c0_i32_0 = arith.constant 0 : i32
    %c0_i32_1 = arith.constant 0 : i32
    return %c0_i32, %c0_i32_0 : i32, i32
  }
  func.func @transform_3(%arg0: i32) -> i32 {
    %c0_i32 = arith.constant 0 : i32
    %c0_i32_0 = arith.constant 0 : i32
    return %c0_i32 : i32
  }
}

module attributes {stable_mosaic.version = 11 : i64} {
  func.func @_stft_stats_kernel(%arg0: i32, %arg1: memref<18x512xbf16, #tpu.memory_space<vmem>>, %arg2: memref<18x512xbf16, #tpu.memory_space<vmem>>, %arg3: memref<512x768xbf16, #tpu.memory_space<vmem>>, %arg4: memref<4xf32, #tpu.memory_space<smem>>) attributes {dimension_semantics = [#tpu.dimension_semantics<arbitrary>], iteration_bounds = array<i64: 1>, scalar_prefetch = 0 : i64, scratch_operands = 0 : i64, tpu.core_type = #tpu.core_type<tc>, window_params = [{pipeline_mode = #tpu.pipeline_mode<synchronous>, transform_indices = @transform_0, window_bounds = array<i64: 18, 512>}, {pipeline_mode = #tpu.pipeline_mode<synchronous>, transform_indices = @transform_1, window_bounds = array<i64: 18, 512>}, {pipeline_mode = #tpu.pipeline_mode<synchronous>, transform_indices = @transform_2, window_bounds = array<i64: 512, 768>}, {transform_indices = @transform_3, window_bounds = array<i64: 4>}]} {
    %c0 = arith.constant 0 : index
    %c0_0 = arith.constant 0 : index
    %0 = vector.load %arg3[%c0, %c0_0] : memref<512x768xbf16, #tpu.memory_space<vmem>>, vector<512x768xbf16>
    %c0_1 = arith.constant 0 : index
    %c0_2 = arith.constant 0 : index
    %1 = vector.load %arg1[%c0_1, %c0_2] : memref<18x512xbf16, #tpu.memory_space<vmem>>, vector<18x512xbf16>
    %cst = arith.constant dense<0.000000e+00> : vector<18x768xf32>
    %2 = tpu.matmul %1, %0, %cst {dimension_numbers = #tpu.dot_dimension_numbers<[1], [0], [0], [1], [0, 0, 1, 1], [], []>} : vector<18x512xbf16>, vector<512x768xbf16>, vector<18x768xf32> -> vector<18x768xf32>
    %c0_3 = arith.constant 0 : index
    %c0_4 = arith.constant 0 : index
    %3 = vector.load %arg2[%c0_3, %c0_4] : memref<18x512xbf16, #tpu.memory_space<vmem>>, vector<18x512xbf16>
    %cst_5 = arith.constant dense<0.000000e+00> : vector<18x768xf32>
    %4 = tpu.matmul %3, %0, %cst_5 {dimension_numbers = #tpu.dot_dimension_numbers<[1], [0], [0], [1], [0, 0, 1, 1], [], []>} : vector<18x512xbf16>, vector<512x768xbf16>, vector<18x768xf32> -> vector<18x768xf32>
    %5 = vector.extract_strided_slice %2 {offsets = [0, 0], sizes = [18, 384], strides = [1, 1]} : vector<18x768xf32> to vector<18x384xf32>
    %6 = vector.extract_strided_slice %2 {offsets = [0, 0], sizes = [18, 384], strides = [1, 1]} : vector<18x768xf32> to vector<18x384xf32>
    %7 = arith.mulf %5, %6 : vector<18x384xf32>
    %8 = vector.extract_strided_slice %2 {offsets = [0, 384], sizes = [18, 384], strides = [1, 1]} : vector<18x768xf32> to vector<18x384xf32>
    %9 = vector.extract_strided_slice %2 {offsets = [0, 384], sizes = [18, 384], strides = [1, 1]} : vector<18x768xf32> to vector<18x384xf32>
    %10 = arith.mulf %8, %9 : vector<18x384xf32>
    %11 = arith.addf %7, %10 : vector<18x384xf32>
    %cst_6 = arith.constant 9.99999993E-9 : f32
    %12 = vector.broadcast %cst_6 : f32 to vector<18x384xf32>
    %13 = arith.maximumf %11, %12 : vector<18x384xf32>
    %14 = math.sqrt %13 : vector<18x384xf32>
    %15 = vector.extract_strided_slice %4 {offsets = [0, 0], sizes = [18, 384], strides = [1, 1]} : vector<18x768xf32> to vector<18x384xf32>
    %16 = vector.extract_strided_slice %4 {offsets = [0, 0], sizes = [18, 384], strides = [1, 1]} : vector<18x768xf32> to vector<18x384xf32>
    %17 = arith.mulf %15, %16 : vector<18x384xf32>
    %18 = vector.extract_strided_slice %4 {offsets = [0, 384], sizes = [18, 384], strides = [1, 1]} : vector<18x768xf32> to vector<18x384xf32>
    %19 = vector.extract_strided_slice %4 {offsets = [0, 384], sizes = [18, 384], strides = [1, 1]} : vector<18x768xf32> to vector<18x384xf32>
    %20 = arith.mulf %18, %19 : vector<18x384xf32>
    %21 = arith.addf %17, %20 : vector<18x384xf32>
    %cst_7 = arith.constant 9.99999993E-9 : f32
    %22 = vector.broadcast %cst_7 : f32 to vector<18x384xf32>
    %23 = arith.maximumf %21, %22 : vector<18x384xf32>
    %24 = math.sqrt %23 : vector<18x384xf32>
    %25 = arith.subf %24, %14 : vector<18x384xf32>
    %26 = tpu.iota {dimensions = array<i32: 1>} : vector<18x384xi32>
    %c257_i32 = arith.constant 257 : i32
    %27 = vector.broadcast %c257_i32 : i32 to vector<18x384xi32>
    %28 = arith.cmpi slt, %26, %27 : vector<18x384xi32>
    %29 = arith.mulf %24, %24 : vector<18x384xf32>
    %cst_8 = arith.constant 0.000000e+00 : f32
    %30 = vector.broadcast %cst_8 : f32 to vector<18x384xf32>
    %31 = arith.select %28, %29, %30 : vector<18x384xi1>, vector<18x384xf32>
    %32 = math.absf %25 : vector<18x384xf32>
    %33 = vector.shape_cast %32 : vector<18x384xf32> to vector<1x18x384xf32>
    %cst_9 = arith.constant dense<0.000000e+00> : vector<1xf32>
    %34 = vector.multi_reduction <add>, %33, %cst_9 [1, 2] : vector<1x18x384xf32> to vector<1xf32>
    %35 = vector.shape_cast %34 : vector<1xf32> to vector<1x1x1xf32>
    %36 = vector.extract %35[0, 0, 0] : f32 from vector<1x1x1xf32>
    %c0_10 = arith.constant 0 : index
    %37 = memref.load %arg4[%c0_10] : memref<4xf32, #tpu.memory_space<smem>>
    memref.store %36, %arg4[%c0_10] : memref<4xf32, #tpu.memory_space<smem>>
    %38 = math.log %14 : vector<18x384xf32>
    %39 = math.log %24 : vector<18x384xf32>
    %40 = arith.subf %38, %39 : vector<18x384xf32>
    %41 = math.absf %40 : vector<18x384xf32>
    %42 = vector.shape_cast %41 : vector<18x384xf32> to vector<1x18x384xf32>
    %cst_11 = arith.constant dense<0.000000e+00> : vector<1xf32>
    %43 = vector.multi_reduction <add>, %42, %cst_11 [1, 2] : vector<1x18x384xf32> to vector<1xf32>
    %44 = vector.shape_cast %43 : vector<1xf32> to vector<1x1x1xf32>
    %45 = vector.extract %44[0, 0, 0] : f32 from vector<1x1x1xf32>
    %c1 = arith.constant 1 : index
    %46 = memref.load %arg4[%c1] : memref<4xf32, #tpu.memory_space<smem>>
    memref.store %45, %arg4[%c1] : memref<4xf32, #tpu.memory_space<smem>>
    %47 = arith.mulf %25, %25 : vector<18x384xf32>
    %48 = vector.shape_cast %47 : vector<18x384xf32> to vector<1x18x384xf32>
    %cst_12 = arith.constant dense<0.000000e+00> : vector<1xf32>
    %49 = vector.multi_reduction <add>, %48, %cst_12 [1, 2] : vector<1x18x384xf32> to vector<1xf32>
    %50 = vector.shape_cast %49 : vector<1xf32> to vector<1x1x1xf32>
    %51 = vector.extract %50[0, 0, 0] : f32 from vector<1x1x1xf32>
    %c2 = arith.constant 2 : index
    %52 = memref.load %arg4[%c2] : memref<4xf32, #tpu.memory_space<smem>>
    memref.store %51, %arg4[%c2] : memref<4xf32, #tpu.memory_space<smem>>
    %53 = vector.shape_cast %31 : vector<18x384xf32> to vector<1x18x384xf32>
    %cst_13 = arith.constant dense<0.000000e+00> : vector<1xf32>
    %54 = vector.multi_reduction <add>, %53, %cst_13 [1, 2] : vector<1x18x384xf32> to vector<1xf32>
    %55 = vector.shape_cast %54 : vector<1xf32> to vector<1x1x1xf32>
    %56 = vector.extract %55[0, 0, 0] : f32 from vector<1x1x1xf32>
    %c3 = arith.constant 3 : index
    %57 = memref.load %arg4[%c3] : memref<4xf32, #tpu.memory_space<smem>>
    memref.store %56, %arg4[%c3] : memref<4xf32, #tpu.memory_space<smem>>
    return
  }
  func.func @transform_0(%arg0: i32) -> (i32, i32) {
    %c0_i32 = arith.constant 0 : i32
    %c0_i32_0 = arith.constant 0 : i32
    %c0_i32_1 = arith.constant 0 : i32
    return %c0_i32, %c0_i32_0 : i32, i32
  }
  func.func @transform_1(%arg0: i32) -> (i32, i32) {
    %c0_i32 = arith.constant 0 : i32
    %c0_i32_0 = arith.constant 0 : i32
    %c0_i32_1 = arith.constant 0 : i32
    return %c0_i32, %c0_i32_0 : i32, i32
  }
  func.func @transform_2(%arg0: i32) -> (i32, i32) {
    %c0_i32 = arith.constant 0 : i32
    %c0_i32_0 = arith.constant 0 : i32
    %c0_i32_1 = arith.constant 0 : i32
    return %c0_i32, %c0_i32_0 : i32, i32
  }
  func.func @transform_3(%arg0: i32) -> i32 {
    %c0_i32 = arith.constant 0 : i32
    %c0_i32_0 = arith.constant 0 : i32
    return %c0_i32 : i32
  }
}

module attributes {stable_mosaic.version = 11 : i64} {
  func.func @_stft_energy_kernel(%arg0: i32, %arg1: memref<18x256xbf16, #tpu.memory_space<vmem>>, %arg2: memref<18x256xbf16, #tpu.memory_space<vmem>>, %arg3: memref<256x512xbf16, #tpu.memory_space<vmem>>, %arg4: memref<18x1xf32, #tpu.memory_space<vmem>>, %arg5: memref<18x1xf32, #tpu.memory_space<vmem>>) attributes {dimension_semantics = [#tpu.dimension_semantics<arbitrary>], iteration_bounds = array<i64: 1>, scalar_prefetch = 0 : i64, scratch_operands = 0 : i64, tpu.core_type = #tpu.core_type<tc>, window_params = [{pipeline_mode = #tpu.pipeline_mode<synchronous>, transform_indices = @transform_0, window_bounds = array<i64: 18, 256>}, {pipeline_mode = #tpu.pipeline_mode<synchronous>, transform_indices = @transform_1, window_bounds = array<i64: 18, 256>}, {pipeline_mode = #tpu.pipeline_mode<synchronous>, transform_indices = @transform_2, window_bounds = array<i64: 256, 512>}, {pipeline_mode = #tpu.pipeline_mode<synchronous>, transform_indices = @transform_3, window_bounds = array<i64: 18, 1>}, {pipeline_mode = #tpu.pipeline_mode<synchronous>, transform_indices = @transform_4, window_bounds = array<i64: 18, 1>}]} {
    %c0 = arith.constant 0 : index
    %c0_0 = arith.constant 0 : index
    %0 = vector.load %arg3[%c0, %c0_0] : memref<256x512xbf16, #tpu.memory_space<vmem>>, vector<256x512xbf16>
    %c0_1 = arith.constant 0 : index
    %c0_2 = arith.constant 0 : index
    %1 = vector.load %arg1[%c0_1, %c0_2] : memref<18x256xbf16, #tpu.memory_space<vmem>>, vector<18x256xbf16>
    %cst = arith.constant dense<0.000000e+00> : vector<18x512xf32>
    %2 = tpu.matmul %1, %0, %cst {dimension_numbers = #tpu.dot_dimension_numbers<[1], [0], [0], [1], [0, 0, 1, 1], [], []>} : vector<18x256xbf16>, vector<256x512xbf16>, vector<18x512xf32> -> vector<18x512xf32>
    %c0_3 = arith.constant 0 : index
    %c0_4 = arith.constant 0 : index
    %3 = vector.load %arg2[%c0_3, %c0_4] : memref<18x256xbf16, #tpu.memory_space<vmem>>, vector<18x256xbf16>
    %cst_5 = arith.constant dense<0.000000e+00> : vector<18x512xf32>
    %4 = tpu.matmul %3, %0, %cst_5 {dimension_numbers = #tpu.dot_dimension_numbers<[1], [0], [0], [1], [0, 0, 1, 1], [], []>} : vector<18x256xbf16>, vector<256x512xbf16>, vector<18x512xf32> -> vector<18x512xf32>
    %5 = arith.mulf %2, %2 : vector<18x512xf32>
    %cst_6 = arith.constant dense<0.000000e+00> : vector<18xf32>
    %6 = vector.multi_reduction <add>, %5, %cst_6 [1] : vector<18x512xf32> to vector<18xf32>
    %7 = vector.shape_cast %6 : vector<18xf32> to vector<18x1xf32>
    %c0_7 = arith.constant 0 : index
    %c0_8 = arith.constant 0 : index
    %8 = vector.load %arg4[%c0_7, %c0_8] : memref<18x1xf32, #tpu.memory_space<vmem>>, vector<18x1xf32>
    tpu.vector_store %arg4[%c0_7, %c0_8], %7 {strides = array<i32>} : memref<18x1xf32, #tpu.memory_space<vmem>>, vector<18x1xf32>,
    %9 = arith.mulf %4, %4 : vector<18x512xf32>
    %cst_9 = arith.constant dense<0.000000e+00> : vector<18xf32>
    %10 = vector.multi_reduction <add>, %9, %cst_9 [1] : vector<18x512xf32> to vector<18xf32>
    %11 = vector.shape_cast %10 : vector<18xf32> to vector<18x1xf32>
    %c0_10 = arith.constant 0 : index
    %c0_11 = arith.constant 0 : index
    %12 = vector.load %arg5[%c0_10, %c0_11] : memref<18x1xf32, #tpu.memory_space<vmem>>, vector<18x1xf32>
    tpu.vector_store %arg5[%c0_10, %c0_11], %11 {strides = array<i32>} : memref<18x1xf32, #tpu.memory_space<vmem>>, vector<18x1xf32>,
    return
  }
  func.func @transform_0(%arg0: i32) -> (i32, i32) {
    %c0_i32 = arith.constant 0 : i32
    %c0_i32_0 = arith.constant 0 : i32
    %c0_i32_1 = arith.constant 0 : i32
    return %c0_i32, %c0_i32_0 : i32, i32
  }
  func.func @transform_1(%arg0: i32) -> (i32, i32) {
    %c0_i32 = arith.constant 0 : i32
    %c0_i32_0 = arith.constant 0 : i32
    %c0_i32_1 = arith.constant 0 : i32
    return %c0_i32, %c0_i32_0 : i32, i32
  }
  func.func @transform_2(%arg0: i32) -> (i32, i32) {
    %c0_i32 = arith.constant 0 : i32
    %c0_i32_0 = arith.constant 0 : i32
    %c0_i32_1 = arith.constant 0 : i32
    return %c0_i32, %c0_i32_0 : i32, i32
  }
  func.func @transform_3(%arg0: i32) -> (i32, i32) {
    %c0_i32 = arith.constant 0 : i32
    %c0_i32_0 = arith.constant 0 : i32
    %c0_i32_1 = arith.constant 0 : i32
    return %c0_i32, %c0_i32_0 : i32, i32
  }
  func.func @transform_4(%arg0: i32) -> (i32, i32) {
    %c0_i32 = arith.constant 0 : i32
    %c0_i32_0 = arith.constant 0 : i32
    %c0_i32_1 = arith.constant 0 : i32
    return %c0_i32, %c0_i32_0 : i32, i32
  }
}

</mosaic_0001>

<bundles_post_ra>
// kernel: criterion_forward.6
= control target key start
LH: loop header
LB: loop body
LE: loop exit
PB: predicated region body
PF: predicated region fallthrough
CT: control target
= control target key end

     0   :  { %11 = vsyncpa [#allocation3], 0  ;;  %s2635_s0 = inlined_call_operand.vmem [shape: f32[2,768], index: 0, kind: input, shape index: {}]   ;;  %s2636_s1 = inlined_call_operand.vmem [shape: f32[2,768], index: 1, kind: input, shape index: {}]   ;;  %s2637_s2 = inlined_call_operand.hbm [shape: f32[768,512], index: 2, kind: input, shape index: {}]   ;;  %s2638_s3 = inlined_call_operand.vmem [shape: f32[2,512], index: 3, kind: output, shape index: {0}]   ;;  %s2639_s4 = inlined_call_operand.vmem [shape: f32[2,512], index: 4, kind: output, shape index: {1}]   ;;  %s2640_s5 = inlined_call_operand.vmem [shape: f32[6], index: 5, kind: output, shape index: {2}]  }
   0x1   :  { %12 = vsyncpa [#allocation4], 0  ;;  %s2011_s18 = smov [#allocation2]  }
   0x2   :  { %s22_s19 = sshll.u32 %s2011_s18, 4  ;;  %s23_s19 = int_to_ptr.vmem [resolvable:$true] %s22_s19 }
   0x3   :  { %s1983_s20 = scalar_lea.vmem %s23_s19, 49152  ;;  %p1988_p1 = scmp.lt.s32.totalorder %s23_s19, %s23_s19 }
   0x4   :  { %p1984_p0 = scmp.ne.s32.totalorder %s23_s19, %s1983_s20  ;;  %p1989_p2 = scmp.lt.s32.totalorder %s1983_s20, %s1983_s20 }
   0x6   :  { %p1990_p3 = por %p1989_p2, %p1988_p1 }
   0x8   :  { %p1991_p4 = pnand %p1990_p3, %p1984_p0 }
   0xa   :  { %1994 = shalt.err (!%p1991_p4)
}
   0xb   :  { %s2012_s21 = smov 512   ;;  %s2013_s22 = smov 32  }
   0xc   :  { %28 = dma.hbm_to_vmem [thread:$0]  %s2637_s2, 49152, %s23_s19, [#allocation3], %s2012_s21, %s2012_s21, %s2013_s22  }
   0xd   :  { %2007 = dma.done.wait [#allocation3], 49152  }
   0xe   :  { %2008 = vsyncadd [#allocation3], 4294918144  ;;  %v97_v0 = vld [vmem:[#allocation2 + $0x1e8] sm:$0xff]  ;;  %v96_v2 = vld [vmem:[#allocation2 + $0x1e0] sm:$0xff]  ;;  %vm1387_vm0 = vcmask 1041408   ;;  %s1649_s18 = sshll.u32 %s2640_s5, 4  ;;  %s1650_s18 = int_to_ptr.vmem [resolvable:$true] %s1649_s18 }
   0xf   :  { %v225_v1 = vld [vmem:[#allocation2 + $0x5e8] sm:$0xff]  ;;  %453 = vmatprep.subr.mxu0 %v97_v0  ;;  %v224_v3 = vld [vmem:[#allocation2 + $0x5e0] sm:$0xff]  ;;  %s1995_s20 = scalar_lea.vmem %s1650_s18, 16  ;;  %p2000_p6 = scmp.lt.s32.totalorder %s1650_s18, %s1650_s18 }
  0x10   :  { %524 = vmatprep.subr.mxu1 %v225_v1  ;;  %v93_v4 = vld [vmem:[#allocation2 + $0x1c8] sm:$0xff]  ;;  %454 = vmatpush1.msra.mxu0 %v96_v2  ;;  %v92_v6 = vld [vmem:[#allocation2 + $0x1c0] sm:$0xff]  ;;  %p1996_p5 = scmp.ne.s32.totalorder %s1650_s18, %s1995_s20  ;;  %p2001_p7 = scmp.lt.s32.totalorder %s1995_s20, %s1995_s20 }
  0x11   :  { %v221_v5 = vld [vmem:[#allocation2 + $0x5c8] sm:$0xff]  ;;  %525 = vmatpush1.msra.mxu1 %v224_v3  ;;  %v220_v7 = vld [vmem:[#allocation2 + $0x5c0] sm:$0xff]  ;;  %455 = vmatprep.subr.mxu0 %v93_v4 }
  0x12   :  { %v89_v8 = vld [vmem:[#allocation2 + $0x1a8] sm:$0xff]  ;;  %526 = vmatprep.subr.mxu1 %v221_v5  ;;  %v88_v10 = vld [vmem:[#allocation2 + $0x1a0] sm:$0xff]  ;;  %456 = vmatpush1.msra.mxu0 %v92_v6  ;;  %p2002_p8 = por %p2001_p7, %p2000_p6 }
  0x13   :  { %v217_v9 = vld [vmem:[#allocation2 + $0x5a8] sm:$0xff]  ;;  %v216_v11 = vld [vmem:[#allocation2 + $0x5a0] sm:$0xff]  ;;  %527 = vmatpush1.msra.mxu1 %v220_v7  ;;  %457 = vmatprep.subr.mxu0 %v89_v8 }
  0x14   :  { %v85_v12 = vld [vmem:[#allocation2 + $0x188] sm:$0xff]  ;;  %528 = vmatprep.subr.mxu1 %v217_v9  ;;  %v84_v14 = vld [vmem:[#allocation2 + $0x180] sm:$0xff]  ;;  %458 = vmatpush1.msra.mxu0 %v88_v10  ;;  %p2003_p9 = pnand %p2002_p8, %p1996_p5 }
  0x15   :  { %v213_v13 = vld [vmem:[#allocation2 + $0x588] sm:$0xff]  ;;  %v212_v15 = vld [vmem:[#allocation2 + $0x580] sm:$0xff]  ;;  %529 = vmatpush1.msra.mxu1 %v216_v11  ;;  %459 = vmatprep.subr.mxu0 %v85_v12 }
  0x16   :  { %v81_v16 = vld [vmem:[#allocation2 + $0x168] sm:$0xff]  ;;  %530 = vmatprep.subr.mxu1 %v213_v13  ;;  %v80_v18 = vld [vmem:[#allocation2 + $0x160] sm:$0xff]  ;;  %460 = vmatpush1.msra.mxu0 %v84_v14 }
  0x17   :  { %v209_v17 = vld [vmem:[#allocation2 + $0x568] sm:$0xff]  ;;  %v208_v19 = vld [vmem:[#allocation2 + $0x560] sm:$0xff]  ;;  %531 = vmatpush1.msra.mxu1 %v212_v15  ;;  %461 = vmatprep.subr.mxu0 %v81_v16 }
  0x18   :  { %v77_v20 = vld [vmem:[#allocation2 + $0x148] sm:$0xff]  ;;  %532 = vmatprep.subr.mxu1 %v209_v17  ;;  %v76_v22 = vld [vmem:[#allocation2 + $0x140] sm:$0xff]  ;;  %462 = vmatpush1.msra.mxu0 %v80_v18 }
  0x19   :  { %v205_v21 = vld [vmem:[#allocation2 + $0x548] sm:$0xff]  ;;  %v204_v23 = vld [vmem:[#allocation2 + $0x540] sm:$0xff]  ;;  %533 = vmatpush1.msra.mxu1 %v208_v19  ;;  %463 = vmatprep.subr.mxu0 %v77_v20 }
  0x1a   :  { %v73_v24 = vld [vmem:[#allocation2 + $0x128] sm:$0xff]  ;;  %534 = vmatprep.subr.mxu1 %v205_v21  ;;  %v72_v26 = vld [vmem:[#allocation2 + $0x120] sm:$0xff]  ;;  %464 = vmatpush1.msra.mxu0 %v76_v22 }
  0x1b   :  { %v201_v25 = vld [vmem:[#allocation2 + $0x528] sm:$0xff]  ;;  %v200_v27 = vld [vmem:[#allocation2 + $0x520] sm:$0xff]  ;;  %535 = vmatpush1.msra.mxu1 %v204_v23  ;;  %465 = vmatprep.subr.mxu0 %v73_v24 }
  0x1c   :  { %v69_v28 = vld [vmem:[#allocation2 + $0x108] sm:$0xff]  ;;  %536 = vmatprep.subr.mxu1 %v201_v25  ;;  %v68_v30 = vld [vmem:[#allocation2 + $0x100] sm:$0xff]  ;;  %466 = vmatpush1.msra.mxu0 %v72_v26 }
  0x1d   :  { %v197_v29 = vld [vmem:[#allocation2 + $0x508] sm:$0xff]  ;;  %v196_v31 = vld [vmem:[#allocation2 + $0x500] sm:$0xff]  ;;  %537 = vmatpush1.msra.mxu1 %v200_v27  ;;  %467 = vmatprep.subr.mxu0 %v69_v28 }
  0x1e   :  { %v65_v32 = vld [vmem:[#allocation2 + $0xe8] sm:$0xff]  ;;  %538 = vmatprep.subr.mxu1 %v197_v29  ;;  %v64_v34 = vld [vmem:[#allocation2 + $0xe0] sm:$0xff]  ;;  %468 = vmatpush1.msra.mxu0 %v68_v30  ;;  %v2014_v30 = vmov 1983009808  }
  0x1f   :  { %v193_v33 = vld [vmem:[#allocation2 + $0x4e8] sm:$0xff]  ;;  %v192_v35 = vld [vmem:[#allocation2 + $0x4e0] sm:$0xff]  ;;  %539 = vmatpush1.msra.mxu1 %v196_v31  ;;  %469 = vmatprep.subr.mxu0 %v65_v32  ;;  %v424_v31 = vunpack.c.l.s4 %v2014_v30  ;;  %v426_v32 = vlaneseq }
  0x20   :  { %v61_v36 = vld [vmem:[#allocation2 + $0xc8] sm:$0xff]  ;;  %540 = vmatprep.subr.mxu1 %v193_v33  ;;  %v60_v38 = vld [vmem:[#allocation2 + $0xc0] sm:$0xff]  ;;  %470 = vmatpush1.msra.mxu0 %v64_v34 }
  0x21   :  { %v189_v37 = vld [vmem:[#allocation2 + $0x4c8] sm:$0xff]  ;;  %v188_v39 = vld [vmem:[#allocation2 + $0x4c0] sm:$0xff]  ;;  %541 = vmatpush1.msra.mxu1 %v192_v35  ;;  %471 = vmatprep.subr.mxu0 %v61_v36 }
  0x22   :  { %v57_v40 = vld [vmem:[#allocation2 + $0xa8] sm:$0xff]  ;;  %542 = vmatprep.subr.mxu1 %v189_v37  ;;  %v56_v42 = vld [vmem:[#allocation2 + $0xa0] sm:$0xff]  ;;  %472 = vmatpush1.msra.mxu0 %v60_v38 }
  0x23   :  { %v185_v41 = vld [vmem:[#allocation2 + $0x4a8] sm:$0xff]  ;;  %v184_v43 = vld [vmem:[#allocation2 + $0x4a0] sm:$0xff]  ;;  %543 = vmatpush1.msra.mxu1 %v188_v39  ;;  %473 = vmatprep.subr.mxu0 %v57_v40 }
  0x24   :  { %v53_v44 = vld [vmem:[#allocation2 + $0x88] sm:$0xff]  ;;  %544 = vmatprep.subr.mxu1 %v185_v41  ;;  %v52_v46 = vld [vmem:[#allocation2 + $0x80] sm:$0xff]  ;;  %474 = vmatpush1.msra.mxu0 %v56_v42  ;;  %v425_v41 = vunpack.c.0.s8 %v424_v31  ;;  %v427_v42 = vshrl.u32 %v426_v32, 7  ;;  %v82_v31 = vld [vmem:[#allocation2 + $0x170] sm:$0xff] }
  0x25   :  { %v181_v45 = vld [vmem:[#allocation2 + $0x488] sm:$0xff]  ;;  %v180_v47 = vld [vmem:[#allocation2 + $0x480] sm:$0xff]  ;;  %545 = vmatpush1.msra.mxu1 %v184_v43  ;;  %475 = vmatprep.subr.mxu0 %v53_v44 }
  0x26   :  { %v49_v48 = vld [vmem:[#allocation2 + $0x68] sm:$0xff]  ;;  %546 = vmatprep.subr.mxu1 %v181_v45  ;;  %v48_v50 = vld [vmem:[#allocation2 + $0x60] sm:$0xff]  ;;  %476 = vmatpush1.msra.mxu0 %v52_v46 }
  0x27   :  { %v177_v49 = vld [vmem:[#allocation2 + $0x468] sm:$0xff]  ;;  %v176_v51 = vld [vmem:[#allocation2 + $0x460] sm:$0xff]  ;;  %547 = vmatpush1.msra.mxu1 %v180_v47  ;;  %477 = vmatprep.subr.mxu0 %v49_v48 }
  0x28   :  { %v45_v52 = vld [vmem:[#allocation2 + $0x48] sm:$0xff]  ;;  %548 = vmatprep.subr.mxu1 %v177_v49  ;;  %v44_v54 = vld [vmem:[#allocation2 + $0x40] sm:$0xff]  ;;  %478 = vmatpush1.msra.mxu0 %v48_v50 }
  0x29   :  { %v173_v53 = vld [vmem:[#allocation2 + $0x448] sm:$0xff]  ;;  %v172_v55 = vld [vmem:[#allocation2 + $0x440] sm:$0xff]  ;;  %549 = vmatpush1.msra.mxu1 %v176_v51  ;;  %479 = vmatprep.subr.mxu0 %v45_v52  ;;  %v2052_v52 = vsub.s32 %v425_v41, %v427_v42  ;;  %v71_v41 = vld [vmem:[#allocation2 + $0x118] sm:$0xff] }
  0x2a   :  { %v41_v56 = vld [vmem:[#allocation2 + $0x28] sm:$0xff]  ;;  %550 = vmatprep.subr.mxu1 %v173_v53  ;;  %v40_v58 = vld [vmem:[#allocation2 + $0x20] sm:$0xff]  ;;  %480 = vmatpush1.msra.mxu0 %v44_v54 }
  0x2b   :  { %v169_v57 = vld [vmem:[#allocation2 + $0x428] sm:$0xff]  ;;  %v168_v59 = vld [vmem:[#allocation2 + $0x420] sm:$0xff]  ;;  %551 = vmatpush1.msra.mxu1 %v172_v55  ;;  %481 = vmatprep.subr.mxu0 %v41_v56 }
  0x2c   :  { %v37_v60 = vld [vmem:[#allocation2 + $0x8] sm:$0xff]  ;;  %552 = vmatprep.subr.mxu1 %v169_v57  ;;  %v36_v62 = vld [vmem:[#allocation2] sm:$0xff]  ;;  %482 = vmatpush1.msra.mxu0 %v40_v58 }
  0x2d   :  { %v165_v61 = vld [vmem:[#allocation2 + $0x408] sm:$0xff]  ;;  %v164_v63 = vld [vmem:[#allocation2 + $0x400] sm:$0xff]  ;;  %553 = vmatpush1.msra.mxu1 %v168_v59  ;;  %483 = vmatprep.subr.mxu0 %v37_v60 }
  0x2e   :  { %v161_v0 = vld [vmem:[#allocation2 + $0x3e8] sm:$0xff]  ;;  %554 = vmatprep.subr.mxu1 %v165_v61  ;;  %v160_v2 = vld [vmem:[#allocation2 + $0x3e0] sm:$0xff]  ;;  %484 = vmatpush1.msra.mxu0 %v36_v62 }
  0x2f   :  { %v289_v1 = vld [vmem:[#allocation2 + $0x7e8] sm:$0xff]  ;;  %v288_v3 = vld [vmem:[#allocation2 + $0x7e0] sm:$0xff]  ;;  %555 = vmatpush1.msra.mxu1 %v164_v63  ;;  %485 = vmatprep.subr.mxu0 %v161_v0 }
  0x30   :  { %v157_v4 = vld [vmem:[#allocation2 + $0x3c8] sm:$0xff]  ;;  %556 = vmatprep.subr.mxu1 %v289_v1  ;;  %v156_v6 = vld [vmem:[#allocation2 + $0x3c0] sm:$0xff]  ;;  %486 = vmatpush2.msra.mxu0 %v160_v2 }
  0x31   :  { %v285_v5 = vld [vmem:[#allocation2 + $0x7c8] sm:$0xff]  ;;  %v284_v7 = vld [vmem:[#allocation2 + $0x7c0] sm:$0xff]  ;;  %557 = vmatpush2.msra.mxu1 %v288_v3  ;;  %487 = vmatprep.subr.mxu0 %v157_v4 }
  0x32   :  { %v153_v8 = vld [vmem:[#allocation2 + $0x3a8] sm:$0xff]  ;;  %558 = vmatprep.subr.mxu1 %v285_v5  ;;  %v152_v10 = vld [vmem:[#allocation2 + $0x3a0] sm:$0xff]  ;;  %488 = vmatpush2.msra.mxu0 %v156_v6 }
  0x33   :  { %v281_v9 = vld [vmem:[#allocation2 + $0x7a8] sm:$0xff]  ;;  %v280_v11 = vld [vmem:[#allocation2 + $0x7a0] sm:$0xff]  ;;  %559 = vmatpush2.msra.mxu1 %v284_v7  ;;  %489 = vmatprep.subr.mxu0 %v153_v8 }
  0x34   :  { %v149_v12 = vld [vmem:[#allocation2 + $0x388] sm:$0xff]  ;;  %560 = vmatprep.subr.mxu1 %v281_v9  ;;  %v148_v14 = vld [vmem:[#allocation2 + $0x380] sm:$0xff]  ;;  %490 = vmatpush2.msra.mxu0 %v152_v10 }
  0x35   :  { %v277_v13 = vld [vmem:[#allocation2 + $0x788] sm:$0xff]  ;;  %v276_v15 = vld [vmem:[#allocation2 + $0x780] sm:$0xff]  ;;  %561 = vmatpush2.msra.mxu1 %v280_v11  ;;  %491 = vmatprep.subr.mxu0 %v149_v12 }
  0x36   :  { %v145_v16 = vld [vmem:[#allocation2 + $0x368] sm:$0xff]  ;;  %562 = vmatprep.subr.mxu1 %v277_v13  ;;  %v144_v18 = vld [vmem:[#allocation2 + $0x360] sm:$0xff]  ;;  %492 = vmatpush2.msra.mxu0 %v148_v14  ;;  %v99_v13 = vld [vmem:[#allocation2 + $0x1f8] sm:$0xff] }
  0x37   :  { %v273_v17 = vld [vmem:[#allocation2 + $0x768] sm:$0xff]  ;;  %v272_v19 = vld [vmem:[#allocation2 + $0x760] sm:$0xff]  ;;  %563 = vmatpush2.msra.mxu1 %v276_v15  ;;  %493 = vmatprep.subr.mxu0 %v145_v16  ;;  %v98_v15 = vld [vmem:[#allocation2 + $0x1f0] sm:$0xff] }
  0x38   :  { %v141_v20 = vld [vmem:[#allocation2 + $0x348] sm:$0xff]  ;;  %564 = vmatprep.subr.mxu1 %v273_v17  ;;  %v140_v22 = vld [vmem:[#allocation2 + $0x340] sm:$0xff]  ;;  %494 = vmatpush2.msra.mxu0 %v144_v18  ;;  %v95_v17 = vld [vmem:[#allocation2 + $0x1d8] sm:$0xff] }
  0x39   :  { %v269_v21 = vld [vmem:[#allocation2 + $0x748] sm:$0xff]  ;;  %v268_v23 = vld [vmem:[#allocation2 + $0x740] sm:$0xff]  ;;  %565 = vmatpush2.msra.mxu1 %v272_v19  ;;  %495 = vmatprep.subr.mxu0 %v141_v20  ;;  %v94_v19 = vld [vmem:[#allocation2 + $0x1d0] sm:$0xff] }
  0x3a   :  { %v137_v24 = vld [vmem:[#allocation2 + $0x328] sm:$0xff]  ;;  %566 = vmatprep.subr.mxu1 %v269_v21  ;;  %v136_v26 = vld [vmem:[#allocation2 + $0x320] sm:$0xff]  ;;  %496 = vmatpush2.msra.mxu0 %v140_v22  ;;  %v91_v21 = vld [vmem:[#allocation2 + $0x1b8] sm:$0xff] }
  0x3b   :  { %v265_v25 = vld [vmem:[#allocation2 + $0x728] sm:$0xff]  ;;  %v264_v27 = vld [vmem:[#allocation2 + $0x720] sm:$0xff]  ;;  %567 = vmatpush2.msra.mxu1 %v268_v23  ;;  %497 = vmatprep.subr.mxu0 %v137_v24  ;;  %v90_v23 = vld [vmem:[#allocation2 + $0x1b0] sm:$0xff] }
  0x3c   :  { %v133_v28 = vld [vmem:[#allocation2 + $0x308] sm:$0xff]  ;;  %568 = vmatprep.subr.mxu1 %v265_v25  ;;  %v132_v33 = vld [vmem:[#allocation2 + $0x300] sm:$0xff]  ;;  %498 = vmatpush2.msra.mxu0 %v136_v26  ;;  %v87_v25 = vld [vmem:[#allocation2 + $0x198] sm:$0xff] }
  0x3d   :  { %v261_v29 = vld [vmem:[#allocation2 + $0x708] sm:$0xff]  ;;  %v260_v34 = vld [vmem:[#allocation2 + $0x700] sm:$0xff]  ;;  %569 = vmatpush2.msra.mxu1 %v264_v27  ;;  %499 = vmatprep.subr.mxu0 %v133_v28  ;;  %v86_v27 = vld [vmem:[#allocation2 + $0x190] sm:$0xff] }
  0x3e   :  { %v129_v35 = vld [vmem:[#allocation2 + $0x2e8] sm:$0xff]  ;;  %570 = vmatprep.subr.mxu1 %v261_v29  ;;  %v128_v37 = vld [vmem:[#allocation2 + $0x2e0] sm:$0xff]  ;;  %500 = vmatpush2.msra.mxu0 %v132_v33  ;;  %v83_v29 = vld [vmem:[#allocation2 + $0x178] sm:$0xff] }
  0x3f   :  { %v257_v36 = vld [vmem:[#allocation2 + $0x6e8] sm:$0xff]  ;;  %v256_v38 = vld [vmem:[#allocation2 + $0x6e0] sm:$0xff]  ;;  %571 = vmatpush2.msra.mxu1 %v260_v34  ;;  %501 = vmatprep.subr.mxu0 %v129_v35  ;;  %v79_v33 = vld [vmem:[#allocation2 + $0x158] sm:$0xff] }
  0x40   :  { %v125_v39 = vld [vmem:[#allocation2 + $0x2c8] sm:$0xff]  ;;  %572 = vmatprep.subr.mxu1 %v257_v36  ;;  %v124_v43 = vld [vmem:[#allocation2 + $0x2c0] sm:$0xff]  ;;  %502 = vmatpush2.msra.mxu0 %v128_v37  ;;  %v78_v35 = vld [vmem:[#allocation2 + $0x150] sm:$0xff] }
  0x41   :  { %v253_v40 = vld [vmem:[#allocation2 + $0x6c8] sm:$0xff]  ;;  %v252_v44 = vld [vmem:[#allocation2 + $0x6c0] sm:$0xff]  ;;  %573 = vmatpush2.msra.mxu1 %v256_v38  ;;  %503 = vmatprep.subr.mxu0 %v125_v39  ;;  %v75_v37 = vld [vmem:[#allocation2 + $0x138] sm:$0xff] }
  0x42   :  { %v121_v45 = vld [vmem:[#allocation2 + $0x2a8] sm:$0xff]  ;;  %v32_v47 = vld [vmem:[%s2635_s0] sm:$0xff]  ;;  %574 = vmatprep.subr.mxu1 %v253_v40  ;;  %504 = vmatpush2.msra.mxu0 %v124_v43  ;;  %v74_v39 = vld [vmem:[#allocation2 + $0x130] sm:$0xff] }
  0x43   :  { %v249_v46 = vld [vmem:[#allocation2 + $0x6a8] sm:$0xff]  ;;  %v120_v48 = vld [vmem:[#allocation2 + $0x2a0] sm:$0xff]  ;;  %575 = vmatpush2.msra.mxu1 %v252_v44  ;;  %505 = vmatprep.subr.mxu0 %v121_v45  ;;  %v422_v55 = vcombine.high %v32_v47, %v32_v47  ;;  %v2055_v62 = vrot.slane %v32_v47, %v2052_v52  ;;  %v70_v43 = vld [vmem:[#allocation2 + $0x110] sm:$0xff] }
  0x44   :  { %v248_v49 = vld [vmem:[#allocation2 + $0x6a0] sm:$0xff]  ;;  %v117_v50 = vld [vmem:[#allocation2 + $0x288] sm:$0xff]  ;;  %576 = vmatprep.subr.mxu1 %v249_v46  ;;  %506 = vmatpush2.msra.mxu0 %v120_v48  ;;  %v67_v45 = vld [vmem:[#allocation2 + $0xf8] sm:$0xff] }
  0x45   :  { %v245_v51 = vld [vmem:[#allocation2 + $0x688] sm:$0xff]  ;;  %v116_v53 = vld [vmem:[#allocation2 + $0x280] sm:$0xff]  ;;  %577 = vmatpush2.msra.mxu1 %v248_v49  ;;  %507 = vmatprep.subr.mxu0 %v117_v50  ;;  %v2058_v1 = vrot.slane %v422_v55, %v2052_v52  ;;  %v2062_v8 = vcombine.high %v2055_v62, %v2055_v62  ;;  %v66_v47 = vld [vmem:[#allocation2 + $0xf0] sm:$0xff] }
  0x46   :  { %v244_v54 = vld [vmem:[#allocation2 + $0x680] sm:$0xff]  ;;  %v113_v56 = vld [vmem:[#allocation2 + $0x268] sm:$0xff]  ;;  %578 = vmatprep.subr.mxu1 %v245_v51  ;;  %508 = vmatpush2.msra.mxu0 %v116_v53  ;;  %v63_v49 = vld [vmem:[#allocation2 + $0xd8] sm:$0xff] }
  0x47   :  { %v241_v57 = vld [vmem:[#allocation2 + $0x668] sm:$0xff]  ;;  %v112_v58 = vld [vmem:[#allocation2 + $0x260] sm:$0xff]  ;;  %579 = vmatpush2.msra.mxu1 %v244_v54  ;;  %509 = vmatprep.subr.mxu0 %v113_v56  ;;  %v2066_v10 = vcombine.high %v2058_v1, %v2058_v1  ;;  %v62_v51 = vld [vmem:[#allocation2 + $0xd0] sm:$0xff] }
  0x48   :  { %v240_v59 = vld [vmem:[#allocation2 + $0x660] sm:$0xff]  ;;  %v109_v60 = vld [vmem:[#allocation2 + $0x248] sm:$0xff]  ;;  %580 = vmatprep.subr.mxu1 %v241_v57  ;;  %510 = vmatpush2.msra.mxu0 %v112_v58  ;;  %v59_v54 = vld [vmem:[#allocation2 + $0xb8] sm:$0xff] }
  0x49   :  { %v237_v61 = vld [vmem:[#allocation2 + $0x648] sm:$0xff]  ;;  %v108_v63 = vld [vmem:[#allocation2 + $0x240] sm:$0xff]  ;;  %581 = vmatpush2.msra.mxu1 %v240_v59  ;;  %511 = vmatprep.subr.mxu0 %v109_v60  ;;  %v58_v56 = vld [vmem:[#allocation2 + $0xb0] sm:$0xff] }
  0x4a   :  { %v236_v0 = vld [vmem:[#allocation2 + $0x640] sm:$0xff]  ;;  %v105_v2 = vld [vmem:[#allocation2 + $0x228] sm:$0xff]  ;;  %582 = vmatprep.subr.mxu1 %v237_v61  ;;  %512 = vmatpush2.msra.mxu0 %v108_v63  ;;  %v55_v58 = vld [vmem:[#allocation2 + $0x98] sm:$0xff] }
  0x4b   :  { %v233_v3 = vld [vmem:[#allocation2 + $0x628] sm:$0xff]  ;;  %v104_v4 = vld [vmem:[#allocation2 + $0x220] sm:$0xff]  ;;  %583 = vmatpush2.msra.mxu1 %v236_v0  ;;  %513 = vmatprep.subr.mxu0 %v105_v2  ;;  %v54_v60 = vld [vmem:[#allocation2 + $0x90] sm:$0xff] }
  0x4c   :  { %v232_v5 = vld [vmem:[#allocation2 + $0x620] sm:$0xff]  ;;  %v101_v6 = vld [vmem:[#allocation2 + $0x208] sm:$0xff]  ;;  %584 = vmatprep.subr.mxu1 %v233_v3  ;;  %514 = vmatpush2.msra.mxu0 %v104_v4  ;;  %v51_v63 = vld [vmem:[#allocation2 + $0x78] sm:$0xff] }
  0x4d   :  { %v229_v7 = vld [vmem:[#allocation2 + $0x608] sm:$0xff]  ;;  %v100_v9 = vld [vmem:[#allocation2 + $0x200] sm:$0xff]  ;;  %585 = vmatpush2.msra.mxu1 %v232_v5  ;;  %515 = vmatprep.subr.mxu0 %v101_v6  ;;  %v50_v2 = vld [vmem:[#allocation2 + $0x70] sm:$0xff] }
  0x4e   :  { %v228_v11 = vld [vmem:[#allocation2 + $0x600] sm:$0xff]  ;;  %586 = vmatprep.subr.mxu1 %v229_v7  ;;  %516 = vmatpush2.msra.mxu0 %v100_v9  ;;  %v353_v12 = vld [vmem:[#allocation2 + $0x9e8] sm:$0xff]  ;;  %v47_v4 = vld [vmem:[#allocation2 + $0x58] sm:$0xff] }
  0x4f   :  { %517 = vmatprep.mubr.f32.mxu0 %v2062_v8  ;;  %587 = vmatpush2.msra.mxu1 %v228_v11  ;;  %v352_v14 = vld [vmem:[#allocation2 + $0x9e0] sm:$0xff]  ;;  %v349_v16 = vld [vmem:[#allocation2 + $0x9c8] sm:$0xff]  ;;  %v46_v6 = vld [vmem:[#allocation2 + $0x50] sm:$0xff] }
  0x50   :  { %588 = vmatprep.mubr.f32.mxu1 %v2066_v10  ;;  %518 = vmatmul.mubr.f32.vlgmr.msra.gmra.mxu0 %v2055_v62  ;;  %v348_v18 = vld [vmem:[#allocation2 + $0x9c0] sm:$0xff]  ;;  %v345_v20 = vld [vmem:[#allocation2 + $0x9a8] sm:$0xff]  ;;  %v43_v9 = vld [vmem:[#allocation2 + $0x38] sm:$0xff] }
  0x51   :  { %589 = vmatmul.mubr.f32.vlgmr.msra.gmra.mxu1 %v2058_v1  ;;  %595 = vmatprep.subr.mxu0 %v353_v12  ;;  %v344_v22 = vld [vmem:[#allocation2 + $0x9a0] sm:$0xff]  ;;  %v341_v24 = vld [vmem:[#allocation2 + $0x988] sm:$0xff]  ;;  %v42_v12 = vld [vmem:[#allocation2 + $0x30] sm:$0xff] }
  0x52   :  { %666 = vmatprep.subr.mxu1 %v99_v13  ;;  %596 = vmatpush1.msra.mxu0 %v352_v14  ;;  %v340_v26 = vld [vmem:[#allocation2 + $0x980] sm:$0xff]  ;;  %v337_v28 = vld [vmem:[#allocation2 + $0x968] sm:$0xff]  ;;  %v39_v14 = vld [vmem:[#allocation2 + $0x18] sm:$0xff] }
  0x53   :  { %667 = vmatpush1.msra.mxu1 %v98_v15  ;;  %597 = vmatprep.subr.mxu0 %v349_v16  ;;  %v336_v30 = vld [vmem:[#allocation2 + $0x960] sm:$0xff]  ;;  %v333_v32 = vld [vmem:[#allocation2 + $0x948] sm:$0xff]  ;;  %v38_v16 = vld [vmem:[#allocation2 + $0x10] sm:$0xff] }
  0x54   :  { %668 = vmatprep.subr.mxu1 %v95_v17  ;;  %598 = vmatpush1.msra.mxu0 %v348_v18  ;;  %v332_v34 = vld [vmem:[#allocation2 + $0x940] sm:$0xff]  ;;  %v329_v36 = vld [vmem:[#allocation2 + $0x928] sm:$0xff]  ;;  %v163_v18 = vld [vmem:[#allocation2 + $0x3f8] sm:$0xff] }
  0x55   :  { %669 = vmatpush1.msra.mxu1 %v94_v19  ;;  %599 = vmatprep.subr.mxu0 %v345_v20  ;;  %v328_v38 = vld [vmem:[#allocation2 + $0x920] sm:$0xff]  ;;  %v325_v40 = vld [vmem:[#allocation2 + $0x908] sm:$0xff]  ;;  %v162_v20 = vld [vmem:[#allocation2 + $0x3f0] sm:$0xff] }
  0x56   :  { %670 = vmatprep.subr.mxu1 %v91_v21  ;;  %600 = vmatpush1.msra.mxu0 %v344_v22  ;;  %v324_v42 = vld [vmem:[#allocation2 + $0x900] sm:$0xff]  ;;  %v321_v44 = vld [vmem:[#allocation2 + $0x8e8] sm:$0xff]  ;;  %v159_v22 = vld [vmem:[#allocation2 + $0x3d8] sm:$0xff] }
  0x57   :  { %671 = vmatpush1.msra.mxu1 %v90_v23  ;;  %601 = vmatprep.subr.mxu0 %v341_v24  ;;  %v320_v46 = vld [vmem:[#allocation2 + $0x8e0] sm:$0xff]  ;;  %v317_v48 = vld [vmem:[#allocation2 + $0x8c8] sm:$0xff]  ;;  %v158_v24 = vld [vmem:[#allocation2 + $0x3d0] sm:$0xff] }
  0x58   :  { %672 = vmatprep.subr.mxu1 %v87_v25  ;;  %602 = vmatpush1.msra.mxu0 %v340_v26  ;;  %v316_v50 = vld [vmem:[#allocation2 + $0x8c0] sm:$0xff]  ;;  %v313_v53 = vld [vmem:[#allocation2 + $0x8a8] sm:$0xff]  ;;  %v155_v26 = vld [vmem:[#allocation2 + $0x3b8] sm:$0xff] }
  0x59   :  { %673 = vmatpush1.msra.mxu1 %v86_v27  ;;  %603 = vmatprep.subr.mxu0 %v337_v28  ;;  %v312_v55 = vld [vmem:[#allocation2 + $0x8a0] sm:$0xff]  ;;  %v309_v57 = vld [vmem:[#allocation2 + $0x888] sm:$0xff]  ;;  %v154_v28 = vld [vmem:[#allocation2 + $0x3b0] sm:$0xff] }
  0x5a   :  { %674 = vmatprep.subr.mxu1 %v83_v29  ;;  %604 = vmatpush1.msra.mxu0 %v336_v30  ;;  %v308_v59 = vld [vmem:[#allocation2 + $0x880] sm:$0xff]  ;;  %v305_v61 = vld [vmem:[#allocation2 + $0x868] sm:$0xff]  ;;  %v151_v30 = vld [vmem:[#allocation2 + $0x398] sm:$0xff] }
  0x5b   :  { %675 = vmatpush1.msra.mxu1 %v82_v31  ;;  %605 = vmatprep.subr.mxu0 %v333_v32  ;;  %v304_v0 = vld [vmem:[#allocation2 + $0x860] sm:$0xff]  ;;  %v301_v3 = vld [vmem:[#allocation2 + $0x848] sm:$0xff]  ;;  %v150_v32 = vld [vmem:[#allocation2 + $0x390] sm:$0xff] }
  0x5c   :  { %676 = vmatprep.subr.mxu1 %v79_v33  ;;  %606 = vmatpush1.msra.mxu0 %v332_v34  ;;  %v300_v5 = vld [vmem:[#allocation2 + $0x840] sm:$0xff]  ;;  %v297_v7 = vld [vmem:[#allocation2 + $0x828] sm:$0xff]  ;;  %v147_v34 = vld [vmem:[#allocation2 + $0x378] sm:$0xff] }
  0x5d   :  { %677 = vmatpush1.msra.mxu1 %v78_v35  ;;  %607 = vmatprep.subr.mxu0 %v329_v36  ;;  %v296_v11 = vld [vmem:[#allocation2 + $0x820] sm:$0xff]  ;;  %v293_v13 = vld [vmem:[#allocation2 + $0x808] sm:$0xff]  ;;  %v146_v36 = vld [vmem:[#allocation2 + $0x370] sm:$0xff] }
  0x5e   :  { %678 = vmatprep.subr.mxu1 %v75_v37  ;;  %608 = vmatpush1.msra.mxu0 %v328_v38  ;;  %v292_v15 = vld [vmem:[#allocation2 + $0x800] sm:$0xff]  ;;  %v417_v17 = vld [vmem:[#allocation2 + $0xbe8] sm:$0xff]  ;;  %v143_v38 = vld [vmem:[#allocation2 + $0x358] sm:$0xff] }
  0x5f   :  { %679 = vmatpush1.msra.mxu1 %v74_v39  ;;  %609 = vmatprep.subr.mxu0 %v325_v40  ;;  %v416_v19 = vld [vmem:[#allocation2 + $0xbe0] sm:$0xff]  ;;  %v413_v21 = vld [vmem:[#allocation2 + $0xbc8] sm:$0xff]  ;;  %v142_v40 = vld [vmem:[#allocation2 + $0x350] sm:$0xff] }
  0x60   :  { %680 = vmatprep.subr.mxu1 %v71_v41  ;;  %610 = vmatpush1.msra.mxu0 %v324_v42  ;;  %v412_v23 = vld [vmem:[#allocation2 + $0xbc0] sm:$0xff]  ;;  %v409_v25 = vld [vmem:[#allocation2 + $0xba8] sm:$0xff]  ;;  %v139_v42 = vld [vmem:[#allocation2 + $0x338] sm:$0xff] }
  0x61   :  { %681 = vmatpush1.msra.mxu1 %v70_v43  ;;  %611 = vmatprep.subr.mxu0 %v321_v44  ;;  %v408_v27 = vld [vmem:[#allocation2 + $0xba0] sm:$0xff]  ;;  %v405_v29 = vld [vmem:[#allocation2 + $0xb88] sm:$0xff]  ;;  %v138_v44 = vld [vmem:[#allocation2 + $0x330] sm:$0xff] }
  0x62   :  { %682 = vmatprep.subr.mxu1 %v67_v45  ;;  %612 = vmatpush1.msra.mxu0 %v320_v46  ;;  %v404_v31 = vld [vmem:[#allocation2 + $0xb80] sm:$0xff]  ;;  %v401_v33 = vld [vmem:[#allocation2 + $0xb68] sm:$0xff]  ;;  %v135_v46 = vld [vmem:[#allocation2 + $0x318] sm:$0xff] }
  0x63   :  { %683 = vmatpush1.msra.mxu1 %v66_v47  ;;  %613 = vmatprep.subr.mxu0 %v317_v48  ;;  %v400_v35 = vld [vmem:[#allocation2 + $0xb60] sm:$0xff]  ;;  %v397_v37 = vld [vmem:[#allocation2 + $0xb48] sm:$0xff]  ;;  %v134_v48 = vld [vmem:[#allocation2 + $0x310] sm:$0xff] }
  0x64   :  { %684 = vmatprep.subr.mxu1 %v63_v49  ;;  %614 = vmatpush1.msra.mxu0 %v316_v50  ;;  %v396_v39 = vld [vmem:[#allocation2 + $0xb40] sm:$0xff]  ;;  %v393_v41 = vld [vmem:[#allocation2 + $0xb28] sm:$0xff]  ;;  %v131_v50 = vld [vmem:[#allocation2 + $0x2f8] sm:$0xff] }
  0x65   :  { %685 = vmatpush1.msra.mxu1 %v62_v51  ;;  %615 = vmatprep.subr.mxu0 %v313_v53  ;;  %v392_v43 = vld [vmem:[#allocation2 + $0xb20] sm:$0xff]  ;;  %v389_v45 = vld [vmem:[#allocation2 + $0xb08] sm:$0xff]  ;;  %v130_v53 = vld [vmem:[#allocation2 + $0x2f0] sm:$0xff] }
  0x66   :  { %686 = vmatprep.subr.mxu1 %v59_v54  ;;  %616 = vmatpush1.msra.mxu0 %v312_v55  ;;  %v388_v47 = vld [vmem:[#allocation2 + $0xb00] sm:$0xff]  ;;  %v385_v49 = vld [vmem:[#allocation2 + $0xae8] sm:$0xff]  ;;  %v127_v55 = vld [vmem:[#allocation2 + $0x2d8] sm:$0xff] }
  0x67   :  { %687 = vmatpush1.msra.mxu1 %v58_v56  ;;  %617 = vmatprep.subr.mxu0 %v309_v57  ;;  %v384_v51 = vld [vmem:[#allocation2 + $0xae0] sm:$0xff]  ;;  %v381_v54 = vld [vmem:[#allocation2 + $0xac8] sm:$0xff]  ;;  %v126_v57 = vld [vmem:[#allocation2 + $0x2d0] sm:$0xff] }
  0x68   :  { %688 = vmatprep.subr.mxu1 %v55_v58  ;;  %618 = vmatpush1.msra.mxu0 %v308_v59  ;;  %v380_v56 = vld [vmem:[#allocation2 + $0xac0] sm:$0xff]  ;;  %v377_v58 = vld [vmem:[#allocation2 + $0xaa8] sm:$0xff]  ;;  %v123_v59 = vld [vmem:[#allocation2 + $0x2b8] sm:$0xff] }
  0x69   :  { %689 = vmatpush1.msra.mxu1 %v54_v60  ;;  %619 = vmatprep.subr.mxu0 %v305_v61  ;;  %v376_v60 = vld [vmem:[#allocation2 + $0xaa0] sm:$0xff]  ;;  %v122_v61 = vld [vmem:[#allocation2 + $0x2b0] sm:$0xff] }
  0x6a   :  { %690 = vmatprep.subr.mxu1 %v51_v63  ;;  %620 = vmatpush1.msra.mxu0 %v304_v0  ;;  %v373_v63 = vld [vmem:[#allocation2 + $0xa88] sm:$0xff]  ;;  %v119_v0 = vld [vmem:[#allocation2 + $0x298] sm:$0xff] }
  0x6b   :  { %691 = vmatpush1.msra.mxu1 %v50_v2  ;;  %621 = vmatprep.subr.mxu0 %v301_v3  ;;  %v372_v2 = vld [vmem:[#allocation2 + $0xa80] sm:$0xff]  ;;  %v118_v3 = vld [vmem:[#allocation2 + $0x290] sm:$0xff] }
  0x6c   :  { %692 = vmatprep.subr.mxu1 %v47_v4  ;;  %622 = vmatpush1.msra.mxu0 %v300_v5  ;;  %v2075_v4 = vld.sshfl [vmem:[%s2635_s0 + $0x8] sm:$0x33 pattern:$0x76325410] }
  0x6d   :  { %693 = vmatpush1.msra.mxu1 %v46_v6  ;;  %623 = vmatprep.subr.mxu0 %v297_v7  ;;  %v369_v5 = vld [vmem:[#allocation2 + $0xa68] sm:$0xff]  ;;  %v115_v6 = vld [vmem:[#allocation2 + $0x278] sm:$0xff]  ;;  %v368_v7 = vld [vmem:[#allocation2 + $0xa60] sm:$0xff] }
  0x6e   :  { %694 = vmatprep.subr.mxu1 %v43_v9  ;;  %624 = vmatpush1.msra.mxu0 %v296_v11  ;;  %v114_v9 = vld [vmem:[#allocation2 + $0x270] sm:$0xff]  ;;  %v365_v11 = vld [vmem:[#allocation2 + $0xa48] sm:$0xff] }
  0x6f   :  { %695 = vmatpush1.msra.mxu1 %v42_v12  ;;  %625 = vmatprep.subr.mxu0 %v293_v13  ;;  %v111_v12 = vld [vmem:[#allocation2 + $0x258] sm:$0xff]  ;;  %v364_v13 = vld [vmem:[#allocation2 + $0xa40] sm:$0xff] }
  0x70   :  { %696 = vmatprep.subr.mxu1 %v39_v14  ;;  %626 = vmatpush1.msra.mxu0 %v292_v15  ;;  %v110_v14 = vld [vmem:[#allocation2 + $0x250] sm:$0xff]  ;;  %v361_v15 = vld [vmem:[#allocation2 + $0xa28] sm:$0xff] }
  0x71   :  { %697 = vmatpush1.msra.mxu1 %v38_v16  ;;  %627 = vmatprep.subr.mxu0 %v417_v17  ;;  %v107_v16 = vld [vmem:[#allocation2 + $0x238] sm:$0xff]  ;;  %v360_v17 = vld [vmem:[#allocation2 + $0xa20] sm:$0xff] }
  0x72   :  { %698 = vmatprep.subr.mxu1 %v163_v18  ;;  %628 = vmatpush2.msra.mxu0 %v416_v19  ;;  %v106_v18 = vld [vmem:[#allocation2 + $0x230] sm:$0xff]  ;;  %v357_v19 = vld [vmem:[#allocation2 + $0xa08] sm:$0xff] }
  0x73   :  { %699 = vmatpush2.msra.mxu1 %v162_v20  ;;  %629 = vmatprep.subr.mxu0 %v413_v21  ;;  %v103_v20 = vld [vmem:[#allocation2 + $0x218] sm:$0xff]  ;;  %v2079_v21 = vcombine.high %v2075_v4, %v2075_v4 }
  0x74   :  { %700 = vmatprep.subr.mxu1 %v159_v22  ;;  %630 = vmatpush2.msra.mxu0 %v412_v23  ;;  %v356_v22 = vld [vmem:[#allocation2 + $0xa00] sm:$0xff]  ;;  %v102_v23 = vld [vmem:[#allocation2 + $0x210] sm:$0xff] }
  0x75   :  { %701 = vmatpush2.msra.mxu1 %v158_v24  ;;  %631 = vmatprep.subr.mxu0 %v409_v25  ;;  %v227_v24 = vld [vmem:[#allocation2 + $0x5f8] sm:$0xff] }
  0x76   :  { %702 = vmatprep.subr.mxu1 %v155_v26  ;;  %632 = vmatpush2.msra.mxu0 %v408_v27  ;;  %v355_v25 = vld [vmem:[#allocation2 + $0x9f8] sm:$0xff]  ;;  %v226_v26 = vld [vmem:[#allocation2 + $0x5f0] sm:$0xff] }
  0x77   :  { %703 = vmatpush2.msra.mxu1 %v154_v28  ;;  %633 = vmatprep.subr.mxu0 %v405_v29  ;;  %v354_v27 = vld [vmem:[#allocation2 + $0x9f0] sm:$0xff]  ;;  %v223_v28 = vld [vmem:[#allocation2 + $0x5d8] sm:$0xff] }
  0x78   :  { %704 = vmatprep.subr.mxu1 %v151_v30  ;;  %634 = vmatpush2.msra.mxu0 %v404_v31  ;;  %v351_v29 = vld [vmem:[#allocation2 + $0x9d8] sm:$0xff]  ;;  %v222_v30 = vld [vmem:[#allocation2 + $0x5d0] sm:$0xff] }
  0x79   :  { %705 = vmatpush2.msra.mxu1 %v150_v32  ;;  %635 = vmatprep.subr.mxu0 %v401_v33  ;;  %v350_v31 = vld [vmem:[#allocation2 + $0x9d0] sm:$0xff]  ;;  %v219_v32 = vld [vmem:[#allocation2 + $0x5b8] sm:$0xff] }
  0x7a   :  { %706 = vmatprep.subr.mxu1 %v147_v34  ;;  %636 = vmatpush2.msra.mxu0 %v400_v35  ;;  %v347_v33 = vld [vmem:[#allocation2 + $0x9b8] sm:$0xff]  ;;  %v218_v34 = vld [vmem:[#allocation2 + $0x5b0] sm:$0xff] }
  0x7b   :  { %707 = vmatpush2.msra.mxu1 %v146_v36  ;;  %637 = vmatprep.subr.mxu0 %v397_v37  ;;  %v346_v35 = vld [vmem:[#allocation2 + $0x9b0] sm:$0xff]  ;;  %v215_v36 = vld [vmem:[#allocation2 + $0x598] sm:$0xff] }
  0x7c   :  { %708 = vmatprep.subr.mxu1 %v143_v38  ;;  %638 = vmatpush2.msra.mxu0 %v396_v39  ;;  %v214_v37 = vld [vmem:[#allocation2 + $0x590] sm:$0xff]  ;;  %v339_v39 = vld [vmem:[#allocation2 + $0x978] sm:$0xff] }
  0x7d   :  { %709 = vmatpush2.msra.mxu1 %v142_v40  ;;  %639 = vmatprep.subr.mxu0 %v393_v41  ;;  %v342_v38 = vld [vmem:[#allocation2 + $0x990] sm:$0xff] }
  0x7e   :  { %710 = vmatprep.subr.mxu1 %v139_v42  ;;  %640 = vmatpush2.msra.mxu0 %v392_v43  ;;  %v210_v40 = vld [vmem:[#allocation2 + $0x570] sm:$0xff]  ;;  %v207_v42 = vld [vmem:[#allocation2 + $0x558] sm:$0xff] }
  0x7f   :  { %711 = vmatpush2.msra.mxu1 %v138_v44  ;;  %641 = vmatprep.subr.mxu0 %v389_v45  ;;  %v338_v41 = vld [vmem:[#allocation2 + $0x970] sm:$0xff]  ;;  %v335_v43 = vld [vmem:[#allocation2 + $0x958] sm:$0xff] }
  0x80   :  { %712 = vmatprep.subr.mxu1 %v135_v46  ;;  %642 = vmatpush2.msra.mxu0 %v388_v47  ;;  %v206_v44 = vld [vmem:[#allocation2 + $0x550] sm:$0xff]  ;;  %v203_v46 = vld [vmem:[#allocation2 + $0x538] sm:$0xff] }
  0x81   :  { %713 = vmatpush2.msra.mxu1 %v134_v48  ;;  %643 = vmatprep.subr.mxu0 %v385_v49  ;;  %v334_v45 = vld [vmem:[#allocation2 + $0x950] sm:$0xff]  ;;  %v331_v47 = vld [vmem:[#allocation2 + $0x938] sm:$0xff] }
  0x82   :  { %714 = vmatprep.subr.mxu1 %v131_v50  ;;  %644 = vmatpush2.msra.mxu0 %v384_v51  ;;  %v2085_v48 = vld [vmem:[#allocation2 + $0x530] sm:$0xff]  ;;  %v2089_v50 = vld [vmem:[#allocation2 + $0x518] sm:$0xff] }
  0x83   :  { %715 = vmatpush2.msra.mxu1 %v130_v53  ;;  %645 = vmatprep.subr.mxu0 %v381_v54  ;;  %v2087_v49 = vld [vmem:[#allocation2 + $0x930] sm:$0xff]  ;;  %v2091_v51 = vld [vmem:[#allocation2 + $0x918] sm:$0xff] }
  0x84   :  { %716 = vmatprep.subr.mxu1 %v127_v55  ;;  %646 = vmatpush2.msra.mxu0 %v380_v56  ;;  %v2093_v53 = vld [vmem:[#allocation2 + $0x510] sm:$0xff]  ;;  %v2099_v55 = vld [vmem:[#allocation2 + $0x4f8] sm:$0xff] }
  0x85   :  { %717 = vmatpush2.msra.mxu1 %v126_v57  ;;  %647 = vmatprep.subr.mxu0 %v377_v58  ;;  %v2095_v54 = vld [vmem:[#allocation2 + $0x910] sm:$0xff]  ;;  %v2101_v56 = vld [vmem:[#allocation2 + $0x8f8] sm:$0xff] }
  0x86   :  { %718 = vmatprep.subr.mxu1 %v123_v59  ;;  %648 = vmatpush2.msra.mxu0 %v376_v60  ;;  %v2105_v57 = vld [vmem:[#allocation2 + $0x4f0] sm:$0xff]  ;;  %v2111_v59 = vld [vmem:[#allocation2 + $0x4d8] sm:$0xff] }
  0x87   :  { %719 = vmatpush2.msra.mxu1 %v122_v61  ;;  %649 = vmatprep.subr.mxu0 %v373_v63  ;;  %v2107_v58 = vld [vmem:[#allocation2 + $0x8f0] sm:$0xff]  ;;  %v2113_v60 = vld [vmem:[#allocation2 + $0x8d8] sm:$0xff] }
  0x88   :  { %720 = vmatprep.subr.mxu1 %v119_v0  ;;  %650 = vmatpush2.msra.mxu0 %v372_v2  ;;  %v2117_v61 = vld [vmem:[#allocation2 + $0x4d0] sm:$0xff]  ;;  %v2123_v0 = vld [vmem:[#allocation2 + $0x4b8] sm:$0xff] }
  0x89   :  { %721 = vmatpush2.msra.mxu1 %v118_v3  ;;  %651 = vmatprep.subr.mxu0 %v369_v5  ;;  %v2119_v63 = vld [vmem:[#allocation2 + $0x8d0] sm:$0xff]  ;;  %v2125_v2 = vld [vmem:[#allocation2 + $0x8b8] sm:$0xff] }
  0x8a   :  { %722 = vmatprep.subr.mxu1 %v115_v6  ;;  %652 = vmatpush2.msra.mxu0 %v368_v7  ;;  %v2129_v3 = vld [vmem:[#allocation2 + $0x4b0] sm:$0xff]  ;;  %v2135_v6 = vld [vmem:[#allocation2 + $0x498] sm:$0xff] }
  0x8b   :  { %723 = vmatpush2.msra.mxu1 %v114_v9  ;;  %653 = vmatprep.subr.mxu0 %v365_v11  ;;  %v2131_v5 = vld [vmem:[#allocation2 + $0x8b0] sm:$0xff]  ;;  %v2137_v7 = vld [vmem:[#allocation2 + $0x898] sm:$0xff] }
  0x8c   :  { %724 = vmatprep.subr.mxu1 %v111_v12  ;;  %654 = vmatpush2.msra.mxu0 %v364_v13  ;;  %v2141_v9 = vld [vmem:[#allocation2 + $0x490] sm:$0xff]  ;;  %v2147_v12 = vld [vmem:[#allocation2 + $0x478] sm:$0xff] }
  0x8d   :  { %725 = vmatpush2.msra.mxu1 %v110_v14  ;;  %655 = vmatprep.subr.mxu0 %v361_v15  ;;  %v2143_v11 = vld [vmem:[#allocation2 + $0x890] sm:$0xff]  ;;  %v2149_v13 = vld [vmem:[#allocation2 + $0x878] sm:$0xff] }
  0x8e   :  { %726 = vmatprep.subr.mxu1 %v107_v16  ;;  %656 = vmatpush2.msra.mxu0 %v360_v17  ;;  %v2153_v14 = vld [vmem:[#allocation2 + $0x470] sm:$0xff]  ;;  %v2159_v16 = vld [vmem:[#allocation2 + $0x458] sm:$0xff] }
  0x8f   :  { %727 = vmatpush2.msra.mxu1 %v106_v18  ;;  %657 = vmatprep.subr.mxu0 %v357_v19  ;;  %v2155_v15 = vld [vmem:[#allocation2 + $0x870] sm:$0xff]  ;;  %v2161_v17 = vld [vmem:[#allocation2 + $0x858] sm:$0xff] }
  0x90   :  { %728 = vmatprep.subr.mxu1 %v103_v20  ;;  %658 = vmatpush2.msra.mxu0 %v356_v22  ;;  %v2165_v18 = vld [vmem:[#allocation2 + $0x450] sm:$0xff]  ;;  %v2171_v20 = vld [vmem:[#allocation2 + $0x438] sm:$0xff] }
  0x91   :  { %659 = vmatprep.mubr.f32.mxu0 %v2079_v21  ;;  %729 = vmatpush2.msra.mxu1 %v102_v23  ;;  %v2167_v19 = vld [vmem:[#allocation2 + $0x850] sm:$0xff]  ;;  %v2173_v22 = vld [vmem:[#allocation2 + $0x838] sm:$0xff] }
  0x92   :  { %660 = vmatmul.mubr.f32.vlgmr.msra.gmra.mxu0 %v2075_v4  ;;  %730 = vmatprep.mubr.f32.mxu1 %v2062_v8  ;;  %v343_v8 = vld [vmem:[#allocation2 + $0x998] sm:$0xff]  ;;  %v2177_v23 = vld [vmem:[#allocation2 + $0x430] sm:$0xff] }
  0x93   :  { %737 = vmatprep.subr.mxu0 %v227_v24  ;;  %808 = vmatprep.subr.mxu1 %v355_v25  ;;  %v2179_v24 = vld [vmem:[#allocation2 + $0x830] sm:$0xff]  ;;  %v2183_v25 = vld [vmem:[#allocation2 + $0x418] sm:$0xff] }
  0x94   :  { %731 = vmatmul.mubr.f32.vlgmr.msra.gmra.mxu1 %v2055_v62  ;;  %738 = vmatpush1.msra.mxu0 %v226_v26  ;;  %v211_v62 = vld [vmem:[#allocation2 + $0x578] sm:$0xff] }
  0x95   :  { %809 = vmatpush1.msra.mxu1 %v354_v27  ;;  %739 = vmatprep.subr.mxu0 %v223_v28  ;;  %v2185_v26 = vld [vmem:[#allocation2 + $0x818] sm:$0xff]  ;;  %v2189_v27 = vld [vmem:[#allocation2 + $0x410] sm:$0xff] }
  0x96   :  { %810 = vmatprep.subr.mxu1 %v351_v29  ;;  %740 = vmatpush1.msra.mxu0 %v222_v30  ;;  %v2191_v28 = vld [vmem:[#allocation2 + $0x810] sm:$0xff]  ;;  %v2195_v29 = vld [vmem:[#allocation2 + $0x7f8] sm:$0xff] }
  0x97   :  { %811 = vmatpush1.msra.mxu1 %v350_v31  ;;  %741 = vmatprep.subr.mxu0 %v219_v32  ;;  %v2197_v30 = vld [vmem:[#allocation2 + $0xbf8] sm:$0xff]  ;;  %v2201_v31 = vld [vmem:[#allocation2 + $0x7f0] sm:$0xff] }
  0x98   :  { %812 = vmatprep.subr.mxu1 %v347_v33  ;;  %742 = vmatpush1.msra.mxu0 %v218_v34  ;;  %v2203_v32 = vld [vmem:[#allocation2 + $0xbf0] sm:$0xff]  ;;  %v2207_v33 = vld [vmem:[#allocation2 + $0x7d8] sm:$0xff] }
  0x99   :  { %813 = vmatpush1.msra.mxu1 %v346_v35  ;;  %743 = vmatprep.subr.mxu0 %v215_v36  ;;  %v2209_v34 = vld [vmem:[#allocation2 + $0xbd8] sm:$0xff]  ;;  %v2213_v35 = vld [vmem:[#allocation2 + $0x7d0] sm:$0xff] }
  0x9a   :  { %814 = vmatprep.subr.mxu1 %v343_v8  ;;  %744 = vmatpush1.msra.mxu0 %v214_v37  ;;  %v2215_v36 = vld [vmem:[#allocation2 + $0xbd0] sm:$0xff]  ;;  %v2219_v8 = vld [vmem:[#allocation2 + $0x7b8] sm:$0xff] }
  0x9b   :  { %815 = vmatpush1.msra.mxu1 %v342_v38  ;;  %745 = vmatprep.subr.mxu0 %v211_v62  ;;  %v2221_v37 = vld [vmem:[#allocation2 + $0xbb8] sm:$0xff]  ;;  %v2225_v38 = vld [vmem:[#allocation2 + $0x7b0] sm:$0xff] }
  0x9c   :  { %816 = vmatprep.subr.mxu1 %v339_v39  ;;  %746 = vmatpush1.msra.mxu0 %v210_v40  ;;  %2698 = vst [vmem:[#allocation8_spill] sm:$0xff] %v2225_v38  ;;  %v2227_v62 = vld [vmem:[#allocation2 + $0xbb0] sm:$0xff]  ;;  %v2231_v39 = vld [vmem:[#allocation2 + $0x798] sm:$0xff] }
  0x9d   :  { %817 = vmatpush1.msra.mxu1 %v338_v41  ;;  %747 = vmatprep.subr.mxu0 %v207_v42  ;;  %2699 = vst [vmem:[#allocation9_spill] sm:$0xff] %v2227_v62  ;;  %2700 = vst [vmem:[#allocation10_spill] sm:$0xff] %v2231_v39  ;;  %v2233_v40 = vld [vmem:[#allocation2 + $0xb98] sm:$0xff]  ;;  %v2237_v41 = vld [vmem:[#allocation2 + $0x790] sm:$0xff] }
  0x9e   :  { %818 = vmatprep.subr.mxu1 %v335_v43  ;;  %748 = vmatpush1.msra.mxu0 %v206_v44  ;;  %2701 = vst [vmem:[#allocation11_spill] sm:$0xff] %v2233_v40  ;;  %2702 = vst [vmem:[#allocation12_spill] sm:$0xff] %v2237_v41  ;;  %v2239_v42 = vld [vmem:[#allocation2 + $0xb90] sm:$0xff]  ;;  %v2243_v43 = vld [vmem:[#allocation2 + $0x778] sm:$0xff] }
  0x9f   :  { %819 = vmatpush1.msra.mxu1 %v334_v45  ;;  %749 = vmatprep.subr.mxu0 %v203_v46  ;;  %2703 = vst [vmem:[#allocation13_spill] sm:$0xff] %v2239_v42  ;;  %2704 = vst [vmem:[#allocation14_spill] sm:$0xff] %v2243_v43  ;;  %v2245_v44 = vld [vmem:[#allocation2 + $0xb78] sm:$0xff]  ;;  %v2249_v45 = vld [vmem:[#allocation2 + $0x770] sm:$0xff] }
  0xa0   :  { %820 = vmatprep.subr.mxu1 %v331_v47  ;;  %750 = vmatpush1.msra.mxu0 %v2085_v48  ;;  %2705 = vst [vmem:[#allocation15_spill] sm:$0xff] %v2245_v44  ;;  %2706 = vst [vmem:[#allocation16_spill] sm:$0xff] %v2249_v45  ;;  %v2251_v46 = vld [vmem:[#allocation2 + $0xb70] sm:$0xff]  ;;  %v2255_v47 = vld [vmem:[#allocation2 + $0x758] sm:$0xff] }
  0xa1   :  { %821 = vmatpush1.msra.mxu1 %v2087_v49  ;;  %751 = vmatprep.subr.mxu0 %v2089_v50  ;;  %2707 = vst [vmem:[#allocation17_spill] sm:$0xff] %v2251_v46  ;;  %2708 = vst [vmem:[#allocation18_spill] sm:$0xff] %v2255_v47 }
  0xa2   :  { %822 = vmatprep.subr.mxu1 %v2091_v51  ;;  %752 = vmatpush1.msra.mxu0 %v2093_v53 }
  0xa3   :  { %823 = vmatpush1.msra.mxu1 %v2095_v54  ;;  %753 = vmatprep.subr.mxu0 %v2099_v55 }
  0xa4   :  { %824 = vmatprep.subr.mxu1 %v2101_v56  ;;  %754 = vmatpush1.msra.mxu0 %v2105_v57 }
  0xa5   :  { %825 = vmatpush1.msra.mxu1 %v2107_v58  ;;  %755 = vmatprep.subr.mxu0 %v2111_v59 }
  0xa6   :  { %826 = vmatprep.subr.mxu1 %v2113_v60  ;;  %756 = vmatpush1.msra.mxu0 %v2117_v61 }
  0xa7   :  { %827 = vmatpush1.msra.mxu1 %v2119_v63  ;;  %757 = vmatprep.subr.mxu0 %v2123_v0 }
  0xa8   :  { %828 = vmatprep.subr.mxu1 %v2125_v2  ;;  %758 = vmatpush1.msra.mxu0 %v2129_v3 }
  0xa9   :  { %829 = vmatpush1.msra.mxu1 %v2131_v5  ;;  %759 = vmatprep.subr.mxu0 %v2135_v6 }
  0xaa   :  { %830 = vmatprep.subr.mxu1 %v2137_v7  ;;  %760 = vmatpush1.msra.mxu0 %v2141_v9 }
  0xab   :  { %831 = vmatpush1.msra.mxu1 %v2143_v11  ;;  %761 = vmatprep.subr.mxu0 %v2147_v12 }
  0xac   :  { %832 = vmatprep.subr.mxu1 %v2149_v13  ;;  %762 = vmatpush1.msra.mxu0 %v2153_v14 }
  0xad   :  { %833 = vmatpush1.msra.mxu1 %v2155_v15  ;;  %763 = vmatprep.subr.mxu0 %v2159_v16 }
  0xae   :  { %834 = vmatprep.subr.mxu1 %v2161_v17  ;;  %764 = vmatpush1.msra.mxu0 %v2165_v18 }
  0xaf   :  { %835 = vmatpush1.msra.mxu1 %v2167_v19  ;;  %765 = vmatprep.subr.mxu0 %v2171_v20 }
  0xb0   :  { %836 = vmatprep.subr.mxu1 %v2173_v22  ;;  %766 = vmatpush1.msra.mxu0 %v2177_v23 }
  0xb1   :  { %837 = vmatpush1.msra.mxu1 %v2179_v24  ;;  %767 = vmatprep.subr.mxu0 %v2183_v25 }
  0xb2   :  { %838 = vmatprep.subr.mxu1 %v2185_v26  ;;  %768 = vmatpush1.msra.mxu0 %v2189_v27 }
  0xb3   :  { %839 = vmatpush1.msra.mxu1 %v2191_v28  ;;  %769 = vmatprep.subr.mxu0 %v2195_v29 }
  0xb4   :  { %840 = vmatprep.subr.mxu1 %v2197_v30  ;;  %770 = vmatpush2.msra.mxu0 %v2201_v31 }
  0xb5   :  { %841 = vmatpush2.msra.mxu1 %v2203_v32  ;;  %771 = vmatprep.subr.mxu0 %v2207_v33 }
  0xb6   :  { %842 = vmatprep.subr.mxu1 %v2209_v34  ;;  %772 = vmatpush2.msra.mxu0 %v2213_v35 }
  0xb7   :  { %843 = vmatpush2.msra.mxu1 %v2215_v36  ;;  %773 = vmatprep.subr.mxu0 %v2219_v8 }
  0xb8   :  { %844 = vmatprep.subr.mxu1 %v2221_v37  ;;  %774 = vmatpush2.msra.mxu0 %v2225_v38  ;;  %v2257_v38 = vld [vmem:[#allocation2 + $0xb58] sm:$0xff] }
  0xb9   :  { %845 = vmatpush2.msra.mxu1 %v2227_v62  ;;  %775 = vmatprep.subr.mxu0 %v2231_v39  ;;  %2709 = vst [vmem:[#allocation19_spill] sm:$0xff] %v2257_v38  ;;  %v2261_v62 = vld [vmem:[#allocation2 + $0x750] sm:$0xff] }
  0xba   :  { %846 = vmatprep.subr.mxu1 %v2233_v40  ;;  %776 = vmatpush2.msra.mxu0 %v2237_v41  ;;  %2710 = vst [vmem:[#allocation20_spill] sm:$0xff] %v2261_v62  ;;  %v2263_v39 = vld [vmem:[#allocation2 + $0xb50] sm:$0xff]  ;;  %v2267_v40 = vld [vmem:[#allocation2 + $0x738] sm:$0xff] }
  0xbb   :  { %847 = vmatpush2.msra.mxu1 %v2239_v42  ;;  %777 = vmatprep.subr.mxu0 %v2243_v43  ;;  %2711 = vst [vmem:[#allocation21_spill] sm:$0xff] %v2263_v39  ;;  %2712 = vst [vmem:[#allocation22_spill] sm:$0xff] %v2267_v40  ;;  %v2269_v41 = vld [vmem:[#allocation2 + $0xb38] sm:$0xff]  ;;  %v2273_v42 = vld [vmem:[#allocation2 + $0x730] sm:$0xff] }
  0xbc   :  { %848 = vmatprep.subr.mxu1 %v2245_v44  ;;  %778 = vmatpush2.msra.mxu0 %v2249_v45  ;;  %2713 = vst [vmem:[#allocation23_spill] sm:$0xff] %v2269_v41  ;;  %2714 = vst [vmem:[#allocation24_spill] sm:$0xff] %v2273_v42  ;;  %v2275_v43 = vld [vmem:[#allocation2 + $0xb30] sm:$0xff]  ;;  %v2279_v44 = vld [vmem:[#allocation2 + $0x718] sm:$0xff] }
  0xbd   :  { %849 = vmatpush2.msra.mxu1 %v2251_v46  ;;  %779 = vmatprep.subr.mxu0 %v2255_v47  ;;  %2715 = vst [vmem:[#allocation25_spill] sm:$0xff] %v2275_v43  ;;  %2716 = vst [vmem:[#allocation26_spill] sm:$0xff] %v2279_v44  ;;  %v2281_v45 = vld [vmem:[#allocation2 + $0xb18] sm:$0xff]  ;;  %v2285_v46 = vld [vmem:[#allocation2 + $0x710] sm:$0xff] }
  0xbe   :  { %850 = vmatprep.subr.mxu1 %v2257_v38  ;;  %780 = vmatpush2.msra.mxu0 %v2261_v62  ;;  %2717 = vst [vmem:[#allocation27_spill] sm:$0xff] %v2281_v45  ;;  %2718 = vst [vmem:[#allocation28_spill] sm:$0xff] %v2285_v46  ;;  %v2287_v47 = vld [vmem:[#allocation2 + $0xb10] sm:$0xff]  ;;  %v2291_v38 = vld [vmem:[#allocation2 + $0x6f8] sm:$0xff] }
  0xbf   :  { %851 = vmatpush2.msra.mxu1 %v2263_v39  ;;  %781 = vmatprep.subr.mxu0 %v2267_v40  ;;  %2719 = vst [vmem:[#allocation29_spill] sm:$0xff] %v2287_v47  ;;  %2720 = vst [vmem:[#allocation30_spill] sm:$0xff] %v2291_v38  ;;  %v2293_v62 = vld [vmem:[#allocation2 + $0xaf8] sm:$0xff]  ;;  %v2297_v39 = vld [vmem:[#allocation2 + $0x6f0] sm:$0xff] }
  0xc0   :  { %852 = vmatprep.subr.mxu1 %v2269_v41  ;;  %782 = vmatpush2.msra.mxu0 %v2273_v42  ;;  %2721 = vst [vmem:[#allocation31_spill] sm:$0xff] %v2293_v62  ;;  %2722 = vst [vmem:[#allocation32_spill] sm:$0xff] %v2297_v39  ;;  %v2299_v40 = vld [vmem:[#allocation2 + $0xaf0] sm:$0xff]  ;;  %v2303_v41 = vld [vmem:[#allocation2 + $0x6d8] sm:$0xff] }
  0xc1   :  { %853 = vmatpush2.msra.mxu1 %v2275_v43  ;;  %783 = vmatprep.subr.mxu0 %v2279_v44  ;;  %2723 = vst [vmem:[#allocation33_spill] sm:$0xff] %v2299_v40  ;;  %2724 = vst [vmem:[#allocation34_spill] sm:$0xff] %v2303_v41  ;;  %v2305_v42 = vld [vmem:[#allocation2 + $0xad8] sm:$0xff]  ;;  %v2309_v43 = vld [vmem:[#allocation2 + $0x6d0] sm:$0xff] }
  0xc2   :  { %854 = vmatprep.subr.mxu1 %v2281_v45  ;;  %784 = vmatpush2.msra.mxu0 %v2285_v46  ;;  %2725 = vst [vmem:[#allocation35_spill] sm:$0xff] %v2305_v42  ;;  %2726 = vst [vmem:[#allocation36_spill] sm:$0xff] %v2309_v43  ;;  %v2311_v44 = vld [vmem:[#allocation2 + $0xad0] sm:$0xff]  ;;  %v2315_v45 = vld [vmem:[#allocation2 + $0x6b8] sm:$0xff] }
  0xc3   :  { %855 = vmatpush2.msra.mxu1 %v2287_v47  ;;  %785 = vmatprep.subr.mxu0 %v2291_v38  ;;  %2727 = vst [vmem:[#allocation37_spill] sm:$0xff] %v2311_v44  ;;  %2728 = vst [vmem:[#allocation38_spill] sm:$0xff] %v2315_v45  ;;  %v2317_v46 = vld [vmem:[#allocation2 + $0xab8] sm:$0xff]  ;;  %v2321_v47 = vld [vmem:[#allocation2 + $0x6b0] sm:$0xff] }
  0xc4   :  { %856 = vmatprep.subr.mxu1 %v2293_v62  ;;  %786 = vmatpush2.msra.mxu0 %v2297_v39  ;;  %2729 = vst [vmem:[#allocation39_spill] sm:$0xff] %v2317_v46  ;;  %2730 = vst [vmem:[#allocation40_spill] sm:$0xff] %v2321_v47  ;;  %v2323_v38 = vld [vmem:[#allocation2 + $0xab0] sm:$0xff]  ;;  %v2327_v62 = vld [vmem:[#allocation2 + $0x698] sm:$0xff] }
  0xc5   :  { %857 = vmatpush2.msra.mxu1 %v2299_v40  ;;  %787 = vmatprep.subr.mxu0 %v2303_v41  ;;  %2731 = vst [vmem:[#allocation41_spill] sm:$0xff] %v2323_v38  ;;  %2732 = vst [vmem:[#allocation42_spill] sm:$0xff] %v2327_v62  ;;  %v2329_v39 = vld [vmem:[#allocation2 + $0xa98] sm:$0xff]  ;;  %v2333_v40 = vld [vmem:[#allocation2 + $0x690] sm:$0xff] }
  0xc6   :  { %858 = vmatprep.subr.mxu1 %v2305_v42  ;;  %788 = vmatpush2.msra.mxu0 %v2309_v43  ;;  %2733 = vst [vmem:[#allocation43_spill] sm:$0xff] %v2329_v39  ;;  %2734 = vst [vmem:[#allocation44_spill] sm:$0xff] %v2333_v40  ;;  %v2335_v41 = vld [vmem:[#allocation2 + $0xa90] sm:$0xff]  ;;  %v2339_v42 = vld [vmem:[#allocation2 + $0x678] sm:$0xff] }
  0xc7   :  { %859 = vmatpush2.msra.mxu1 %v2311_v44  ;;  %789 = vmatprep.subr.mxu0 %v2315_v45  ;;  %2735 = vst [vmem:[#allocation45_spill] sm:$0xff] %v2335_v41  ;;  %2736 = vst [vmem:[#allocation46_spill] sm:$0xff] %v2339_v42  ;;  %v2341_v43 = vld [vmem:[#allocation2 + $0xa78] sm:$0xff]  ;;  %v2345_v44 = vld [vmem:[#allocation2 + $0x670] sm:$0xff] }
  0xc8   :  { %860 = vmatprep.subr.mxu1 %v2317_v46  ;;  %790 = vmatpush2.msra.mxu0 %v2321_v47  ;;  %2737 = vst [vmem:[#allocation47_spill] sm:$0xff] %v2341_v43  ;;  %2738 = vst [vmem:[#allocation48_spill] sm:$0xff] %v2345_v44  ;;  %v2347_v45 = vld [vmem:[#allocation2 + $0xa70] sm:$0xff]  ;;  %v2351_v46 = vld [vmem:[#allocation2 + $0x658] sm:$0xff] }
  0xc9   :  { %861 = vmatpush2.msra.mxu1 %v2323_v38  ;;  %791 = vmatprep.subr.mxu0 %v2327_v62  ;;  %2739 = vst [vmem:[#allocation49_spill] sm:$0xff] %v2347_v45  ;;  %v2353_v47 = vld [vmem:[#allocation2 + $0xa58] sm:$0xff]  ;;  %v2357_v38 = vld [vmem:[#allocation2 + $0x650] sm:$0xff] }
  0xca   :  { %862 = vmatprep.subr.mxu1 %v2329_v39  ;;  %792 = vmatpush2.msra.mxu0 %v2333_v40  ;;  %2740 = vst [vmem:[#allocation50_spill] sm:$0xff] %v2353_v47  ;;  %v2359_v62 = vld [vmem:[#allocation2 + $0xa50] sm:$0xff]  ;;  %v2363_v39 = vld [vmem:[#allocation2 + $0x638] sm:$0xff] }
  0xcb   :  { %863 = vmatpush2.msra.mxu1 %v2335_v41  ;;  %793 = vmatprep.subr.mxu0 %v2339_v42  ;;  %2741 = vst [vmem:[#allocation51_spill] sm:$0xff] %v2359_v62  ;;  %2742 = vst [vmem:[#allocation52_spill] sm:$0xff] %v2363_v39  ;;  %v2365_v40 = vld [vmem:[#allocation2 + $0xa38] sm:$0xff]  ;;  %v2369_v41 = vld [vmem:[#allocation2 + $0x630] sm:$0xff] }
  0xcc   :  { %864 = vmatprep.subr.mxu1 %v2341_v43  ;;  %794 = vmatpush2.msra.mxu0 %v2345_v44  ;;  %2743 = vst [vmem:[#allocation53_spill] sm:$0xff] %v2365_v40  ;;  %2744 = vst [vmem:[#allocation54_spill] sm:$0xff] %v2369_v41  ;;  %v2371_v42 = vld [vmem:[#allocation2 + $0xa30] sm:$0xff]  ;;  %v2375_v43 = vld [vmem:[#allocation2 + $0x618] sm:$0xff] }
  0xcd   :  { %865 = vmatpush2.msra.mxu1 %v2347_v45  ;;  %795 = vmatprep.subr.mxu0 %v2351_v46  ;;  %2745 = vst [vmem:[#allocation55_spill] sm:$0xff] %v2371_v42  ;;  %2746 = vst [vmem:[#allocation56_spill] sm:$0xff] %v2375_v43  ;;  %v2377_v44 = vld [vmem:[#allocation2 + $0xa18] sm:$0xff]  ;;  %v2381_v45 = vld [vmem:[#allocation2 + $0x610] sm:$0xff] }
  0xce   :  { %866 = vmatprep.subr.mxu1 %v2353_v47  ;;  %796 = vmatpush2.msra.mxu0 %v2357_v38  ;;  %2747 = vst [vmem:[#allocation57_spill] sm:$0xff] %v2377_v44  ;;  %2748 = vst [vmem:[#allocation58_spill] sm:$0xff] %v2381_v45  ;;  %v2385_v47 = vld [vmem:[#allocation2 + $0xa10] sm:$0xff] }
  0xcf   :  { %867 = vmatpush2.msra.mxu1 %v2359_v62  ;;  %797 = vmatprep.subr.mxu0 %v2363_v39  ;;  %2749 = vst [vmem:[#allocation59_spill] sm:$0xff] %v2385_v47  ;;  %v1809_v39 = vld [vmem:[#allocation2 + $0x640] sm:$0xff]  ;;  %v1827_v62 = vld [vmem:[#allocation2 + $0x1b8] sm:$0xff] }
  0xd0   :  { %868 = vmatprep.subr.mxu1 %v2365_v40  ;;  %798 = vmatpush2.msra.mxu0 %v2369_v41  ;;  %v1690_v40 = vld [vmem:[#allocation2 + $0x1e8] sm:$0xff] }
  0xd1   :  { %869 = vmatpush2.msra.mxu1 %v2371_v42  ;;  %799 = vmatprep.subr.mxu0 %v2375_v43  ;;  %v1691_v41 = vld [vmem:[#allocation2 + $0x5e8] sm:$0xff]  ;;  %v1692_v42 = vld [vmem:[#allocation2 + $0x1e0] sm:$0xff] }
  0xd2   :  { %870 = vmatprep.subr.mxu1 %v2377_v44  ;;  %800 = vmatpush2.msra.mxu0 %v2381_v45  ;;  %v1693_v43 = vld [vmem:[#allocation2 + $0x5e0] sm:$0xff]  ;;  %v1694_v44 = vld [vmem:[#allocation2 + $0x1c8] sm:$0xff] }
  0xd3   :  { %801 = vmatprep.mubr.f32.mxu0 %v2066_v10  ;;  %871 = vmatpush2.msra.mxu1 %v2385_v47  ;;  %v1695_v45 = vld [vmem:[#allocation2 + $0x5c8] sm:$0xff]  ;;  %v1696_v10 = vld [vmem:[#allocation2 + $0x1c0] sm:$0xff] }
  0xd4   :  { %802 = vmatmul.mubr.f32.vlgmr.msra.gmra.mxu0 %v2058_v1  ;;  %872 = vmatprep.mubr.f32.mxu1 %v2079_v21  ;;  %v1697_v47 = vld [vmem:[#allocation2 + $0x5c0] sm:$0xff]  ;;  %v1698_v1 = vld [vmem:[#allocation2 + $0x1a8] sm:$0xff] }
  0xd5   :  { %912 = vmatprep.subr.mxu0 %v1690_v40  ;;  %983 = vmatprep.subr.mxu1 %v1691_v41  ;;  %v1699_v21 = vld [vmem:[#allocation2 + $0x5a8] sm:$0xff]  ;;  %v1700_v40 = vld [vmem:[#allocation2 + $0x1a0] sm:$0xff] }
  0xd6   :  { %873 = vmatmul.mubr.f32.vlgmr.msra.gmra.mxu1 %v2075_v4  ;;  %913 = vmatpush1.msra.mxu0 %v1692_v42  ;;  %v1701_v41 = vld [vmem:[#allocation2 + $0x5a0] sm:$0xff]  ;;  %v1702_v4 = vld [vmem:[#allocation2 + $0x188] sm:$0xff] }
  0xd7   :  { %984 = vmatpush1.msra.mxu1 %v1693_v43  ;;  %914 = vmatprep.subr.mxu0 %v1694_v44  ;;  %v1703_v42 = vld [vmem:[#allocation2 + $0x588] sm:$0xff]  ;;  %v1704_v43 = vld [vmem:[#allocation2 + $0x180] sm:$0xff] }
  0xd8   :  { %985 = vmatprep.subr.mxu1 %v1695_v45  ;;  %915 = vmatpush1.msra.mxu0 %v1696_v10  ;;  %v1705_v44 = vld [vmem:[#allocation2 + $0x580] sm:$0xff]  ;;  %v1706_v45 = vld [vmem:[#allocation2 + $0x168] sm:$0xff] }
  0xd9   :  { %986 = vmatpush1.msra.mxu1 %v1697_v47  ;;  %916 = vmatprep.subr.mxu0 %v1698_v1  ;;  %v1707_v10 = vld [vmem:[#allocation2 + $0x568] sm:$0xff]  ;;  %v1708_v47 = vld [vmem:[#allocation2 + $0x160] sm:$0xff] }
  0xda   :  { %987 = vmatprep.subr.mxu1 %v1699_v21  ;;  %917 = vmatpush1.msra.mxu0 %v1700_v40  ;;  %v1709_v1 = vld [vmem:[#allocation2 + $0x560] sm:$0xff]  ;;  %v1710_v21 = vld [vmem:[#allocation2 + $0x148] sm:$0xff] }
  0xdb   :  { %988 = vmatpush1.msra.mxu1 %v1701_v41  ;;  %918 = vmatprep.subr.mxu0 %v1702_v4  ;;  %v1711_v40 = vld [vmem:[#allocation2 + $0x548] sm:$0xff]  ;;  %v1712_v41 = vld [vmem:[#allocation2 + $0x140] sm:$0xff] }
  0xdc   :  { %989 = vmatprep.subr.mxu1 %v1703_v42  ;;  %919 = vmatpush1.msra.mxu0 %v1704_v43  ;;  %v1713_v4 = vld [vmem:[#allocation2 + $0x540] sm:$0xff]  ;;  %v1714_v42 = vld [vmem:[#allocation2 + $0x128] sm:$0xff] }
  0xdd   :  { %990 = vmatpush1.msra.mxu1 %v1705_v44  ;;  %920 = vmatprep.subr.mxu0 %v1706_v45  ;;  %v1715_v43 = vld [vmem:[#allocation2 + $0x528] sm:$0xff]  ;;  %v1716_v44 = vld [vmem:[#allocation2 + $0x120] sm:$0xff] }
  0xde   :  { %991 = vmatprep.subr.mxu1 %v1707_v10  ;;  %921 = vmatpush1.msra.mxu0 %v1708_v47  ;;  %v1717_v45 = vld [vmem:[#allocation2 + $0x520] sm:$0xff]  ;;  %v1718_v10 = vld [vmem:[#allocation2 + $0x108] sm:$0xff] }
  0xdf   :  { %992 = vmatpush1.msra.mxu1 %v1709_v1  ;;  %922 = vmatprep.subr.mxu0 %v1710_v21  ;;  %v1719_v47 = vld [vmem:[#allocation2 + $0x508] sm:$0xff]  ;;  %v1720_v1 = vld [vmem:[#allocation2 + $0x100] sm:$0xff] }
  0xe0   :  { %993 = vmatprep.subr.mxu1 %v1711_v40  ;;  %923 = vmatpush1.msra.mxu0 %v1712_v41  ;;  %v1721_v21 = vld [vmem:[#allocation2 + $0x500] sm:$0xff]  ;;  %v1722_v40 = vld [vmem:[#allocation2 + $0xe8] sm:$0xff] }
  0xe1   :  { %994 = vmatpush1.msra.mxu1 %v1713_v4  ;;  %924 = vmatprep.subr.mxu0 %v1714_v42  ;;  %v1723_v41 = vld [vmem:[#allocation2 + $0x4e8] sm:$0xff]  ;;  %v1724_v4 = vld [vmem:[#allocation2 + $0xe0] sm:$0xff] }
  0xe2   :  { %995 = vmatprep.subr.mxu1 %v1715_v43  ;;  %925 = vmatpush1.msra.mxu0 %v1716_v44  ;;  %v1725_v42 = vld [vmem:[#allocation2 + $0x4e0] sm:$0xff]  ;;  %v1726_v43 = vld [vmem:[#allocation2 + $0xc8] sm:$0xff] }
  0xe3   :  { %996 = vmatpush1.msra.mxu1 %v1717_v45  ;;  %926 = vmatprep.subr.mxu0 %v1718_v10  ;;  %v1727_v44 = vld [vmem:[#allocation2 + $0x4c8] sm:$0xff]  ;;  %v1728_v45 = vld [vmem:[#allocation2 + $0xc0] sm:$0xff] }
  0xe4   :  { %997 = vmatprep.subr.mxu1 %v1719_v47  ;;  %927 = vmatpush1.msra.mxu0 %v1720_v1  ;;  %v1729_v10 = vld [vmem:[#allocation2 + $0x4c0] sm:$0xff]  ;;  %v1730_v47 = vld [vmem:[#allocation2 + $0xa8] sm:$0xff] }
  0xe5   :  { %998 = vmatpush1.msra.mxu1 %v1721_v21  ;;  %928 = vmatprep.subr.mxu0 %v1722_v40  ;;  %v1731_v1 = vld [vmem:[#allocation2 + $0x4a8] sm:$0xff]  ;;  %v1732_v21 = vld [vmem:[#allocation2 + $0xa0] sm:$0xff] }
  0xe6   :  { %999 = vmatprep.subr.mxu1 %v1723_v41  ;;  %929 = vmatpush1.msra.mxu0 %v1724_v4  ;;  %v1733_v40 = vld [vmem:[#allocation2 + $0x4a0] sm:$0xff]  ;;  %v1734_v41 = vld [vmem:[#allocation2 + $0x88] sm:$0xff] }
  0xe7   :  { %1000 = vmatpush1.msra.mxu1 %v1725_v42  ;;  %930 = vmatprep.subr.mxu0 %v1726_v43  ;;  %v1735_v4 = vld [vmem:[#allocation2 + $0x488] sm:$0xff]  ;;  %v1736_v42 = vld [vmem:[#allocation2 + $0x80] sm:$0xff] }
  0xe8   :  { %1001 = vmatprep.subr.mxu1 %v1727_v44  ;;  %931 = vmatpush1.msra.mxu0 %v1728_v45  ;;  %v1737_v43 = vld [vmem:[#allocation2 + $0x480] sm:$0xff]  ;;  %v1738_v44 = vld [vmem:[#allocation2 + $0x68] sm:$0xff] }
  0xe9   :  { %1002 = vmatpush1.msra.mxu1 %v1729_v10  ;;  %932 = vmatprep.subr.mxu0 %v1730_v47  ;;  %v1739_v45 = vld [vmem:[#allocation2 + $0x468] sm:$0xff]  ;;  %v1740_v10 = vld [vmem:[#allocation2 + $0x60] sm:$0xff] }
  0xea   :  { %1003 = vmatprep.subr.mxu1 %v1731_v1  ;;  %933 = vmatpush1.msra.mxu0 %v1732_v21  ;;  %v1741_v47 = vld [vmem:[#allocation2 + $0x460] sm:$0xff]  ;;  %v1742_v1 = vld [vmem:[#allocation2 + $0x48] sm:$0xff] }
  0xeb   :  { %1004 = vmatpush1.msra.mxu1 %v1733_v40  ;;  %934 = vmatprep.subr.mxu0 %v1734_v41  ;;  %v1743_v21 = vld [vmem:[#allocation2 + $0x448] sm:$0xff]  ;;  %v1744_v40 = vld [vmem:[#allocation2 + $0x40] sm:$0xff] }
  0xec   :  { %1005 = vmatprep.subr.mxu1 %v1735_v4  ;;  %935 = vmatpush1.msra.mxu0 %v1736_v42  ;;  %v1745_v41 = vld [vmem:[#allocation2 + $0x440] sm:$0xff]  ;;  %v1746_v4 = vld [vmem:[#allocation2 + $0x28] sm:$0xff] }
  0xed   :  { %1006 = vmatpush1.msra.mxu1 %v1737_v43  ;;  %936 = vmatprep.subr.mxu0 %v1738_v44  ;;  %v1747_v42 = vld [vmem:[#allocation2 + $0x428] sm:$0xff]  ;;  %v1748_v43 = vld [vmem:[#allocation2 + $0x20] sm:$0xff] }
  0xee   :  { %1007 = vmatprep.subr.mxu1 %v1739_v45  ;;  %937 = vmatpush1.msra.mxu0 %v1740_v10  ;;  %v1749_v44 = vld [vmem:[#allocation2 + $0x420] sm:$0xff]  ;;  %v1750_v45 = vld [vmem:[#allocation2 + $0x8] sm:$0xff] }
  0xef   :  { %1008 = vmatpush1.msra.mxu1 %v1741_v47  ;;  %938 = vmatprep.subr.mxu0 %v1742_v1  ;;  %v1751_v10 = vld [vmem:[#allocation2 + $0x408] sm:$0xff]  ;;  %v1752_v47 = vld [vmem:[#allocation2] sm:$0xff] }
  0xf0   :  { %1009 = vmatprep.subr.mxu1 %v1743_v21  ;;  %939 = vmatpush1.msra.mxu0 %v1744_v40  ;;  %v1753_v1 = vld [vmem:[#allocation2 + $0x400] sm:$0xff]  ;;  %v1754_v21 = vld [vmem:[#allocation2 + $0x3e8] sm:$0xff] }
  0xf1   :  { %1010 = vmatpush1.msra.mxu1 %v1745_v41  ;;  %940 = vmatprep.subr.mxu0 %v1746_v4  ;;  %v1755_v40 = vld [vmem:[#allocation2 + $0x7e8] sm:$0xff]  ;;  %v1756_v41 = vld [vmem:[#allocation2 + $0x3e0] sm:$0xff] }
  0xf2   :  { %1011 = vmatprep.subr.mxu1 %v1747_v42  ;;  %941 = vmatpush1.msra.mxu0 %v1748_v43  ;;  %v1757_v4 = vld [vmem:[#allocation2 + $0x7e0] sm:$0xff]  ;;  %v1758_v42 = vld [vmem:[#allocation2 + $0x3c8] sm:$0xff] }
  0xf3   :  { %1012 = vmatpush1.msra.mxu1 %v1749_v44  ;;  %942 = vmatprep.subr.mxu0 %v1750_v45  ;;  %v1759_v43 = vld [vmem:[#allocation2 + $0x7c8] sm:$0xff]  ;;  %v1760_v44 = vld [vmem:[#allocation2 + $0x3c0] sm:$0xff] }
  0xf4   :  { %1013 = vmatprep.subr.mxu1 %v1751_v10  ;;  %943 = vmatpush1.msra.mxu0 %v1752_v47  ;;  %v1761_v45 = vld [vmem:[#allocation2 + $0x7c0] sm:$0xff]  ;;  %v1762_v10 = vld [vmem:[#allocation2 + $0x3a8] sm:$0xff] }
  0xf5   :  { %1014 = vmatpush1.msra.mxu1 %v1753_v1  ;;  %944 = vmatprep.subr.mxu0 %v1754_v21  ;;  %v1763_v47 = vld [vmem:[#allocation2 + $0x7a8] sm:$0xff]  ;;  %v1764_v1 = vld [vmem:[#allocation2 + $0x3a0] sm:$0xff] }
  0xf6   :  { %1015 = vmatprep.subr.mxu1 %v1755_v40  ;;  %945 = vmatpush2.msra.mxu0 %v1756_v41  ;;  %v1765_v21 = vld [vmem:[#allocation2 + $0x7a0] sm:$0xff]  ;;  %v1766_v40 = vld [vmem:[#allocation2 + $0x388] sm:$0xff] }
  0xf7   :  { %1016 = vmatpush2.msra.mxu1 %v1757_v4  ;;  %946 = vmatprep.subr.mxu0 %v1758_v42  ;;  %v1767_v41 = vld [vmem:[#allocation2 + $0x788] sm:$0xff]  ;;  %v1768_v4 = vld [vmem:[#allocation2 + $0x380] sm:$0xff] }
  0xf8   :  { %1017 = vmatprep.subr.mxu1 %v1759_v43  ;;  %947 = vmatpush2.msra.mxu0 %v1760_v44  ;;  %v1769_v42 = vld [vmem:[#allocation2 + $0x780] sm:$0xff]  ;;  %v1770_v43 = vld [vmem:[#allocation2 + $0x368] sm:$0xff] }
  0xf9   :  { %1018 = vmatpush2.msra.mxu1 %v1761_v45  ;;  %948 = vmatprep.subr.mxu0 %v1762_v10  ;;  %v1771_v44 = vld [vmem:[#allocation2 + $0x768] sm:$0xff]  ;;  %v1772_v45 = vld [vmem:[#allocation2 + $0x360] sm:$0xff] }
  0xfa   :  { %1019 = vmatprep.subr.mxu1 %v1763_v47  ;;  %949 = vmatpush2.msra.mxu0 %v1764_v1  ;;  %v1773_v10 = vld [vmem:[#allocation2 + $0x760] sm:$0xff]  ;;  %v1774_v47 = vld [vmem:[#allocation2 + $0x348] sm:$0xff] }
  0xfb   :  { %1020 = vmatpush2.msra.mxu1 %v1765_v21  ;;  %950 = vmatprep.subr.mxu0 %v1766_v40  ;;  %v1775_v1 = vld [vmem:[#allocation2 + $0x748] sm:$0xff]  ;;  %v1776_v21 = vld [vmem:[#allocation2 + $0x340] sm:$0xff] }
  0xfc   :  { %1021 = vmatprep.subr.mxu1 %v1767_v41  ;;  %951 = vmatpush2.msra.mxu0 %v1768_v4  ;;  %v1777_v40 = vld [vmem:[#allocation2 + $0x740] sm:$0xff]  ;;  %v1778_v41 = vld [vmem:[#allocation2 + $0x328] sm:$0xff] }
  0xfd   :  { %1022 = vmatpush2.msra.mxu1 %v1769_v42  ;;  %952 = vmatprep.subr.mxu0 %v1770_v43  ;;  %v1779_v4 = vld [vmem:[#allocation2 + $0x728] sm:$0xff]  ;;  %v1780_v42 = vld [vmem:[#allocation2 + $0x320] sm:$0xff] }
  0xfe   :  { %1023 = vmatprep.subr.mxu1 %v1771_v44  ;;  %953 = vmatpush2.msra.mxu0 %v1772_v45  ;;  %v1781_v43 = vld [vmem:[#allocation2 + $0x720] sm:$0xff]  ;;  %v1782_v44 = vld [vmem:[#allocation2 + $0x308] sm:$0xff] }
  0xff   :  { %1024 = vmatpush2.msra.mxu1 %v1773_v10  ;;  %954 = vmatprep.subr.mxu0 %v1774_v47  ;;  %v1783_v45 = vld [vmem:[#allocation2 + $0x708] sm:$0xff]  ;;  %v1784_v10 = vld [vmem:[#allocation2 + $0x300] sm:$0xff] }
 0x100   :  { %1025 = vmatprep.subr.mxu1 %v1775_v1  ;;  %955 = vmatpush2.msra.mxu0 %v1776_v21  ;;  %v1785_v47 = vld [vmem:[#allocation2 + $0x700] sm:$0xff]  ;;  %v1786_v1 = vld [vmem:[#allocation2 + $0x2e8] sm:$0xff] }
 0x101   :  { %1026 = vmatpush2.msra.mxu1 %v1777_v40  ;;  %956 = vmatprep.subr.mxu0 %v1778_v41  ;;  %v1787_v21 = vld [vmem:[#allocation2 + $0x6e8] sm:$0xff]  ;;  %v1788_v40 = vld [vmem:[#allocation2 + $0x2e0] sm:$0xff] }
 0x102   :  { %1027 = vmatprep.subr.mxu1 %v1779_v4  ;;  %957 = vmatpush2.msra.mxu0 %v1780_v42  ;;  %v1789_v41 = vld [vmem:[#allocation2 + $0x6e0] sm:$0xff]  ;;  %v1790_v42 = vld [vmem:[#allocation2 + $0x2c8] sm:$0xff] }
 0x103   :  { %1028 = vmatpush2.msra.mxu1 %v1781_v43  ;;  %958 = vmatprep.subr.mxu0 %v1782_v44  ;;  %v2398_v4 = vld [vmem:[%s2636_s1] sm:$0xff]  ;;  %v1791_v43 = vld [vmem:[#allocation2 + $0x6c8] sm:$0xff] }
 0x104   :  { %1029 = vmatprep.subr.mxu1 %v1783_v45  ;;  %959 = vmatpush2.msra.mxu0 %v1784_v10  ;;  %2750 = vst [vmem:[#allocation60_spill] sm:$0xff] %v2398_v4  ;;  %v1792_v44 = vld [vmem:[#allocation2 + $0x2c0] sm:$0xff]  ;;  %v1794_v10 = vld [vmem:[#allocation2 + $0x2a8] sm:$0xff] }
 0x105   :  { %1030 = vmatpush2.msra.mxu1 %v1785_v47  ;;  %960 = vmatprep.subr.mxu0 %v1786_v1  ;;  %v1793_v45 = vld [vmem:[#allocation2 + $0x6c0] sm:$0xff]  ;;  %v1795_v47 = vld [vmem:[#allocation2 + $0x6a8] sm:$0xff]  ;;  %v881_v1 = vcombine.high %v2398_v4, %v2398_v4 }
 0x106   :  { %1031 = vmatprep.subr.mxu1 %v1787_v21  ;;  %961 = vmatpush2.msra.mxu0 %v1788_v40  ;;  %v1796_v21 = vld [vmem:[#allocation2 + $0x2a0] sm:$0xff] }
 0x107   :  { %1032 = vmatpush2.msra.mxu1 %v1789_v41  ;;  %962 = vmatprep.subr.mxu0 %v1790_v42  ;;  %v1797_v40 = vld [vmem:[#allocation2 + $0x6a0] sm:$0xff]  ;;  %v1798_v41 = vld [vmem:[#allocation2 + $0x288] sm:$0xff] }
 0x108   :  { %1033 = vmatprep.subr.mxu1 %v1791_v43  ;;  %963 = vmatpush2.msra.mxu0 %v1792_v44  ;;  %v1799_v42 = vld [vmem:[#allocation2 + $0x688] sm:$0xff]  ;;  %v1800_v43 = vld [vmem:[#allocation2 + $0x280] sm:$0xff] }
 0x109   :  { %1034 = vmatpush2.msra.mxu1 %v1793_v45  ;;  %964 = vmatprep.subr.mxu0 %v1794_v10  ;;  %v1801_v44 = vld [vmem:[#allocation2 + $0x680] sm:$0xff]  ;;  %v2404_v45 = vrot.slane %v2398_v4, %v2052_v52  ;;  %v1802_v10 = vld [vmem:[#allocation2 + $0x268] sm:$0xff] }
 0x10a   :  { %1035 = vmatprep.subr.mxu1 %v1795_v47  ;;  %965 = vmatpush2.msra.mxu0 %v1796_v21  ;;  %v1803_v47 = vld [vmem:[#allocation2 + $0x668] sm:$0xff]  ;;  %v2407_v21 = vrot.slane %v881_v1, %v2052_v52  ;;  %v1817_v4 = vld [vmem:[#allocation2 + $0x600] sm:$0xff] }
 0x10b   :  { %1036 = vmatpush2.msra.mxu1 %v1797_v40  ;;  %966 = vmatprep.subr.mxu0 %v1798_v41  ;;  %v1804_v40 = vld [vmem:[#allocation2 + $0x260] sm:$0xff]  ;;  %v1811_v1 = vld [vmem:[#allocation2 + $0x628] sm:$0xff] }
 0x10c   :  { %1037 = vmatprep.subr.mxu1 %v1799_v42  ;;  %967 = vmatpush2.msra.mxu0 %v1800_v43  ;;  %2751 = vst [vmem:[#allocation61_spill] sm:$0xff] %v2407_v21  ;;  %v1805_v41 = vld [vmem:[#allocation2 + $0x660] sm:$0xff]  ;;  %v1806_v42 = vld [vmem:[#allocation2 + $0x248] sm:$0xff] }
 0x10d   :  { %1038 = vmatpush2.msra.mxu1 %v1801_v44  ;;  %968 = vmatprep.subr.mxu0 %v1802_v10  ;;  %v1807_v43 = vld [vmem:[#allocation2 + $0x648] sm:$0xff]  ;;  %v1808_v44 = vld [vmem:[#allocation2 + $0x240] sm:$0xff]  ;;  %v2411_v10 = vcombine.high %v2404_v45, %v2404_v45 }
 0x10e   :  { %1039 = vmatprep.subr.mxu1 %v1803_v47  ;;  %969 = vmatpush2.msra.mxu0 %v1804_v40  ;;  %v1810_v47 = vld [vmem:[#allocation2 + $0x228] sm:$0xff]  ;;  %v2415_v40 = vcombine.high %v2407_v21, %v2407_v21 }
 0x10f   :  { %1040 = vmatpush2.msra.mxu1 %v1805_v41  ;;  %970 = vmatprep.subr.mxu0 %v1806_v42  ;;  %v1812_v41 = vld [vmem:[#allocation2 + $0x220] sm:$0xff] }
 0x110   :  { %1041 = vmatprep.subr.mxu1 %v1807_v43  ;;  %971 = vmatpush2.msra.mxu0 %v1808_v44  ;;  %2752 = vst [vmem:[#allocation62_spill] sm:$0xff] %v2415_v40  ;;  %v1813_v42 = vld [vmem:[#allocation2 + $0x620] sm:$0xff]  ;;  %v1814_v43 = vld [vmem:[#allocation2 + $0x208] sm:$0xff] }
 0x111   :  { %1042 = vmatpush2.msra.mxu1 %v1809_v39  ;;  %972 = vmatprep.subr.mxu0 %v1810_v47  ;;  %v1815_v44 = vld [vmem:[#allocation2 + $0x608] sm:$0xff]  ;;  %v1816_v39 = vld [vmem:[#allocation2 + $0x200] sm:$0xff] }
 0x112   :  { %1043 = vmatprep.subr.mxu1 %v1811_v1  ;;  %973 = vmatpush2.msra.mxu0 %v1812_v41  ;;  %v1818_v47 = vld [vmem:[#allocation2 + $0x9e8] sm:$0xff]  ;;  %v1819_v1 = vld [vmem:[#allocation2 + $0x1f8] sm:$0xff]  ;;  %v1820_v41 = vld [vmem:[#allocation2 + $0x9e0] sm:$0xff] }
 0x113   :  { %1044 = vmatpush2.msra.mxu1 %v1813_v42  ;;  %974 = vmatprep.subr.mxu0 %v1814_v43  ;;  %v1821_v42 = vld [vmem:[#allocation2 + $0x1f0] sm:$0xff]  ;;  %v1822_v43 = vld [vmem:[#allocation2 + $0x9c8] sm:$0xff] }
 0x114   :  { %1045 = vmatprep.subr.mxu1 %v1815_v44  ;;  %975 = vmatpush2.msra.mxu0 %v1816_v39  ;;  %v1823_v44 = vld [vmem:[#allocation2 + $0x1d8] sm:$0xff]  ;;  %v1824_v39 = vld [vmem:[#allocation2 + $0x9c0] sm:$0xff] }
 0x115   :  { %976 = vmatprep.mubr.f32.mxu0 %v2411_v10  ;;  %1046 = vmatpush2.msra.mxu1 %v1817_v4  ;;  %v1825_v4 = vld [vmem:[#allocation2 + $0x1d0] sm:$0xff] }
 0x116   :  { %1047 = vmatprep.mubr.f32.mxu1 %v2415_v40  ;;  %977 = vmatmul.mubr.f32.vlgmr.msra.gmra.mxu0 %v2404_v45  ;;  %v1826_v40 = vld [vmem:[#allocation2 + $0x9a8] sm:$0xff] }
 0x117   :  { %1048 = vmatmul.mubr.f32.vlgmr.msra.gmra.mxu1 %v2407_v21  ;;  %1054 = vmatprep.subr.mxu0 %v1818_v47  ;;  %v1828_v21 = vld [vmem:[#allocation2 + $0x9a0] sm:$0xff]  ;;  %v1829_v47 = vld [vmem:[#allocation2 + $0x1b0] sm:$0xff] }
 0x118   :  { %1125 = vmatprep.subr.mxu1 %v1819_v1  ;;  %1055 = vmatpush1.msra.mxu0 %v1820_v41  ;;  %v1830_v1 = vld [vmem:[#allocation2 + $0x988] sm:$0xff]  ;;  %v1831_v41 = vld [vmem:[#allocation2 + $0x198] sm:$0xff] }
 0x119   :  { %1126 = vmatpush1.msra.mxu1 %v1821_v42  ;;  %1056 = vmatprep.subr.mxu0 %v1822_v43  ;;  %v1832_v42 = vld [vmem:[#allocation2 + $0x980] sm:$0xff]  ;;  %v1833_v43 = vld [vmem:[#allocation2 + $0x190] sm:$0xff] }
 0x11a   :  { %1127 = vmatprep.subr.mxu1 %v1823_v44  ;;  %1057 = vmatpush1.msra.mxu0 %v1824_v39  ;;  %v1834_v44 = vld [vmem:[#allocation2 + $0x968] sm:$0xff]  ;;  %v1835_v39 = vld [vmem:[#allocation2 + $0x178] sm:$0xff] }
 0x11b   :  { %1128 = vmatpush1.msra.mxu1 %v1825_v4  ;;  %1058 = vmatprep.subr.mxu0 %v1826_v40  ;;  %v1836_v4 = vld [vmem:[#allocation2 + $0x960] sm:$0xff]  ;;  %v1837_v40 = vld [vmem:[#allocation2 + $0x170] sm:$0xff] }
 0x11c   :  { %1129 = vmatprep.subr.mxu1 %v1827_v62  ;;  %1059 = vmatpush1.msra.mxu0 %v1828_v21  ;;  %v1838_v62 = vld [vmem:[#allocation2 + $0x948] sm:$0xff]  ;;  %v1839_v21 = vld [vmem:[#allocation2 + $0x158] sm:$0xff] }
 0x11d   :  { %1130 = vmatpush1.msra.mxu1 %v1829_v47  ;;  %1060 = vmatprep.subr.mxu0 %v1830_v1  ;;  %v1840_v47 = vld [vmem:[#allocation2 + $0x940] sm:$0xff]  ;;  %v1841_v1 = vld [vmem:[#allocation2 + $0x150] sm:$0xff] }
 0x11e   :  { %1131 = vmatprep.subr.mxu1 %v1831_v41  ;;  %1061 = vmatpush1.msra.mxu0 %v1832_v42  ;;  %v1842_v41 = vld [vmem:[#allocation2 + $0x928] sm:$0xff]  ;;  %v1843_v42 = vld [vmem:[#allocation2 + $0x138] sm:$0xff] }
 0x11f   :  { %1132 = vmatpush1.msra.mxu1 %v1833_v43  ;;  %1062 = vmatprep.subr.mxu0 %v1834_v44  ;;  %v1844_v43 = vld [vmem:[#allocation2 + $0x920] sm:$0xff]  ;;  %v1845_v44 = vld [vmem:[#allocation2 + $0x130] sm:$0xff] }
 0x120   :  { %1133 = vmatprep.subr.mxu1 %v1835_v39  ;;  %1063 = vmatpush1.msra.mxu0 %v1836_v4  ;;  %v1846_v39 = vld [vmem:[#allocation2 + $0x908] sm:$0xff]  ;;  %v1847_v4 = vld [vmem:[#allocation2 + $0x118] sm:$0xff] }
 0x121   :  { %1134 = vmatpush1.msra.mxu1 %v1837_v40  ;;  %1064 = vmatprep.subr.mxu0 %v1838_v62  ;;  %v1848_v40 = vld [vmem:[#allocation2 + $0x900] sm:$0xff]  ;;  %v1849_v62 = vld [vmem:[#allocation2 + $0x110] sm:$0xff] }
 0x122   :  { %1135 = vmatprep.subr.mxu1 %v1839_v21  ;;  %1065 = vmatpush1.msra.mxu0 %v1840_v47  ;;  %v1850_v21 = vld [vmem:[#allocation2 + $0x8e8] sm:$0xff]  ;;  %v1851_v47 = vld [vmem:[#allocation2 + $0xf8] sm:$0xff] }
 0x123   :  { %1136 = vmatpush1.msra.mxu1 %v1841_v1  ;;  %1066 = vmatprep.subr.mxu0 %v1842_v41  ;;  %v1852_v1 = vld [vmem:[#allocation2 + $0x8e0] sm:$0xff]  ;;  %v1853_v41 = vld [vmem:[#allocation2 + $0xf0] sm:$0xff] }
 0x124   :  { %1137 = vmatprep.subr.mxu1 %v1843_v42  ;;  %1067 = vmatpush1.msra.mxu0 %v1844_v43  ;;  %v1854_v42 = vld [vmem:[#allocation2 + $0x8c8] sm:$0xff]  ;;  %v1855_v43 = vld [vmem:[#allocation2 + $0xd8] sm:$0xff] }
 0x125   :  { %1138 = vmatpush1.msra.mxu1 %v1845_v44  ;;  %1068 = vmatprep.subr.mxu0 %v1846_v39  ;;  %v1856_v44 = vld [vmem:[#allocation2 + $0x8c0] sm:$0xff]  ;;  %v1857_v39 = vld [vmem:[#allocation2 + $0xd0] sm:$0xff] }
 0x126   :  { %1139 = vmatprep.subr.mxu1 %v1847_v4  ;;  %1069 = vmatpush1.msra.mxu0 %v1848_v40  ;;  %v1858_v4 = vld [vmem:[#allocation2 + $0x8a8] sm:$0xff]  ;;  %v1859_v40 = vld [vmem:[#allocation2 + $0xb8] sm:$0xff] }
 0x127   :  { %1140 = vmatpush1.msra.mxu1 %v1849_v62  ;;  %1070 = vmatprep.subr.mxu0 %v1850_v21  ;;  %v1860_v62 = vld [vmem:[#allocation2 + $0x8a0] sm:$0xff]  ;;  %v1861_v21 = vld [vmem:[#allocation2 + $0xb0] sm:$0xff] }
 0x128   :  { %1141 = vmatprep.subr.mxu1 %v1851_v47  ;;  %1071 = vmatpush1.msra.mxu0 %v1852_v1  ;;  %v1862_v47 = vld [vmem:[#allocation2 + $0x888] sm:$0xff]  ;;  %v1863_v1 = vld [vmem:[#allocation2 + $0x98] sm:$0xff] }
 0x129   :  { %1142 = vmatpush1.msra.mxu1 %v1853_v41  ;;  %1072 = vmatprep.subr.mxu0 %v1854_v42  ;;  %v1864_v41 = vld [vmem:[#allocation2 + $0x880] sm:$0xff]  ;;  %v1865_v42 = vld [vmem:[#allocation2 + $0x90] sm:$0xff] }
 0x12a   :  { %1143 = vmatprep.subr.mxu1 %v1855_v43  ;;  %1073 = vmatpush1.msra.mxu0 %v1856_v44  ;;  %v1866_v43 = vld [vmem:[#allocation2 + $0x868] sm:$0xff]  ;;  %v1867_v44 = vld [vmem:[#allocation2 + $0x78] sm:$0xff] }
 0x12b   :  { %1144 = vmatpush1.msra.mxu1 %v1857_v39  ;;  %1074 = vmatprep.subr.mxu0 %v1858_v4  ;;  %v1868_v39 = vld [vmem:[#allocation2 + $0x860] sm:$0xff]  ;;  %v1869_v4 = vld [vmem:[#allocation2 + $0x70] sm:$0xff] }
 0x12c   :  { %1145 = vmatprep.subr.mxu1 %v1859_v40  ;;  %1075 = vmatpush1.msra.mxu0 %v1860_v62  ;;  %v1870_v40 = vld [vmem:[#allocation2 + $0x848] sm:$0xff]  ;;  %v1871_v62 = vld [vmem:[#allocation2 + $0x58] sm:$0xff] }
 0x12d   :  { %1146 = vmatpush1.msra.mxu1 %v1861_v21  ;;  %1076 = vmatprep.subr.mxu0 %v1862_v47  ;;  %v1872_v21 = vld [vmem:[#allocation2 + $0x840] sm:$0xff]  ;;  %v1873_v47 = vld [vmem:[#allocation2 + $0x50] sm:$0xff] }
 0x12e   :  { %1147 = vmatprep.subr.mxu1 %v1863_v1  ;;  %1077 = vmatpush1.msra.mxu0 %v1864_v41  ;;  %v1874_v1 = vld [vmem:[#allocation2 + $0x828] sm:$0xff]  ;;  %v1875_v41 = vld [vmem:[#allocation2 + $0x38] sm:$0xff] }
 0x12f   :  { %1148 = vmatpush1.msra.mxu1 %v1865_v42  ;;  %1078 = vmatprep.subr.mxu0 %v1866_v43  ;;  %v1876_v42 = vld [vmem:[#allocation2 + $0x820] sm:$0xff]  ;;  %v1877_v43 = vld [vmem:[#allocation2 + $0x30] sm:$0xff] }
 0x130   :  { %1149 = vmatprep.subr.mxu1 %v1867_v44  ;;  %1079 = vmatpush1.msra.mxu0 %v1868_v39  ;;  %v1878_v44 = vld [vmem:[#allocation2 + $0x808] sm:$0xff]  ;;  %v1879_v39 = vld [vmem:[#allocation2 + $0x18] sm:$0xff] }
 0x131   :  { %1150 = vmatpush1.msra.mxu1 %v1869_v4  ;;  %1080 = vmatprep.subr.mxu0 %v1870_v40  ;;  %v1880_v4 = vld [vmem:[#allocation2 + $0x800] sm:$0xff]  ;;  %v1881_v40 = vld [vmem:[#allocation2 + $0x10] sm:$0xff] }
 0x132   :  { %1151 = vmatprep.subr.mxu1 %v1871_v62  ;;  %1081 = vmatpush1.msra.mxu0 %v1872_v21  ;;  %v1882_v62 = vld [vmem:[#allocation2 + $0xbe8] sm:$0xff]  ;;  %v1883_v21 = vld [vmem:[#allocation2 + $0x3f8] sm:$0xff] }
 0x133   :  { %1152 = vmatpush1.msra.mxu1 %v1873_v47  ;;  %1082 = vmatprep.subr.mxu0 %v1874_v1  ;;  %v1884_v47 = vld [vmem:[#allocation2 + $0xbe0] sm:$0xff]  ;;  %v1885_v1 = vld [vmem:[#allocation2 + $0x3f0] sm:$0xff] }
 0x134   :  { %1153 = vmatprep.subr.mxu1 %v1875_v41  ;;  %1083 = vmatpush1.msra.mxu0 %v1876_v42  ;;  %v1886_v41 = vld [vmem:[#allocation2 + $0xbc8] sm:$0xff]  ;;  %v1887_v42 = vld [vmem:[#allocation2 + $0x3d8] sm:$0xff] }
 0x135   :  { %1154 = vmatpush1.msra.mxu1 %v1877_v43  ;;  %1084 = vmatprep.subr.mxu0 %v1878_v44  ;;  %v1888_v43 = vld [vmem:[#allocation2 + $0xbc0] sm:$0xff]  ;;  %v1889_v44 = vld [vmem:[#allocation2 + $0x3d0] sm:$0xff] }
 0x136   :  { %1155 = vmatprep.subr.mxu1 %v1879_v39  ;;  %1085 = vmatpush1.msra.mxu0 %v1880_v4  ;;  %v1890_v39 = vld [vmem:[#allocation2 + $0xba8] sm:$0xff]  ;;  %v1891_v4 = vld [vmem:[#allocation2 + $0x3b8] sm:$0xff] }
 0x137   :  { %1156 = vmatpush1.msra.mxu1 %v1881_v40  ;;  %1086 = vmatprep.subr.mxu0 %v1882_v62  ;;  %v1892_v40 = vld [vmem:[#allocation2 + $0xba0] sm:$0xff]  ;;  %v1893_v62 = vld [vmem:[#allocation2 + $0x3b0] sm:$0xff] }
 0x138   :  { %1157 = vmatprep.subr.mxu1 %v1883_v21  ;;  %1087 = vmatpush2.msra.mxu0 %v1884_v47  ;;  %v1894_v21 = vld [vmem:[#allocation2 + $0xb88] sm:$0xff]  ;;  %v1895_v47 = vld [vmem:[#allocation2 + $0x398] sm:$0xff] }
 0x139   :  { %1158 = vmatpush2.msra.mxu1 %v1885_v1  ;;  %1088 = vmatprep.subr.mxu0 %v1886_v41  ;;  %v1896_v1 = vld [vmem:[#allocation2 + $0xb80] sm:$0xff]  ;;  %v1897_v41 = vld [vmem:[#allocation2 + $0x390] sm:$0xff] }
 0x13a   :  { %1159 = vmatprep.subr.mxu1 %v1887_v42  ;;  %1089 = vmatpush2.msra.mxu0 %v1888_v43  ;;  %v1898_v42 = vld [vmem:[#allocation2 + $0xb68] sm:$0xff]  ;;  %v1899_v43 = vld [vmem:[#allocation2 + $0x378] sm:$0xff] }
 0x13b   :  { %1160 = vmatpush2.msra.mxu1 %v1889_v44  ;;  %1090 = vmatprep.subr.mxu0 %v1890_v39  ;;  %v1900_v44 = vld [vmem:[#allocation2 + $0xb60] sm:$0xff]  ;;  %v1901_v39 = vld [vmem:[#allocation2 + $0x370] sm:$0xff] }
 0x13c   :  { %1161 = vmatprep.subr.mxu1 %v1891_v4  ;;  %1091 = vmatpush2.msra.mxu0 %v1892_v40  ;;  %v1902_v4 = vld [vmem:[#allocation2 + $0xb48] sm:$0xff]  ;;  %v1903_v40 = vld [vmem:[#allocation2 + $0x358] sm:$0xff] }
 0x13d   :  { %1162 = vmatpush2.msra.mxu1 %v1893_v62  ;;  %1092 = vmatprep.subr.mxu0 %v1894_v21  ;;  %v1904_v62 = vld [vmem:[#allocation2 + $0xb40] sm:$0xff]  ;;  %v1905_v21 = vld [vmem:[#allocation2 + $0x350] sm:$0xff] }
 0x13e   :  { %1163 = vmatprep.subr.mxu1 %v1895_v47  ;;  %1093 = vmatpush2.msra.mxu0 %v1896_v1  ;;  %v1906_v47 = vld [vmem:[#allocation2 + $0xb28] sm:$0xff]  ;;  %v1907_v1 = vld [vmem:[#allocation2 + $0x338] sm:$0xff] }
 0x13f   :  { %1164 = vmatpush2.msra.mxu1 %v1897_v41  ;;  %1094 = vmatprep.subr.mxu0 %v1898_v42  ;;  %v1908_v41 = vld [vmem:[#allocation2 + $0xb20] sm:$0xff]  ;;  %v1909_v42 = vld [vmem:[#allocation2 + $0x330] sm:$0xff] }
 0x140   :  { %1165 = vmatprep.subr.mxu1 %v1899_v43  ;;  %1095 = vmatpush2.msra.mxu0 %v1900_v44  ;;  %v1910_v43 = vld [vmem:[#allocation2 + $0xb08] sm:$0xff]  ;;  %v1911_v44 = vld [vmem:[#allocation2 + $0x318] sm:$0xff] }
 0x141   :  { %1166 = vmatpush2.msra.mxu1 %v1901_v39  ;;  %1096 = vmatprep.subr.mxu0 %v1902_v4  ;;  %v1912_v39 = vld [vmem:[#allocation2 + $0xb00] sm:$0xff]  ;;  %v1913_v4 = vld [vmem:[#allocation2 + $0x310] sm:$0xff] }
 0x142   :  { %1167 = vmatprep.subr.mxu1 %v1903_v40  ;;  %1097 = vmatpush2.msra.mxu0 %v1904_v62  ;;  %v1914_v40 = vld [vmem:[#allocation2 + $0xae8] sm:$0xff]  ;;  %v1915_v62 = vld [vmem:[#allocation2 + $0x2f8] sm:$0xff] }
 0x143   :  { %1168 = vmatpush2.msra.mxu1 %v1905_v21  ;;  %1098 = vmatprep.subr.mxu0 %v1906_v47  ;;  %v1916_v21 = vld [vmem:[#allocation2 + $0xae0] sm:$0xff]  ;;  %v1917_v47 = vld [vmem:[#allocation2 + $0x2f0] sm:$0xff] }
 0x144   :  { %1169 = vmatprep.subr.mxu1 %v1907_v1  ;;  %1099 = vmatpush2.msra.mxu0 %v1908_v41  ;;  %v1918_v1 = vld [vmem:[#allocation2 + $0xac8] sm:$0xff]  ;;  %v1919_v41 = vld [vmem:[#allocation2 + $0x2d8] sm:$0xff] }
 0x145   :  { %1170 = vmatpush2.msra.mxu1 %v1909_v42  ;;  %1100 = vmatprep.subr.mxu0 %v1910_v43  ;;  %v1920_v42 = vld [vmem:[#allocation2 + $0xac0] sm:$0xff]  ;;  %v1921_v43 = vld [vmem:[#allocation2 + $0x2d0] sm:$0xff] }
 0x146   :  { %1171 = vmatprep.subr.mxu1 %v1911_v44  ;;  %1101 = vmatpush2.msra.mxu0 %v1912_v39  ;;  %v1922_v44 = vld [vmem:[#allocation2 + $0xaa8] sm:$0xff]  ;;  %v1923_v39 = vld [vmem:[#allocation2 + $0x2b8] sm:$0xff] }
 0x147   :  { %1172 = vmatpush2.msra.mxu1 %v1913_v4  ;;  %1102 = vmatprep.subr.mxu0 %v1914_v40  ;;  %v2424_v4 = vld [vmem:[%s2636_s1 + $0x8] sm:$0xf]  ;;  %v1924_v40 = vld [vmem:[#allocation2 + $0xaa0] sm:$0xff] }
 0x148   :  { %1173 = vmatprep.subr.mxu1 %v1915_v62  ;;  %1103 = vmatpush2.msra.mxu0 %v1916_v21  ;;  %2753 = vst [vmem:[#allocation63_spill] sm:$0xff] %v2424_v4  ;;  %v1925_v62 = vld [vmem:[#allocation2 + $0x2b0] sm:$0xff]  ;;  %v1926_v21 = vld [vmem:[#allocation2 + $0xa88] sm:$0xff] }
 0x149   :  { %1174 = vmatpush2.msra.mxu1 %v1917_v47  ;;  %1104 = vmatprep.subr.mxu0 %v1918_v1  ;;  %v1927_v47 = vld [vmem:[#allocation2 + $0x298] sm:$0xff]  ;;  %v1928_v1 = vld [vmem:[#allocation2 + $0xa80] sm:$0xff] }
 0x14a   :  { %1175 = vmatprep.subr.mxu1 %v1919_v41  ;;  %1105 = vmatpush2.msra.mxu0 %v1920_v42  ;;  %v1929_v41 = vld [vmem:[#allocation2 + $0x290] sm:$0xff]  ;;  %v2428_v42 = vrot.slane %v2424_v4, %v2052_v52  ;;  %v1938_v4 = vld [vmem:[#allocation2 + $0xa28] sm:$0xff] }
 0x14b   :  { %1176 = vmatpush2.msra.mxu1 %v1921_v43  ;;  %1106 = vmatprep.subr.mxu0 %v1922_v44  ;;  %v1930_v43 = vld [vmem:[#allocation2 + $0xa68] sm:$0xff]  ;;  %v1931_v44 = vld [vmem:[#allocation2 + $0x278] sm:$0xff] }
 0x14c   :  { %1177 = vmatprep.subr.mxu1 %v1923_v39  ;;  %1107 = vmatpush2.msra.mxu0 %v1924_v40  ;;  %v1932_v39 = vld [vmem:[#allocation2 + $0xa60] sm:$0xff]  ;;  %v1933_v40 = vld [vmem:[#allocation2 + $0x270] sm:$0xff] }
 0x14d   :  { %1178 = vmatpush2.msra.mxu1 %v1925_v62  ;;  %1108 = vmatprep.subr.mxu0 %v1926_v21  ;;  %v1934_v62 = vld [vmem:[#allocation2 + $0xa48] sm:$0xff]  ;;  %v1935_v21 = vld [vmem:[#allocation2 + $0x258] sm:$0xff] }
 0x14e   :  { %1179 = vmatprep.subr.mxu1 %v1927_v47  ;;  %1109 = vmatpush2.msra.mxu0 %v1928_v1  ;;  %v1936_v47 = vld [vmem:[#allocation2 + $0xa40] sm:$0xff]  ;;  %v1937_v1 = vld [vmem:[#allocation2 + $0x250] sm:$0xff] }
 0x14f   :  { %1180 = vmatpush2.msra.mxu1 %v1929_v41  ;;  %1110 = vmatprep.subr.mxu0 %v1930_v43  ;;  %v2432_v41 = vcombine.high %v2428_v42, %v2428_v42  ;;  %v1939_v43 = vld [vmem:[#allocation2 + $0x238] sm:$0xff] }
 0x150   :  { %1181 = vmatprep.subr.mxu1 %v1931_v44  ;;  %1111 = vmatpush2.msra.mxu0 %v1932_v39  ;;  %v1940_v44 = vld [vmem:[#allocation2 + $0xa20] sm:$0xff]  ;;  %v1941_v39 = vld [vmem:[#allocation2 + $0x230] sm:$0xff] }
 0x151   :  { %1182 = vmatpush2.msra.mxu1 %v1933_v40  ;;  %1112 = vmatprep.subr.mxu0 %v1934_v62  ;;  %v1942_v40 = vld [vmem:[#allocation2 + $0xa08] sm:$0xff]  ;;  %v1943_v62 = vld [vmem:[#allocation2 + $0x218] sm:$0xff] }
 0x152   :  { %1183 = vmatprep.subr.mxu1 %v1935_v21  ;;  %1113 = vmatpush2.msra.mxu0 %v1936_v47  ;;  %v1944_v21 = vld [vmem:[#allocation2 + $0xa00] sm:$0xff]  ;;  %v1945_v47 = vld [vmem:[#allocation2 + $0x210] sm:$0xff] }
 0x153   :  { %1184 = vmatpush2.msra.mxu1 %v1937_v1  ;;  %1114 = vmatprep.subr.mxu0 %v1938_v4  ;;  %v1946_v4 = vld [vmem:[#allocation2 + $0x5f8] sm:$0xff] }
 0x154   :  { %1185 = vmatprep.subr.mxu1 %v1939_v43  ;;  %1115 = vmatpush2.msra.mxu0 %v1940_v44  ;;  %v1947_v1 = vld [vmem:[#allocation2 + $0x9f8] sm:$0xff]  ;;  %v1948_v43 = vld [vmem:[#allocation2 + $0x5f0] sm:$0xff] }
 0x155   :  { %1186 = vmatpush2.msra.mxu1 %v1941_v39  ;;  %1116 = vmatprep.subr.mxu0 %v1942_v40  ;;  %v1949_v44 = vld [vmem:[#allocation2 + $0x9f0] sm:$0xff]  ;;  %v1950_v39 = vld [vmem:[#allocation2 + $0x5d8] sm:$0xff] }
 0x156   :  { %1187 = vmatprep.subr.mxu1 %v1943_v62  ;;  %1117 = vmatpush2.msra.mxu0 %v1944_v21  ;;  %v1951_v40 = vld [vmem:[#allocation2 + $0x9d8] sm:$0xff]  ;;  %v1952_v62 = vld [vmem:[#allocation2 + $0x5d0] sm:$0xff] }
 0x157   :  { %1118 = vmatprep.mubr.f32.mxu0 %v2432_v41  ;;  %1188 = vmatpush2.msra.mxu1 %v1945_v47  ;;  %v1953_v21 = vld [vmem:[#allocation2 + $0x9d0] sm:$0xff]  ;;  %v1954_v47 = vld [vmem:[#allocation2 + $0x5b8] sm:$0xff] }
 0x158   :  { %1119 = vmatmul.mubr.f32.vlgmr.msra.gmra.mxu0 %v2428_v42  ;;  %1189 = vmatprep.mubr.f32.mxu1 %v2411_v10  ;;  %v1955_v10 = vld [vmem:[#allocation2 + $0x9b8] sm:$0xff] }
 0x159   :  { %1196 = vmatprep.subr.mxu0 %v1946_v4  ;;  %1267 = vmatprep.subr.mxu1 %v1947_v1  ;;  %v1956_v4 = vld [vmem:[#allocation2 + $0x5b0] sm:$0xff] }
 0x15a   :  { %1190 = vmatmul.mubr.f32.vlgmr.msra.gmra.mxu1 %v2404_v45  ;;  %1197 = vmatpush1.msra.mxu0 %v1948_v43  ;;  %v1957_v1 = vld [vmem:[#allocation2 + $0x9b0] sm:$0xff]  ;;  %v1958_v45 = vld [vmem:[#allocation2 + $0x598] sm:$0xff] }
 0x15b   :  { %1268 = vmatpush1.msra.mxu1 %v1949_v44  ;;  %1198 = vmatprep.subr.mxu0 %v1950_v39  ;;  %v1959_v43 = vld [vmem:[#allocation2 + $0x998] sm:$0xff]  ;;  %v1960_v44 = vld [vmem:[#allocation2 + $0x590] sm:$0xff] }
 0x15c   :  { %1269 = vmatprep.subr.mxu1 %v1951_v40  ;;  %1199 = vmatpush1.msra.mxu0 %v1952_v62  ;;  %v1961_v39 = vld [vmem:[#allocation2 + $0x990] sm:$0xff]  ;;  %v1962_v40 = vld [vmem:[#allocation2 + $0x578] sm:$0xff] }
 0x15d   :  { %1270 = vmatpush1.msra.mxu1 %v1953_v21  ;;  %1200 = vmatprep.subr.mxu0 %v1954_v47  ;;  %v1963_v62 = vld [vmem:[#allocation2 + $0x978] sm:$0xff]  ;;  %v1964_v21 = vld [vmem:[#allocation2 + $0x570] sm:$0xff] }
 0x15e   :  { %1271 = vmatprep.subr.mxu1 %v1955_v10  ;;  %1201 = vmatpush1.msra.mxu0 %v1956_v4  ;;  %v1965_v47 = vld [vmem:[#allocation2 + $0x970] sm:$0xff]  ;;  %v1966_v10 = vld [vmem:[#allocation2 + $0x558] sm:$0xff] }
 0x15f   :  { %1272 = vmatpush1.msra.mxu1 %v1957_v1  ;;  %1202 = vmatprep.subr.mxu0 %v1958_v45  ;;  %v1967_v4 = vld [vmem:[#allocation2 + $0x958] sm:$0xff]  ;;  %v1968_v1 = vld [vmem:[#allocation2 + $0x550] sm:$0xff] }
 0x160   :  { %1273 = vmatprep.subr.mxu1 %v1959_v43  ;;  %1203 = vmatpush1.msra.mxu0 %v1960_v44  ;;  %v1969_v45 = vld [vmem:[#allocation2 + $0x950] sm:$0xff]  ;;  %v1970_v43 = vld [vmem:[#allocation2 + $0x538] sm:$0xff] }
 0x161   :  { %1274 = vmatpush1.msra.mxu1 %v1961_v39  ;;  %1204 = vmatprep.subr.mxu0 %v1962_v40  ;;  %v1971_v44 = vld [vmem:[#allocation2 + $0x938] sm:$0xff]  ;;  %v2794_v39 = vld [vmem:[#allocation48_spill] sm:$0xff]  ;;  %v2795_v40 = vld [vmem:[#allocation49_spill] sm:$0xff] }
 0x162   :  { %1275 = vmatprep.subr.mxu1 %v1963_v62  ;;  %1205 = vmatpush1.msra.mxu0 %v1964_v21  ;;  %v2796_v21 = vld [vmem:[#allocation50_spill] sm:$0xff] }
 0x163   :  { %1276 = vmatpush1.msra.mxu1 %v1965_v47  ;;  %1206 = vmatprep.subr.mxu0 %v1966_v10 }
 0x164   :  { %1277 = vmatprep.subr.mxu1 %v1967_v4  ;;  %1207 = vmatpush1.msra.mxu0 %v1968_v1  ;;  %v2797_v1 = vld [vmem:[#allocation51_spill] sm:$0xff] }
 0x165   :  { %1278 = vmatpush1.msra.mxu1 %v1969_v45  ;;  %1208 = vmatprep.subr.mxu0 %v1970_v43  ;;  %v2798_v43 = vld [vmem:[#allocation52_spill] sm:$0xff] }
 0x166   :  { %1279 = vmatprep.subr.mxu1 %v1971_v44  ;;  %1209 = vmatpush1.msra.mxu0 %v2085_v48  ;;  %v2754_v48 = vld [vmem:[#allocation8_spill] sm:$0xff]  ;;  %v2799_v44 = vld [vmem:[#allocation53_spill] sm:$0xff] }
 0x167   :  { %1280 = vmatpush1.msra.mxu1 %v2087_v49  ;;  %1210 = vmatprep.subr.mxu0 %v2089_v50  ;;  %v2755_v49 = vld [vmem:[#allocation9_spill] sm:$0xff]  ;;  %v2756_v50 = vld [vmem:[#allocation10_spill] sm:$0xff] }
 0x168   :  { %1281 = vmatprep.subr.mxu1 %v2091_v51  ;;  %1211 = vmatpush1.msra.mxu0 %v2093_v53  ;;  %v2757_v51 = vld [vmem:[#allocation11_spill] sm:$0xff]  ;;  %v2758_v53 = vld [vmem:[#allocation12_spill] sm:$0xff] }
 0x169   :  { %1282 = vmatpush1.msra.mxu1 %v2095_v54  ;;  %1212 = vmatprep.subr.mxu0 %v2099_v55  ;;  %v2759_v54 = vld [vmem:[#allocation13_spill] sm:$0xff]  ;;  %v2760_v55 = vld [vmem:[#allocation14_spill] sm:$0xff] }
 0x16a   :  { %1283 = vmatprep.subr.mxu1 %v2101_v56  ;;  %1213 = vmatpush1.msra.mxu0 %v2105_v57  ;;  %v2761_v56 = vld [vmem:[#allocation15_spill] sm:$0xff]  ;;  %v2762_v57 = vld [vmem:[#allocation16_spill] sm:$0xff] }
 0x16b   :  { %1284 = vmatpush1.msra.mxu1 %v2107_v58  ;;  %1214 = vmatprep.subr.mxu0 %v2111_v59  ;;  %v2763_v58 = vld [vmem:[#allocation17_spill] sm:$0xff]  ;;  %v2764_v59 = vld [vmem:[#allocation18_spill] sm:$0xff] }
 0x16c   :  { %1285 = vmatprep.subr.mxu1 %v2113_v60  ;;  %1215 = vmatpush1.msra.mxu0 %v2117_v61  ;;  %v2765_v60 = vld [vmem:[#allocation19_spill] sm:$0xff]  ;;  %v2766_v61 = vld [vmem:[#allocation20_spill] sm:$0xff] }
 0x16d   :  { %1286 = vmatpush1.msra.mxu1 %v2119_v63  ;;  %1216 = vmatprep.subr.mxu0 %v2123_v0  ;;  %v2767_v63 = vld [vmem:[#allocation21_spill] sm:$0xff]  ;;  %v2768_v0 = vld [vmem:[#allocation22_spill] sm:$0xff] }
 0x16e   :  { %1287 = vmatprep.subr.mxu1 %v2125_v2  ;;  %1217 = vmatpush1.msra.mxu0 %v2129_v3  ;;  %v2769_v2 = vld [vmem:[#allocation23_spill] sm:$0xff]  ;;  %v2770_v3 = vld [vmem:[#allocation24_spill] sm:$0xff] }
 0x16f   :  { %1288 = vmatpush1.msra.mxu1 %v2131_v5  ;;  %1218 = vmatprep.subr.mxu0 %v2135_v6  ;;  %v2771_v5 = vld [vmem:[#allocation25_spill] sm:$0xff]  ;;  %v519_v6 = vpop.f32.mrf.mxu0 }
 0x170   :  { %1289 = vmatprep.subr.mxu1 %v2137_v7  ;;  %1219 = vmatpush1.msra.mxu0 %v2141_v9  ;;  %v2772_v7 = vld [vmem:[#allocation26_spill] sm:$0xff]  ;;  %v2773_v9 = vld [vmem:[#allocation27_spill] sm:$0xff] }
 0x171   :  { %1290 = vmatpush1.msra.mxu1 %v2143_v11  ;;  %1220 = vmatprep.subr.mxu0 %v2147_v12  ;;  %v2774_v11 = vld [vmem:[#allocation28_spill] sm:$0xff]  ;;  %v2775_v12 = vld [vmem:[#allocation29_spill] sm:$0xff] }
 0x172   :  { %1291 = vmatprep.subr.mxu1 %v2149_v13  ;;  %1221 = vmatpush1.msra.mxu0 %v2153_v14  ;;  %v590_v13 = vpop.f32.mrf.mxu1  ;;  %v2776_v14 = vld [vmem:[#allocation30_spill] sm:$0xff] }
 0x173   :  { %1292 = vmatpush1.msra.mxu1 %v2155_v15  ;;  %1222 = vmatprep.subr.mxu0 %v2159_v16  ;;  %v2777_v15 = vld [vmem:[#allocation31_spill] sm:$0xff]  ;;  %v2778_v16 = vld [vmem:[#allocation32_spill] sm:$0xff]  ;;  %v591_v10 = vadd.f32 %v590_v13, %v519_v6 }
 0x174   :  { %1293 = vmatprep.subr.mxu1 %v2161_v17  ;;  %1223 = vmatpush1.msra.mxu0 %v2165_v18  ;;  %v2779_v17 = vld [vmem:[#allocation33_spill] sm:$0xff]  ;;  %v521_v18 = vpop.f32.mrf.mxu0 }
 0x175   :  { %1294 = vmatpush1.msra.mxu1 %v2167_v19  ;;  %1224 = vmatprep.subr.mxu0 %v2171_v20  ;;  %v2780_v19 = vld [vmem:[#allocation34_spill] sm:$0xff]  ;;  %v2781_v20 = vld [vmem:[#allocation35_spill] sm:$0xff] }
 0x176   :  { %1295 = vmatprep.subr.mxu1 %v2173_v22  ;;  %1225 = vmatpush1.msra.mxu0 %v2177_v23  ;;  %v2782_v22 = vld [vmem:[#allocation36_spill] sm:$0xff]  ;;  %v2783_v23 = vld [vmem:[#allocation37_spill] sm:$0xff] }
 0x177   :  { %1296 = vmatpush1.msra.mxu1 %v2179_v24  ;;  %1226 = vmatprep.subr.mxu0 %v2183_v25  ;;  %v592_v24 = vpop.f32.mrf.mxu1  ;;  %v661_v25 = vpop.f32.mrf.mxu0 }
 0x178   :  { %1297 = vmatprep.subr.mxu1 %v2185_v26  ;;  %1227 = vmatpush1.msra.mxu0 %v2189_v27  ;;  %v2784_v26 = vld [vmem:[#allocation38_spill] sm:$0xff]  ;;  %v2785_v27 = vld [vmem:[#allocation39_spill] sm:$0xff] }
 0x179   :  { %1298 = vmatpush1.msra.mxu1 %v2191_v28  ;;  %1228 = vmatprep.subr.mxu0 %v2195_v29  ;;  %v2786_v28 = vld [vmem:[#allocation40_spill] sm:$0xff]  ;;  %v2787_v29 = vld [vmem:[#allocation41_spill] sm:$0xff] }
 0x17a   :  { %1299 = vmatprep.subr.mxu1 %v2197_v30  ;;  %1229 = vmatpush2.msra.mxu0 %v2201_v31  ;;  %v732_v30 = vpop.f32.mrf.mxu1  ;;  %v2788_v31 = vld [vmem:[#allocation42_spill] sm:$0xff] }
 0x17b   :  { %1300 = vmatpush2.msra.mxu1 %v2203_v32  ;;  %1230 = vmatprep.subr.mxu0 %v2207_v33  ;;  %v2789_v32 = vld [vmem:[#allocation43_spill] sm:$0xff]  ;;  %v2790_v33 = vld [vmem:[#allocation44_spill] sm:$0xff] }
 0x17c   :  { %1301 = vmatprep.subr.mxu1 %v2209_v34  ;;  %1231 = vmatpush2.msra.mxu0 %v2213_v35  ;;  %v2791_v34 = vld [vmem:[#allocation45_spill] sm:$0xff]  ;;  %v663_v35 = vpop.f32.mrf.mxu0  ;;  %v734_v62 = vpop.f32.mrf.mxu1 }
 0x17d   :  { %1302 = vmatpush2.msra.mxu1 %v2215_v36  ;;  %1232 = vmatprep.subr.mxu0 %v2219_v8  ;;  %v2792_v36 = vld [vmem:[#allocation46_spill] sm:$0xff]  ;;  %v2793_v8 = vld [vmem:[#allocation47_spill] sm:$0xff] }
 0x17e   :  { %1303 = vmatprep.subr.mxu1 %v2221_v37  ;;  %1233 = vmatpush2.msra.mxu0 %v2754_v48  ;;  %v593_v37 = vadd.f32 %v592_v24, %v521_v18 }
 0x17f   :  { %1304 = vmatpush2.msra.mxu1 %v2755_v49  ;;  %1234 = vmatprep.subr.mxu0 %v2756_v50  ;;  %v2536_v50 = vadd.f32 %v661_v25, %v591_v10 }
 0x180   :  { %1305 = vmatprep.subr.mxu1 %v2757_v51  ;;  %1235 = vmatpush2.msra.mxu0 %v2758_v53  ;;  %v2530_v4 = vadd.f32 %v663_v35, %v593_v37  ;;  %v2801_v51 = vld [vmem:[#allocation55_spill] sm:$0xff] }
 0x181   :  { %1306 = vmatpush2.msra.mxu1 %v2759_v54  ;;  %1236 = vmatprep.subr.mxu0 %v2760_v55  ;;  %v2802_v54 = vld [vmem:[#allocation56_spill] sm:$0xff]  ;;  %v2803_v55 = vld [vmem:[#allocation57_spill] sm:$0xff] }
 0x182   :  { %1307 = vmatprep.subr.mxu1 %v2761_v56  ;;  %1237 = vmatpush2.msra.mxu0 %v2762_v57  ;;  %v1342_v56 = vcombine.low %v2536_v50, %v2530_v4  ;;  %v2804_v57 = vld [vmem:[#allocation58_spill] sm:$0xff] }
 0x183   :  { %1308 = vmatpush2.msra.mxu1 %v2763_v58  ;;  %1238 = vmatprep.subr.mxu0 %v2764_v59  ;;  %v2805_v58 = vld [vmem:[#allocation62_spill] sm:$0xff] }
 0x184   :  { %1309 = vmatprep.subr.mxu1 %v2765_v60  ;;  %1239 = vmatpush2.msra.mxu0 %v2766_v61  ;;  %v2806_v61 = vld [vmem:[#allocation59_spill] sm:$0xff] }
 0x185   :  { %1310 = vmatpush2.msra.mxu1 %v2767_v63  ;;  %1240 = vmatprep.subr.mxu0 %v2768_v0  ;;  %v2807_v63 = vld [vmem:[#allocation61_spill] sm:$0xff] }
 0x186   :  { %1311 = vmatprep.subr.mxu1 %v2769_v2  ;;  %1241 = vmatpush2.msra.mxu0 %v2770_v3  ;;  %v1350_v2 = vrot.slane %v1342_v56, %v2052_v52 }
 0x187   :  { %1312 = vmatpush2.msra.mxu1 %v2771_v5  ;;  %1242 = vmatprep.subr.mxu0 %v2772_v7  ;;  %v1972_v5 = vld [vmem:[%s2635_s0 + $0x8] sm:$0xf]  ;;  %v2808_v7 = vld [vmem:[#allocation63_spill] sm:$0xff] }
 0x188   :  { %1313 = vmatprep.subr.mxu1 %v2773_v9  ;;  %1243 = vmatpush2.msra.mxu0 %v2774_v11  ;;  %v1401_v6 = vrot.slane %v1972_v5, 6  ;;  %v1386_v9 = vrot.slane %v2808_v7, 6 }
 0x189   :  { %1314 = vmatpush2.msra.mxu1 %v2775_v12  ;;  %1244 = vmatprep.subr.mxu0 %v2776_v14 }
 0x18a   :  { %1315 = vmatprep.subr.mxu1 %v2777_v15  ;;  %1245 = vmatpush2.msra.mxu0 %v2778_v16 }
 0x18b   :  { %1316 = vmatpush2.msra.mxu1 %v2779_v17  ;;  %1246 = vmatprep.subr.mxu0 %v2780_v19 }
 0x18c   :  { %1317 = vmatprep.subr.mxu1 %v2781_v20  ;;  %1247 = vmatpush2.msra.mxu0 %v2782_v22 }
 0x18d   :  { %1318 = vmatpush2.msra.mxu1 %v2783_v23  ;;  %1248 = vmatprep.subr.mxu0 %v2784_v26 }
 0x18e   :  { %1319 = vmatprep.subr.mxu1 %v2785_v27  ;;  %1249 = vmatpush2.msra.mxu0 %v2786_v28 }
 0x18f   :  { %1320 = vmatpush2.msra.mxu1 %v2787_v29  ;;  %1250 = vmatprep.subr.mxu0 %v2788_v31 }
 0x190   :  { %1321 = vmatprep.subr.mxu1 %v2789_v32  ;;  %1251 = vmatpush2.msra.mxu0 %v2790_v33 }
 0x191   :  { %1322 = vmatpush2.msra.mxu1 %v2791_v34  ;;  %1252 = vmatprep.subr.mxu0 %v2792_v36 }
 0x192   :  { %1323 = vmatprep.subr.mxu1 %v2793_v8  ;;  %1253 = vmatpush2.msra.mxu0 %v2794_v39 }
 0x193   :  { %1324 = vmatpush2.msra.mxu1 %v2795_v40  ;;  %1254 = vmatprep.subr.mxu0 %v2351_v46  ;;  %v2800_v46 = vld [vmem:[#allocation54_spill] sm:$0xff] }
 0x194   :  { %1325 = vmatprep.subr.mxu1 %v2796_v21  ;;  %v803_v47 = vpop.f32.mrf.mxu0  ;;  %1255 = vmatpush2.msra.mxu0 %v2357_v38 }
 0x195   :  { %1326 = vmatpush2.msra.mxu1 %v2797_v1  ;;  %v804_v45 = vadd.f32 %v803_v47, %v732_v30  ;;  %1256 = vmatprep.subr.mxu0 %v2798_v43 }
 0x196   :  { %1327 = vmatprep.subr.mxu1 %v2799_v44  ;;  %v874_v48 = vpop.f32.mrf.mxu1  ;;  %v805_v49 = vpop.f32.mrf.mxu0  ;;  %1257 = vmatpush2.msra.mxu0 %v2800_v46 }
 0x197   :  { %1328 = vmatpush2.msra.mxu1 %v2801_v51  ;;  %v806_v53 = vadd.f32 %v805_v49, %v734_v62  ;;  %1258 = vmatprep.subr.mxu0 %v2802_v54  ;;  %v2546_v59 = vadd.f32 %v874_v48, %v804_v45 }
 0x198   :  { %1329 = vmatprep.subr.mxu1 %v2803_v55  ;;  %v876_v38 = vpop.f32.mrf.mxu1  ;;  %1259 = vmatpush2.msra.mxu0 %v2804_v57 }
 0x199   :  { %1260 = vmatprep.mubr.f32.mxu0 %v2805_v58  ;;  %v2548_v60 = vadd.f32 %v876_v38, %v806_v53  ;;  %1330 = vmatpush2.msra.mxu1 %v2806_v61 }
 0x19a   :  { %1331 = vmatprep.mubr.f32.mxu1 %v2432_v41  ;;  %1261 = vmatmul.mubr.f32.vlgmr.msra.gmra.mxu0 %v2807_v63  ;;  %v2809_v41 = vld [vmem:[#allocation60_spill] sm:$0xff] }
 0x19b   :  { %1332 = vmatmul.mubr.f32.vlgmr.msra.gmra.mxu1 %v2428_v42  ;;  %v1343_v0 = vcombine.low %v2546_v59, %v2548_v60  ;;  %v2568_v42 = vld [vmem:[%s2635_s0] sm:$0xff]  ;;  %v1385_v13 = vrot.slane %v2809_v41, 6  ;;  %v1384_v15 = vmul.f32 %v2809_v41, %v2809_v41 }
 0x19c   :  { %v1419_v12 = vsub.f32 %v2809_v41, %v2568_v42  ;;  %v1400_v14 = vrot.slane %v2568_v42, 6  ;;  %v1399_v19 = vmul.f32 %v2568_v42, %v2568_v42 }
 0x19d   :  { %v1357_v3 = vrot.slane %v1343_v0, %v2052_v52  ;;  %v2577_v17 = vsel %vm1387_vm0, %v1385_v13, %v1386_v9 }
 0x19e   :  { %v1420_v16 = vand.u32 2147483647, %v1419_v12  ;;  %v2580_v18 = vsel %vm1387_vm0, %v1400_v14, %v1401_v6  ;;  %v1390_v20 = vmul.f32 %v2577_v17, %v2577_v17 }
 0x19f   :  { %v1358_v11 = vcombine.low %v1350_v2, %v1357_v3  ;;  %v1457_v22 = vsub.f32 %v2577_v17, %v2580_v18  ;;  %v1404_v23 = vmul.f32 %v2580_v18, %v2580_v18 }
 0x1a0   :  { %v1422_v24 = vcombine.high %v1420_v16, %v1420_v16  ;;  %v1429_v25 = vrot.slane %v1420_v16, %v2052_v52  ;;  %v1391_v26 = vadd.f32 %v1390_v20, %v1384_v15 }
 0x1a1   :  { %1360 = vst [vmem:[%s2638_s3] sm:$0xff] %v1358_v11  ;;  %v1458_v27 = vand.u32 2147483647, %v1457_v22  ;;  %v1405_v31 = vadd.f32 %v1404_v23, %v1399_v19 }
 0x1a2   :  { %v1436_v28 = vrot.slane %v1422_v24, %v2052_v52  ;;  %v1437_v29 = vcombine.high %v1429_v25, %v1429_v25  ;;  %v1441_v30 = vsel %vm1387_vm0, %v1429_v25, 0.0  ;;  %1682 = vrsqrt.f32 %v1391_v26 }
 0x1a3   :  { %v1460_v32 = vcombine.high %v1458_v27, %v1458_v27  ;;  %v1467_v33 = vrot.slane %v1458_v27, %v2052_v52  ;;  %1684 = vrsqrt.f32 %v1405_v31  ;;  %vm1394_vm1 = vcmp.eq.f32.partialorder %v1391_v26, inf }
 0x1a4   :  { %v1442_v34 = vsel %vm1387_vm0, %v1437_v29, 0.0  ;;  %v1444_v35 = vsel %vm1387_vm0, %v1436_v28, 0.0  ;;  %v1397_v45 = vand.u32 2147483648, %v1391_v26  ;;  %vm1396_vm2 = vcmp.eq.f32.partialorder %v1391_v26, 0.0 }
 0x1a5   :  { %v1443_v36 = vadd.f32 %v1442_v34, %v1441_v30  ;;  %v1474_v8 = vrot.slane %v1460_v32, %v2052_v52  ;;  %v1475_v37 = vcombine.high %v1467_v33, %v1467_v33  ;;  %v1479_v39 = vsel %vm1387_vm0, %v1467_v33, 0.0 }
 0x1a6   :  { %vm1408_vm3 = vcmp.eq.f32.partialorder %v1405_v31, inf  ;;  %v1411_v49 = vand.u32 2147483648, %v1405_v31  ;;  %vm1410_vm4 = vcmp.eq.f32.partialorder %v1405_v31, 0.0 }
 0x1a7   :  { %v1445_v40 = vadd.f32 %v1444_v35, %v1443_v36  ;;  %v1480_v62 = vsel %vm1387_vm0, %v1475_v37, 0.0  ;;  %v1482_v21 = vsel %vm1387_vm0, %v1474_v8, 0.0 }
 0x1a8   :  { %v1481_v47 = vadd.f32 %v1480_v62, %v1479_v39 }
 0x1a9   :  { %1446 = vadd.xlane.f32.xlu0 %v1445_v40 }
 0x1aa   :  { %v1483_v10 = vadd.f32 %v1482_v21, %v1481_v47 }
 0x1ad   :  { %1484 = vadd.xlane.f32.xlu0 %v1483_v10 }
 0x1af   :  { %v1683_v1 = vpop.eup %1682 }
 0x1b0   :  { %v1393_v43 = vmul.f32 %v1683_v1, %v1391_v26  ;;  %v1685_v44 = vpop.eup %1684 }
 0x1b1   :  { %v1407_v51 = vmul.f32 %v1685_v44, %v1405_v31 }
 0x1b2   :  { %v1395_v48 = vsel %vm1394_vm1, %v1391_v26, %v1393_v43 }
 0x1b3   :  { %v1398_v46 = vsel %vm1396_vm2, %v1397_v45, %v1395_v48  ;;  %v1409_v53 = vsel %vm1408_vm3, %v1405_v31, %v1407_v51 }
 0x1b4   :  { %v1413_v54 = vmax.f32 %v1398_v46, 1e-30  ;;  %v1412_v55 = vsel %vm1410_vm4, %v1411_v49, %v1409_v53 }
 0x1b5   :  { %v1495_v38 = vsub.f32 %v1398_v46, %v1412_v55  ;;  %v1416_v56 = vmax.f32 %v1412_v55, 1e-30 }
 0x1b6   :  { %1686 = vrcp.f32 %v1413_v54 }
 0x1b7   :  { %v1496_v57 = vand.u32 2147483647, %v1495_v38  ;;  %1688 = vrcp.f32 %v1416_v56 }
 0x1b9   :  { %v1498_v58 = vcombine.high %v1496_v57, %v1496_v57  ;;  %v1505_v61 = vrot.slane %v1496_v57, %v2052_v52 }
 0x1bb   :  { %v1512_v63 = vrot.slane %v1498_v58, %v2052_v52  ;;  %v1513_v0 = vcombine.high %v1505_v61, %v1505_v61  ;;  %v1517_v2 = vsel %vm1387_vm0, %v1505_v61, 0.0 }
 0x1bd   :  { %v1518_v3 = vsel %vm1387_vm0, %v1513_v0, 0.0  ;;  %v1520_v5 = vsel %vm1387_vm0, %v1512_v63, 0.0 }
 0x1be   :  { %v1519_v6 = vadd.f32 %v1518_v3, %v1517_v2 }
 0x1c0   :  { %v1521_v7 = vadd.f32 %v1520_v5, %v1519_v6 }
 0x1c2   :  { %1522 = vadd.xlane.f32.xlu1 %v1521_v7 }
 0x1c3   :  { %v1687_v9 = vpop.eup %1686 }
 0x1c4   :  { %v1689_v11 = vpop.eup %1688  ;;  %v1533_v12 = vmul.f32 %v1687_v9, %v2809_v41  ;;  %v1573_v16 = vmul.f32 %v1687_v9, %v2577_v17 }
 0x1c5   :  { %v1534_v13 = vmul.f32 %v2568_v42, %v1689_v11  ;;  %v1574_v19 = vmul.f32 %v1689_v11, %v2580_v18 }
 0x1c7   :  { %v1535_v14 = vsub.f32 %v1533_v12, %v1534_v13  ;;  %v1575_v22 = vsub.f32 %v1573_v16, %v1574_v19 }
 0x1c9   :  { %v1536_v15 = vand.u32 2147483647, %v1535_v14  ;;  %v1576_v25 = vand.u32 2147483647, %v1575_v22 }
 0x1cb   :  { %v1545_v20 = vrot.slane %v1536_v15, %v2052_v52  ;;  %v1538_v23 = vcombine.high %v1536_v15, %v1536_v15  ;;  %v1585_v42 = vrot.slane %v1576_v25, %v2052_v52  ;;  %v1578_v17 = vcombine.high %v1576_v25, %v1576_v25 }
 0x1cd   :  { %v1553_v24 = vcombine.high %v1545_v20, %v1545_v20  ;;  %v1552_v26 = vrot.slane %v1538_v23, %v2052_v52  ;;  %v1557_v27 = vsel %vm1387_vm0, %v1545_v20, 0.0  ;;  %v1593_v18 = vcombine.high %v1585_v42, %v1585_v42 }
 0x1ce   :  { %v1592_v31 = vrot.slane %v1578_v17, %v2052_v52  ;;  %v1597_v32 = vsel %vm1387_vm0, %v1585_v42, 0.0 }
 0x1cf   :  { %v1558_v41 = vsel %vm1387_vm0, %v1553_v24, 0.0  ;;  %v1560_v29 = vsel %vm1387_vm0, %v1552_v26, 0.0  ;;  %v1598_v33 = vsel %vm1387_vm0, %v1593_v18, 0.0 }
 0x1d0   :  { %v1559_v28 = vadd.f32 %v1558_v41, %v1557_v27  ;;  %v1599_v34 = vadd.f32 %v1598_v33, %v1597_v32  ;;  %v1600_v35 = vsel %vm1387_vm0, %v1592_v31, 0.0 }
 0x1d2   :  { %v1561_v30 = vadd.f32 %v1560_v29, %v1559_v28  ;;  %v1601_v36 = vadd.f32 %v1600_v35, %v1599_v34 }
 0x1d4   :  { %1562 = vadd.xlane.f32.xlu1 %v1561_v30  ;;  %1602 = vadd.xlane.f32.xlu0 %v1601_v36 }
 0x1d6   :  { %v978_v46 = vpop.f32.mrf.mxu0 }
 0x1d7   :  { %v1049_v51 = vpop.f32.mrf.mxu1 }
 0x1d8   :  { %v980_v53 = vpop.f32.mrf.mxu0  ;;  %v1050_v58 = vadd.f32 %v1049_v51, %v978_v46 }
 0x1d9   :  { %v1051_v55 = vpop.f32.mrf.mxu1 }
 0x1da   :  { %v1052_v56 = vadd.f32 %v1051_v55, %v980_v53 }
 0x218   :  { %v1120_v54 = vpop.f32.mrf.mxu0 }
 0x219   :  { %v1121_v2 = vadd.f32 %v1120_v54, %v1050_v58 }
 0x21a   :  { %v1122_v38 = vpop.f32.mrf.mxu0  ;;  %v1191_v0 = vpop.f32.mrf.mxu1 }
 0x21b   :  { %v1123_v61 = vadd.f32 %v1122_v38, %v1052_v56  ;;  %v1613_v9 = vsub.f32 %v2536_v50, %v1121_v2 }
 0x21c   :  { %v1193_v7 = vpop.f32.mrf.mxu1 }
 0x21d   :  { %v1614_v5 = vsub.f32 %v2530_v4, %v1123_v61  ;;  %v1617_v20 = vand.u32 2147483647, %v1613_v9  ;;  %v1365_v26 = vcombine.low %v1121_v2, %v1123_v61 }
 0x21f   :  { %v1618_v14 = vand.u32 2147483647, %v1614_v5  ;;  %v1621_v50 = vsel %vm1387_vm0, %v1617_v20, 0.0  ;;  %v1373_v30 = vrot.slane %v1365_v26, %v2052_v52 }
 0x221   :  { %v1622_v27 = vsel %vm1387_vm0, %v1618_v14, 0.0 }
 0x222   :  { %v1623_v17 = vadd.f32 %v1622_v27, %v1621_v50 }
 0x232   :  { %v1447_v8 = vpop.xlane.xlu0 %1446 }
 0x233   :  { %v1448_v37 = vrot.slane %v1447_v8, 4 }
 0x235   :  { %v1449_v39 = vadd.f32 %v1448_v37, %v1447_v8 }
 0x236   :  { %v1485_v40 = vpop.xlane.xlu0 %1484 }
 0x237   :  { %v1450_v62 = vrot.slane %v1449_v39, 2  ;;  %v1486_v21 = vrot.slane %v1485_v40, 4 }
 0x239   :  { %v1487_v47 = vadd.f32 %v1486_v21, %v1485_v40  ;;  %v1451_v10 = vadd.f32 %v1450_v62, %v1449_v39 }
 0x23b   :  { %v1488_v1 = vrot.slane %v1487_v47, 2  ;;  %v1452_v45 = vrot.slane %v1451_v10, 1 }
 0x23d   :  { %v1453_v43 = vadd.f32 %v1452_v45, %v1451_v10  ;;  %v1489_v44 = vadd.f32 %v1488_v1, %v1487_v47 }
 0x23f   :  { %1663 = vpush %v1453_v43  ;;  %v1490_v48 = vrot.slane %v1489_v44, 1 }
 0x241   :  { %v1491_v49 = vadd.f32 %v1490_v48, %v1489_v44 }
 0x243   :  { %1665 = vpush %v1491_v49 }
 0x24b   :  { %v1523_v57 = vpop.xlane.xlu1 %1522 }
 0x24c   :  { %v1524_v63 = vrot.slane %v1523_v57, 4 }
 0x24e   :  { %v1525_v3 = vadd.f32 %v1524_v63, %v1523_v57 }
 0x250   :  { %v1526_v6 = vrot.slane %v1525_v3, 2 }
 0x252   :  { %v1527_v11 = vadd.f32 %v1526_v6, %v1525_v3 }
 0x254   :  { %v1528_v16 = vrot.slane %v1527_v11, 1 }
 0x256   :  { %v1529_v24 = vadd.f32 %v1528_v16, %v1527_v11 }
 0x258   :  { %1667 = vpush %v1529_v24 }
 0x25a   :  { %v1262_v12 = vpop.f32.mrf.mxu0 }
 0x25b   :  { %v1333_v13 = vpop.f32.mrf.mxu1  ;;  %v1263_v15 = vadd.f32 %v1262_v12, %v1191_v0 }
 0x25c   :  { %v1264_v19 = vpop.f32.mrf.mxu0 }
 0x25d   :  { %v1334_v22 = vadd.f32 %v1333_v13, %v1263_v15  ;;  %v1265_v23 = vadd.f32 %v1264_v19, %v1193_v7  ;;  %v1335_v25 = vpop.f32.mrf.mxu1  ;;  %v1563_v36 = vpop.xlane.xlu1 %1562 }
 0x25e   :  { %v1603_v39 = vpop.xlane.xlu0 %1602 }
 0x25f   :  { %v1615_v4 = vsub.f32 %v2546_v59, %v1334_v22  ;;  %v1336_v41 = vadd.f32 %v1335_v25, %v1265_v23  ;;  %v1604_v40 = vrot.slane %v1603_v39, 4 }
 0x261   :  { %v1619_v28 = vand.u32 2147483647, %v1615_v4  ;;  %v1366_v42 = vcombine.low %v1334_v22, %v1336_v41  ;;  %v1616_v29 = vsub.f32 %v2548_v60, %v1336_v41  ;;  %v1564_v60 = vrot.slane %v1563_v36, 4 }
 0x262   :  { %v1605_v62 = vadd.f32 %v1604_v40, %v1603_v39 }
 0x263   :  { %v1380_v18 = vrot.slane %v1366_v42, %v2052_v52  ;;  %v1620_v31 = vand.u32 2147483647, %v1616_v29  ;;  %v1624_v32 = vsel %vm1387_vm0, %v1619_v28, 0.0  ;;  %v1565_v8 = vadd.f32 %v1564_v60, %v1563_v36 }
 0x264   :  { %v1625_v33 = vadd.f32 %v1624_v32, %v1623_v17  ;;  %v1606_v47 = vrot.slane %v1605_v62, 2 }
 0x265   :  { %v1381_v34 = vcombine.low %v1373_v30, %v1380_v18  ;;  %v1626_v59 = vsel %vm1387_vm0, %v1620_v31, 0.0  ;;  %v1566_v37 = vrot.slane %v1565_v8, 2 }
 0x266   :  { %v1627_v35 = vadd.f32 %v1626_v59, %v1625_v33  ;;  %v1607_v1 = vadd.f32 %v1606_v47, %v1605_v62 }
 0x267   :  { %1383 = vst [vmem:[%s2639_s4] sm:$0xff] %v1381_v34  ;;  %v1567_v52 = vadd.f32 %v1566_v37, %v1565_v8 }
 0x268   :  { %1628 = vadd.xlane.f32.xlu1 %v1627_v35  ;;  %v1608_v45 = vrot.slane %v1607_v1, 1 }
 0x269   :  { %v1568_v21 = vrot.slane %v1567_v52, 1 }
 0x26a   :  { %v1609_v43 = vadd.f32 %v1608_v45, %v1607_v1 }
 0x26b   :  { %v1569_v10 = vadd.f32 %v1568_v21, %v1567_v52 }
 0x26d   :  { %1669 = vpush %v1569_v10 }
 0x26e   :  { %1671 = vpush %v1609_v43 }
 0x270   :  { %s1664_s12 = spop %1663 }
 0x271   :  { %1456 = sst [smem:[#allocation5]] %s1664_s12 }
 0x274   :  { %s1666_s4 = spop %1665 }
 0x275   :  { %1494 = sst [smem:[#allocation5 + $0x1]] %s1666_s4 }
 0x289   :  { %s1668_s13 = spop %1667 }
 0x28a   :  { %1532 = sst [smem:[#allocation5 + $0x2]] %s1668_s13 }
 0x29e   :  { %s1670_s14 = spop %1669 }
 0x29f   :  { %1572 = sst [smem:[#allocation5 + $0x3]] %s1670_s14  ;;  %s1672_s15 = spop %1671 }
 0x2a0   :  { %1612 = sst [smem:[#allocation5 + $0x4]] %s1672_s15 }
 0x2f1   :  { %v1629_v44 = vpop.xlane.xlu1 %1628 }
 0x2f2   :  { %v1630_v48 = vrot.slane %v1629_v44, 4 }
 0x2f4   :  { %v1631_v49 = vadd.f32 %v1630_v48, %v1629_v44 }
 0x2f6   :  { %v1632_v46 = vrot.slane %v1631_v49, 2 }
 0x2f8   :  { %v1633_v51 = vadd.f32 %v1632_v46, %v1631_v49 }
 0x2fa   :  { %v1634_v53 = vrot.slane %v1633_v51, 1 }
 0x2fc   :  { %v1635_v54 = vadd.f32 %v1634_v53, %v1633_v51 }
 0x2fe   :  { %1673 = vpush %v1635_v54 }
 0x32f   :  { %s1674_s19 = spop %1673 }
 0x330   :  { %1638 = sst [smem:[#allocation5 + $0x5]] %s1674_s19 }
 0x331   :  { %2006 = shalt.err (!%p2003_p9)
}
 0x332   :  { %s2015_s21 = smov [#allocation5]  }
 0x333   :  { %1652 = dma.smem_to_vmem %s2015_s21, 16, %s1650_s18, [#allocation4]  }
 0x334   :  { %2009 = dma.done.wait [#allocation4], 16  }
 0x335   :  { %2010 = vsyncadd [#allocation4], 4294967280 }
 0x336   :  { %1660 = sfence }
 0x337   :  { %1661 = vsyncpa [#allocation3], 1 }
 0x338   :  { %1662 = vsyncpa [#allocation4], 1 }

// kernel: criterion_forward.11
= control target key start
LH: loop header
LB: loop body
LE: loop exit
PB: predicated region body
PF: predicated region fallthrough
CT: control target
= control target key end

     0   :  { %v2495_v2 = vmov 0   ;;  %vm180_vm0 = vcmask 523264   ;;  %s4283_s0 = inlined_call_operand.vmem [shape: bf16[258,64], index: 0, kind: input, shape index: {}]   ;;  %s4284_s1 = inlined_call_operand.vmem [shape: bf16[258,64], index: 1, kind: input, shape index: {}]   ;;  %s4285_s2 = inlined_call_operand.vmem [shape: bf16[64,256], index: 2, kind: input, shape index: {}]   ;;  %s4286_s3 = inlined_call_operand.vmem [shape: f32[4], index: 3, kind: output, shape index: {}]  }
   0x1   :  { %v2171_v0 = vld [vmem:[%s4285_s2 + $0x34] ss:$8 sps:$4 sm:$0xff]   ;;  %v2173_v1 = vld [vmem:[%s4285_s2 + $0x30] ss:$8 sps:$4 sm:$0xff]   ;;  %264 = vmatprep.mubr.bf16.mxu0 %v2495_v2  ;;  %632 = vmatprep.mubr.bf16.mxu1 %v2495_v2  ;;  %v2174_v3 = vld [vmem:[%s4285_s2 + $0x24] ss:$8 sps:$4 sm:$0xff]  }
   0x2   :  { %240 = vmatprep.subr.bf16.mxu0 %v2171_v0  ;;  %608 = vmatprep.subr.bf16.mxu1 %v2171_v0  ;;  %v2176_v4 = vld [vmem:[%s4285_s2 + $0x20] ss:$8 sps:$4 sm:$0xff]   ;;  %v2177_v5 = vld [vmem:[%s4285_s2 + $0x14] ss:$8 sps:$4 sm:$0xff]   ;;  %v2179_v6 = vld [vmem:[%s4285_s2 + $0x10] ss:$8 sps:$4 sm:$0xff]  }
   0x3   :  { %241 = vmatpush1.bf16.msra.mxu0 %v2173_v1  ;;  %609 = vmatpush1.bf16.msra.mxu1 %v2173_v1  ;;  %v2180_v7 = vld [vmem:[%s4285_s2 + $0x4] ss:$8 sps:$4 sm:$0xff]   ;;  %v2182_v8 = vld [vmem:[%s4285_s2] ss:$8 sps:$4 sm:$0xff]   ;;  %v2187_v13 = vld [vmem:[%s4283_s0 + $0x10] sm:$0xff]  }
   0x4   :  { %242 = vmatprep.subr.bf16.mxu0 %v2174_v3  ;;  %610 = vmatprep.subr.bf16.mxu1 %v2174_v3  ;;  %v2183_v9 = vld [vmem:[%s4283_s0] sm:$0xff]   ;;  %v2185_v11 = vld [vmem:[%s4283_s0 + $0x8] sm:$0xff]   ;;  %v2188_v14 = vld [vmem:[%s4284_s1 + $0x10] sm:$0xff]  }
   0x5   :  { %v2184_v10 = vld [vmem:[%s4284_s1] sm:$0xff]   ;;  %v2186_v12 = vld [vmem:[%s4284_s1 + $0x8] sm:$0xff]   ;;  %v2189_v15 = vld [vmem:[%s4283_s0 + $0x18] sm:$0xff]  }
   0x6   :  { %v2190_v16 = vld [vmem:[%s4284_s1 + $0x18] sm:$0xff]  }
   0x7   :  { %243 = vmatpush1.bf16.msra.mxu0 %v2176_v4  ;;  %611 = vmatpush1.bf16.msra.mxu1 %v2176_v4 }
   0x8   :  { %244 = vmatprep.subr.bf16.mxu0 %v2177_v5  ;;  %612 = vmatprep.subr.bf16.mxu1 %v2177_v5 }
   0xb   :  { %245 = vmatpush1.bf16.msra.mxu0 %v2179_v6  ;;  %613 = vmatpush1.bf16.msra.mxu1 %v2179_v6 }
   0xc   :  { %246 = vmatprep.subr.bf16.mxu0 %v2180_v7  ;;  %614 = vmatprep.subr.bf16.mxu1 %v2180_v7 }
   0xf   :  { %247 = vmatpush1.bf16.msra.mxu0 %v2182_v8  ;;  %615 = vmatpush1.bf16.msra.mxu1 %v2182_v8 }
  0x12   :  { %2110 = vmatmul.mubr.msk.bf16.vlgmr.msra.gmra.mxu0 %vm180_vm0, %v2183_v9  ;;  %2144 = vmatmul.mubr.msk.bf16.vlgmr.msra.gmra.mxu1 %vm180_vm0, %v2184_v10 }
  0x13   :  { %274 = vmatprep.mubr.bf16.mxu0 %v2495_v2  ;;  %642 = vmatprep.mubr.bf16.mxu1 %v2495_v2 }
  0x1a   :  { %2111 = vmatmul.mubr.msk.bf16.gmra.mxu0 %vm180_vm0, %v2185_v11  ;;  %2145 = vmatmul.mubr.msk.bf16.gmra.mxu1 %vm180_vm0, %v2186_v12 }
  0x1b   :  { %284 = vmatprep.mubr.bf16.mxu0 %v2495_v2  ;;  %652 = vmatprep.mubr.bf16.mxu1 %v2495_v2 }
  0x22   :  { %2112 = vmatmul.mubr.msk.bf16.gmra.mxu0 %vm180_vm0, %v2187_v13  ;;  %2146 = vmatmul.mubr.msk.bf16.gmra.mxu1 %vm180_vm0, %v2188_v14 }
  0x23   :  { %294 = vmatprep.mubr.bf16.mxu0 %v2495_v2  ;;  %662 = vmatprep.mubr.bf16.mxu1 %v2495_v2 }
  0x24   :  { %8 = vsyncpa [#allocation3], 0  ;;  %v2191_v17 = vld [vmem:[%s4283_s0 + $0x20] sm:$0xff]   ;;  %v2193_v19 = vld [vmem:[%s4283_s0 + $0x28] sm:$0xff]   ;;  %v1560_v13 = vlaneseq  ;;  %s2076_s13 = sshll.u32 %s4286_s3, 4  ;;  %s2077_s13 = int_to_ptr.vmem [resolvable:$true] %s2076_s13 }
  0x25   :  { %v2192_v18 = vld [vmem:[%s4284_s1 + $0x20] sm:$0xff]   ;;  %v2194_v20 = vld [vmem:[%s4284_s1 + $0x28] sm:$0xff]   ;;  %v2195_v21 = vld [vmem:[%s4283_s0 + $0x30] sm:$0xff]   ;;  %s2481_s17 = scalar_lea.vmem %s2077_s13, 16  ;;  %p2486_p1 = scmp.lt.s32.totalorder %s2077_s13, %s2077_s13 }
  0x26   :  { %v2196_v22 = vld [vmem:[%s4284_s1 + $0x30] sm:$0xff]   ;;  %v2197_v23 = vld [vmem:[%s4283_s0 + $0x38] sm:$0xff]   ;;  %v2199_v25 = vld [vmem:[%s4283_s0 + $0x40] sm:$0xff]   ;;  %p2482_p0 = scmp.ne.s32.totalorder %s2077_s13, %s2481_s17  ;;  %p2487_p2 = scmp.lt.s32.totalorder %s2481_s17, %s2481_s17 }
  0x27   :  { %v2198_v24 = vld [vmem:[%s4284_s1 + $0x38] sm:$0xff]   ;;  %v2200_v26 = vld [vmem:[%s4284_s1 + $0x40] sm:$0xff]   ;;  %v2201_v27 = vld [vmem:[%s4283_s0 + $0x48] sm:$0xff]  }
  0x28   :  { %v2202_v28 = vld [vmem:[%s4284_s1 + $0x48] sm:$0xff]   ;;  %v2203_v29 = vld [vmem:[%s4283_s0 + $0x50] sm:$0xff]   ;;  %v2205_v31 = vld [vmem:[%s4283_s0 + $0x58] sm:$0xff]   ;;  %p2488_p3 = por %p2487_p2, %p2486_p1 }
  0x29   :  { %v2204_v30 = vld [vmem:[%s4284_s1 + $0x50] sm:$0xff]   ;;  %v2206_v32 = vld [vmem:[%s4284_s1 + $0x58] sm:$0xff]   ;;  %v2207_v33 = vld [vmem:[%s4283_s0 + $0x60] sm:$0xff]  }
  0x2a   :  { %2113 = vmatmul.mubr.msk.bf16.gmra.mxu0 %vm180_vm0, %v2189_v15  ;;  %2147 = vmatmul.mubr.msk.bf16.gmra.mxu1 %vm180_vm0, %v2190_v16  ;;  %v2208_v34 = vld [vmem:[%s4284_s1 + $0x60] sm:$0xff]   ;;  %v2209_v35 = vld [vmem:[%s4283_s0 + $0x68] sm:$0xff]   ;;  %v2211_v37 = vld [vmem:[%s4283_s0 + $0x70] sm:$0xff]   ;;  %p2489_p4 = pnand %p2488_p3, %p2482_p0 }
  0x2b   :  { %304 = vmatprep.mubr.bf16.mxu0 %v2495_v2  ;;  %672 = vmatprep.mubr.bf16.mxu1 %v2495_v2  ;;  %v2210_v36 = vld [vmem:[%s4284_s1 + $0x68] sm:$0xff]   ;;  %v2212_v38 = vld [vmem:[%s4284_s1 + $0x70] sm:$0xff]   ;;  %v2213_v39 = vld [vmem:[%s4283_s0 + $0x78] sm:$0xff]  }
  0x2c   :  { %v2214_v40 = vld [vmem:[%s4284_s1 + $0x78] sm:$0xff]   ;;  %v2215_v41 = vld [vmem:[%s4283_s0 + $0x80] ss:$0 sps:$4 sm:$0x11]  }
  0x2d   :  { %v2216_v42 = vld [vmem:[%s4284_s1 + $0x80] ss:$0 sps:$4 sm:$0x11]  }
  0x32   :  { %2114 = vmatmul.mubr.msk.bf16.gmra.mxu0 %vm180_vm0, %v2191_v17  ;;  %2148 = vmatmul.mubr.msk.bf16.gmra.mxu1 %vm180_vm0, %v2192_v18 }
  0x33   :  { %314 = vmatprep.mubr.bf16.mxu0 %v2495_v2  ;;  %682 = vmatprep.mubr.bf16.mxu1 %v2495_v2 }
  0x3a   :  { %2115 = vmatmul.mubr.msk.bf16.gmra.mxu0 %vm180_vm0, %v2193_v19  ;;  %2149 = vmatmul.mubr.msk.bf16.gmra.mxu1 %vm180_vm0, %v2194_v20 }
  0x3b   :  { %324 = vmatprep.mubr.bf16.mxu0 %v2495_v2  ;;  %692 = vmatprep.mubr.bf16.mxu1 %v2495_v2 }
  0x42   :  { %2116 = vmatmul.mubr.msk.bf16.gmra.mxu0 %vm180_vm0, %v2195_v21  ;;  %2150 = vmatmul.mubr.msk.bf16.gmra.mxu1 %vm180_vm0, %v2196_v22 }
  0x43   :  { %334 = vmatprep.mubr.bf16.mxu0 %v2495_v2  ;;  %702 = vmatprep.mubr.bf16.mxu1 %v2495_v2 }
  0x4a   :  { %2117 = vmatmul.mubr.msk.bf16.gmra.mxu0 %vm180_vm0, %v2197_v23  ;;  %2151 = vmatmul.mubr.msk.bf16.gmra.mxu1 %vm180_vm0, %v2198_v24  ;;  %v2729_v24 = vand.u32 127, %v1560_v13 }
  0x4b   :  { %344 = vmatprep.mubr.bf16.mxu0 %v2495_v2  ;;  %712 = vmatprep.mubr.bf16.mxu1 %v2495_v2 }
  0x4c   :  { %vm1562_vm5 = vcmp.lt.s32.totalorder %v2729_v24, 33 }
  0x52   :  { %2118 = vmatmul.mubr.msk.bf16.gmra.mxu0 %vm180_vm0, %v2199_v25  ;;  %2152 = vmatmul.mubr.msk.bf16.gmra.mxu1 %vm180_vm0, %v2200_v26 }
  0x53   :  { %354 = vmatprep.mubr.bf16.mxu0 %v2495_v2  ;;  %722 = vmatprep.mubr.bf16.mxu1 %v2495_v2 }
  0x5a   :  { %2119 = vmatmul.mubr.msk.bf16.gmra.mxu0 %vm180_vm0, %v2201_v27  ;;  %2153 = vmatmul.mubr.msk.bf16.gmra.mxu1 %vm180_vm0, %v2202_v28 }
  0x5b   :  { %364 = vmatprep.mubr.bf16.mxu0 %v2495_v2  ;;  %732 = vmatprep.mubr.bf16.mxu1 %v2495_v2 }
  0x62   :  { %2120 = vmatmul.mubr.msk.bf16.gmra.mxu0 %vm180_vm0, %v2203_v29  ;;  %2154 = vmatmul.mubr.msk.bf16.gmra.mxu1 %vm180_vm0, %v2204_v30 }
  0x63   :  { %374 = vmatprep.mubr.bf16.mxu0 %v2495_v2  ;;  %742 = vmatprep.mubr.bf16.mxu1 %v2495_v2 }
  0x6a   :  { %2121 = vmatmul.mubr.msk.bf16.gmra.mxu0 %vm180_vm0, %v2205_v31  ;;  %2155 = vmatmul.mubr.msk.bf16.gmra.mxu1 %vm180_vm0, %v2206_v32 }
  0x6b   :  { %384 = vmatprep.mubr.bf16.mxu0 %v2495_v2  ;;  %752 = vmatprep.mubr.bf16.mxu1 %v2495_v2 }
  0x72   :  { %2122 = vmatmul.mubr.msk.bf16.gmra.mxu0 %vm180_vm0, %v2207_v33  ;;  %2156 = vmatmul.mubr.msk.bf16.gmra.mxu1 %vm180_vm0, %v2208_v34 }
  0x73   :  { %394 = vmatprep.mubr.bf16.mxu0 %v2495_v2  ;;  %762 = vmatprep.mubr.bf16.mxu1 %v2495_v2 }
  0x7a   :  { %2123 = vmatmul.mubr.msk.bf16.gmra.mxu0 %vm180_vm0, %v2209_v35  ;;  %2157 = vmatmul.mubr.msk.bf16.gmra.mxu1 %vm180_vm0, %v2210_v36 }
  0x7b   :  { %404 = vmatprep.mubr.bf16.mxu0 %v2495_v2  ;;  %772 = vmatprep.mubr.bf16.mxu1 %v2495_v2 }
  0x82   :  { %2124 = vmatmul.mubr.msk.bf16.gmra.mxu0 %vm180_vm0, %v2211_v37  ;;  %2158 = vmatmul.mubr.msk.bf16.gmra.mxu1 %vm180_vm0, %v2212_v38 }
  0x83   :  { %414 = vmatprep.mubr.bf16.mxu0 %v2495_v2  ;;  %782 = vmatprep.mubr.bf16.mxu1 %v2495_v2 }
  0x8a   :  { %2125 = vmatmul.mubr.msk.bf16.gmra.mxu0 %vm180_vm0, %v2213_v39  ;;  %2159 = vmatmul.mubr.msk.bf16.gmra.mxu1 %vm180_vm0, %v2214_v40 }
  0x8b   :  { %424 = vmatprep.mubr.bf16.mxu0 %v2495_v2  ;;  %792 = vmatprep.mubr.bf16.mxu1 %v2495_v2 }
  0x92   :  { %2126 = vmatmul.mubr.msk.bf16.gmra.mxu0 %vm180_vm0, %v2215_v41  ;;  %2160 = vmatmul.mubr.msk.bf16.gmra.mxu1 %vm180_vm0, %v2216_v42 }
  0xd2   :  { %v266_v43 = vpop.f32.mrf.mxu0  ;;  %v634_v44 = vpop.f32.mrf.mxu1 }
  0xd3   :  { %v801_v47 = vmul.f32 %v266_v43, %v266_v43  ;;  %v1164_v48 = vmul.f32 %v634_v44, %v634_v44 }
  0xd4   :  { %v268_v45 = vpop.f32.mrf.mxu0  ;;  %v636_v46 = vpop.f32.mrf.mxu1 }
  0xd5   :  { %v834_v49 = vmul.f32 %v268_v45, %v268_v45  ;;  %v1197_v50 = vmul.f32 %v636_v46, %v636_v46 }
  0xd6   :  { %v270_v51 = vpop.f32.mrf.mxu0  ;;  %v638_v52 = vpop.f32.mrf.mxu1 }
  0xd7   :  { %v867_v53 = vadd.f32 %v834_v49, %v801_v47  ;;  %v1230_v54 = vadd.f32 %v1197_v50, %v1164_v48  ;;  %v802_v63 = vmul.f32 %v270_v51, %v270_v51  ;;  %v1165_v0 = vmul.f32 %v638_v52, %v638_v52 }
  0xd8   :  { %v272_v55 = vpop.f32.mrf.mxu0  ;;  %v640_v56 = vpop.f32.mrf.mxu1 }
  0xd9   :  { %v2711_v57 = vmax.f32 %v867_v53, 1e-08  ;;  %v2713_v58 = vmax.f32 %v1230_v54, 1e-08  ;;  %v835_v59 = vmul.f32 %v272_v55, %v272_v55  ;;  %v1198_v60 = vmul.f32 %v640_v56, %v640_v56 }
  0xda   :  { %v276_v61 = vpop.f32.mrf.mxu0  ;;  %v644_v62 = vpop.f32.mrf.mxu1 }
  0xdb   :  { %2217 = vrsqrt.f32 %v2711_v57  ;;  %v868_v3 = vadd.f32 %v835_v59, %v802_v63  ;;  %v1231_v4 = vadd.f32 %v1198_v60, %v1165_v0  ;;  %v803_v5 = vmul.f32 %v276_v61, %v276_v61 }
  0xdc   :  { %2219 = vrsqrt.f32 %v2713_v58  ;;  %v278_v1 = vpop.f32.mrf.mxu0  ;;  %v646_v2 = vpop.f32.mrf.mxu1  ;;  %v1166_v6 = vmul.f32 %v644_v62, %v644_v62  ;;  %vm935_vm1 = vcmp.eq.f32.partialorder %v2711_v57, inf  ;;  %vm937_vm2 = vcmp.eq.f32.partialorder %v2711_v57, 0.0 }
  0xdd   :  { %v836_v7 = vmul.f32 %v278_v1, %v278_v1  ;;  %v1199_v8 = vmul.f32 %v646_v2, %v646_v2  ;;  %v2717_v11 = vmax.f32 %v868_v3, 1e-08  ;;  %v2719_v12 = vmax.f32 %v1231_v4, 1e-08 }
  0xde   :  { %v280_v9 = vpop.f32.mrf.mxu0  ;;  %v648_v10 = vpop.f32.mrf.mxu1  ;;  %v938_v27 = vand.u32 2147483648, %v2711_v57  ;;  %vm1298_vm3 = vcmp.eq.f32.partialorder %v2713_v58, inf  ;;  %vm1300_vm4 = vcmp.eq.f32.partialorder %v2713_v58, 0.0  ;;  %v1301_v38 = vand.u32 2147483648, %v2713_v58 }
  0xdf   :  { %v869_v14 = vadd.f32 %v836_v7, %v803_v5  ;;  %v1232_v15 = vadd.f32 %v1199_v8, %v1166_v6  ;;  %2221 = vrsqrt.f32 %v2717_v11  ;;  %v804_v28 = vmul.f32 %v280_v9, %v280_v9 }
  0xe0   :  { %v282_v16 = vpop.f32.mrf.mxu0  ;;  %v650_v17 = vpop.f32.mrf.mxu1  ;;  %2223 = vrsqrt.f32 %v2719_v12  ;;  %v1167_v29 = vmul.f32 %v648_v10, %v648_v10  ;;  %vm942_vm6 = vcmp.eq.f32.partialorder %v2717_v11, inf  ;;  %v945_v39 = vand.u32 2147483648, %v2717_v11 }
  0xe1   :  { %v2723_v20 = vmax.f32 %v869_v14, 1e-08  ;;  %v2725_v21 = vmax.f32 %v1232_v15, 1e-08  ;;  %v837_v22 = vmul.f32 %v282_v16, %v282_v16  ;;  %v1200_v23 = vmul.f32 %v650_v17, %v650_v17 }
  0xe2   :  { %v286_v18 = vpop.f32.mrf.mxu0  ;;  %v654_v19 = vpop.f32.mrf.mxu1  ;;  %vm944_vm7 = vcmp.eq.f32.partialorder %v2717_v11, 0.0  ;;  %vm1305_vm8 = vcmp.eq.f32.partialorder %v2719_v12, inf  ;;  %vm1307_vm9 = vcmp.eq.f32.partialorder %v2719_v12, 0.0  ;;  %v1308_v53 = vand.u32 2147483648, %v2719_v12 }
  0xe3   :  { %2225 = vrsqrt.f32 %v2723_v20  ;;  %v805_v30 = vmul.f32 %v286_v18, %v286_v18  ;;  %v870_v33 = vadd.f32 %v837_v22, %v804_v28  ;;  %v1233_v34 = vadd.f32 %v1200_v23, %v1167_v29 }
  0xe4   :  { %v288_v25 = vpop.f32.mrf.mxu0  ;;  %v656_v26 = vpop.f32.mrf.mxu1  ;;  %2227 = vrsqrt.f32 %v2725_v21  ;;  %v1168_v40 = vmul.f32 %v654_v19, %v654_v19  ;;  %vm949_vm10 = vcmp.eq.f32.partialorder %v2723_v20, inf  ;;  %vm951_vm11 = vcmp.eq.f32.partialorder %v2723_v20, 0.0 }
  0xe5   :  { %v838_v35 = vmul.f32 %v288_v25, %v288_v25  ;;  %v1201_v36 = vmul.f32 %v656_v26, %v656_v26  ;;  %v2742_v45 = vmax.f32 %v870_v33, 1e-08  ;;  %v2744_v46 = vmax.f32 %v1233_v34, 1e-08 }
  0xe6   :  { %v290_v31 = vpop.f32.mrf.mxu0  ;;  %v658_v32 = vpop.f32.mrf.mxu1  ;;  %v952_v1 = vand.u32 2147483648, %v2723_v20  ;;  %vm1312_vm12 = vcmp.eq.f32.partialorder %v2725_v21, inf  ;;  %vm1314_vm13 = vcmp.eq.f32.partialorder %v2725_v21, 0.0  ;;  %v1315_v9 = vand.u32 2147483648, %v2725_v21 }
  0xe7   :  { %v871_v47 = vadd.f32 %v838_v35, %v805_v30  ;;  %v1234_v49 = vadd.f32 %v1201_v36, %v1168_v40  ;;  %2229 = vrsqrt.f32 %v2742_v45  ;;  %v1169_v15 = vmul.f32 %v658_v32, %v658_v32 }
  0xe8   :  { %v2218_v37 = vpop.eup %2217  ;;  %v292_v41 = vpop.f32.mrf.mxu0  ;;  %2231 = vrsqrt.f32 %v2744_v46  ;;  %v959_v22 = vand.u32 2147483648, %v2742_v45  ;;  %vm956_vm14 = vcmp.eq.f32.partialorder %v2742_v45, inf  ;;  %vm1319_vm15 = vcmp.eq.f32.partialorder %v2744_v46, inf }
  0xe9   :  { %v660_v42 = vpop.f32.mrf.mxu1  ;;  %v2220_v43 = vpop.eup %2219  ;;  %v934_v44 = vmul.f32 %v2218_v37, %v2711_v57  ;;  %v839_v54 = vmul.f32 %v292_v41, %v292_v41  ;;  %v2778_v6 = vmax.f32 %v871_v47, 1e-08  ;;  %vm958_vm0 = vcmp.eq.f32.partialorder %v2742_v45, 0.0 }
  0xea   :  { %v1297_v48 = vmul.f32 %v2220_v43, %v2713_v58  ;;  %v2749_v50 = vpop.f32.mrf.mxu0  ;;  %v1202_v16 = vmul.f32 %v660_v42, %v660_v42  ;;  %v1322_v47 = vand.u32 2147483648, %v2744_v46 }
  0xeb   :  { %v2751_v51 = vpop.f32.mrf.mxu1  ;;  %v936_v52 = vsel %vm935_vm1, %v2711_v57, %v934_v44  ;;  %v806_v57 = vmul.f32 %v290_v31, %v290_v31  ;;  %vm1321_vm1 = vcmp.eq.f32.partialorder %v2744_v46, 0.0 }
  0xec   :  { %v939_v55 = vsel %vm937_vm2, %v938_v27, %v936_v52  ;;  %v1299_v56 = vsel %vm1298_vm3, %v2713_v58, %v1297_v48  ;;  %v2765_v59 = vpop.f32.mrf.mxu0  ;;  %v2222_v62 = vpop.eup %2221  ;;  %v2780_v58 = vmax.f32 %v1234_v49, 1e-08  ;;  %vm963_vm2 = vcmp.eq.f32.partialorder %v2778_v6, inf }
  0xed   :  { %v2767_v60 = vpop.f32.mrf.mxu1  ;;  %2233 = vlog2.f32 %v939_v55  ;;  %v1302_v61 = vsel %vm1300_vm4, %v1301_v38, %v1299_v56  ;;  %v2224_v4 = vpop.eup %2223  ;;  %v941_v5 = vmul.f32 %v2222_v62, %v2717_v11  ;;  %v872_v7 = vadd.f32 %v839_v54, %v806_v57 }
  0xee   :  { %v1527_v63 = vsub.f32 %v1302_v61, %v939_v55  ;;  %v1563_v0 = vmul.f32 %v1302_v61, %v1302_v61  ;;  %2235 = vlog2.f32 %v1302_v61  ;;  %v2773_v2 = vpop.f32.mrf.mxu0  ;;  %v1304_v8 = vmul.f32 %v2224_v4, %v2719_v12 }
  0xef   :  { %v2775_v3 = vpop.f32.mrf.mxu1  ;;  %v943_v14 = vsel %vm942_vm6, %v2717_v11, %v941_v5  ;;  %2237 = vrsqrt.f32 %v2778_v6  ;;  %v2822_v36 = vmax.f32 %v872_v7, 1e-08  ;;  %vm965_vm3 = vcmp.eq.f32.partialorder %v2778_v6, 0.0 }
  0xf0   :  { %v2786_v10 = vpop.f32.mrf.mxu0  ;;  %v2226_v17 = vpop.eup %2225  ;;  %v946_v18 = vsel %vm944_vm7, %v945_v39, %v943_v14  ;;  %v1306_v19 = vsel %vm1305_vm8, %v2719_v12, %v1304_v8  ;;  %2239 = vrsqrt.f32 %v2780_v58  ;;  %v1596_v27 = vsel %vm1562_vm5, %v1563_v0, 0.0 }
  0xf1   :  { %v2788_v13 = vpop.f32.mrf.mxu1  ;;  %v2228_v26 = vpop.eup %2227  ;;  %2241 = vlog2.f32 %v946_v18  ;;  %v1309_v11 = vsel %vm1307_vm9, %v1308_v53, %v1306_v19  ;;  %v948_v28 = vmul.f32 %v2226_v17, %v2723_v20  ;;  %v1629_v12 = vand.u32 2147483647, %v1527_v63 }
  0xf2   :  { %v2801_v23 = vpop.f32.mrf.mxu0  ;;  %v1528_v29 = vsub.f32 %v1309_v11, %v946_v18  ;;  %v1564_v30 = vmul.f32 %v1309_v11, %v1309_v11  ;;  %2243 = vlog2.f32 %v1309_v11  ;;  %v1311_v31 = vmul.f32 %v2228_v26, %v2725_v21 }
  0xf3   :  { %v2803_v25 = vpop.f32.mrf.mxu1  ;;  %v1949_v34 = vmul.f32 %v1527_v63, %v1527_v63  ;;  %v950_v35 = vsel %vm949_vm10, %v2723_v20, %v948_v28  ;;  %v1235_v0 = vadd.f32 %v1202_v16, %v1169_v15  ;;  %vm1326_vm4 = vcmp.eq.f32.partialorder %v2780_v58, inf }
  0xf4   :  { %v2815_v32 = vpop.f32.mrf.mxu0  ;;  %v1597_v37 = vsel %vm1562_vm5, %v1564_v30, 0.0  ;;  %v1630_v38 = vand.u32 2147483647, %v1528_v29  ;;  %v1950_v39 = vmul.f32 %v1528_v29, %v1528_v29  ;;  %v953_v40 = vsel %vm951_vm11, %v952_v1, %v950_v35  ;;  %v2230_v48 = vpop.eup %2229 }
  0xf5   :  { %v2817_v33 = vpop.f32.mrf.mxu1  ;;  %v2026_v43 = vadd.f32 %v1597_v37, %v1596_v27  ;;  %2245 = vlog2.f32 %v953_v40  ;;  %v1313_v44 = vsel %vm1312_vm12, %v2725_v21, %v1311_v31  ;;  %v2232_v55 = vpop.eup %2231  ;;  %v955_v57 = vmul.f32 %v2230_v48, %v2742_v45 }
  0xf6   :  { %v2828_v41 = vpop.f32.mrf.mxu0  ;;  %v1662_v49 = vadd.f32 %v1630_v38, %v1629_v12  ;;  %v1982_v52 = vadd.f32 %v1950_v39, %v1949_v34  ;;  %v1316_v53 = vsel %vm1314_vm13, %v1315_v9, %v1313_v44  ;;  %2247 = vrsqrt.f32 %v2822_v36 }
  0xf7   :  { %v2830_v42 = vpop.f32.mrf.mxu1  ;;  %v1529_v56 = vsub.f32 %v1316_v53, %v953_v40  ;;  %v1565_v61 = vmul.f32 %v1316_v53, %v1316_v53  ;;  %2249 = vlog2.f32 %v1316_v53  ;;  %v1318_v63 = vmul.f32 %v2232_v55, %v2744_v46 }
  0xf8   :  { %v2840_v20 = vpop.f32.mrf.mxu0  ;;  %v966_v21 = vand.u32 2147483648, %v2778_v6  ;;  %v957_v19 = vsel %vm956_vm14, %v2742_v45, %v955_v57  ;;  %v1329_v45 = vand.u32 2147483648, %v2780_v58  ;;  %v2879_v44 = vmax.f32 %v1235_v0, 1e-08 }
  0xf9   :  { %v2842_v54 = vpop.f32.mrf.mxu1  ;;  %v1598_v8 = vsel %vm1562_vm5, %v1565_v61, 0.0  ;;  %v1631_v9 = vand.u32 2147483647, %v1529_v56  ;;  %v1951_v14 = vmul.f32 %v1529_v56, %v1529_v56  ;;  %v1320_v15 = vsel %vm1319_vm15, %v2744_v46, %v1318_v63 }
  0xfa   :  { %v2234_v62 = vpop.eup %2233  ;;  %v2848_v1 = vpop.f32.mrf.mxu0  ;;  %v2027_v18 = vadd.f32 %v2026_v43, %v1598_v8  ;;  %v960_v28 = vsel %vm958_vm0, %v959_v22, %v957_v19  ;;  %v1323_v29 = vsel %vm1321_vm1, %v1322_v47, %v1320_v15  ;;  %vm1328_vm6 = vcmp.eq.f32.partialorder %v2780_v58, 0.0 }
  0xfb   :  { %v2850_v4 = vpop.f32.mrf.mxu1  ;;  %v2236_v5 = vpop.eup %2235  ;;  %v1708_v7 = vmul.f32 0.6931472, %v2234_v62  ;;  %v1663_v27 = vadd.f32 %v1662_v49, %v1631_v9  ;;  %v1983_v11 = vadd.f32 %v1982_v52, %v1951_v14  ;;  %2251 = vlog2.f32 %v960_v28 }
  0xfc   :  { %v1774_v17 = vmul.f32 0.6931472, %v2236_v5  ;;  %v2860_v16 = vpop.f32.mrf.mxu0  ;;  %v2238_v30 = vpop.eup %2237  ;;  %v1530_v12 = vsub.f32 %v1323_v29, %v960_v28  ;;  %v1566_v34 = vmul.f32 %v1323_v29, %v1323_v29  ;;  %2253 = vlog2.f32 %v1323_v29 }
  0xfd   :  { %v2862_v26 = vpop.f32.mrf.mxu1  ;;  %v2240_v38 = vpop.eup %2239  ;;  %v962_v39 = vmul.f32 %v2238_v30, %v2778_v6  ;;  %v840_v30 = vmul.f32 %v2765_v59, %v2765_v59  ;;  %vm970_vm7 = vcmp.eq.f32.partialorder %v2822_v36, inf  ;;  %vm972_vm8 = vcmp.eq.f32.partialorder %v2822_v36, 0.0 }
  0xfe   :  { %v1839_v31 = vsub.f32 %v1708_v7, %v1774_v17  ;;  %v2870_v35 = vpop.f32.mrf.mxu0  ;;  %v2242_v22 = vpop.eup %2241  ;;  %v1599_v46 = vsel %vm1562_vm5, %v1566_v34, 0.0  ;;  %v1632_v40 = vand.u32 2147483647, %v1530_v12  ;;  %v1952_v43 = vmul.f32 %v1530_v12, %v1530_v12 }
  0xff   :  { %v2872_v37 = vpop.f32.mrf.mxu1  ;;  %v2244_v49 = vpop.eup %2243  ;;  %v1710_v52 = vmul.f32 0.6931472, %v2242_v22  ;;  %v2028_v53 = vadd.f32 %v2027_v18, %v1599_v46  ;;  %v964_v55 = vsel %vm963_vm2, %v2778_v6, %v962_v39  ;;  %v1325_v56 = vmul.f32 %v2240_v38, %v2780_v58 }
 0x100   :  { %v2881_v47 = vpop.f32.mrf.mxu0  ;;  %v1776_v61 = vmul.f32 0.6931472, %v2244_v49  ;;  %v1664_v57 = vadd.f32 %v1663_v27, %v1632_v40  ;;  %v1984_v62 = vadd.f32 %v1983_v11, %v1952_v43  ;;  %v967_v63 = vsel %vm965_vm3, %v966_v21, %v964_v55 }
 0x101   :  { %v2883_v48 = vpop.f32.mrf.mxu1  ;;  %2255 = vlog2.f32 %v967_v63  ;;  %v1327_v7 = vsel %vm1326_vm4, %v2780_v58, %v1325_v56  ;;  %v807_v6 = vmul.f32 %v2749_v50, %v2749_v50  ;;  %v1872_v28 = vand.u32 2147483647, %v1839_v31 }
 0x102   :  { %v2891_v0 = vpop.f32.mrf.mxu0  ;;  %v2246_v8 = vpop.eup %2245  ;;  %v1840_v9 = vsub.f32 %v1710_v52, %v1776_v61  ;;  %v1330_v14 = vsel %vm1328_vm6, %v1329_v45, %v1327_v7  ;;  %2257 = vrsqrt.f32 %v2879_v44  ;;  %v973_v56 = vand.u32 2147483648, %v2822_v36 }
 0x103   :  { %v2893_v5 = vpop.f32.mrf.mxu1  ;;  %v2248_v18 = vpop.eup %2247  ;;  %v1712_v19 = vmul.f32 0.6931472, %v2246_v8  ;;  %v1531_v15 = vsub.f32 %v1330_v14, %v967_v63  ;;  %v1567_v27 = vmul.f32 %v1330_v14, %v1330_v14  ;;  %2259 = vlog2.f32 %v1330_v14 }
 0x104   :  { %v2902_v21 = vpop.f32.mrf.mxu0  ;;  %v2250_v11 = vpop.eup %2249  ;;  %v1873_v58 = vand.u32 2147483647, %v1840_v9  ;;  %v969_v29 = vmul.f32 %v2248_v18, %v2822_v36  ;;  %v873_v31 = vadd.f32 %v840_v30, %v807_v6  ;;  %v1203_v61 = vmul.f32 %v2767_v60, %v2767_v60 }
 0x105   :  { %v2904_v17 = vpop.f32.mrf.mxu1  ;;  %v1778_v34 = vmul.f32 0.6931472, %v2250_v11  ;;  %v1600_v38 = vsel %vm1562_vm5, %v1567_v27, 0.0  ;;  %v1633_v39 = vand.u32 2147483647, %v1531_v15  ;;  %v1953_v45 = vmul.f32 %v1531_v15, %v1531_v15 }
 0x106   :  { %v2909_v12 = vpop.f32.mrf.mxu0  ;;  %v1905_v22 = vadd.f32 %v1873_v58, %v1872_v28  ;;  %v2915_v46 = vadd.f32 %v2028_v53, %v1600_v38  ;;  %v971_v55 = vsel %vm970_vm7, %v2822_v36, %v969_v29  ;;  %v2929_v53 = vmax.f32 %v873_v31, 1e-08 }
 0x107   :  { %v2911_v50 = vpop.f32.mrf.mxu1  ;;  %v1841_v59 = vsub.f32 %v1712_v19, %v1778_v34  ;;  %v2922_v49 = vadd.f32 %v1664_v57, %v1633_v39  ;;  %v2924_v52 = vadd.f32 %v1984_v62, %v1953_v45  ;;  %v1170_v62 = vmul.f32 %v2751_v51, %v2751_v51 }
 0x108   :  { %v2918_v40 = vpop.f32.mrf.mxu0  ;;  %v2252_v8 = vpop.eup %2251  ;;  %v841_v9 = vmul.f32 %v2786_v10, %v2786_v10  ;;  %v1204_v14 = vmul.f32 %v2788_v13, %v2788_v13  ;;  %2261 = vrsqrt.f32 %v2929_v53  ;;  %v808_v60 = vmul.f32 %v2773_v2, %v2773_v2 }
 0x109   :  { %v2920_v43 = vpop.f32.mrf.mxu1  ;;  %v1874_v57 = vand.u32 2147483647, %v1841_v59  ;;  %v2254_v6 = vpop.eup %2253  ;;  %v1714_v18 = vmul.f32 0.6931472, %v2252_v8  ;;  %v1171_v19 = vmul.f32 %v2775_v3, %v2775_v3  ;;  %v974_v10 = vsel %vm972_vm8, %v973_v56, %v971_v55 }
 0x10a   :  { %v2933_v63 = vpop.f32.mrf.mxu0  ;;  %v1780_v11 = vmul.f32 0.6931472, %v2254_v6  ;;  %v1236_v13 = vadd.f32 %v1203_v61, %v1170_v62  ;;  %v874_v28 = vadd.f32 %v841_v9, %v808_v60  ;;  %2263 = vlog2.f32 %v974_v10 }
 0x10b   :  { %v2935_v7 = vpop.f32.mrf.mxu1  ;;  %v1906_v51 = vadd.f32 %v1905_v22, %v1874_v57  ;;  %v1237_v58 = vadd.f32 %v1204_v14, %v1171_v19  ;;  %vm1333_vm9 = vcmp.eq.f32.partialorder %v2879_v44, inf  ;;  %vm1335_vm10 = vcmp.eq.f32.partialorder %v2879_v44, 0.0 }
 0x10c   :  { %v2948_v15 = vpop.f32.mrf.mxu0  ;;  %v1842_v2 = vsub.f32 %v1714_v18, %v1780_v11  ;;  %v2958_v34 = vmax.f32 %v1236_v13, 1e-08  ;;  %v2961_v38 = vmax.f32 %v874_v28, 1e-08  ;;  %v1336_v61 = vand.u32 2147483648, %v2879_v44 }
 0x10d   :  { %v2950_v27 = vpop.f32.mrf.mxu1  ;;  %v2963_v39 = vmax.f32 %v1237_v58, 1e-08  ;;  %v842_v8 = vmul.f32 %v2815_v32, %v2815_v32  ;;  %vm977_vm11 = vcmp.eq.f32.partialorder %v2929_v53, inf  ;;  %v1205_v6 = vmul.f32 %v2817_v33, %v2817_v33 }
 0x10e   :  { %v2954_v29 = vpop.f32.mrf.mxu0  ;;  %v2256_v3 = vpop.eup %2255  ;;  %v1875_v31 = vand.u32 2147483647, %v1842_v2  ;;  %2265 = vrsqrt.f32 %v2958_v34  ;;  %vm979_vm12 = vcmp.eq.f32.partialorder %v2929_v53, 0.0  ;;  %v809_v32 = vmul.f32 %v2801_v23, %v2801_v23 }
 0x10f   :  { %v2956_v30 = vpop.f32.mrf.mxu1  ;;  %v2258_v22 = vpop.eup %2257  ;;  %v1716_v59 = vmul.f32 0.6931472, %v2256_v3  ;;  %2267 = vrsqrt.f32 %v2961_v38  ;;  %v980_v33 = vand.u32 2147483648, %v2929_v53  ;;  %v1172_v13 = vmul.f32 %v2803_v25, %v2803_v25 }
 0x110   :  { %v2965_v36 = vpop.f32.mrf.mxu0  ;;  %v2260_v55 = vpop.eup %2259  ;;  %v1332_v56 = vmul.f32 %v2258_v22, %v2879_v44  ;;  %v1907_v9 = vadd.f32 %v1906_v51, %v1875_v31  ;;  %2269 = vrsqrt.f32 %v2963_v39  ;;  %v875_v2 = vadd.f32 %v842_v8, %v809_v32 }
 0x111   :  { %v2967_v45 = vpop.f32.mrf.mxu1  ;;  %v1782_v14 = vmul.f32 0.6931472, %v2260_v55  ;;  %v1238_v31 = vadd.f32 %v1205_v6, %v1172_v13  ;;  %vm1340_vm13 = vcmp.eq.f32.partialorder %v2958_v34, inf  ;;  %vm1342_vm14 = vcmp.eq.f32.partialorder %v2958_v34, 0.0 }
 0x112   :  { %v2976_v57 = vpop.f32.mrf.mxu0  ;;  %v1334_v18 = vsel %vm1333_vm9, %v2879_v44, %v1332_v56  ;;  %v843_v44 = vmul.f32 %v2840_v20, %v2840_v20  ;;  %v1206_v56 = vmul.f32 %v2842_v54, %v2842_v54  ;;  %vm984_vm15 = vcmp.eq.f32.partialorder %v2961_v38, inf }
 0x113   :  { %v2978_v62 = vpop.f32.mrf.mxu1  ;;  %v1843_v51 = vsub.f32 %v1716_v59, %v1782_v14  ;;  %v1337_v11 = vsel %vm1335_vm10, %v1336_v61, %v1334_v18  ;;  %v810_v59 = vmul.f32 %v2828_v41, %v2828_v41  ;;  %v3020_v18 = vmax.f32 %v875_v2, 1e-08 }
 0x114   :  { %v2990_v60 = vpop.f32.mrf.mxu0  ;;  %v1532_v28 = vsub.f32 %v1337_v11, %v974_v10  ;;  %v1568_v58 = vmul.f32 %v1337_v11, %v1337_v11  ;;  %2271 = vlog2.f32 %v1337_v11  ;;  %v3022_v20 = vmax.f32 %v1238_v31, 1e-08 }
 0x115   :  { %v2992_v19 = vpop.f32.mrf.mxu1  ;;  %v1876_v22 = vand.u32 2147483647, %v1843_v51  ;;  %v2262_v14 = vpop.eup %2261  ;;  %v876_v11 = vadd.f32 %v843_v44, %v810_v59  ;;  %2273 = vrsqrt.f32 %v3020_v18  ;;  %vm986_vm0 = vcmp.eq.f32.partialorder %v2961_v38, 0.0 }
 0x116   :  { %v2999_v3 = vpop.f32.mrf.mxu0  ;;  %v1601_v55 = vsel %vm1562_vm5, %v1568_v58, 0.0  ;;  %v1634_v25 = vand.u32 2147483647, %v1532_v28  ;;  %v1954_v10 = vmul.f32 %v1532_v28, %v1532_v28  ;;  %v976_v54 = vmul.f32 %v2262_v14, %v2929_v53 }
 0x117   :  { %v3001_v23 = vpop.f32.mrf.mxu1  ;;  %v3015_v6 = vadd.f32 %v1907_v9, %v1876_v22  ;;  %v3018_v41 = vadd.f32 %v2915_v46, %v1601_v55  ;;  %v1173_v46 = vmul.f32 %v2830_v42, %v2830_v42  ;;  %2275 = vrsqrt.f32 %v3022_v20  ;;  %v2264_v2 = vpop.eup %2263 }
 0x118   :  { %v3011_v61 = vpop.f32.mrf.mxu0  ;;  %v3025_v32 = vadd.f32 %v2922_v49, %v1634_v25  ;;  %v3028_v51 = vadd.f32 %v2924_v52, %v1954_v10  ;;  %v978_v49 = vsel %vm977_vm11, %v2929_v53, %v976_v54  ;;  %v1343_v52 = vand.u32 2147483648, %v2958_v34 }
 0x119   :  { %v3013_v8 = vpop.f32.mrf.mxu1  ;;  %v981_v22 = vsel %vm979_vm12, %v980_v33, %v978_v49  ;;  %v3053_v42 = vmax.f32 %v876_v11, 1e-08  ;;  %v1239_v31 = vadd.f32 %v1206_v56, %v1173_v46  ;;  %v987_v44 = vand.u32 2147483648, %v2961_v38 }
 0x11a   :  { %v3031_v13 = vpop.f32.mrf.mxu0  ;;  %2277 = vlog2.f32 %v981_v22  ;;  %v811_v55 = vmul.f32 %v2848_v1, %v2848_v1  ;;  %v844_v25 = vmul.f32 %v2860_v16, %v2860_v16  ;;  %vm1347_vm1 = vcmp.eq.f32.partialorder %v2963_v39, inf }
 0x11b   :  { %v3033_v9 = vpop.f32.mrf.mxu1  ;;  %v2266_v59 = vpop.eup %2265  ;;  %vm1349_vm2 = vcmp.eq.f32.partialorder %v2963_v39, 0.0  ;;  %2279 = vrsqrt.f32 %v3053_v42  ;;  %v1350_v1 = vand.u32 2147483648, %v2963_v39  ;;  %v3070_v54 = vmax.f32 %v1239_v31, 1e-08 }
 0x11c   :  { %4289 = vst [vmem:[#allocation5_spill] sm:$0xff] %v3033_v9  ;;  %v3046_v28 = vpop.f32.mrf.mxu0  ;;  %v2268_v53 = vpop.eup %2267  ;;  %v1339_v33 = vmul.f32 %v2266_v59, %v2958_v34  ;;  %v877_v16 = vadd.f32 %v844_v25, %v811_v55  ;;  %vm991_vm3 = vcmp.eq.f32.partialorder %v3020_v18, inf  ;;  %vm993_vm4 = vcmp.eq.f32.partialorder %v3020_v18, 0.0 }
 0x11d   :  { %v3048_v58 = vpop.f32.mrf.mxu1  ;;  %v983_v56 = vmul.f32 %v2268_v53, %v2961_v38  ;;  %v2270_v49 = vpop.eup %2269  ;;  %2281 = vrsqrt.f32 %v3070_v54  ;;  %vm1354_vm6 = vcmp.eq.f32.partialorder %v3022_v20, inf  ;;  %vm1356_vm7 = vcmp.eq.f32.partialorder %v3022_v20, 0.0 }
 0x11e   :  { %v3060_v10 = vpop.f32.mrf.mxu0  ;;  %v1341_v59 = vsel %vm1340_vm13, %v2958_v34, %v1339_v33  ;;  %v1346_v55 = vmul.f32 %v2270_v49, %v2963_v39  ;;  %vm998_vm8 = vcmp.eq.f32.partialorder %v3053_v42, inf  ;;  %vm1000_vm9 = vcmp.eq.f32.partialorder %v3053_v42, 0.0 }
 0x11f   :  { %4290 = vst [vmem:[#allocation6_spill] sm:$0xff] %v3060_v10  ;;  %v3062_v14 = vpop.f32.mrf.mxu1  ;;  %v1344_v53 = vsel %vm1342_vm14, %v1343_v52, %v1341_v59  ;;  %v985_v31 = vsel %vm984_vm15, %v2961_v38, %v983_v56  ;;  %vm1361_vm10 = vcmp.eq.f32.partialorder %v3070_v54, inf  ;;  %vm1363_vm11 = vcmp.eq.f32.partialorder %v3070_v54, 0.0 }
 0x120   :  { %4291 = vst [vmem:[#allocation7_spill] sm:$0xff] %v3062_v14  ;;  %v3072_v11 = vpop.f32.mrf.mxu0  ;;  %v1718_v14 = vmul.f32 0.6931472, %v2264_v2  ;;  %v1533_v10 = vsub.f32 %v1344_v53, %v981_v22  ;;  %v1569_v9 = vmul.f32 %v1344_v53, %v1344_v53  ;;  %2283 = vlog2.f32 %v1344_v53 }
 0x121   :  { %v3074_v46 = vpop.f32.mrf.mxu1  ;;  %v2272_v33 = vpop.eup %2271  ;;  %v988_v34 = vsel %vm986_vm0, %v987_v44, %v985_v31  ;;  %v1348_v56 = vsel %vm1347_vm1, %v2963_v39, %v1346_v55  ;;  %v1174_v22 = vmul.f32 %v2850_v4, %v2850_v4 }
 0x122   :  { %v3089_v2 = vpop.f32.mrf.mxu0  ;;  %v1784_v52 = vmul.f32 0.6931472, %v2272_v33  ;;  %2285 = vlog2.f32 %v988_v34  ;;  %v1602_v38 = vsel %vm1562_vm5, %v1569_v9, 0.0  ;;  %v1635_v44 = vand.u32 2147483647, %v1533_v10  ;;  %v2274_v39 = vpop.eup %2273 }
 0x123   :  { %4292 = vst [vmem:[#allocation8_spill] sm:$0xff] %v3089_v2  ;;  %v3091_v25 = vpop.f32.mrf.mxu1  ;;  %v1955_v53 = vmul.f32 %v1533_v10, %v1533_v10  ;;  %v1351_v31 = vsel %vm1349_vm2, %v1350_v1, %v1348_v56  ;;  %v2031_v55 = vadd.f32 %v3018_v41, %v1602_v38 }
 0x124   :  { %4293 = vst [vmem:[#allocation9_spill] sm:$0xff] %v3091_v25  ;;  %v3103_v49 = vpop.f32.mrf.mxu0  ;;  %v1844_v33 = vsub.f32 %v1718_v14, %v1784_v52  ;;  %v1534_v25 = vsub.f32 %v1351_v31, %v988_v34  ;;  %v1570_v2 = vmul.f32 %v1351_v31, %v1351_v31  ;;  %2287 = vlog2.f32 %v1351_v31  ;;  %v2276_v56 = vpop.eup %2275 }
 0x125   :  { %4294 = vst [vmem:[#allocation10_spill] sm:$0xff] %v3103_v49  ;;  %v3105_v59 = vpop.f32.mrf.mxu1  ;;  %v1987_v9 = vadd.f32 %v3028_v51, %v1955_v53  ;;  %v1207_v51 = vmul.f32 %v2862_v26, %v2862_v26  ;;  %v812_v26 = vmul.f32 %v2870_v35, %v2870_v35  ;;  %v4303_v35 = vand.u32 2147483648, %v3022_v20 }
 0x126   :  { %4295 = vst [vmem:[#allocation11_spill] sm:$0xff] %v3105_v59  ;;  %v3113_v4 = vpop.f32.mrf.mxu0  ;;  %v1667_v59 = vadd.f32 %v3025_v32, %v1635_v44  ;;  %v1877_v10 = vand.u32 2147483647, %v1844_v33  ;;  %v1603_v41 = vsel %vm1562_vm5, %v1570_v2, 0.0  ;;  %v1636_v14 = vand.u32 2147483647, %v1534_v25 }
 0x127   :  { %v3115_v49 = vpop.f32.mrf.mxu1  ;;  %v1956_v1 = vmul.f32 %v1534_v25, %v1534_v25  ;;  %v2032_v38 = vadd.f32 %v2031_v55, %v1603_v41  ;;  %v990_v32 = vmul.f32 %v2274_v39, %v3020_v18  ;;  %v3127_v44 = vmax.f32 %v877_v16, 1e-08 }
 0x128   :  { %4296 = vst [vmem:[#allocation12_spill] sm:$0xff] %v3115_v49  ;;  %v3122_v34 = vpop.f32.mrf.mxu0  ;;  %v3132_v53 = vadd.f32 %v3015_v6, %v1877_v10  ;;  %v1668_v31 = vadd.f32 %v1667_v59, %v1636_v14  ;;  %v1353_v25 = vmul.f32 %v2276_v56, %v3022_v20  ;;  %v1001_v55 = vand.u32 2147483648, %v3053_v42 }
 0x129   :  { %v3124_v52 = vpop.f32.mrf.mxu1  ;;  %v1988_v2 = vadd.f32 %v1987_v9, %v1956_v1  ;;  %v992_v16 = vsel %vm991_vm3, %v3020_v18, %v990_v32  ;;  %2289 = vrsqrt.f32 %v3127_v44  ;;  %v4300_v59 = vand.u32 2147483648, %v3020_v18 }
 0x12a   :  { %4297 = vst [vmem:[#allocation13_spill] sm:$0xff] %v3124_v52  ;;  %v3135_v33 = vpop.f32.mrf.mxu0  ;;  %v2278_v52 = vpop.eup %2277  ;;  %v1355_v39 = vsel %vm1354_vm6, %v3022_v20, %v1353_v25  ;;  %v1175_v10 = vmul.f32 %v2872_v37, %v2872_v37  ;;  %v1240_v56 = vadd.f32 %v1207_v51, %v1174_v22  ;;  %v845_v20 = vmul.f32 %v2881_v47, %v2881_v47 }
 0x12b   :  { %4298 = vst [vmem:[#allocation14_spill] sm:$0xff] %v3135_v33  ;;  %v3137_v49 = vpop.f32.mrf.mxu1  ;;  %v2280_v6 = vpop.eup %2279  ;;  %v995_v9 = vsel %vm993_vm4, %v4300_v59, %v992_v16  ;;  %v1358_v18 = vsel %vm1356_vm7, %v4303_v35, %v1355_v39  ;;  %v1720_v32 = vmul.f32 0.6931472, %v2278_v52  ;;  %v1208_v22 = vmul.f32 %v2883_v48, %v2883_v48 }
 0x12c   :  { %4299 = vst [vmem:[#allocation15_spill] sm:$0xff] %v3137_v49  ;;  %v3156_v41 = vpop.f32.mrf.mxu0  ;;  %2291 = vlog2.f32 %v995_v9  ;;  %v997_v1 = vmul.f32 %v2280_v6, %v3053_v42  ;;  %v1535_v25 = vsub.f32 %v1358_v18, %v995_v9  ;;  %v1571_v16 = vmul.f32 %v1358_v18, %v1358_v18  ;;  %v2282_v49 = vpop.eup %2281 }
 0x12d   :  { %4301 = vst [vmem:[#allocation16_spill] sm:$0xff] %v3156_v41  ;;  %v3158_v14 = vpop.f32.mrf.mxu1  ;;  %2293 = vlog2.f32 %v1358_v18  ;;  %v3172_v33 = vmax.f32 %v1240_v56, 1e-08  ;;  %v2284_v52 = vpop.eup %2283  ;;  %v1360_v47 = vmul.f32 %v2282_v49, %v3070_v54  ;;  %v1364_v41 = vand.u32 2147483648, %v3070_v54 }
 0x12e   :  { %4302 = vst [vmem:[#allocation17_spill] sm:$0xff] %v3158_v14  ;;  %v3165_v59 = vpop.f32.mrf.mxu0  ;;  %v999_v14 = vsel %vm998_vm8, %v3053_v42, %v997_v1  ;;  %v1604_v51 = vsel %vm1562_vm5, %v1571_v16, 0.0  ;;  %v1637_v6 = vand.u32 2147483647, %v1535_v25  ;;  %v1957_v9 = vmul.f32 %v1535_v25, %v1535_v25 }
 0x12f   :  { %4304 = vst [vmem:[#allocation18_spill] sm:$0xff] %v3165_v59  ;;  %v3167_v37 = vpop.f32.mrf.mxu1  ;;  %v1002_v39 = vsel %vm1000_vm9, %v1001_v55, %v999_v14  ;;  %v2286_v1 = vpop.eup %2285  ;;  %v1786_v56 = vmul.f32 0.6931472, %v2284_v52  ;;  %v1362_v16 = vsel %vm1361_vm10, %v3070_v54, %v1360_v47  ;;  %vm1005_vm12 = vcmp.eq.f32.partialorder %v3127_v44, inf }
 0x130   :  { %4305 = vst [vmem:[#allocation19_spill] sm:$0xff] %v3167_v37  ;;  %v3182_v35 = vpop.f32.mrf.mxu0  ;;  %v2033_v37 = vadd.f32 %v2032_v38, %v1604_v51  ;;  %2295 = vlog2.f32 %v1002_v39  ;;  %v1669_v48 = vadd.f32 %v1668_v31, %v1637_v6  ;;  %v1989_v59 = vadd.f32 %v1988_v2, %v1957_v9 }
 0x131   :  { %v3184_v18 = vpop.f32.mrf.mxu1  ;;  %2297 = vrsqrt.f32 %v3172_v33  ;;  %v1845_v55 = vsub.f32 %v1720_v32, %v1786_v56  ;;  %v1722_v14 = vmul.f32 0.6931472, %v2286_v1  ;;  %v2288_v38 = vpop.eup %2287  ;;  %v1365_v49 = vsel %vm1363_vm11, %v1364_v41, %v1362_v16 }
 0x132   :  { %v3189_v25 = vpop.f32.mrf.mxu0  ;;  %v878_v31 = vadd.f32 %v845_v20, %v812_v26  ;;  %v1241_v2 = vadd.f32 %v1208_v22, %v1175_v10  ;;  %v1788_v9 = vmul.f32 0.6931472, %v2288_v38  ;;  %2299 = vlog2.f32 %v1365_v49 }
 0x133   :  { %4306 = vst [vmem:[#allocation20_spill] sm:$0xff] %v3189_v25  ;;  %v3191_v42 = vpop.f32.mrf.mxu1  ;;  %v1878_v6 = vand.u32 2147483647, %v1845_v55  ;;  %v1536_v25 = vsub.f32 %v1365_v49, %v1002_v39  ;;  %vm1007_vm13 = vcmp.eq.f32.partialorder %v3127_v44, 0.0  ;;  %vm1368_vm14 = vcmp.eq.f32.partialorder %v3172_v33, inf }
 0x134   :  { %4307 = vst [vmem:[#allocation21_spill] sm:$0xff] %v3191_v42  ;;  %v3197_v52 = vpop.f32.mrf.mxu0  ;;  %v1572_v42 = vmul.f32 %v1365_v49, %v1365_v49  ;;  %v3201_v32 = vmax.f32 %v878_v31, 1e-08  ;;  %v3203_v1 = vmax.f32 %v1241_v2, 1e-08  ;;  %v1846_v10 = vsub.f32 %v1722_v14, %v1788_v9 }
 0x135   :  { %v3199_v51 = vpop.f32.mrf.mxu1  ;;  %v1910_v26 = vadd.f32 %v3132_v53, %v1878_v6  ;;  %v1638_v20 = vand.u32 2147483647, %v1536_v25  ;;  %v1958_v47 = vmul.f32 %v1536_v25, %v1536_v25  ;;  %vm1370_vm15 = vcmp.eq.f32.partialorder %v3172_v33, 0.0 }
 0x136   :  { %v3205_v56 = vpop.f32.mrf.mxu0  ;;  %v1605_v41 = vsel %vm1562_vm5, %v1572_v42, 0.0  ;;  %v2290_v22 = vpop.eup %2289  ;;  %2301 = vrsqrt.f32 %v3201_v32  ;;  %v1879_v38 = vand.u32 2147483647, %v1846_v10  ;;  %v813_v10 = vmul.f32 %v2891_v0, %v2891_v0 }
 0x137   :  { %v3207_v54 = vpop.f32.mrf.mxu1  ;;  %v3212_v39 = vadd.f32 %v2033_v37, %v1605_v41  ;;  %v3219_v49 = vadd.f32 %v1669_v48, %v1638_v20  ;;  %v1004_v53 = vmul.f32 %v2290_v22, %v3127_v44  ;;  %v3223_v42 = vadd.f32 %v1989_v59, %v1958_v47 }
 0x138   :  { %v3215_v55 = vpop.f32.mrf.mxu0  ;;  %v1008_v37 = vand.u32 2147483648, %v3127_v44  ;;  %2303 = vrsqrt.f32 %v3203_v1  ;;  %v1911_v48 = vadd.f32 %v1910_v26, %v1879_v38  ;;  %v846_v20 = vmul.f32 %v2902_v21, %v2902_v21 }
 0x139   :  { %v3217_v16 = vpop.f32.mrf.mxu1  ;;  %v2292_v14 = vpop.eup %2291  ;;  %v1006_v9 = vsel %vm1005_vm12, %v3127_v44, %v1004_v53  ;;  %v1176_v26 = vmul.f32 %v2893_v5, %v2893_v5  ;;  %v1209_v44 = vmul.f32 %v2904_v17, %v2904_v17  ;;  %v814_v0 = vmul.f32 %v2909_v12, %v2909_v12 }
 0x13a   :  { %v3228_v25 = vpop.f32.mrf.mxu0  ;;  %v2294_v2 = vpop.eup %2293  ;;  %v1724_v6 = vmul.f32 0.6931472, %v2292_v14  ;;  %v1009_v41 = vsel %vm1007_vm13, %v1008_v37, %v1006_v9  ;;  %v879_v14 = vadd.f32 %v846_v20, %v813_v10  ;;  %v847_v21 = vmul.f32 %v2918_v40, %v2918_v40 }
 0x13b   :  { %v3230_v31 = vpop.f32.mrf.mxu1  ;;  %v1790_v59 = vmul.f32 0.6931472, %v2294_v2  ;;  %v1210_v37 = vmul.f32 %v2920_v43, %v2920_v43  ;;  %2305 = vlog2.f32 %v1009_v41  ;;  %v1371_v17 = vand.u32 2147483648, %v3172_v33 }
 0x13c   :  { %4308 = vst [vmem:[#allocation22_spill] sm:$0xff] %v3230_v31  ;;  %v3238_v22 = vpop.f32.mrf.mxu0  ;;  %v1242_v31 = vadd.f32 %v1209_v44, %v1176_v26  ;;  %v1177_v12 = vmul.f32 %v2911_v50, %v2911_v50  ;;  %v880_v40 = vadd.f32 %v847_v21, %v814_v0  ;;  %vm1012_vm0 = vcmp.eq.f32.partialorder %v3201_v32, inf }
 0x13d   :  { %v3240_v47 = vpop.f32.mrf.mxu1  ;;  %v2296_v38 = vpop.eup %2295  ;;  %v1847_v53 = vsub.f32 %v1724_v6, %v1790_v59  ;;  %v3261_v59 = vmax.f32 %v879_v14, 1e-08  ;;  %vm1014_vm1 = vcmp.eq.f32.partialorder %v3201_v32, 0.0  ;;  %vm1375_vm2 = vcmp.eq.f32.partialorder %v3203_v1, inf }
 0x13e   :  { %v3253_v2 = vpop.f32.mrf.mxu0  ;;  %v2298_v5 = vpop.eup %2297  ;;  %v1243_v26 = vadd.f32 %v1210_v37, %v1177_v12  ;;  %vm1377_vm3 = vcmp.eq.f32.partialorder %v3203_v1, 0.0 }
 0x13f   :  { %4309 = vst [vmem:[#allocation23_spill] sm:$0xff] %v3253_v2  ;;  %v3255_v9 = vpop.f32.mrf.mxu1  ;;  %v1880_v6 = vand.u32 2147483647, %v1847_v53  ;;  %v1367_v10 = vmul.f32 %v2298_v5, %v3172_v33  ;;  %v1726_v2 = vmul.f32 0.6931472, %v2296_v38  ;;  %2307 = vrsqrt.f32 %v3261_v59  ;;  %v2300_v14 = vpop.eup %2299 }
 0x140   :  { %4310 = vst [vmem:[#allocation24_spill] sm:$0xff] %v3255_v9  ;;  %v3263_v20 = vpop.f32.mrf.mxu0  ;;  %v3269_v9 = vmax.f32 %v1242_v31, 1e-08  ;;  %v1015_v31 = vand.u32 2147483648, %v3201_v32  ;;  %vm1019_vm4 = vcmp.eq.f32.partialorder %v3261_v59, inf  ;;  %vm1021_vm6 = vcmp.eq.f32.partialorder %v3261_v59, 0.0 }
 0x141   :  { %v3265_v43 = vpop.f32.mrf.mxu1  ;;  %v1912_v44 = vadd.f32 %v1911_v48, %v1880_v6  ;;  %v1369_v50 = vsel %vm1368_vm14, %v3172_v33, %v1367_v10  ;;  %v1792_v48 = vmul.f32 0.6931472, %v2300_v14  ;;  %v1378_v33 = vand.u32 2147483648, %v3203_v1 }
 0x142   :  { %4311 = vst [vmem:[#allocation25_spill] sm:$0xff] %v3265_v43  ;;  %v3275_v0 = vpop.f32.mrf.mxu0  ;;  %v1372_v21 = vsel %vm1370_vm15, %v1371_v17, %v1369_v50  ;;  %2309 = vrsqrt.f32 %v3269_v9  ;;  %v3290_v17 = vmax.f32 %v880_v40, 1e-08  ;;  %v848_v10 = vmul.f32 %v2948_v15, %v2948_v15 }
 0x143   :  { %4312 = vst [vmem:[#allocation26_spill] sm:$0xff] %v3275_v0  ;;  %v3277_v53 = vpop.f32.mrf.mxu1  ;;  %v1537_v38 = vsub.f32 %v1372_v21, %v1009_v41  ;;  %v1573_v37 = vmul.f32 %v1372_v21, %v1372_v21  ;;  %2311 = vlog2.f32 %v1372_v21  ;;  %v2302_v6 = vpop.eup %2301  ;;  %v1848_v50 = vsub.f32 %v1726_v2, %v1792_v48 }
 0x144   :  { %4313 = vst [vmem:[#allocation27_spill] sm:$0xff] %v3277_v53  ;;  %v3284_v5 = vpop.f32.mrf.mxu0  ;;  %2313 = vrsqrt.f32 %v3290_v17  ;;  %v815_v15 = vmul.f32 %v2933_v63, %v2933_v63  ;;  %v1178_v63 = vmul.f32 %v2935_v7, %v2935_v7  ;;  %vm1382_vm7 = vcmp.eq.f32.partialorder %v3269_v9, inf }
 0x145   :  { %4314 = vst [vmem:[#allocation28_spill] sm:$0xff] %v3284_v5  ;;  %v3286_v12 = vpop.f32.mrf.mxu1  ;;  %v1606_v41 = vsel %vm1562_vm5, %v1573_v37, 0.0  ;;  %v1639_v14 = vand.u32 2147483647, %v1537_v38  ;;  %v1959_v21 = vmul.f32 %v1537_v38, %v1537_v38  ;;  %v1011_v5 = vmul.f32 %v2302_v6, %v3201_v32 }
 0x146   :  { %4315 = vst [vmem:[#allocation29_spill] sm:$0xff] %v3286_v12  ;;  %v3296_v53 = vpop.f32.mrf.mxu0  ;;  %v2304_v12 = vpop.eup %2303  ;;  %v2035_v0 = vadd.f32 %v3212_v39, %v1606_v41  ;;  %v1881_v2 = vand.u32 2147483647, %v1848_v50  ;;  %v3315_v6 = vmax.f32 %v1243_v26, 1e-08  ;;  %v881_v41 = vadd.f32 %v848_v10, %v815_v15 }
 0x147   :  { %v3298_v43 = vpop.f32.mrf.mxu1  ;;  %v1671_v40 = vadd.f32 %v3219_v49, %v1639_v14  ;;  %v1991_v48 = vadd.f32 %v3223_v42, %v1959_v21  ;;  %v1374_v38 = vmul.f32 %v2304_v12, %v3203_v1  ;;  %v1013_v39 = vsel %vm1012_vm0, %v3201_v32, %v1011_v5 }
 0x148   :  { %4316 = vst [vmem:[#allocation30_spill] sm:$0xff] %v3298_v43  ;;  %v3308_v37 = vpop.f32.mrf.mxu0  ;;  %v1211_v49 = vmul.f32 %v2950_v27, %v2950_v27  ;;  %v3321_v50 = vadd.f32 %v1912_v44, %v1881_v2  ;;  %v1016_v42 = vsel %vm1014_vm1, %v1015_v31, %v1013_v39  ;;  %v2306_v27 = vpop.eup %2305  ;;  %v1022_v31 = vand.u32 2147483648, %v3261_v59 }
 0x149   :  { %v3310_v43 = vpop.f32.mrf.mxu1  ;;  %v1376_v12 = vsel %vm1375_vm2, %v3203_v1, %v1374_v38  ;;  %2315 = vlog2.f32 %v1016_v42  ;;  %v3343_v1 = vmax.f32 %v881_v41, 1e-08  ;;  %vm1384_vm8 = vcmp.eq.f32.partialorder %v3269_v9, 0.0 }
 0x14a   :  { %4317 = vst [vmem:[#allocation31_spill] sm:$0xff] %v3310_v43  ;;  %v3328_v14 = vpop.f32.mrf.mxu0  ;;  %v1379_v7 = vsel %vm1377_vm3, %v1378_v33, %v1376_v12  ;;  %v1244_v33 = vadd.f32 %v1211_v49, %v1178_v63  ;;  %vm1026_vm9 = vcmp.eq.f32.partialorder %v3290_v17, inf  ;;  %v1728_v49 = vmul.f32 0.6931472, %v2306_v27 }
 0x14b   :  { %v3330_v26 = vpop.f32.mrf.mxu1  ;;  %v1538_v32 = vsub.f32 %v1379_v7, %v1016_v42  ;;  %v1574_v44 = vmul.f32 %v1379_v7, %v1379_v7  ;;  %2317 = vlog2.f32 %v1379_v7  ;;  %v1385_v7 = vand.u32 2147483648, %v3269_v9 }
 0x14c   :  { %4318 = vst [vmem:[#allocation32_spill] sm:$0xff] %v3330_v26  ;;  %v3337_v5 = vpop.f32.mrf.mxu0  ;;  %2319 = vrsqrt.f32 %v3315_v6  ;;  %v2308_v42 = vpop.eup %2307  ;;  %vm1028_vm10 = vcmp.eq.f32.partialorder %v3290_v17, 0.0  ;;  %v1212_v27 = vmul.f32 %v2967_v45, %v2967_v45  ;;  %vm1389_vm11 = vcmp.eq.f32.partialorder %v3315_v6, inf }
 0x14d   :  { %v3339_v10 = vpop.f32.mrf.mxu1  ;;  %v1607_v21 = vsel %vm1562_vm5, %v1574_v44, 0.0  ;;  %v1640_v15 = vand.u32 2147483647, %v1538_v32  ;;  %v1960_v2 = vmul.f32 %v1538_v32, %v1538_v32  ;;  %2321 = vrsqrt.f32 %v3343_v1 }
 0x14e   :  { %4319 = vst [vmem:[#allocation33_spill] sm:$0xff] %v3339_v10  ;;  %v3348_v38 = vpop.f32.mrf.mxu0  ;;  %v2036_v12 = vadd.f32 %v2035_v0, %v1607_v21  ;;  %v1018_v32 = vmul.f32 %v2308_v42, %v3261_v59  ;;  %v1029_v0 = vand.u32 2147483648, %v3290_v17  ;;  %v3363_v21 = vmax.f32 %v1244_v33, 1e-08 }
 0x14f   :  { %4320 = vst [vmem:[#allocation34_spill] sm:$0xff] %v3348_v38  ;;  %v3350_v39 = vpop.f32.mrf.mxu1  ;;  %v2310_v63 = vpop.eup %2309  ;;  %v1672_v41 = vadd.f32 %v1671_v40, %v1640_v15  ;;  %v1992_v44 = vadd.f32 %v1991_v48, %v1960_v2  ;;  %v849_v48 = vmul.f32 %v2965_v36, %v2965_v36  ;;  %vm1391_vm12 = vcmp.eq.f32.partialorder %v3315_v6, 0.0 }
 0x150   :  { %4321 = vst [vmem:[#allocation35_spill] sm:$0xff] %v3350_v39  ;;  %v3356_v26 = vpop.f32.mrf.mxu0  ;;  %v2312_v38 = vpop.eup %2311  ;;  %v1381_v39 = vmul.f32 %v2310_v63, %v3269_v9  ;;  %v1020_v40 = vsel %vm1019_vm4, %v3261_v59, %v1018_v32  ;;  %2323 = vrsqrt.f32 %v3363_v21  ;;  %v1179_v59 = vmul.f32 %v2956_v30, %v2956_v30 }
 0x151   :  { %v3358_v10 = vpop.f32.mrf.mxu1  ;;  %v1794_v43 = vmul.f32 0.6931472, %v2312_v38  ;;  %v1023_v42 = vsel %vm1021_vm6, %v1022_v31, %v1020_v40  ;;  %v816_v38 = vmul.f32 %v2954_v29, %v2954_v29  ;;  %v2314_v36 = vpop.eup %2313  ;;  %vm1033_vm13 = vcmp.eq.f32.partialorder %v3343_v1, inf }
 0x152   :  { %4322 = vst [vmem:[#allocation36_spill] sm:$0xff] %v3358_v10  ;;  %v3372_v15 = vpop.f32.mrf.mxu0  ;;  %v1383_v33 = vsel %vm1382_vm7, %v3269_v9, %v1381_v39  ;;  %2325 = vlog2.f32 %v1023_v42  ;;  %v1025_v29 = vmul.f32 %v2314_v36, %v3290_v17  ;;  %v1245_v9 = vadd.f32 %v1212_v27, %v1179_v59 }
 0x153   :  { %4323 = vst [vmem:[#allocation37_spill] sm:$0xff] %v3372_v15  ;;  %v3374_v2 = vpop.f32.mrf.mxu1  ;;  %v1849_v63 = vsub.f32 %v1728_v49, %v1794_v43  ;;  %v1386_v45 = vsel %vm1384_vm8, %v1385_v7, %v1383_v33  ;;  %v882_v43 = vadd.f32 %v849_v48, %v816_v38  ;;  %vm1035_vm14 = vcmp.eq.f32.partialorder %v3343_v1, 0.0 }
 0x154   :  { %4324 = vst [vmem:[#allocation38_spill] sm:$0xff] %v3374_v2  ;;  %v3389_v31 = vpop.f32.mrf.mxu0  ;;  %v1539_v39 = vsub.f32 %v1386_v45, %v1023_v42  ;;  %v1575_v40 = vmul.f32 %v1386_v45, %v1386_v45  ;;  %2327 = vlog2.f32 %v1386_v45  ;;  %v1027_v42 = vsel %vm1026_vm9, %v3290_v17, %v1025_v29 }
 0x155   :  { %4325 = vst [vmem:[#allocation39_spill] sm:$0xff] %v3389_v31  ;;  %v3391_v32 = vpop.f32.mrf.mxu1  ;;  %v1882_v2 = vand.u32 2147483647, %v1849_v63  ;;  %v1030_v63 = vsel %vm1028_vm10, %v1029_v0, %v1027_v42  ;;  %v3403_v48 = vmax.f32 %v882_v43, 1e-08  ;;  %vm1396_vm15 = vcmp.eq.f32.partialorder %v3363_v21, inf }
 0x156   :  { %4326 = vst [vmem:[#allocation40_spill] sm:$0xff] %v3391_v32  ;;  %v430_v7 = vpop.f32.mrf.mxu0  ;;  %v1608_v33 = vsel %vm1562_vm5, %v1575_v40, 0.0  ;;  %v1641_v30 = vand.u32 2147483647, %v1539_v39  ;;  %v1961_v15 = vmul.f32 %v1539_v39, %v1539_v39  ;;  %v2316_v32 = vpop.eup %2315  ;;  %v1392_v39 = vand.u32 2147483648, %v3315_v6 }
 0x157   :  { %v798_v49 = vpop.f32.mrf.mxu1  ;;  %v1914_v45 = vadd.f32 %v3321_v50, %v1882_v2  ;;  %v2037_v36 = vadd.f32 %v2036_v12, %v1608_v33  ;;  %v1730_v7 = vmul.f32 0.6931472, %v2316_v32  ;;  %2329 = vrsqrt.f32 %v3403_v48 }
 0x158   :  { %v431_v27 = vpop.f32.mrf.mxu0  ;;  %v2318_v59 = vpop.eup %2317  ;;  %v1673_v40 = vadd.f32 %v1672_v41, %v1641_v30  ;;  %v1993_v49 = vadd.f32 %v1992_v44, %v1961_v15  ;;  %2331 = vlog2.f32 %v1030_v63  ;;  %v1036_v50 = vand.u32 2147483648, %v3343_v1 }
 0x159   :  { %v799_v38 = vpop.f32.mrf.mxu1  ;;  %v2320_v10 = vpop.eup %2319  ;;  %v1796_v31 = vmul.f32 0.6931472, %v2318_v59  ;;  %v3411_v12 = vmax.f32 %v1245_v9, 1e-08  ;;  %v817_v44 = vmul.f32 %v2976_v57, %v2976_v57  ;;  %v850_v15 = vmul.f32 %v2990_v60, %v2990_v60 }
 0x15a   :  { %v1388_v17 = vmul.f32 %v2320_v10, %v3315_v6  ;;  %v2322_v0 = vpop.eup %2321  ;;  %v1213_v2 = vmul.f32 %v2992_v19, %v2992_v19  ;;  %v1399_v29 = vand.u32 2147483648, %v3363_v21  ;;  %v1180_v60 = vmul.f32 %v2978_v62, %v2978_v62 }
 0x15b   :  { %v1850_v41 = vsub.f32 %v1730_v7, %v1796_v31  ;;  %v1032_v10 = vmul.f32 %v2322_v0, %v3343_v1  ;;  %2333 = vrsqrt.f32 %v3411_v12  ;;  %v883_v27 = vadd.f32 %v850_v15, %v817_v44 }
 0x15c   :  { %v1390_v32 = vsel %vm1389_vm11, %v3315_v6, %v1388_v17  ;;  %v1246_v6 = vadd.f32 %v1213_v2, %v1180_v60  ;;  %vm1398_vm0 = vcmp.eq.f32.partialorder %v3363_v21, 0.0  ;;  %vm1040_vm1 = vcmp.eq.f32.partialorder %v3403_v48, inf }
 0x15d   :  { %v1883_v31 = vand.u32 2147483647, %v1850_v41  ;;  %v1393_v57 = vsel %vm1391_vm12, %v1392_v39, %v1390_v32  ;;  %v1034_v9 = vsel %vm1033_vm13, %v3343_v1, %v1032_v10  ;;  %v2324_v33 = vpop.eup %2323  ;;  %v3438_v41 = vmax.f32 %v883_v27, 1e-08 }
 0x15e   :  { %v1540_v19 = vsub.f32 %v1393_v57, %v1030_v63  ;;  %v1576_v43 = vmul.f32 %v1393_v57, %v1393_v57  ;;  %2335 = vlog2.f32 %v1393_v57  ;;  %v1037_v42 = vsel %vm1035_vm14, %v1036_v50, %v1034_v9 }
 0x15f   :  { %v1915_v30 = vadd.f32 %v1914_v45, %v1883_v31  ;;  %v2326_v38 = vpop.eup %2325  ;;  %2337 = vlog2.f32 %v1037_v42  ;;  %v1395_v0 = vmul.f32 %v2324_v33, %v3363_v21  ;;  %v3440_v50 = vmax.f32 %v1246_v6, 1e-08 }
 0x160   :  { %v1609_v59 = vsel %vm1562_vm5, %v1576_v43, 0.0  ;;  %v1642_v7 = vand.u32 2147483647, %v1540_v19  ;;  %v1962_v62 = vmul.f32 %v1540_v19, %v1540_v19  ;;  %v1732_v39 = vmul.f32 0.6931472, %v2326_v38 }
 0x161   :  { %v2328_v63 = vpop.eup %2327  ;;  %v2038_v17 = vadd.f32 %v2037_v36, %v1609_v59  ;;  %v1397_v44 = vsel %vm1396_vm15, %v3363_v21, %v1395_v0  ;;  %2339 = vrsqrt.f32 %v3438_v41  ;;  %vm1042_vm2 = vcmp.eq.f32.partialorder %v3403_v48, 0.0 }
 0x162   :  { %v1798_v45 = vmul.f32 0.6931472, %v2328_v63  ;;  %v1674_v32 = vadd.f32 %v1673_v40, %v1642_v7  ;;  %v1994_v1 = vadd.f32 %v1993_v49, %v1962_v62  ;;  %v1400_v2 = vsel %vm1398_vm0, %v1399_v29, %v1397_v44 }
 0x163   :  { %2341 = vrsqrt.f32 %v3440_v50  ;;  %v1541_v36 = vsub.f32 %v1400_v2, %v1037_v42  ;;  %v1577_v10 = vmul.f32 %v1400_v2, %v1400_v2  ;;  %v1043_v49 = vand.u32 2147483648, %v3403_v48 }
 0x164   :  { %v1851_v15 = vsub.f32 %v1732_v39, %v1798_v45  ;;  %2343 = vlog2.f32 %v1400_v2  ;;  %v2330_v31 = vpop.eup %2329  ;;  %v818_v33 = vmul.f32 %v2999_v3, %v2999_v3  ;;  %v851_v42 = vmul.f32 %v3011_v61, %v3011_v61 }
 0x165   :  { %v2332_v57 = vpop.eup %2331  ;;  %v1610_v21 = vsel %vm1562_vm5, %v1577_v10, 0.0  ;;  %v1643_v60 = vand.u32 2147483647, %v1541_v36  ;;  %v1963_v19 = vmul.f32 %v1541_v36, %v1541_v36  ;;  %v1039_v29 = vmul.f32 %v2330_v31, %v3403_v48 }
 0x166   :  { %v1884_v40 = vand.u32 2147483647, %v1851_v15  ;;  %v2039_v9 = vadd.f32 %v2038_v17, %v1610_v21  ;;  %v1214_v7 = vmul.f32 %v3013_v8, %v3013_v8  ;;  %v1734_v62 = vmul.f32 0.6931472, %v2332_v57 }
 0x167   :  { %v1675_v6 = vadd.f32 %v1674_v32, %v1643_v60  ;;  %v1995_v38 = vadd.f32 %v1994_v1, %v1963_v19  ;;  %v1041_v59 = vsel %vm1040_vm1, %v3403_v48, %v1039_v29  ;;  %vm1403_vm3 = vcmp.eq.f32.partialorder %v3411_v12, inf }
 0x168   :  { %v1916_v43 = vadd.f32 %v1915_v30, %v1884_v40  ;;  %v2334_v27 = vpop.eup %2333  ;;  %v1044_v63 = vsel %vm1042_vm2, %v1043_v49, %v1041_v59  ;;  %v1406_v61 = vand.u32 2147483648, %v3411_v12  ;;  %v1181_v39 = vmul.f32 %v3001_v23, %v3001_v23 }
 0x169   :  { %v1402_v30 = vmul.f32 %v2334_v27, %v3411_v12  ;;  %2345 = vlog2.f32 %v1044_v63  ;;  %v884_v17 = vadd.f32 %v851_v42, %v818_v33  ;;  %vm1405_vm4 = vcmp.eq.f32.partialorder %v3411_v12, 0.0 }
 0x16a   :  { %vm1047_vm6 = vcmp.eq.f32.partialorder %v3438_v41, inf  ;;  %vm1049_vm7 = vcmp.eq.f32.partialorder %v3438_v41, 0.0  ;;  %v1247_v32 = vadd.f32 %v1214_v7, %v1181_v39  ;;  %v1050_v2 = vand.u32 2147483648, %v3438_v41 }
 0x16b   :  { %v2336_v3 = vpop.eup %2335  ;;  %v1404_v45 = vsel %vm1403_vm3, %v3411_v12, %v1402_v30  ;;  %vm1410_vm8 = vcmp.eq.f32.partialorder %v3440_v50, inf  ;;  %v3474_v23 = vmax.f32 %v884_v17, 1e-08  ;;  %v852_v12 = vmul.f32 %v3046_v28, %v3046_v28 }
 0x16c   :  { %v1800_v0 = vmul.f32 0.6931472, %v2336_v3  ;;  %v2338_v8 = vpop.eup %2337  ;;  %v1407_v48 = vsel %vm1405_vm4, %v1406_v61, %v1404_v45  ;;  %v3483_v29 = vmax.f32 %v1247_v32, 1e-08  ;;  %vm1412_vm9 = vcmp.eq.f32.partialorder %v3440_v50, 0.0  ;;  %v4327_v61 = vld [vmem:[#allocation5_spill] sm:$0xff] }
 0x16d   :  { %v1542_v44 = vsub.f32 %v1407_v48, %v1044_v63  ;;  %v1578_v15 = vmul.f32 %v1407_v48, %v1407_v48  ;;  %2347 = vlog2.f32 %v1407_v48  ;;  %v1736_v21 = vmul.f32 0.6931472, %v2338_v8 }
 0x16e   :  { %v1852_v1 = vsub.f32 %v1734_v62, %v1800_v0  ;;  %v2340_v36 = vpop.eup %2339  ;;  %v1413_v63 = vand.u32 2147483648, %v3440_v50  ;;  %2349 = vrsqrt.f32 %v3474_v23  ;;  %vm1054_vm10 = vcmp.eq.f32.partialorder %v3474_v23, inf }
 0x16f   :  { %v1611_v31 = vsel %vm1562_vm5, %v1578_v15, 0.0  ;;  %v1644_v40 = vand.u32 2147483647, %v1542_v44  ;;  %v1964_v49 = vmul.f32 %v1542_v44, %v1542_v44  ;;  %v1046_v19 = vmul.f32 %v2340_v36, %v3438_v41 }
 0x170   :  { %v1885_v10 = vand.u32 2147483647, %v1852_v1  ;;  %v2342_v57 = vpop.eup %2341  ;;  %v3480_v60 = vadd.f32 %v2039_v9, %v1611_v31  ;;  %v1215_v9 = vmul.f32 %v3048_v58, %v3048_v58  ;;  %v1182_v58 = vmul.f32 %v4327_v61, %v4327_v61 }
 0x171   :  { %v2344_v33 = vpop.eup %2343  ;;  %v1676_v27 = vadd.f32 %v1675_v6, %v1644_v40  ;;  %v1996_v59 = vadd.f32 %v1995_v38, %v1964_v49  ;;  %v1409_v28 = vmul.f32 %v2342_v57, %v3440_v50  ;;  %v1048_v62 = vsel %vm1047_vm6, %v3438_v41, %v1046_v19  ;;  %v4329_v19 = vld [vmem:[#allocation7_spill] sm:$0xff] }
 0x172   :  { %v1917_v42 = vadd.f32 %v1916_v43, %v1885_v10  ;;  %v1802_v7 = vmul.f32 0.6931472, %v2344_v33  ;;  %v1051_v30 = vsel %vm1049_vm7, %v1050_v2, %v1048_v62  ;;  %v819_v6 = vmul.f32 %v3031_v13, %v3031_v13  ;;  %v4328_v10 = vld [vmem:[#allocation6_spill] sm:$0xff] }
 0x173   :  { %v1411_v43 = vsel %vm1410_vm8, %v3440_v50, %v1409_v28  ;;  %2351 = vrsqrt.f32 %v3483_v29  ;;  %v1248_v0 = vadd.f32 %v1215_v9, %v1182_v58  ;;  %v853_v36 = vmul.f32 %v3072_v11, %v3072_v11  ;;  %v4331_v62 = vld [vmem:[#allocation10_spill] sm:$0xff] }
 0x174   :  { %v1853_v38 = vsub.f32 %v1736_v21, %v1802_v7  ;;  %v3500_v3 = vsel %vm1412_vm9, %v1413_v63, %v1411_v43  ;;  %v885_v39 = vadd.f32 %v852_v12, %v819_v6  ;;  %v820_v31 = vmul.f32 %v4328_v10, %v4328_v10  ;;  %v4332_v43 = vld [vmem:[#allocation8_spill] sm:$0xff] }
 0x175   :  { %v1543_v41 = vsub.f32 %v3500_v3, %v1051_v30  ;;  %v3513_v15 = vmax.f32 %v1248_v0, 1e-08  ;;  %v1216_v49 = vmul.f32 %v3074_v46, %v3074_v46  ;;  %v1183_v33 = vmul.f32 %v4329_v19, %v4329_v19 }
 0x176   :  { %v1886_v17 = vand.u32 2147483647, %v1853_v38  ;;  %v2346_v45 = vpop.eup %2345  ;;  %v3511_v1 = vmax.f32 %v885_v39, 1e-08  ;;  %v886_v57 = vadd.f32 %v853_v36, %v820_v31  ;;  %v854_v46 = vmul.f32 %v4331_v62, %v4331_v62 }
 0x177   :  { %v1645_v50 = vand.u32 2147483647, %v1543_v41  ;;  %v1965_v8 = vmul.f32 %v1543_v41, %v1543_v41  ;;  %v1738_v44 = vmul.f32 0.6931472, %v2346_v45  ;;  %v821_v6 = vmul.f32 %v4332_v43, %v4332_v43 }
 0x178   :  { %v1918_v48 = vadd.f32 %v1917_v42, %v1886_v17  ;;  %2353 = vrsqrt.f32 %v3511_v1  ;;  %v3527_v28 = vmax.f32 %v886_v57, 1e-08  ;;  %vm1417_vm11 = vcmp.eq.f32.partialorder %v3483_v29, inf  ;;  %v4334_v17 = vld [vmem:[#allocation9_spill] sm:$0xff] }
 0x179   :  { %v3507_v13 = vadd.f32 %v1676_v27, %v1645_v50  ;;  %v3509_v32 = vadd.f32 %v1996_v59, %v1965_v8  ;;  %2355 = vrsqrt.f32 %v3513_v15  ;;  %v1249_v59 = vadd.f32 %v1216_v49, %v1183_v33  ;;  %v4335_v49 = vld [vmem:[#allocation13_spill] sm:$0xff]  ;;  %v4336_v33 = vld [vmem:[#allocation12_spill] sm:$0xff] }
 0x17a   :  { %v2348_v2 = vpop.eup %2347  ;;  %2357 = vlog2.f32 %v1051_v30  ;;  %v4333_v30 = vld [vmem:[#allocation11_spill] sm:$0xff]  ;;  %v887_v58 = vadd.f32 %v854_v46, %v821_v6  ;;  %v1057_v41 = vand.u32 2147483648, %v3474_v23  ;;  %v1184_v0 = vmul.f32 %v4334_v17, %v4334_v17  ;;  %v4337_v17 = vld [vmem:[#allocation16_spill] sm:$0xff] }
 0x17b   :  { %v1804_v12 = vmul.f32 0.6931472, %v2348_v2  ;;  %v2350_v42 = vpop.eup %2349  ;;  %2359 = vlog2.f32 %v3500_v3  ;;  %v3534_v9 = vmax.f32 %v1249_v59, 1e-08  ;;  %v1217_v38 = vmul.f32 %v4333_v30, %v4333_v30 }
 0x17c   :  { %v1053_v7 = vmul.f32 %v2350_v42, %v3474_v23  ;;  %2361 = vrsqrt.f32 %v3527_v28  ;;  %v855_v45 = vmul.f32 %v3122_v34, %v3122_v34  ;;  %vm1056_vm12 = vcmp.eq.f32.partialorder %v3474_v23, 0.0 }
 0x17d   :  { %v1854_v40 = vsub.f32 %v1738_v44, %v1804_v12  ;;  %v1420_v8 = vand.u32 2147483648, %v3483_v29  ;;  %2363 = vrsqrt.f32 %v3534_v9  ;;  %vm1419_vm13 = vcmp.eq.f32.partialorder %v3483_v29, 0.0 }
 0x17e   :  { %v1055_v61 = vsel %vm1054_vm10, %v3474_v23, %v1053_v7  ;;  %v1250_v2 = vadd.f32 %v1217_v38, %v1184_v0  ;;  %v822_v36 = vmul.f32 %v3113_v4, %v3113_v4  ;;  %v3556_v10 = vmax.f32 %v887_v58, 1e-08 }
 0x17f   :  { %v1887_v21 = vand.u32 2147483647, %v1854_v40  ;;  %v1058_v44 = vsel %vm1056_vm12, %v1057_v41, %v1055_v61  ;;  %v1218_v57 = vmul.f32 %v4335_v49, %v4335_v49  ;;  %vm1061_vm14 = vcmp.eq.f32.partialorder %v3511_v1, inf }
 0x180   :  { %v2352_v27 = vpop.eup %2351  ;;  %v888_v31 = vadd.f32 %v855_v45, %v822_v36  ;;  %2365 = vlog2.f32 %v1058_v44  ;;  %v3560_v40 = vmax.f32 %v1250_v2, 1e-08  ;;  %vm1424_vm15 = vcmp.eq.f32.partialorder %v3513_v15, inf }
 0x181   :  { %v3525_v11 = vadd.f32 %v1918_v48, %v1887_v21  ;;  %v1416_v63 = vmul.f32 %v2352_v27, %v3483_v29  ;;  %v1579_v21 = vmul.f32 %v3500_v3, %v3500_v3  ;;  %v1185_v42 = vmul.f32 %v4336_v33, %v4336_v33 }
 0x182   :  { %v3572_v27 = vmax.f32 %v888_v31, 1e-08  ;;  %v1064_v59 = vand.u32 2147483648, %v3511_v1  ;;  %vm1063_vm0 = vcmp.eq.f32.partialorder %v3511_v1, 0.0  ;;  %v1427_v3 = vand.u32 2147483648, %v3513_v15 }
 0x183   :  { %4330 = vst [vmem:[#allocation5_spill] sm:$0xff] %v3525_v11  ;;  %v1418_v39 = vsel %vm1417_vm11, %v3483_v29, %v1416_v63  ;;  %v1251_v62 = vadd.f32 %v1218_v57, %v1185_v42  ;;  %vm1426_vm1 = vcmp.eq.f32.partialorder %v3513_v15, 0.0  ;;  %v1612_v30 = vsel %vm1562_vm5, %v1579_v21, 0.0  ;;  %v4340_v21 = vld [vmem:[#allocation17_spill] sm:$0xff] }
 0x184   :  { %v1421_v12 = vsel %vm1419_vm13, %v1420_v8, %v1418_v39  ;;  %v856_v0 = vmul.f32 %v4337_v17, %v4337_v17  ;;  %vm1068_vm2 = vcmp.eq.f32.partialorder %v3527_v28, inf  ;;  %vm1070_vm3 = vcmp.eq.f32.partialorder %v3527_v28, 0.0 }
 0x185   :  { %v2354_v50 = vpop.eup %2353  ;;  %2367 = vlog2.f32 %v1421_v12  ;;  %v1544_v38 = vsub.f32 %v1421_v12, %v1058_v44  ;;  %v1580_v58 = vmul.f32 %v1421_v12, %v1421_v12  ;;  %v3584_v39 = vmax.f32 %v1251_v62, 1e-08 }
 0x186   :  { %v2356_v48 = vpop.eup %2355  ;;  %v1060_v34 = vmul.f32 %v2354_v50, %v3511_v1  ;;  %2369 = vrsqrt.f32 %v3556_v10  ;;  %v1071_v8 = vand.u32 2147483648, %v3527_v28  ;;  %vm1431_vm4 = vcmp.eq.f32.partialorder %v3534_v9, inf }
 0x187   :  { %v1423_v23 = vmul.f32 %v2356_v48, %v3513_v15  ;;  %v2358_v29 = vpop.eup %2357  ;;  %2371 = vrsqrt.f32 %v3560_v40  ;;  %v1646_v50 = vand.u32 2147483647, %v1544_v38  ;;  %v4338_v48 = vld [vmem:[#allocation14_spill] sm:$0xff]  ;;  %v1613_v2 = vsel %vm1562_vm5, %v1580_v58, 0.0 }
 0x188   :  { %v2360_v4 = vpop.eup %2359  ;;  %v1062_v19 = vsel %vm1061_vm14, %v3511_v1, %v1060_v34  ;;  %v1740_v63 = vmul.f32 0.6931472, %v2358_v29  ;;  %2373 = vrsqrt.f32 %v3572_v27  ;;  %v823_v44 = vmul.f32 %v4338_v48, %v4338_v48 }
 0x189   :  { %v1425_v7 = vsel %vm1424_vm15, %v3513_v15, %v1423_v23  ;;  %v2362_v46 = vpop.eup %2361  ;;  %v1806_v43 = vmul.f32 0.6931472, %v2360_v4  ;;  %v1065_v6 = vsel %vm1063_vm0, %v1064_v59, %v1062_v19  ;;  %v2041_v15 = vadd.f32 %v3480_v60, %v1612_v30 }
 0x18a   :  { %v1428_v61 = vsel %vm1426_vm1, %v1427_v3, %v1425_v7  ;;  %v2364_v1 = vpop.eup %2363  ;;  %2375 = vlog2.f32 %v1065_v6  ;;  %v1067_v41 = vmul.f32 %v2362_v46, %v3527_v28  ;;  %v1966_v34 = vmul.f32 %v1544_v38, %v1544_v38  ;;  %v4341_v46 = vld [vmem:[#allocation15_spill] sm:$0xff] }
 0x18b   :  { %v1855_v45 = vsub.f32 %v1740_v63, %v1806_v43  ;;  %2377 = vlog2.f32 %v1428_v61  ;;  %v1581_v36 = vmul.f32 %v1428_v61, %v1428_v61  ;;  %v1430_v12 = vmul.f32 %v2364_v1, %v3534_v9 }
 0x18c   :  { %v1069_v31 = vsel %vm1068_vm2, %v3527_v28, %v1067_v41  ;;  %2379 = vrsqrt.f32 %v3584_v39  ;;  %v889_v23 = vadd.f32 %v856_v0, %v823_v44  ;;  %vm1433_vm6 = vcmp.eq.f32.partialorder %v3534_v9, 0.0 }
 0x18d   :  { %v2366_v60 = vpop.eup %2365  ;;  %v3600_v57 = vand.u32 2147483647, %v1855_v45  ;;  %v1434_v29 = vand.u32 2147483648, %v3534_v9  ;;  %v1219_v4 = vmul.f32 %v4340_v21, %v4340_v21  ;;  %v3607_v33 = vadd.f32 %v3507_v13, %v1646_v50  ;;  %v4343_v21 = vld [vmem:[#allocation19_spill] sm:$0xff] }
 0x18e   :  { %v2042_v42 = vadd.f32 %v2041_v15, %v1613_v2  ;;  %v3609_v59 = vsub.f32 %v1428_v61, %v1065_v6  ;;  %vm1075_vm7 = vcmp.eq.f32.partialorder %v3556_v10, inf  ;;  %v1614_v7 = vsel %vm1562_vm5, %v1581_v36, 0.0 }
 0x18f   :  { %4339 = vst [vmem:[#allocation6_spill] sm:$0xff] %v3600_v57  ;;  %v1072_v3 = vsel %vm1070_vm3, %v1071_v8, %v1069_v31  ;;  %v1432_v62 = vsel %vm1431_vm4, %v3534_v9, %v1430_v12  ;;  %vm1077_vm8 = vcmp.eq.f32.partialorder %v3556_v10, 0.0  ;;  %v1186_v13 = vmul.f32 %v4341_v46, %v4341_v46  ;;  %v4342_v31 = vld [vmem:[#allocation18_spill] sm:$0xff] }
 0x190   :  { %v1742_v63 = vmul.f32 0.6931472, %v2366_v60  ;;  %v3623_v6 = vadd.f32 %v3509_v32, %v1966_v34  ;;  %v3625_v30 = vmax.f32 %v889_v23, 1e-08  ;;  %v1078_v61 = vand.u32 2147483648, %v3556_v10 }
 0x191   :  { %vm1438_vm9 = vcmp.eq.f32.partialorder %v3560_v40, inf  ;;  %v1252_v58 = vadd.f32 %v1219_v4, %v1186_v13  ;;  %2381 = vlog2.f32 %v1072_v3  ;;  %v1435_v1 = vsel %vm1433_vm6, %v1434_v29, %v1432_v62 }
 0x192   :  { %v2368_v49 = vpop.eup %2367  ;;  %vm1440_vm10 = vcmp.eq.f32.partialorder %v3560_v40, 0.0  ;;  %v1441_v41 = vand.u32 2147483648, %v3560_v40  ;;  %v3637_v0 = vmul.f32 %v3609_v59, %v3609_v59  ;;  %v3639_v45 = vadd.f32 %v2042_v42, %v1614_v7 }
 0x193   :  { %v2370_v19 = vpop.eup %2369  ;;  %v1808_v43 = vmul.f32 0.6931472, %v2368_v49  ;;  %vm1082_vm11 = vcmp.eq.f32.partialorder %v3572_v27, inf  ;;  %vm1084_vm12 = vcmp.eq.f32.partialorder %v3572_v27, 0.0  ;;  %v1085_v9 = vand.u32 2147483648, %v3572_v27 }
 0x194   :  { %v2372_v38 = vpop.eup %2371  ;;  %v1074_v28 = vmul.f32 %v2370_v19, %v3556_v10  ;;  %2383 = vrsqrt.f32 %v3625_v30  ;;  %v1582_v48 = vmul.f32 %v1435_v1, %v1435_v1  ;;  %v3649_v2 = vmax.f32 %v1252_v58, 1e-08 }
 0x195   :  { %v2374_v32 = vpop.eup %2373  ;;  %v1856_v15 = vsub.f32 %v1742_v63, %v1808_v43  ;;  %v1437_v50 = vmul.f32 %v2372_v38, %v3560_v40  ;;  %v857_v36 = vmul.f32 %v3182_v35, %v3182_v35  ;;  %v3653_v60 = vsub.f32 %v1435_v1, %v1072_v3 }
 0x196   :  { %v1076_v44 = vsel %vm1075_vm7, %v3556_v10, %v1074_v28  ;;  %v1081_v34 = vmul.f32 %v2374_v32, %v3572_v27  ;;  %v824_v23 = vmul.f32 %v4342_v31, %v4342_v31  ;;  %v1220_v49 = vmul.f32 %v3184_v18, %v3184_v18 }
 0x197   :  { %v2376_v8 = vpop.eup %2375  ;;  %2385 = vlog2.f32 %v1435_v1  ;;  %vm1445_vm13 = vcmp.eq.f32.partialorder %v3584_v39, inf  ;;  %v1448_v29 = vand.u32 2147483648, %v3584_v39  ;;  %v1187_v4 = vmul.f32 %v4343_v21, %v4343_v21  ;;  %v4347_v1 = vld [vmem:[#allocation20_spill] sm:$0xff] }
 0x198   :  { %v2378_v12 = vpop.eup %2377  ;;  %v3664_v35 = vand.u32 2147483647, %v1856_v15  ;;  %v3666_v19 = vmul.f32 0.6931472, %v2376_v8  ;;  %v1079_v42 = vsel %vm1077_vm8, %v1078_v61, %v1076_v44  ;;  %v1439_v7 = vsel %vm1438_vm9, %v3560_v40, %v1437_v50  ;;  %v4348_v15 = vld [vmem:[#allocation21_spill] sm:$0xff] }
 0x199   :  { %v2380_v18 = vpop.eup %2379  ;;  %v3673_v3 = vmul.f32 0.6931472, %v2378_v12  ;;  %v3677_v62 = vsel %vm1562_vm5, %v1582_v48, 0.0  ;;  %2387 = vrsqrt.f32 %v3649_v2  ;;  %v890_v46 = vadd.f32 %v857_v36, %v824_v23 }
 0x19a   :  { %4344 = vst [vmem:[#allocation7_spill] sm:$0xff] %v3664_v35  ;;  %4345 = vst [vmem:[#allocation10_spill] sm:$0xff] %v3666_v19  ;;  %v3683_v10 = vmul.f32 %v3653_v60, %v3653_v60  ;;  %v1083_v63 = vsel %vm1082_vm11, %v3572_v27, %v1081_v34  ;;  %vm1447_vm14 = vcmp.eq.f32.partialorder %v3584_v39, 0.0  ;;  %v1253_v43 = vadd.f32 %v1220_v49, %v1187_v4 }
 0x19b   :  { %4346 = vst [vmem:[#allocation8_spill] sm:$0xff] %v3673_v3  ;;  %2389 = vlog2.f32 %v1079_v42  ;;  %v1442_v38 = vsel %vm1440_vm10, %v1441_v41, %v1439_v7  ;;  %v1092_v28 = vand.u32 2147483648, %v3625_v30  ;;  %v858_v61 = vmul.f32 %v3197_v52, %v3197_v52 }
 0x19c   :  { %v1444_v58 = vmul.f32 %v2380_v18, %v3584_v39  ;;  %v825_v32 = vmul.f32 %v4347_v1, %v4347_v1  ;;  %v1188_v50 = vmul.f32 %v4348_v15, %v4348_v15  ;;  %v1221_v8 = vmul.f32 %v3199_v51, %v3199_v51 }
 0x19d   :  { %v1086_v41 = vsel %vm1084_vm12, %v1085_v9, %v1083_v63  ;;  %v3705_v48 = vmax.f32 %v890_v46, 1e-08  ;;  %v859_v52 = vmul.f32 %v3215_v55, %v3215_v55  ;;  %v3709_v44 = vsub.f32 %v1442_v38, %v1079_v42 }
 0x19e   :  { %v3711_v36 = vmul.f32 %v1442_v38, %v1442_v38  ;;  %v3713_v12 = vmax.f32 %v1253_v43, 1e-08  ;;  %v860_v51 = vmul.f32 %v3238_v22, %v3238_v22  ;;  %v2382_v34 = vpop.eup %2381  ;;  %2391 = vlog2.f32 %v1442_v38 }
 0x19f   :  { %vm1089_vm15 = vcmp.eq.f32.partialorder %v3625_v30, inf  ;;  %v891_v27 = vadd.f32 %v858_v61, %v825_v32  ;;  %v826_v9 = vmul.f32 %v3205_v56, %v3205_v56  ;;  %v1222_v55 = vmul.f32 %v3217_v16, %v3217_v16  ;;  %v4351_v32 = vld [vmem:[#allocation28_spill] sm:$0xff] }
 0x1a0   :  { %2393 = vlog2.f32 %v1086_v41  ;;  %v1446_v31 = vsel %vm1445_vm13, %v3584_v39, %v1444_v58  ;;  %v1254_v23 = vadd.f32 %v1221_v8, %v1188_v50  ;;  %v827_v22 = vmul.f32 %v3228_v25, %v3228_v25 }
 0x1a1   :  { %v2384_v49 = vpop.eup %2383  ;;  %v1455_v21 = vand.u32 2147483648, %v3649_v2  ;;  %2395 = vrsqrt.f32 %v3705_v48  ;;  %v1189_v56 = vmul.f32 %v3207_v54, %v3207_v54  ;;  %v892_v4 = vadd.f32 %v859_v52, %v826_v9 }
 0x1a2   :  { %v3731_v42 = vmul.f32 0.6931472, %v2382_v34  ;;  %2397 = vrsqrt.f32 %v3713_v12  ;;  %v893_v16 = vadd.f32 %v860_v51, %v827_v22  ;;  %v861_v7 = vmul.f32 %v3263_v20, %v3263_v20  ;;  %v4349_v20 = vld [vmem:[#allocation23_spill] sm:$0xff]  ;;  %v4352_v34 = vld [vmem:[#allocation26_spill] sm:$0xff] }
 0x1a3   :  { %v3738_v25 = vsel %vm1447_vm14, %v1448_v29, %v1446_v31  ;;  %v3740_v18 = vmax.f32 %v891_v27, 1e-08  ;;  %v1255_v46 = vadd.f32 %v1222_v55, %v1189_v56  ;;  %v1223_v63 = vmul.f32 %v3240_v47, %v3240_v47  ;;  %v4350_v47 = vld [vmem:[#allocation22_spill] sm:$0xff]  ;;  %v4353_v31 = vld [vmem:[#allocation25_spill] sm:$0xff] }
 0x1a4   :  { %v3744_v54 = vpop.eup %2385  ;;  %v1088_v43 = vmul.f32 %v2384_v49, %v3625_v30  ;;  %vm1091_vm0 = vcmp.eq.f32.partialorder %v3625_v30, 0.0  ;;  %v3749_v61 = vmax.f32 %v1254_v23, 1e-08  ;;  %v828_v39 = vmul.f32 %v4349_v20, %v4349_v20 }
 0x1a5   :  { %vm1452_vm1 = vcmp.eq.f32.partialorder %v3649_v2, inf  ;;  %v1462_v29 = vand.u32 2147483648, %v3713_v12  ;;  %v3755_v58 = vmax.f32 %v892_v4, 1e-08  ;;  %v1190_v1 = vmul.f32 %v4350_v47, %v4350_v47 }
 0x1a6   :  { %v862_v15 = vmul.f32 %v4351_v32, %v4351_v32  ;;  %v2388_v50 = vpop.eup %2387  ;;  %v3762_v8 = vsub.f32 %v3738_v25, %v1086_v41  ;;  %v3764_v52 = vmax.f32 %v893_v16, 1e-08  ;;  %v894_v51 = vadd.f32 %v861_v7, %v828_v39  ;;  %v4354_v16 = vld [vmem:[#allocation24_spill] sm:$0xff] }
 0x1a7   :  { %v829_v27 = vmul.f32 %v4352_v34, %v4352_v34  ;;  %2399 = vrsqrt.f32 %v3740_v18  ;;  %v3769_v9 = vmax.f32 %v1255_v46, 1e-08  ;;  %v1256_v55 = vadd.f32 %v1223_v63, %v1190_v1  ;;  %v4355_v46 = vld [vmem:[#allocation29_spill] sm:$0xff]  ;;  %v4356_v1 = vld [vmem:[#allocation27_spill] sm:$0xff] }
 0x1a8   :  { %v1224_v23 = vmul.f32 %v4353_v31, %v4353_v31  ;;  %v3773_v22 = vpop.eup %2389  ;;  %v1090_v41 = vsel %vm1089_vm15, %v3625_v30, %v1088_v43  ;;  %2401 = vrsqrt.f32 %v3749_v61  ;;  %v863_v56 = vmul.f32 %v3308_v37, %v3308_v37  ;;  %v4358_v30 = vld [vmem:[#allocation34_spill] sm:$0xff] }
 0x1a9   :  { %v895_v49 = vadd.f32 %v862_v15, %v829_v27  ;;  %v1451_v4 = vmul.f32 %v2388_v50, %v3649_v2  ;;  %vm1454_vm2 = vcmp.eq.f32.partialorder %v3649_v2, 0.0  ;;  %2403 = vrsqrt.f32 %v3755_v58 }
 0x1aa   :  { %v1191_v7 = vmul.f32 %v4354_v16, %v4354_v16  ;;  %v1225_v63 = vmul.f32 %v4355_v46, %v4355_v46  ;;  %2405 = vrsqrt.f32 %v3764_v52  ;;  %v3789_v43 = vmax.f32 %v894_v51, 1e-08  ;;  %v4360_v46 = vld [vmem:[#allocation33_spill] sm:$0xff] }
 0x1ab   :  { %v830_v20 = vmul.f32 %v3296_v53, %v3296_v53  ;;  %v864_v37 = vmul.f32 %v3337_v5, %v3337_v5  ;;  %2407 = vrsqrt.f32 %v3769_v9  ;;  %v3796_v39 = vmax.f32 %v1256_v55, 1e-08  ;;  %v3800_v15 = vpop.eup %2391  ;;  %v4357_v55 = vld [vmem:[#allocation31_spill] sm:$0xff] }
 0x1ac   :  { %v1257_v47 = vadd.f32 %v1224_v23, %v1191_v7  ;;  %v1192_v32 = vmul.f32 %v4356_v1, %v4356_v1  ;;  %2409 = vlog2.f32 %v3738_v25  ;;  %v3803_v50 = vmax.f32 %v895_v49, 1e-08  ;;  %v4359_v7 = vld [vmem:[#allocation30_spill] sm:$0xff] }
 0x1ad   :  { %v896_v51 = vadd.f32 %v863_v56, %v830_v20  ;;  %v831_v53 = vmul.f32 %v3328_v14, %v3328_v14  ;;  %v3807_v34 = vpop.eup %2393  ;;  %v3813_v5 = vsel %vm1091_vm0, %v1092_v28, %v1090_v41  ;;  %v1226_v31 = vmul.f32 %v4357_v55, %v4357_v55 }
 0x1ae   :  { %v1258_v27 = vadd.f32 %v1225_v63, %v1192_v32  ;;  %v865_v23 = vmul.f32 %v3356_v26, %v3356_v26  ;;  %v2396_v49 = vpop.eup %2395  ;;  %v1453_v14 = vsel %vm1452_vm1, %v3649_v2, %v1451_v4  ;;  %vm1459_vm3 = vcmp.eq.f32.partialorder %v3713_v12, inf }
 0x1af   :  { %2411 = vrsqrt.f32 %v3789_v43  ;;  %v897_v56 = vadd.f32 %v864_v37, %v831_v53  ;;  %v832_v28 = vmul.f32 %v4358_v30, %v4358_v30  ;;  %v2398_v41 = vpop.eup %2397  ;;  %v3827_v16 = vmax.f32 %v1257_v47, 1e-08  ;;  %v4361_v53 = vld [vmem:[#allocation32_spill] sm:$0xff] }
 0x1b0   :  { %2413 = vrsqrt.f32 %v3796_v39  ;;  %v1193_v26 = vmul.f32 %v4359_v7, %v4359_v7  ;;  %v1227_v63 = vmul.f32 %v4360_v46, %v4360_v46  ;;  %v3835_v4 = vmul.f32 %v3738_v25, %v3738_v25 }
 0x1b1   :  { %2415 = vrsqrt.f32 %v3803_v50  ;;  %v3838_v20 = vmax.f32 %v896_v51, 1e-08  ;;  %v898_v37 = vadd.f32 %v865_v23, %v832_v28  ;;  %vm1461_vm4 = vcmp.eq.f32.partialorder %v3713_v12, 0.0  ;;  %v4362_v23 = vld [vmem:[#allocation39_spill] sm:$0xff]  ;;  %v4363_v28 = vld [vmem:[#allocation36_spill] sm:$0xff] }
 0x1b2   :  { %v3842_v1 = vmax.f32 %v1258_v27, 1e-08  ;;  %v1259_v32 = vadd.f32 %v1226_v31, %v1193_v26  ;;  %v1194_v55 = vmul.f32 %v4361_v53, %v4361_v53  ;;  %2417 = vlog2.f32 %v3813_v5 }
 0x1b3   :  { %v3851_v25 = vsel %vm1454_vm2, %v1455_v21, %v1453_v14  ;;  %v3853_v51 = vmax.f32 %v897_v56, 1e-08  ;;  %v866_v30 = vmul.f32 %v4362_v23, %v4362_v23  ;;  %vm1096_vm6 = vcmp.eq.f32.partialorder %v3705_v48, inf  ;;  %v4364_v21 = vld [vmem:[#allocation37_spill] sm:$0xff]  ;;  %v4365_v56 = vld [vmem:[#allocation40_spill] sm:$0xff] }
 0x1b4   :  { %v1458_v27 = vmul.f32 %v2398_v41, %v3713_v12  ;;  %2419 = vrsqrt.f32 %v3827_v16  ;;  %v1260_v31 = vadd.f32 %v1227_v63, %v1194_v55  ;;  %v1228_v7 = vmul.f32 %v4363_v28, %v4363_v28  ;;  %v2400_v26 = vpop.eup %2399  ;;  %v4366_v55 = vld [vmem:[#allocation35_spill] sm:$0xff] }
 0x1b5   :  { %vm1103_vm7 = vcmp.eq.f32.partialorder %v3740_v18, inf  ;;  %2421 = vrsqrt.f32 %v3838_v20  ;;  %v3864_v2 = vmax.f32 %v898_v37, 1e-08  ;;  %v833_v14 = vmul.f32 %v4364_v21, %v4364_v21  ;;  %v2402_v41 = vpop.eup %2401  ;;  %v4367_v37 = vld [vmem:[#allocation38_spill] sm:$0xff] }
 0x1b6   :  { %v1229_v46 = vmul.f32 %v4365_v56, %v4365_v56  ;;  %2423 = vrsqrt.f32 %v3842_v1  ;;  %v3872_v63 = vmax.f32 %v1259_v32, 1e-08  ;;  %v1195_v23 = vmul.f32 %v4366_v55, %v4366_v55  ;;  %v2404_v28 = vpop.eup %2403 }
 0x1b7   :  { %vm1466_vm8 = vcmp.eq.f32.partialorder %v3749_v61, inf  ;;  %vm1110_vm9 = vcmp.eq.f32.partialorder %v3755_v58, inf  ;;  %2425 = vrsqrt.f32 %v3853_v51  ;;  %v1196_v21 = vmul.f32 %v4367_v37, %v4367_v37  ;;  %v2406_v40 = vpop.eup %2405 }
 0x1b8   :  { %v899_v56 = vadd.f32 %v866_v30, %v833_v14  ;;  %2427 = vlog2.f32 %v3851_v25  ;;  %vm1098_vm10 = vcmp.eq.f32.partialorder %v3705_v48, 0.0  ;;  %v1460_v32 = vsel %vm1459_vm3, %v3713_v12, %v1458_v27  ;;  %v2408_v17 = vpop.eup %2407 }
 0x1b9   :  { %v3886_v55 = vmax.f32 %v1260_v31, 1e-08  ;;  %v1261_v13 = vadd.f32 %v1228_v7, %v1195_v23  ;;  %v1095_v53 = vmul.f32 %v2396_v49, %v3705_v48  ;;  %vm1105_vm11 = vcmp.eq.f32.partialorder %v3740_v18, 0.0  ;;  %v3892_v14 = vpop.eup %2409 }
 0x1ba   :  { %vm1112_vm12 = vcmp.eq.f32.partialorder %v3755_v58, 0.0  ;;  %2429 = vrsqrt.f32 %v3864_v2  ;;  %v1262_v30 = vadd.f32 %v1229_v46, %v1196_v21  ;;  %v1102_v37 = vmul.f32 %v2400_v26, %v3740_v18 }
 0x1bb   :  { %v1113_v47 = vand.u32 2147483648, %v3755_v58  ;;  %vm1473_vm13 = vcmp.eq.f32.partialorder %v3769_v9, inf  ;;  %2431 = vrsqrt.f32 %v3872_v63  ;;  %v3902_v49 = vsel %vm1461_vm4, %v1462_v29, %v1460_v32 }
 0x1bc   :  { %v1109_v27 = vmul.f32 %v2404_v28, %v3755_v58  ;;  %v1116_v31 = vmul.f32 %v2406_v40, %v3764_v52  ;;  %v3906_v7 = vmax.f32 %v899_v56, 1e-08  ;;  %v2412_v46 = vpop.eup %2411  ;;  %v1465_v26 = vmul.f32 %v2402_v41, %v3749_v61 }
 0x1bd   :  { %v1472_v23 = vmul.f32 %v2408_v17, %v3769_v9  ;;  %2433 = vrsqrt.f32 %v3886_v55  ;;  %v3911_v21 = vmax.f32 %v1261_v13, 1e-08  ;;  %v2414_v38 = vpop.eup %2413  ;;  %v1097_v12 = vsel %vm1096_vm6, %v3705_v48, %v1095_v53 }
 0x1be   :  { %vm1117_vm14 = vcmp.eq.f32.partialorder %v3764_v52, inf  ;;  %v3918_v40 = vmax.f32 %v1262_v30, 1e-08  ;;  %v2416_v28 = vpop.eup %2415  ;;  %2435 = vlog2.f32 %v3902_v49  ;;  %v1104_v17 = vsel %vm1103_vm7, %v3740_v18, %v1102_v37 }
 0x1bf   :  { %v1120_v13 = vand.u32 2147483648, %v3764_v52  ;;  %vm1468_vm15 = vcmp.eq.f32.partialorder %v3749_v61, 0.0  ;;  %v1111_v53 = vsel %vm1110_vm9, %v3755_v58, %v1109_v27  ;;  %v1123_v56 = vmul.f32 %v2412_v46, %v3789_v43  ;;  %v3933_v30 = vpop.eup %2417 }
 0x1c0   :  { %2437 = vrsqrt.f32 %v3906_v7  ;;  %v1118_v32 = vsel %vm1117_vm14, %v3764_v52, %v1116_v31  ;;  %v1467_v37 = vsel %vm1466_vm8, %v3749_v61, %v1465_v26  ;;  %v1474_v41 = vsel %vm1473_vm13, %v3769_v9, %v1472_v23 }
 0x1c1   :  { %vm1475_vm0 = vcmp.eq.f32.partialorder %v3769_v9, 0.0  ;;  %v1479_v27 = vmul.f32 %v2414_v38, %v3796_v39  ;;  %vm1480_vm1 = vcmp.eq.f32.partialorder %v3796_v39, inf  ;;  %2439 = vrsqrt.f32 %v3911_v21  ;;  %v2420_v46 = vpop.eup %2419 }
 0x1c2   :  { %2441 = vrsqrt.f32 %v3918_v40  ;;  %v4368_v31 = vand.u32 2147483648, %v3705_v48  ;;  %vm1119_vm2 = vcmp.eq.f32.partialorder %v3764_v52, 0.0  ;;  %v1130_v23 = vmul.f32 %v2416_v28, %v3803_v50  ;;  %v2422_v29 = vpop.eup %2421 }
 0x1c3   :  { %v4369_v38 = vand.u32 2147483648, %v3740_v18  ;;  %v3962_v11 = vsel %vm1112_vm12, %v1113_v47, %v1111_v53  ;;  %v3964_v57 = vsel %vm1119_vm2, %v1120_v13, %v1118_v32  ;;  %vm1124_vm3 = vcmp.eq.f32.partialorder %v3789_v43, inf  ;;  %v2424_v48 = vpop.eup %2423 }
 0x1c4   :  { %v3950_v26 = vsel %vm1098_vm10, %v4368_v31, %v1097_v12  ;;  %v1125_v52 = vsel %vm1124_vm3, %v3789_v43, %v1123_v56  ;;  %vm1126_vm4 = vcmp.eq.f32.partialorder %v3789_v43, 0.0  ;;  %v1127_v12 = vand.u32 2147483648, %v3789_v43  ;;  %v2426_v18 = vpop.eup %2425 }
 0x1c5   :  { %v3958_v35 = vsel %vm1105_vm11, %v4369_v38, %v1104_v17  ;;  %vm1131_vm6 = vcmp.eq.f32.partialorder %v3803_v50, inf  ;;  %v1486_v28 = vmul.f32 %v2420_v46, %v3827_v16  ;;  %vm1133_vm7 = vcmp.eq.f32.partialorder %v3803_v50, 0.0  ;;  %v3975_v47 = vpop.eup %2427 }
 0x1c6   :  { %v1134_v58 = vand.u32 2147483648, %v3803_v50  ;;  %vm1138_vm8 = vcmp.eq.f32.partialorder %v3838_v20, inf  ;;  %v1132_v17 = vsel %vm1131_vm6, %v3803_v50, %v1130_v23  ;;  %v1137_v13 = vmul.f32 %v2422_v29, %v3838_v20 }
 0x1c7   :  { %vm1140_vm9 = vcmp.eq.f32.partialorder %v3838_v20, 0.0  ;;  %v1141_v43 = vand.u32 2147483648, %v3838_v20  ;;  %v2430_v53 = vpop.eup %2429  ;;  %v3981_v56 = vsel %vm1126_vm4, %v1127_v12, %v1125_v52  ;;  %vm1145_vm10 = vcmp.eq.f32.partialorder %v3853_v51, inf }
 0x1c8   :  { %vm1147_vm11 = vcmp.eq.f32.partialorder %v3853_v51, 0.0  ;;  %v1148_v32 = vand.u32 2147483648, %v3853_v51  ;;  %v2432_v46 = vpop.eup %2431  ;;  %v1144_v31 = vmul.f32 %v2426_v18, %v3853_v51  ;;  %vm1152_vm12 = vcmp.eq.f32.partialorder %v3864_v2, inf }
 0x1c9   :  { %vm1154_vm13 = vcmp.eq.f32.partialorder %v3864_v2, 0.0  ;;  %v1493_v29 = vmul.f32 %v2424_v48, %v3842_v1  ;;  %v3992_v23 = vsel %vm1133_vm7, %v1134_v58, %v1132_v17  ;;  %v1155_v38 = vand.u32 2147483648, %v3864_v2 }
 0x1ca   :  { %v1162_v52 = vand.u32 2147483648, %v3906_v7  ;;  %v4370_v12 = vand.u32 2147483648, %v3749_v61  ;;  %v2434_v18 = vpop.eup %2433  ;;  %v1139_v19 = vsel %vm1138_vm8, %v3838_v20, %v1137_v13  ;;  %v1151_v48 = vmul.f32 %v2430_v53, %v3864_v2 }
 0x1cb   :  { %v4371_v50 = vand.u32 2147483648, %v3769_v9  ;;  %v1481_v17 = vsel %vm1480_vm1, %v3796_v39, %v1479_v27  ;;  %vm1159_vm14 = vcmp.eq.f32.partialorder %v3906_v7, inf  ;;  %vm1487_vm2 = vcmp.eq.f32.partialorder %v3827_v16, inf }
 0x1cc   :  { %v4000_v3 = vsel %vm1468_vm15, %v4370_v12, %v1467_v37  ;;  %vm1482_vm15 = vcmp.eq.f32.partialorder %v3796_v39, 0.0  ;;  %vm1494_vm3 = vcmp.eq.f32.partialorder %v3842_v1, inf  ;;  %v1500_v61 = vmul.f32 %v2432_v46, %v3872_v63  ;;  %v4020_v37 = vpop.eup %2435 }
 0x1cd   :  { %v4010_v58 = vsel %vm1475_vm0, %v4371_v50, %v1474_v41  ;;  %4372 = vst [vmem:[#allocation11_spill] sm:$0xff] %v4020_v37  ;;  %v1146_v9 = vsel %vm1145_vm10, %v3853_v51, %v1144_v31  ;;  %v1488_v41 = vsel %vm1487_vm2, %v3827_v16, %v1486_v28  ;;  %vm1489_vm0 = vcmp.eq.f32.partialorder %v3827_v16, 0.0  ;;  %v2438_v13 = vpop.eup %2437 }
 0x1ce   :  { %v1495_v27 = vsel %vm1494_vm3, %v3842_v1, %v1493_v29  ;;  %v4030_v53 = vsel %vm1140_vm9, %v1141_v43, %v1139_v19  ;;  %v1490_v12 = vand.u32 2147483648, %v3827_v16  ;;  %v1497_v46 = vand.u32 2147483648, %v3842_v1  ;;  %v2440_v37 = vpop.eup %2439 }
 0x1cf   :  { %v1507_v50 = vmul.f32 %v2434_v18, %v3886_v55  ;;  %v1153_v28 = vsel %vm1152_vm12, %v3864_v2, %v1151_v48  ;;  %vm1161_vm1 = vcmp.eq.f32.partialorder %v3906_v7, 0.0  ;;  %v4373_v31 = vand.u32 2147483648, %v3796_v39  ;;  %v2442_v19 = vpop.eup %2441 }
 0x1d0   :  { %vm1496_vm4 = vcmp.eq.f32.partialorder %v3842_v1, 0.0  ;;  %vm1501_vm6 = vcmp.eq.f32.partialorder %v3872_v63, inf  ;;  %v4049_v16 = vsel %vm1147_vm11, %v1148_v32, %v1146_v9  ;;  %v4051_v43 = vsel %vm1489_vm0, %v1490_v12, %v1488_v41 }
 0x1d1   :  { %v4043_v20 = vsel %vm1482_vm15, %v4373_v31, %v1481_v17  ;;  %v4053_v29 = vsel %vm1496_vm4, %v1497_v46, %v1495_v27  ;;  %v1502_v18 = vsel %vm1501_vm6, %v3872_v63, %v1500_v61  ;;  %v1158_v48 = vmul.f32 %v2438_v13, %v3906_v7 }
 0x1d2   :  { %vm1503_vm7 = vcmp.eq.f32.partialorder %v3872_v63, 0.0  ;;  %v1504_v39 = vand.u32 2147483648, %v3872_v63  ;;  %vm1508_vm8 = vcmp.eq.f32.partialorder %v3886_v55, inf  ;;  %v4062_v1 = vsel %vm1154_vm13, %v1155_v38, %v1153_v28 }
 0x1d3   :  { %v1509_v51 = vsel %vm1508_vm8, %v3886_v55, %v1507_v50  ;;  %vm1510_vm9 = vcmp.eq.f32.partialorder %v3886_v55, 0.0  ;;  %v1514_v32 = vmul.f32 %v2440_v37, %v3911_v21  ;;  %v1521_v17 = vmul.f32 %v2442_v19, %v3918_v40 }
 0x1d4   :  { %v1549_v61 = vsub.f32 %v3851_v25, %v3813_v5  ;;  %v1969_v63 = vmul.f32 %v3709_v44, %v3709_v44  ;;  %v1999_v9 = vadd.f32 %v3623_v6, %v3637_v0  ;;  %v4074_v2 = vsel %vm1503_vm7, %v1504_v39, %v1502_v18 }
 0x1d5   :  { %v1511_v38 = vand.u32 2147483648, %v3886_v55  ;;  %vm1515_vm10 = vcmp.eq.f32.partialorder %v3911_v21, inf  ;;  %vm1517_vm11 = vcmp.eq.f32.partialorder %v3911_v21, 0.0  ;;  %v1160_v37 = vsel %vm1159_vm14, %v3906_v7, %v1158_v48 }
 0x1d6   :  { %v1550_v5 = vsub.f32 %v3902_v49, %v3950_v26  ;;  %v1970_v41 = vmul.f32 %v3762_v8, %v3762_v8  ;;  %v2000_v6 = vadd.f32 %v1999_v9, %v3683_v10  ;;  %v1516_v55 = vsel %vm1515_vm10, %v3911_v21, %v1514_v32 }
 0x1d7   :  { %v4087_v0 = vsel %vm1510_vm9, %v1511_v38, %v1509_v51  ;;  %v1518_v27 = vand.u32 2147483648, %v3911_v21  ;;  %vm1522_vm12 = vcmp.eq.f32.partialorder %v3918_v40, inf  ;;  %v1551_v12 = vsub.f32 %v4000_v3, %v3958_v35 }
 0x1d8   :  { %v1523_v13 = vsel %vm1522_vm12, %v3918_v40, %v1521_v17  ;;  %v1971_v46 = vmul.f32 %v1549_v61, %v1549_v61  ;;  %v2001_v50 = vadd.f32 %v2000_v6, %v1969_v63  ;;  %v4097_v28 = vsel %vm1161_vm1, %v1162_v52, %v1160_v37 }
 0x1d9   :  { %vm1524_vm13 = vcmp.eq.f32.partialorder %v3918_v40, 0.0  ;;  %v1525_v10 = vand.u32 2147483648, %v3918_v40  ;;  %v1552_v31 = vsub.f32 %v4010_v58, %v3962_v11  ;;  %v1972_v19 = vmul.f32 %v1550_v5, %v1550_v5 }
 0x1da   :  { %v2002_v18 = vadd.f32 %v2001_v50, %v1970_v41  ;;  %v1649_v48 = vand.u32 2147483647, %v3709_v44  ;;  %v4374_v39 = vand.u32 2147483647, %v3609_v59  ;;  %v4109_v7 = vsel %vm1517_vm11, %v1518_v27, %v1516_v55 }
 0x1db   :  { %v4111_v52 = vsel %vm1524_vm13, %v1525_v10, %v1523_v13  ;;  %v1553_v40 = vsub.f32 %v4043_v20, %v3964_v57  ;;  %2443 = vlog2.f32 %v3950_v26  ;;  %v1973_v32 = vmul.f32 %v1551_v12, %v1551_v12 }
 0x1dc   :  { %v1679_v51 = vadd.f32 %v3607_v33, %v4374_v39  ;;  %v2003_v17 = vadd.f32 %v2002_v18, %v1971_v46  ;;  %v1650_v63 = vand.u32 2147483647, %v3762_v8  ;;  %v4375_v44 = vand.u32 2147483647, %v3653_v60 }
 0x1dd   :  { %v4121_v33 = vsub.f32 %v4051_v43, %v3981_v56  ;;  %v4125_v21 = vsub.f32 %v4053_v29, %v3992_v23  ;;  %v4129_v9 = vsub.f32 %v4074_v2, %v4030_v53  ;;  %2445 = vlog2.f32 %v3958_v35 }
 0x1de   :  { %v1680_v59 = vadd.f32 %v1679_v51, %v4375_v44  ;;  %v1974_v26 = vmul.f32 %v1552_v31, %v1552_v31  ;;  %v2004_v38 = vadd.f32 %v2003_v17, %v1972_v19  ;;  %v1651_v8 = vand.u32 2147483647, %v1549_v61 }
 0x1df   :  { %v4134_v60 = vsub.f32 %v4087_v0, %v4049_v16  ;;  %v4138_v41 = vsub.f32 %v4109_v7, %v4062_v1  ;;  %2447 = vlog2.f32 %v3962_v11  ;;  %v1975_v6 = vmul.f32 %v1553_v40, %v1553_v40 }
 0x1e0   :  { %v1681_v37 = vadd.f32 %v1680_v59, %v1649_v48  ;;  %2449 = vlog2.f32 %v3964_v57  ;;  %v2005_v55 = vadd.f32 %v2004_v38, %v1973_v32  ;;  %v1652_v27 = vand.u32 2147483647, %v1550_v5 }
 0x1e1   :  { %v4144_v61 = vsub.f32 %v4111_v52, %v4097_v28  ;;  %vm1693_vm14 = vcmask 1041408   ;;  %2451 = vlog2.f32 %v3981_v56  ;;  %v1976_v13 = vmul.f32 %v4121_v33, %v4121_v33 }
 0x1e2   :  { %v1682_v35 = vadd.f32 %v1681_v37, %v1650_v63  ;;  %2453 = vlog2.f32 %v3992_v23  ;;  %v2006_v46 = vadd.f32 %v2005_v55, %v1974_v26  ;;  %v1653_v11 = vand.u32 2147483647, %v1551_v12 }
 0x1e3   :  { %2455 = vlog2.f32 %v4030_v53  ;;  %v1977_v57 = vmul.f32 %v4125_v21, %v4125_v21  ;;  %v1978_v5 = vmul.f32 %v4129_v9, %v4129_v9  ;;  %v1654_v10 = vand.u32 2147483647, %v1552_v31 }
 0x1e4   :  { %v1683_v50 = vadd.f32 %v1682_v35, %v1651_v8  ;;  %v2007_v19 = vadd.f32 %v2006_v46, %v1975_v6  ;;  %v1585_v56 = vmul.f32 %v3851_v25, %v3851_v25  ;;  %v1616_v23 = vsel %vm1562_vm5, %v3711_v36, 0.0 }
 0x1e5   :  { %2457 = vlog2.f32 %v4049_v16  ;;  %v1979_v53 = vmul.f32 %v4134_v60, %v4134_v60  ;;  %v1655_v12 = vand.u32 2147483647, %v1553_v40  ;;  %v2044_v48 = vadd.f32 %v3639_v45, %v3677_v62 }
 0x1e6   :  { %v1684_v18 = vadd.f32 %v1683_v50, %v1652_v27  ;;  %v2008_v39 = vadd.f32 %v2007_v19, %v1976_v13  ;;  %v1586_v51 = vmul.f32 %v3902_v49, %v3902_v49  ;;  %v1617_v25 = vsel %vm1562_vm5, %v3835_v4, 0.0 }
 0x1e7   :  { %2459 = vlog2.f32 %v4062_v1  ;;  %v1981_v36 = vmul.f32 %v4144_v61, %v4144_v61  ;;  %v1656_v16 = vand.u32 2147483647, %v4121_v33  ;;  %v2045_v40 = vadd.f32 %v2044_v48, %v1616_v23 }
 0x1e8   :  { %v1685_v31 = vadd.f32 %v1684_v18, %v1653_v11  ;;  %v4174_v32 = vpop.eup %2443  ;;  %v2009_v45 = vadd.f32 %v2008_v39, %v1977_v57  ;;  %v1587_v17 = vmul.f32 %v4000_v3, %v4000_v3  ;;  %v1618_v49 = vsel %vm1562_vm5, %v1585_v56, 0.0 }
 0x1e9   :  { %2461 = vlog2.f32 %v4097_v28  ;;  %v1980_v4 = vmul.f32 %v4138_v41, %v4138_v41  ;;  %v1657_v1 = vand.u32 2147483647, %v4125_v21  ;;  %v2046_v63 = vadd.f32 %v2045_v40, %v1617_v25 }
 0x1ea   :  { %v1686_v62 = vadd.f32 %v1685_v31, %v1654_v10  ;;  %v4184_v44 = vpop.eup %2445  ;;  %v2010_v59 = vadd.f32 %v2009_v45, %v1978_v5  ;;  %v1588_v26 = vmul.f32 %v4010_v58, %v4010_v58  ;;  %v1619_v38 = vsel %vm1562_vm5, %v1586_v51, 0.0 }
 0x1eb   :  { %2463 = vlog2.f32 %v4000_v3  ;;  %v2013_v28 = vsel %vm1693_vm14, %v1981_v36, 0.0  ;;  %v1658_v8 = vand.u32 2147483647, %v4129_v9  ;;  %v2047_v37 = vadd.f32 %v2046_v63, %v1618_v49 }
 0x1ec   :  { %v1687_v33 = vadd.f32 %v1686_v62, %v1655_v12  ;;  %v4193_v6 = vpop.eup %2447  ;;  %v2011_v21 = vadd.f32 %v2010_v59, %v1979_v53  ;;  %v1589_v27 = vmul.f32 %v4043_v20, %v4043_v20  ;;  %v1620_v35 = vsel %vm1562_vm5, %v1587_v17, 0.0 }
 0x1ed   :  { %v4199_v13 = vpop.eup %2449  ;;  %2465 = vlog2.f32 %v4010_v58  ;;  %v1659_v3 = vand.u32 2147483647, %v4134_v60  ;;  %v1661_v46 = vand.u32 2147483647, %v4144_v61  ;;  %v2048_v9 = vadd.f32 %v2047_v37, %v1619_v38  ;;  %v4376_v38 = vld [vmem:[#allocation10_spill] sm:$0xff] }
 0x1ee   :  { %v1688_v55 = vadd.f32 %v1687_v33, %v1656_v16  ;;  %v4204_v11 = vpop.eup %2451  ;;  %v2012_v50 = vadd.f32 %v2011_v21, %v1980_v4  ;;  %v1590_v5 = vmul.f32 %v4051_v43, %v4051_v43  ;;  %v1621_v10 = vsel %vm1562_vm5, %v1588_v26, 0.0  ;;  %v4379_v37 = vld [vmem:[#allocation6_spill] sm:$0xff] }
 0x1ef   :  { %v4210_v19 = vpop.eup %2453  ;;  %v1812_v18 = vmul.f32 0.6931472, %v3744_v54  ;;  %2467 = vlog2.f32 %v4043_v20  ;;  %v1660_v58 = vand.u32 2147483647, %v4138_v41  ;;  %v2049_v60 = vadd.f32 %v2048_v9, %v1620_v35 }
 0x1f0   :  { %v1689_v57 = vadd.f32 %v1688_v55, %v1657_v1  ;;  %v4215_v61 = vpop.eup %2455  ;;  %v2014_v56 = vadd.f32 %v2013_v28, %v2012_v50  ;;  %v1591_v53 = vmul.f32 %v4053_v29, %v4053_v29  ;;  %v1622_v12 = vsel %vm1562_vm5, %v1589_v27, 0.0  ;;  %v4377_v28 = vld [vmem:[#allocation8_spill] sm:$0xff]  ;;  %v4382_v50 = vld [vmem:[#allocation7_spill] sm:$0xff] }
 0x1f1   :  { %v1748_v48 = vmul.f32 0.6931472, %v3773_v22  ;;  %2469 = vlog2.f32 %v4051_v43  ;;  %v1694_v54 = vsel %vm1693_vm14, %v1661_v46, 0.0  ;;  %v2050_v20 = vadd.f32 %v2049_v60, %v1621_v10 }
 0x1f2   :  { %v1690_v23 = vadd.f32 %v1689_v57, %v1658_v8  ;;  %v4224_v39 = vpop.eup %2457  ;;  %2471 = vlog2.f32 %v4053_v29  ;;  %2015 = vadd.xlane.f32.xlu1 %v2014_v56  ;;  %v1592_v31 = vmul.f32 %v4074_v2, %v4074_v2  ;;  %v1623_v51 = vsel %vm1562_vm5, %v1590_v5, 0.0 }
 0x1f3   :  { %2473 = vlog2.f32 %v4074_v2  ;;  %v1593_v22 = vmul.f32 %v4087_v0, %v4087_v0  ;;  %v1595_v43 = vmul.f32 %v4111_v52, %v4111_v52  ;;  %v2051_v25 = vadd.f32 %v2050_v20, %v1622_v12 }
 0x1f4   :  { %v1691_v41 = vadd.f32 %v1690_v23, %v1659_v3  ;;  %v4236_v36 = vpop.eup %2459  ;;  %v1814_v29 = vmul.f32 0.6931472, %v3800_v15  ;;  %2475 = vlog2.f32 %v4087_v0  ;;  %v1624_v40 = vsel %vm1562_vm5, %v1591_v53, 0.0  ;;  %v4381_v3 = vld [vmem:[#allocation11_spill] sm:$0xff] }
 0x1f5   :  { %v1750_v45 = vmul.f32 0.6931472, %v3807_v34  ;;  %2477 = vlog2.f32 %v4109_v7  ;;  %v1594_v2 = vmul.f32 %v4109_v7, %v4109_v7  ;;  %v2052_v62 = vadd.f32 %v2051_v25, %v1623_v51 }
 0x1f6   :  { %v1692_v16 = vadd.f32 %v1691_v41, %v1660_v58  ;;  %v4246_v17 = vpop.eup %2461  ;;  %v1625_v15 = vsel %vm1562_vm5, %v1592_v31, 0.0  ;;  %v1816_v0 = vmul.f32 0.6931472, %v3892_v14  ;;  %v1858_v4 = vsub.f32 %v3731_v42, %v1812_v18  ;;  %v4380_v42 = vld [vmem:[#allocation5_spill] sm:$0xff] }
 0x1f7   :  { %v1626_v1 = vsel %vm1562_vm5, %v1593_v22, 0.0  ;;  %v1628_v34 = vsel %vm1562_vm5, %v1595_v43, 0.0  ;;  %v2053_v63 = vadd.f32 %v2052_v62, %v1624_v40  ;;  %v1752_v7 = vmul.f32 0.6931472, %v3933_v30 }
 0x1f8   :  { %v1695_v49 = vadd.f32 %v1694_v54, %v1692_v16  ;;  %v2464_v59 = vpop.eup %2463  ;;  %v1818_v33 = vmul.f32 0.6931472, %v3975_v47  ;;  %v1859_v26 = vsub.f32 %v1748_v48, %v1814_v29  ;;  %v4378_v8 = vsub.f32 %v4376_v38, %v4377_v28 }
 0x1f9   :  { %v1920_v21 = vadd.f32 %v4380_v42, %v4379_v37  ;;  %2479 = vlog2.f32 %v4111_v52  ;;  %v1627_v55 = vsel %vm1562_vm5, %v1594_v2, 0.0  ;;  %v2054_v27 = vadd.f32 %v2053_v63, %v1625_v15 }
 0x1fa   :  { %1696 = vadd.xlane.f32.xlu0 %v1695_v49  ;;  %v1890_v14 = vand.u32 2147483647, %v4378_v8  ;;  %v1754_v30 = vmul.f32 0.6931472, %v4174_v32  ;;  %v2466_v35 = vpop.eup %2465  ;;  %v1820_v46 = vmul.f32 0.6931472, %v4381_v3  ;;  %v1860_v47 = vsub.f32 %v1750_v45, %v1816_v0 }
 0x1fb   :  { %v1891_v9 = vand.u32 2147483647, %v1858_v4  ;;  %v1921_v57 = vadd.f32 %v1920_v21, %v4382_v50  ;;  %v2055_v5 = vadd.f32 %v2054_v27, %v1626_v1  ;;  %v2057_v10 = vsel %vm1693_vm14, %v1628_v34, 0.0 }
 0x1fc   :  { %v1756_v18 = vmul.f32 0.6931472, %v4184_v44  ;;  %v2468_v58 = vpop.eup %2467  ;;  %v1822_v52 = vmul.f32 0.6931472, %v2464_v59  ;;  %v1861_v60 = vsub.f32 %v1752_v7, %v1818_v33  ;;  %v1892_v24 = vand.u32 2147483647, %v1859_v26 }
 0x1fd   :  { %v1922_v56 = vadd.f32 %v1921_v57, %v1890_v14  ;;  %v2056_v23 = vadd.f32 %v2055_v5, %v1627_v55  ;;  %v1758_v32 = vmul.f32 0.6931472, %v4193_v6  ;;  %v1824_v12 = vmul.f32 0.6931472, %v2466_v35 }
 0x1fe   :  { %v2470_v53 = vpop.eup %2469  ;;  %v1862_v48 = vsub.f32 %v1754_v30, %v1820_v46  ;;  %v1893_v54 = vand.u32 2147483647, %v1860_v47  ;;  %v1760_v51 = vmul.f32 0.6931472, %v4199_v13  ;;  %v1826_v43 = vmul.f32 0.6931472, %v2468_v58 }
 0x1ff   :  { %v1923_v20 = vadd.f32 %v1922_v56, %v1891_v9  ;;  %v2472_v41 = vpop.eup %2471  ;;  %v2058_v31 = vadd.f32 %v2057_v10, %v2056_v23  ;;  %v1863_v44 = vsub.f32 %v1756_v18, %v1822_v52  ;;  %v1894_v25 = vand.u32 2147483647, %v1861_v60 }
 0x200   :  { %v2474_v22 = vpop.eup %2473  ;;  %v1762_v40 = vmul.f32 0.6931472, %v4204_v11  ;;  %v1828_v6 = vmul.f32 0.6931472, %v2470_v53  ;;  %v1864_v2 = vsub.f32 %v1758_v32, %v1824_v12  ;;  %v1895_v62 = vand.u32 2147483647, %v1862_v48 }
 0x201   :  { %v1924_v29 = vadd.f32 %v1923_v20, %v1892_v24  ;;  %v2476_v16 = vpop.eup %2475  ;;  %2059 = vadd.xlane.f32.xlu1 %v2058_v31  ;;  %v1764_v15 = vmul.f32 0.6931472, %v4210_v19  ;;  %v1830_v0 = vmul.f32 0.6931472, %v2472_v41  ;;  %v1865_v4 = vsub.f32 %v1760_v51, %v1826_v43 }
 0x202   :  { %v2478_v45 = vpop.eup %2477  ;;  %v1896_v1 = vand.u32 2147483647, %v1863_v44  ;;  %v1766_v34 = vmul.f32 0.6931472, %v4215_v61  ;;  %v1832_v7 = vmul.f32 0.6931472, %v2474_v22  ;;  %v1866_v59 = vsub.f32 %v1762_v40, %v1828_v6 }
 0x203   :  { %v1925_v49 = vadd.f32 %v1924_v29, %v1893_v54  ;;  %v1897_v33 = vand.u32 2147483647, %v1864_v2  ;;  %v1768_v11 = vmul.f32 0.6931472, %v4224_v39  ;;  %v1834_v38 = vmul.f32 0.6931472, %v2476_v16 }
 0x204   :  { %v1867_v28 = vsub.f32 %v1764_v15, %v1830_v0  ;;  %v1898_v8 = vand.u32 2147483647, %v1865_v4  ;;  %v1770_v37 = vmul.f32 0.6931472, %v4236_v36  ;;  %v1772_v19 = vmul.f32 0.6931472, %v4246_v17 }
 0x205   :  { %v1926_v13 = vadd.f32 %v1925_v49, %v1894_v25  ;;  %v1836_v21 = vmul.f32 0.6931472, %v2478_v45  ;;  %v1868_v55 = vsub.f32 %v1766_v34, %v1832_v7  ;;  %v1899_v27 = vand.u32 2147483647, %v1866_v59 }
 0x206   :  { %v2480_v63 = vpop.eup %2479  ;;  %v1869_v30 = vsub.f32 %v1768_v11, %v1834_v38  ;;  %v1900_v35 = vand.u32 2147483647, %v1867_v28 }
 0x207   :  { %v1927_v26 = vadd.f32 %v1926_v13, %v1895_v62  ;;  %v1838_v42 = vmul.f32 0.6931472, %v2480_v63  ;;  %v1870_v47 = vsub.f32 %v1770_v37, %v1836_v21  ;;  %v1901_v9 = vand.u32 2147483647, %v1868_v55 }
 0x208   :  { %v1902_v50 = vand.u32 2147483647, %v1869_v30 }
 0x209   :  { %v1928_v14 = vadd.f32 %v1927_v26, %v1896_v1  ;;  %v1871_v46 = vsub.f32 %v1772_v19, %v1838_v42  ;;  %v1903_v10 = vand.u32 2147483647, %v1870_v47 }
 0x20b   :  { %v1929_v61 = vadd.f32 %v1928_v14, %v1897_v33  ;;  %v1904_v5 = vand.u32 2147483647, %v1871_v46 }
 0x20d   :  { %v1930_v3 = vadd.f32 %v1929_v61, %v1898_v8  ;;  %v1936_v17 = vsel %vm1693_vm14, %v1904_v5, 0.0 }
 0x20f   :  { %v1931_v39 = vadd.f32 %v1930_v3, %v1899_v27 }
 0x211   :  { %v1932_v57 = vadd.f32 %v1931_v39, %v1900_v35 }
 0x213   :  { %v1933_v18 = vadd.f32 %v1932_v57, %v1901_v9 }
 0x215   :  { %v1934_v36 = vadd.f32 %v1933_v18, %v1902_v50 }
 0x217   :  { %v1935_v58 = vadd.f32 %v1934_v36, %v1903_v10 }
 0x219   :  { %v1937_v52 = vadd.f32 %v1936_v17, %v1935_v58 }
 0x21b   :  { %1938 = vadd.xlane.f32.xlu0 %v1937_v52 }
 0x27b   :  { %v2016_v48 = vpop.xlane.xlu1 %2015 }
 0x27c   :  { %v2017_v20 = vrot.slane %v2016_v48, 4 }
 0x27e   :  { %v2018_v31 = vadd.f32 %v2017_v20, %v2016_v48 }
 0x280   :  { %v2019_v22 = vrot.slane %v2018_v31, 2 }
 0x282   :  { %v2020_v16 = vadd.f32 %v2019_v22, %v2018_v31 }
 0x283   :  { %v1697_v60 = vpop.xlane.xlu0 %1696 }
 0x284   :  { %v1698_v24 = vrot.slane %v1697_v60, 4  ;;  %v2021_v2 = vrot.slane %v2020_v16, 1 }
 0x286   :  { %v1699_v56 = vadd.f32 %v1698_v24, %v1697_v60  ;;  %v2022_v0 = vadd.f32 %v2021_v2, %v2020_v16 }
 0x288   :  { %v1700_v23 = vrot.slane %v1699_v56, 2 }
 0x28a   :  { %v1701_v32 = vadd.f32 %v1700_v23, %v1699_v56  ;;  %v2060_v54 = vpop.xlane.xlu1 %2059 }
 0x28b   :  { %v2061_v41 = vrot.slane %v2060_v54, 4 }
 0x28c   :  { %v1702_v53 = vrot.slane %v1701_v32, 1 }
 0x28d   :  { %v2062_v51 = vadd.f32 %v2061_v41, %v2060_v54 }
 0x28e   :  { %v1703_v12 = vadd.f32 %v1702_v53, %v1701_v32 }
 0x28f   :  { %v2063_v44 = vrot.slane %v2062_v51, 2 }
 0x290   :  { %2161 = vpush %v1703_v12 }
 0x291   :  { %v2064_v40 = vadd.f32 %v2063_v44, %v2062_v51 }
 0x293   :  { %v2065_v49 = vrot.slane %v2064_v40, 1 }
 0x295   :  { %v2066_v4 = vadd.f32 %v2065_v49, %v2064_v40 }
 0x2a4   :  { %v1939_v43 = vpop.xlane.xlu0 %1938 }
 0x2a5   :  { %v1940_v25 = vrot.slane %v1939_v43, 4 }
 0x2a7   :  { %v1941_v29 = vadd.f32 %v1940_v25, %v1939_v43 }
 0x2a9   :  { %v1942_v45 = vrot.slane %v1941_v29, 2 }
 0x2ab   :  { %v1943_v6 = vadd.f32 %v1942_v45, %v1941_v29 }
 0x2ad   :  { %v1944_v62 = vrot.slane %v1943_v6, 1 }
 0x2af   :  { %v1945_v15 = vadd.f32 %v1944_v62, %v1943_v6 }
 0x2b1   :  { %2163 = vpush %v1945_v15 }
 0x2b2   :  { %2165 = vpush %v2022_v0 }
 0x2b3   :  { %2167 = vpush %v2066_v4 }
 0x2c1   :  { %s2162_s0 = spop %2161 }
 0x2c2   :  { %1706 = sst [smem:[#allocation2]] %s2162_s0 }
 0x2e2   :  { %s2164_s14 = spop %2163 }
 0x2e3   :  { %1948 = sst [smem:[#allocation2 + $0x1]] %s2164_s14  ;;  %s2166_s15 = spop %2165 }
 0x2e4   :  { %2025 = sst [smem:[#allocation2 + $0x2]] %s2166_s15  ;;  %s2168_s16 = spop %2167 }
 0x2e5   :  { %2069 = sst [smem:[#allocation2 + $0x3]] %s2168_s16 }
 0x2e6   :  { %2492 = shalt.err (!%p2489_p4)
}
 0x2e7   :  { %s2496_s18 = smov [#allocation2]  }
 0x2e8   :  { %2079 = dma.smem_to_vmem %s2496_s18, 16, %s2077_s13, [#allocation3]  }
 0x2e9   :  { %2493 = dma.done.wait [#allocation3], 16  }
 0x2ea   :  { %2494 = vsyncadd [#allocation3], 4294967280 }
 0x2eb   :  { %2083 = sfence }
 0x2ec   :  { %2084 = vsyncpa [#allocation3], 1 }

// kernel: criterion_forward.10
= control target key start
LH: loop header
LB: loop body
LE: loop exit
PB: predicated region body
PF: predicated region fallthrough
CT: control target
= control target key end

     0   :  { %v1420_v2 = vmov 0   ;;  %s2526_s0 = inlined_call_operand.vmem [shape: bf16[130,128], index: 0, kind: input, shape index: {}]   ;;  %s2527_s1 = inlined_call_operand.vmem [shape: bf16[130,128], index: 1, kind: input, shape index: {}]   ;;  %s2528_s2 = inlined_call_operand.vmem [shape: bf16[128,256], index: 2, kind: input, shape index: {}]   ;;  %s2529_s3 = inlined_call_operand.vmem [shape: f32[4], index: 3, kind: output, shape index: {}]  }
   0x1   :  { %v1228_v0 = vld [vmem:[%s2528_s2 + $0x74] ss:$8 sps:$4 sm:$0xff]   ;;  %v1230_v1 = vld [vmem:[%s2528_s2 + $0x70] ss:$8 sps:$4 sm:$0xff]   ;;  %213 = vmatprep.mubr.bf16.mxu0 %v1420_v2  ;;  %403 = vmatprep.mubr.bf16.mxu1 %v1420_v2  ;;  %v1231_v3 = vld [vmem:[%s2528_s2 + $0x64] ss:$8 sps:$4 sm:$0xff]  }
   0x2   :  { %181 = vmatprep.subr.bf16.mxu0 %v1228_v0  ;;  %371 = vmatprep.subr.bf16.mxu1 %v1228_v0  ;;  %v1233_v4 = vld [vmem:[%s2528_s2 + $0x60] ss:$8 sps:$4 sm:$0xff]   ;;  %v1234_v5 = vld [vmem:[%s2528_s2 + $0x54] ss:$8 sps:$4 sm:$0xff]   ;;  %v1236_v6 = vld [vmem:[%s2528_s2 + $0x50] ss:$8 sps:$4 sm:$0xff]  }
   0x3   :  { %182 = vmatpush1.bf16.msra.mxu0 %v1230_v1  ;;  %372 = vmatpush1.bf16.msra.mxu1 %v1230_v1  ;;  %v1237_v7 = vld [vmem:[%s2528_s2 + $0x44] ss:$8 sps:$4 sm:$0xff]   ;;  %v1239_v8 = vld [vmem:[%s2528_s2 + $0x40] ss:$8 sps:$4 sm:$0xff]   ;;  %v1240_v9 = vld [vmem:[%s2528_s2 + $0x34] ss:$8 sps:$4 sm:$0xff]  }
   0x4   :  { %183 = vmatprep.subr.bf16.mxu0 %v1231_v3  ;;  %373 = vmatprep.subr.bf16.mxu1 %v1231_v3  ;;  %v1242_v10 = vld [vmem:[%s2528_s2 + $0x30] ss:$8 sps:$4 sm:$0xff]   ;;  %v1243_v11 = vld [vmem:[%s2528_s2 + $0x24] ss:$8 sps:$4 sm:$0xff]   ;;  %v1245_v12 = vld [vmem:[%s2528_s2 + $0x20] ss:$8 sps:$4 sm:$0xff]  }
   0x5   :  { %v1246_v13 = vld [vmem:[%s2528_s2 + $0x14] ss:$8 sps:$4 sm:$0xff]   ;;  %v1248_v14 = vld [vmem:[%s2528_s2 + $0x10] ss:$8 sps:$4 sm:$0xff]   ;;  %v1249_v15 = vld [vmem:[%s2528_s2 + $0x4] ss:$8 sps:$4 sm:$0xff]  }
   0x6   :  { %v1251_v16 = vld [vmem:[%s2528_s2] ss:$8 sps:$4 sm:$0xff]  }
   0x7   :  { %184 = vmatpush1.bf16.msra.mxu0 %v1233_v4  ;;  %374 = vmatpush1.bf16.msra.mxu1 %v1233_v4 }
   0x8   :  { %185 = vmatprep.subr.bf16.mxu0 %v1234_v5  ;;  %375 = vmatprep.subr.bf16.mxu1 %v1234_v5 }
   0xb   :  { %186 = vmatpush1.bf16.msra.mxu0 %v1236_v6  ;;  %376 = vmatpush1.bf16.msra.mxu1 %v1236_v6 }
   0xc   :  { %187 = vmatprep.subr.bf16.mxu0 %v1237_v7  ;;  %377 = vmatprep.subr.bf16.mxu1 %v1237_v7 }
   0xf   :  { %188 = vmatpush1.bf16.msra.mxu0 %v1239_v8  ;;  %378 = vmatpush1.bf16.msra.mxu1 %v1239_v8 }
  0x10   :  { %189 = vmatprep.subr.bf16.mxu0 %v1240_v9  ;;  %379 = vmatprep.subr.bf16.mxu1 %v1240_v9 }
  0x13   :  { %190 = vmatpush1.bf16.msra.mxu0 %v1242_v10  ;;  %380 = vmatpush1.bf16.msra.mxu1 %v1242_v10 }
  0x14   :  { %191 = vmatprep.subr.bf16.mxu0 %v1243_v11  ;;  %381 = vmatprep.subr.bf16.mxu1 %v1243_v11 }
  0x17   :  { %192 = vmatpush1.bf16.msra.mxu0 %v1245_v12  ;;  %382 = vmatpush1.bf16.msra.mxu1 %v1245_v12 }
  0x18   :  { %193 = vmatprep.subr.bf16.mxu0 %v1246_v13  ;;  %383 = vmatprep.subr.bf16.mxu1 %v1246_v13 }
  0x1b   :  { %194 = vmatpush1.bf16.msra.mxu0 %v1248_v14  ;;  %384 = vmatpush1.bf16.msra.mxu1 %v1248_v14 }
  0x1c   :  { %195 = vmatprep.subr.bf16.mxu0 %v1249_v15  ;;  %385 = vmatprep.subr.bf16.mxu1 %v1249_v15 }
  0x1d   :  { %8 = vsyncpa [#allocation3], 0  ;;  %v1252_v17 = vld [vmem:[%s2526_s0] sm:$0xff]   ;;  %v1254_v19 = vld [vmem:[%s2526_s0 + $0x8] sm:$0xff]   ;;  %v883_v5 = vlaneseq  ;;  %s1175_s25 = sshll.u32 %s2529_s3, 4  ;;  %s1176_s25 = int_to_ptr.vmem [resolvable:$true] %s1175_s25 }
  0x1e   :  { %v1253_v18 = vld [vmem:[%s2527_s1] sm:$0xff]   ;;  %v1255_v20 = vld [vmem:[%s2527_s1 + $0x8] sm:$0xff]   ;;  %v1256_v21 = vld [vmem:[%s2526_s0 + $0x10] sm:$0xff]   ;;  %s1406_s29 = scalar_lea.vmem %s1176_s25, 16  ;;  %p1411_p1 = scmp.lt.s32.totalorder %s1176_s25, %s1176_s25 }
  0x1f   :  { %196 = vmatpush1.bf16.msra.mxu0 %v1251_v16  ;;  %386 = vmatpush1.bf16.msra.mxu1 %v1251_v16  ;;  %v1257_v22 = vld [vmem:[%s2527_s1 + $0x10] sm:$0xff]   ;;  %v1258_v23 = vld [vmem:[%s2526_s0 + $0x18] sm:$0xff]   ;;  %v1260_v25 = vld [vmem:[%s2526_s0 + $0x20] sm:$0xff]   ;;  %v1579_v16 = vand.u32 127, %v883_v5  ;;  %p1407_p0 = scmp.ne.s32.totalorder %s1176_s25, %s1406_s29  ;;  %p1412_p2 = scmp.lt.s32.totalorder %s1406_s29, %s1406_s29 }
  0x20   :  { %v1259_v24 = vld [vmem:[%s2527_s1 + $0x18] sm:$0xff]   ;;  %v1261_v26 = vld [vmem:[%s2527_s1 + $0x20] sm:$0xff]   ;;  %v1262_v27 = vld [vmem:[%s2526_s0 + $0x28] sm:$0xff]  }
  0x21   :  { %v1263_v28 = vld [vmem:[%s2527_s1 + $0x28] sm:$0xff]   ;;  %v1264_v29 = vld [vmem:[%s2526_s0 + $0x30] sm:$0xff]   ;;  %v1266_v31 = vld [vmem:[%s2526_s0 + $0x38] sm:$0xff]   ;;  %vm885_vm4 = vcmp.lt.s32.totalorder %v1579_v16, 65  ;;  %p1413_p3 = por %p1412_p2, %p1411_p1 }
  0x22   :  { %214 = vmatmul.mubr.bf16.vlgmr.msra.gmra.mxu0 %v1252_v17  ;;  %404 = vmatmul.mubr.bf16.vlgmr.msra.gmra.mxu1 %v1253_v18  ;;  %v1265_v30 = vld [vmem:[%s2527_s1 + $0x30] sm:$0xff]   ;;  %v1267_v32 = vld [vmem:[%s2527_s1 + $0x38] sm:$0xff]   ;;  %v1268_v33 = vld [vmem:[%s2526_s0 + $0x40] ss:$0 sps:$4 sm:$0x11]  }
  0x23   :  { %223 = vmatprep.mubr.bf16.mxu0 %v1420_v2  ;;  %413 = vmatprep.mubr.bf16.mxu1 %v1420_v2  ;;  %v1269_v34 = vld [vmem:[%s2527_s1 + $0x40] ss:$0 sps:$4 sm:$0x11]   ;;  %p1414_p4 = pnand %p1413_p3, %p1407_p0 }
  0x2a   :  { %224 = vmatmul.mubr.bf16.gmra.mxu0 %v1254_v19  ;;  %414 = vmatmul.mubr.bf16.gmra.mxu1 %v1255_v20 }
  0x2b   :  { %233 = vmatprep.mubr.bf16.mxu0 %v1420_v2  ;;  %423 = vmatprep.mubr.bf16.mxu1 %v1420_v2 }
  0x32   :  { %234 = vmatmul.mubr.bf16.gmra.mxu0 %v1256_v21  ;;  %424 = vmatmul.mubr.bf16.gmra.mxu1 %v1257_v22 }
  0x33   :  { %243 = vmatprep.mubr.bf16.mxu0 %v1420_v2  ;;  %433 = vmatprep.mubr.bf16.mxu1 %v1420_v2 }
  0x3a   :  { %244 = vmatmul.mubr.bf16.gmra.mxu0 %v1258_v23  ;;  %434 = vmatmul.mubr.bf16.gmra.mxu1 %v1259_v24 }
  0x3b   :  { %253 = vmatprep.mubr.bf16.mxu0 %v1420_v2  ;;  %443 = vmatprep.mubr.bf16.mxu1 %v1420_v2 }
  0x42   :  { %254 = vmatmul.mubr.bf16.gmra.mxu0 %v1260_v25  ;;  %444 = vmatmul.mubr.bf16.gmra.mxu1 %v1261_v26 }
  0x43   :  { %263 = vmatprep.mubr.bf16.mxu0 %v1420_v2  ;;  %453 = vmatprep.mubr.bf16.mxu1 %v1420_v2 }
  0x4a   :  { %264 = vmatmul.mubr.bf16.gmra.mxu0 %v1262_v27  ;;  %454 = vmatmul.mubr.bf16.gmra.mxu1 %v1263_v28 }
  0x4b   :  { %273 = vmatprep.mubr.bf16.mxu0 %v1420_v2  ;;  %463 = vmatprep.mubr.bf16.mxu1 %v1420_v2 }
  0x52   :  { %274 = vmatmul.mubr.bf16.gmra.mxu0 %v1264_v29  ;;  %464 = vmatmul.mubr.bf16.gmra.mxu1 %v1265_v30 }
  0x53   :  { %283 = vmatprep.mubr.bf16.mxu0 %v1420_v2  ;;  %473 = vmatprep.mubr.bf16.mxu1 %v1420_v2 }
  0x5a   :  { %284 = vmatmul.mubr.bf16.gmra.mxu0 %v1266_v31  ;;  %474 = vmatmul.mubr.bf16.gmra.mxu1 %v1267_v32 }
  0x5b   :  { %293 = vmatprep.mubr.bf16.mxu0 %v1420_v2  ;;  %483 = vmatprep.mubr.bf16.mxu1 %v1420_v2 }
  0x62   :  { %294 = vmatmul.mubr.bf16.gmra.mxu0 %v1268_v33  ;;  %484 = vmatmul.mubr.bf16.gmra.mxu1 %v1269_v34 }
  0xe2   :  { %v215_v35 = vpop.f32.mrf.mxu0  ;;  %v405_v36 = vpop.f32.mrf.mxu1 }
  0xe3   :  { %v492_v39 = vmul.f32 %v215_v35, %v215_v35  ;;  %v679_v40 = vmul.f32 %v405_v36, %v405_v36 }
  0xe4   :  { %v217_v37 = vpop.f32.mrf.mxu0  ;;  %v407_v38 = vpop.f32.mrf.mxu1 }
  0xe5   :  { %v509_v41 = vmul.f32 %v217_v37, %v217_v37  ;;  %v696_v42 = vmul.f32 %v407_v38, %v407_v38 }
  0xe6   :  { %v219_v43 = vpop.f32.mrf.mxu0  ;;  %v409_v44 = vpop.f32.mrf.mxu1 }
  0xe7   :  { %v526_v45 = vadd.f32 %v509_v41, %v492_v39  ;;  %v713_v46 = vadd.f32 %v696_v42, %v679_v40  ;;  %v493_v55 = vmul.f32 %v219_v43, %v219_v43  ;;  %v680_v56 = vmul.f32 %v409_v44, %v409_v44 }
  0xe8   :  { %v221_v47 = vpop.f32.mrf.mxu0  ;;  %v411_v48 = vpop.f32.mrf.mxu1 }
  0xe9   :  { %v1562_v49 = vmax.f32 %v526_v45, 1e-08  ;;  %v1564_v50 = vmax.f32 %v713_v46, 1e-08  ;;  %v510_v51 = vmul.f32 %v221_v47, %v221_v47  ;;  %v697_v52 = vmul.f32 %v411_v48, %v411_v48 }
  0xea   :  { %v225_v53 = vpop.f32.mrf.mxu0  ;;  %v415_v54 = vpop.f32.mrf.mxu1 }
  0xeb   :  { %1270 = vrsqrt.f32 %v1562_v49  ;;  %v527_v59 = vadd.f32 %v510_v51, %v493_v55  ;;  %v714_v60 = vadd.f32 %v697_v52, %v680_v56  ;;  %v494_v61 = vmul.f32 %v225_v53, %v225_v53 }
  0xec   :  { %1272 = vrsqrt.f32 %v1564_v50  ;;  %v227_v57 = vpop.f32.mrf.mxu0  ;;  %v417_v58 = vpop.f32.mrf.mxu1  ;;  %v681_v62 = vmul.f32 %v415_v54, %v415_v54  ;;  %vm562_vm0 = vcmp.eq.f32.partialorder %v1562_v49, inf  ;;  %vm564_vm1 = vcmp.eq.f32.partialorder %v1562_v49, 0.0 }
  0xed   :  { %v511_v63 = vmul.f32 %v227_v57, %v227_v57  ;;  %v698_v0 = vmul.f32 %v417_v58, %v417_v58  ;;  %v1568_v3 = vmax.f32 %v527_v59, 1e-08  ;;  %v1570_v4 = vmax.f32 %v714_v60, 1e-08 }
  0xee   :  { %v229_v1 = vpop.f32.mrf.mxu0  ;;  %v419_v2 = vpop.f32.mrf.mxu1  ;;  %v565_v21 = vand.u32 2147483648, %v1562_v49  ;;  %vm749_vm2 = vcmp.eq.f32.partialorder %v1564_v50, inf  ;;  %vm751_vm3 = vcmp.eq.f32.partialorder %v1564_v50, 0.0  ;;  %v752_v30 = vand.u32 2147483648, %v1564_v50 }
  0xef   :  { %v528_v6 = vadd.f32 %v511_v63, %v494_v61  ;;  %v715_v7 = vadd.f32 %v698_v0, %v681_v62  ;;  %1274 = vrsqrt.f32 %v1568_v3  ;;  %v495_v19 = vmul.f32 %v229_v1, %v229_v1 }
  0xf0   :  { %v231_v8 = vpop.f32.mrf.mxu0  ;;  %v421_v9 = vpop.f32.mrf.mxu1  ;;  %1276 = vrsqrt.f32 %v1570_v4  ;;  %v682_v20 = vmul.f32 %v419_v2, %v419_v2  ;;  %vm569_vm5 = vcmp.eq.f32.partialorder %v1568_v3, inf  ;;  %vm571_vm6 = vcmp.eq.f32.partialorder %v1568_v3, 0.0 }
  0xf1   :  { %v1574_v12 = vmax.f32 %v528_v6, 1e-08  ;;  %v1576_v13 = vmax.f32 %v715_v7, 1e-08  ;;  %v512_v14 = vmul.f32 %v231_v8, %v231_v8  ;;  %v699_v15 = vmul.f32 %v421_v9, %v421_v9 }
  0xf2   :  { %v235_v10 = vpop.f32.mrf.mxu0  ;;  %v425_v11 = vpop.f32.mrf.mxu1  ;;  %v572_v40 = vand.u32 2147483648, %v1568_v3  ;;  %vm756_vm7 = vcmp.eq.f32.partialorder %v1570_v4, inf  ;;  %vm758_vm8 = vcmp.eq.f32.partialorder %v1570_v4, 0.0  ;;  %v759_v48 = vand.u32 2147483648, %v1570_v4 }
  0xf3   :  { %1278 = vrsqrt.f32 %v1574_v12  ;;  %v496_v22 = vmul.f32 %v235_v10, %v235_v10  ;;  %v529_v25 = vadd.f32 %v512_v14, %v495_v19  ;;  %v716_v26 = vadd.f32 %v699_v15, %v682_v20 }
  0xf4   :  { %v237_v17 = vpop.f32.mrf.mxu0  ;;  %v427_v18 = vpop.f32.mrf.mxu1  ;;  %1280 = vrsqrt.f32 %v1576_v13  ;;  %v683_v31 = vmul.f32 %v425_v11, %v425_v11  ;;  %vm576_vm9 = vcmp.eq.f32.partialorder %v1574_v12, inf  ;;  %vm578_vm10 = vcmp.eq.f32.partialorder %v1574_v12, 0.0 }
  0xf5   :  { %v513_v27 = vmul.f32 %v237_v17, %v237_v17  ;;  %v700_v28 = vmul.f32 %v427_v18, %v427_v18  ;;  %v1592_v36 = vmax.f32 %v529_v25, 1e-08  ;;  %v1594_v37 = vmax.f32 %v716_v26, 1e-08 }
  0xf6   :  { %v239_v23 = vpop.f32.mrf.mxu0  ;;  %v429_v24 = vpop.f32.mrf.mxu1  ;;  %v579_v0 = vand.u32 2147483648, %v1574_v12  ;;  %vm763_vm11 = vcmp.eq.f32.partialorder %v1576_v13, inf  ;;  %vm765_vm12 = vcmp.eq.f32.partialorder %v1576_v13, 0.0  ;;  %v766_v6 = vand.u32 2147483648, %v1576_v13 }
  0xf7   :  { %v530_v38 = vadd.f32 %v513_v27, %v496_v22  ;;  %v717_v41 = vadd.f32 %v700_v28, %v683_v31  ;;  %1282 = vrsqrt.f32 %v1592_v36  ;;  %v684_v7 = vmul.f32 %v429_v24, %v429_v24 }
  0xf8   :  { %v1271_v29 = vpop.eup %1270  ;;  %v241_v32 = vpop.f32.mrf.mxu0  ;;  %1284 = vrsqrt.f32 %v1594_v37  ;;  %vm583_vm13 = vcmp.eq.f32.partialorder %v1592_v36, inf  ;;  %vm585_vm14 = vcmp.eq.f32.partialorder %v1592_v36, 0.0  ;;  %vm770_vm15 = vcmp.eq.f32.partialorder %v1594_v37, inf }
  0xf9   :  { %v431_v33 = vpop.f32.mrf.mxu1  ;;  %v1273_v34 = vpop.eup %1272  ;;  %v561_v35 = vmul.f32 %v1271_v29, %v1562_v49  ;;  %v514_v45 = vmul.f32 %v241_v32, %v241_v32  ;;  %v1628_v61 = vmax.f32 %v530_v38, 1e-08 }
  0xfa   :  { %v748_v39 = vmul.f32 %v1273_v34, %v1564_v50  ;;  %v1599_v42 = vpop.f32.mrf.mxu0  ;;  %v701_v11 = vmul.f32 %v431_v33, %v431_v33 }
  0xfb   :  { %v1601_v43 = vpop.f32.mrf.mxu1  ;;  %v563_v44 = vsel %vm562_vm0, %v1562_v49, %v561_v35  ;;  %v497_v49 = vmul.f32 %v239_v23, %v239_v23  ;;  %vm772_vm0 = vcmp.eq.f32.partialorder %v1594_v37, 0.0 }
  0xfc   :  { %v566_v46 = vsel %vm564_vm1, %v565_v21, %v563_v44  ;;  %v750_v47 = vsel %vm749_vm2, %v1564_v50, %v748_v39  ;;  %v1615_v51 = vpop.f32.mrf.mxu0  ;;  %v1275_v54 = vpop.eup %1274  ;;  %v1630_v50 = vmax.f32 %v717_v41, 1e-08  ;;  %vm590_vm1 = vcmp.eq.f32.partialorder %v1628_v61, inf }
  0xfd   :  { %v1617_v52 = vpop.f32.mrf.mxu1  ;;  %1286 = vlog2.f32 %v566_v46  ;;  %v753_v53 = vsel %vm751_vm3, %v752_v30, %v750_v47  ;;  %v1277_v59 = vpop.eup %1276  ;;  %v568_v60 = vmul.f32 %v1275_v54, %v1568_v3  ;;  %v531_v62 = vadd.f32 %v514_v45, %v497_v49 }
  0xfe   :  { %v866_v55 = vsub.f32 %v753_v53, %v566_v46  ;;  %v886_v56 = vmul.f32 %v753_v53, %v753_v53  ;;  %1288 = vlog2.f32 %v753_v53  ;;  %v1623_v57 = vpop.f32.mrf.mxu0  ;;  %v755_v63 = vmul.f32 %v1277_v59, %v1570_v4 }
  0xff   :  { %v1625_v58 = vpop.f32.mrf.mxu1  ;;  %v570_v5 = vsel %vm569_vm5, %v1568_v3, %v568_v60  ;;  %1290 = vrsqrt.f32 %v1628_v61  ;;  %v1669_v27 = vmax.f32 %v531_v62, 1e-08  ;;  %v586_v49 = vand.u32 2147483648, %v1592_v36 }
 0x100   :  { %v1636_v1 = vpop.f32.mrf.mxu0  ;;  %v1279_v8 = vpop.eup %1278  ;;  %v573_v9 = vsel %vm571_vm6, %v572_v40, %v570_v5  ;;  %v757_v10 = vsel %vm756_vm7, %v1570_v4, %v755_v63  ;;  %1292 = vrsqrt.f32 %v1630_v50  ;;  %v903_v18 = vsel %vm885_vm4, %v886_v56, 0.0 }
 0x101   :  { %v1638_v2 = vpop.f32.mrf.mxu1  ;;  %v1281_v17 = vpop.eup %1280  ;;  %1294 = vlog2.f32 %v573_v9  ;;  %v760_v3 = vsel %vm758_vm8, %v759_v48, %v757_v10  ;;  %v575_v19 = vmul.f32 %v1279_v8, %v1574_v12  ;;  %v920_v25 = vand.u32 2147483647, %v866_v55 }
 0x102   :  { %v1651_v14 = vpop.f32.mrf.mxu0  ;;  %v867_v20 = vsub.f32 %v760_v3, %v573_v9  ;;  %v887_v21 = vmul.f32 %v760_v3, %v760_v3  ;;  %1296 = vlog2.f32 %v760_v3  ;;  %v762_v22 = vmul.f32 %v1281_v17, %v1576_v13 }
 0x103   :  { %v1653_v15 = vpop.f32.mrf.mxu1  ;;  %v1096_v26 = vmul.f32 %v866_v55, %v866_v55  ;;  %v577_v4 = vsel %vm576_vm9, %v1574_v12, %v575_v19  ;;  %v773_v63 = vand.u32 2147483648, %v1594_v37  ;;  %vm592_vm2 = vcmp.eq.f32.partialorder %v1628_v61, 0.0 }
 0x104   :  { %v1662_v23 = vpop.f32.mrf.mxu0  ;;  %v904_v28 = vsel %vm885_vm4, %v887_v21, 0.0  ;;  %v921_v29 = vand.u32 2147483647, %v867_v20  ;;  %v1097_v30 = vmul.f32 %v867_v20, %v867_v20  ;;  %v580_v31 = vsel %vm578_vm10, %v579_v0, %v577_v4  ;;  %v1283_v38 = vpop.eup %1282 }
 0x105   :  { %v1664_v24 = vpop.f32.mrf.mxu1  ;;  %v1141_v34 = vadd.f32 %v904_v28, %v903_v18  ;;  %1298 = vlog2.f32 %v580_v31  ;;  %v764_v35 = vsel %vm763_vm11, %v1576_v13, %v762_v22  ;;  %v1285_v45 = vpop.eup %1284  ;;  %v582_v48 = vmul.f32 %v1283_v38, %v1592_v36 }
 0x106   :  { %v1675_v32 = vpop.f32.mrf.mxu0  ;;  %v1683_v39 = vadd.f32 %v921_v29, %v920_v25  ;;  %v1685_v40 = vadd.f32 %v1097_v30, %v1096_v26  ;;  %v767_v12 = vsel %vm765_vm12, %v766_v6, %v764_v35  ;;  %1300 = vrsqrt.f32 %v1669_v27 }
 0x107   :  { %v1677_v33 = vpop.f32.mrf.mxu1  ;;  %v1694_v46 = vsub.f32 %v767_v12, %v580_v31  ;;  %v888_v47 = vmul.f32 %v767_v12, %v767_v12  ;;  %1302 = vlog2.f32 %v767_v12  ;;  %v769_v54 = vmul.f32 %v1285_v45, %v1594_v37 }
 0x108   :  { %v1690_v41 = vpop.f32.mrf.mxu0  ;;  %v718_v13 = vadd.f32 %v701_v11, %v684_v7  ;;  %v584_v6 = vsel %vm583_vm13, %v1592_v36, %v582_v48  ;;  %v593_v25 = vand.u32 2147483648, %v1628_v61  ;;  %vm777_vm3 = vcmp.eq.f32.partialorder %v1630_v50, inf }
 0x109   :  { %v1692_v44 = vpop.f32.mrf.mxu1  ;;  %v905_v62 = vsel %vm885_vm4, %v888_v47, 0.0  ;;  %v771_v7 = vsel %vm770_vm15, %v1594_v37, %v769_v54  ;;  %v587_v10 = vsel %vm585_vm14, %v586_v49, %v584_v6  ;;  %v780_v38 = vand.u32 2147483648, %v1630_v50 }
 0x10a   :  { %v1287_v53 = vpop.eup %1286  ;;  %v1700_v55 = vpop.f32.mrf.mxu0  ;;  %v1712_v5 = vadd.f32 %v1141_v34, %v905_v62  ;;  %v1724_v11 = vsel %vm772_vm0, %v773_v63, %v771_v7  ;;  %v1726_v17 = vmax.f32 %v718_v13, 1e-08  ;;  %vm779_vm5 = vcmp.eq.f32.partialorder %v1630_v50, 0.0 }
 0x10b   :  { %v1702_v56 = vpop.f32.mrf.mxu1  ;;  %v1289_v59 = vpop.eup %1288  ;;  %v1704_v60 = vmul.f32 0.6931472, %v1287_v53  ;;  %v1731_v19 = vsub.f32 %v1724_v11, %v587_v10  ;;  %v702_v48 = vmul.f32 %v1617_v52, %v1617_v52  ;;  %v498_v13 = vmul.f32 %v1599_v42, %v1599_v42 }
 0x10c   :  { %v1710_v0 = vmul.f32 0.6931472, %v1289_v59  ;;  %2532 = vst [vmem:[#allocation5_spill] sm:$0xff] %v1712_v5  ;;  %v1718_v8 = vpop.f32.mrf.mxu0  ;;  %v1291_v18 = vpop.eup %1290  ;;  %1304 = vrsqrt.f32 %v1726_v17  ;;  %v685_v59 = vmul.f32 %v1601_v43, %v1601_v43  ;;  %vm597_vm6 = vcmp.eq.f32.partialorder %v1669_v27, inf }
 0x10d   :  { %v1720_v9 = vpop.f32.mrf.mxu1  ;;  %v1293_v21 = vpop.eup %1292  ;;  %v589_v22 = vmul.f32 %v1291_v18, %v1628_v61  ;;  %vm599_vm7 = vcmp.eq.f32.partialorder %v1669_v27, 0.0  ;;  %vm784_vm8 = vcmp.eq.f32.partialorder %v1726_v17, inf  ;;  %vm786_vm9 = vcmp.eq.f32.partialorder %v1726_v17, 0.0 }
 0x10e   :  { %v1733_v20 = vpop.f32.mrf.mxu0  ;;  %v1295_v36 = vpop.eup %1294  ;;  %v776_v31 = vmul.f32 %v1293_v21, %v1630_v50  ;;  %v719_v18 = vadd.f32 %v702_v48, %v685_v59  ;;  %v499_v21 = vmul.f32 %v1623_v57, %v1623_v57 }
 0x10f   :  { %v1735_v37 = vpop.f32.mrf.mxu1  ;;  %v1297_v28 = vpop.eup %1296  ;;  %v1745_v29 = vmul.f32 0.6931472, %v1295_v36  ;;  %v591_v30 = vsel %vm590_vm1, %v1628_v61, %v589_v22  ;;  %v515_v61 = vmul.f32 %v1615_v51, %v1615_v51  ;;  %v686_v36 = vmul.f32 %v1625_v58, %v1625_v58 }
 0x110   :  { %v1741_v26 = vpop.f32.mrf.mxu0  ;;  %v1750_v34 = vmul.f32 0.6931472, %v1297_v28  ;;  %v594_v35 = vsel %vm592_vm2, %v593_v25, %v591_v30  ;;  %v778_v47 = vsel %vm777_vm3, %v1630_v50, %v776_v31  ;;  %v516_v25 = vmul.f32 %v1636_v1, %v1636_v1 }
 0x111   :  { %v1743_v4 = vpop.f32.mrf.mxu1  ;;  %v1766_v54 = vsel %vm779_vm5, %v780_v38, %v778_v47  ;;  %v532_v7 = vadd.f32 %v515_v61, %v498_v13  ;;  %v703_v28 = vmul.f32 %v1638_v2, %v1638_v2  ;;  %v1818_v59 = vmax.f32 %v719_v18, 1e-08 }
 0x112   :  { %v1754_v12 = vpop.f32.mrf.mxu0  ;;  %v1299_v53 = vpop.eup %1298  ;;  %v1779_v52 = vsub.f32 %v1766_v54, %v594_v35  ;;  %v1804_v61 = vadd.f32 %v516_v25, %v499_v21  ;;  %v500_v21 = vmul.f32 %v1651_v14, %v1651_v14 }
 0x113   :  { %v1756_v45 = vpop.f32.mrf.mxu1  ;;  %v1301_v51 = vpop.eup %1300  ;;  %v1776_v63 = vmul.f32 0.6931472, %v1299_v53  ;;  %v1795_v30 = vmax.f32 %v532_v7, 1e-08  ;;  %v720_v58 = vadd.f32 %v703_v28, %v686_v36  ;;  %v687_v36 = vmul.f32 %v1653_v15, %v1653_v15 }
 0x114   :  { %v1772_v62 = vpop.f32.mrf.mxu0  ;;  %v1303_v6 = vpop.eup %1302  ;;  %v596_v47 = vmul.f32 %v1301_v51, %v1669_v27  ;;  %v517_v51 = vmul.f32 %v1662_v23, %v1662_v23  ;;  %vm791_vm12 = vcmp.eq.f32.partialorder %v1818_v59, inf  ;;  %vm793_vm14 = vcmp.eq.f32.partialorder %v1818_v59, 0.0 }
 0x115   :  { %v1774_v50 = vpop.f32.mrf.mxu1  ;;  %2533 = vst [vmem:[#allocation6_spill] sm:$0xff] %v1776_v63  ;;  %v1787_v43 = vmul.f32 0.6931472, %v1303_v6  ;;  %1306 = vrsqrt.f32 %v1795_v30  ;;  %v704_v6 = vmul.f32 %v1664_v24, %v1664_v24  ;;  %v787_v24 = vand.u32 2147483648, %v1726_v17 }
 0x116   :  { %v1783_v42 = vpop.f32.mrf.mxu0  ;;  %1308 = vlog2.f32 %v587_v10  ;;  %v598_v13 = vsel %vm597_vm6, %v1669_v27, %v596_v47  ;;  %v600_v10 = vand.u32 2147483648, %v1669_v27  ;;  %v1837_v28 = vmax.f32 %v720_v58, 1e-08 }
 0x117   :  { %v1785_v22 = vpop.f32.mrf.mxu1  ;;  %2534 = vst [vmem:[#allocation7_spill] sm:$0xff] %v1787_v43  ;;  %1310 = vlog2.f32 %v1724_v11  ;;  %v534_v14 = vadd.f32 %v517_v51, %v500_v21  ;;  %v721_v38 = vadd.f32 %v704_v6, %v687_v36  ;;  %v705_v27 = vmul.f32 %v1692_v44, %v1692_v44 }
 0x118   :  { %v1797_v31 = vpop.f32.mrf.mxu0  ;;  %1312 = vlog2.f32 %v594_v35  ;;  %v601_v47 = vsel %vm599_vm7, %v600_v10, %v598_v13  ;;  %v518_v35 = vmul.f32 %v1690_v41, %v1690_v41  ;;  %v688_v41 = vmul.f32 %v1677_v33, %v1677_v33 }
 0x119   :  { %v1799_v57 = vpop.f32.mrf.mxu1  ;;  %v1305_v7 = vpop.eup %1304  ;;  %1314 = vrsqrt.f32 %v1818_v59  ;;  %v1875_v21 = vmul.f32 %v1694_v46, %v1694_v46  ;;  %v689_v43 = vmul.f32 %v1702_v56, %v1702_v56  ;;  %v706_v10 = vmul.f32 %v1720_v9, %v1720_v9 }
 0x11a   :  { %v1806_v48 = vpop.f32.mrf.mxu0  ;;  %v783_v23 = vmul.f32 %v1305_v7, %v1726_v17  ;;  %1316 = vrsqrt.f32 %v1837_v28  ;;  %v503_v63 = vmul.f32 %v1733_v20, %v1733_v20  ;;  %v1901_v20 = vmax.f32 %v1804_v61, 1e-08 }
 0x11b   :  { %v1808_v1 = vpop.f32.mrf.mxu1  ;;  %1318 = vlog2.f32 %v1766_v54  ;;  %vm604_vm10 = vcmp.eq.f32.partialorder %v1795_v30, inf  ;;  %vm606_vm11 = vcmp.eq.f32.partialorder %v1795_v30, 0.0  ;;  %vm798_vm13 = vcmp.eq.f32.partialorder %v1837_v28, inf }
 0x11c   :  { %v1813_v2 = vpop.f32.mrf.mxu0  ;;  %v785_v3 = vsel %vm784_vm8, %v1726_v17, %v783_v23  ;;  %v889_v17 = vmul.f32 %v1724_v11, %v1724_v11  ;;  %v722_v23 = vadd.f32 %v705_v27, %v688_v41  ;;  %v502_v11 = vmul.f32 %v1700_v55, %v1700_v55 }
 0x11d   :  { %v1815_v53 = vpop.f32.mrf.mxu1  ;;  %v1848_v7 = vsel %vm786_vm9, %v787_v24, %v785_v3  ;;  %v501_v3 = vmul.f32 %v1675_v32, %v1675_v32  ;;  %v519_v32 = vmul.f32 %v1718_v8, %v1718_v8  ;;  %v2535_v55 = vsub.f32 %v1704_v60, %v1710_v0 }
 0x11e   :  { %v1830_v25 = vpop.f32.mrf.mxu0  ;;  %v1859_v51 = vsub.f32 %v1848_v7, %v601_v47  ;;  %v1896_v8 = vsel %vm885_vm4, %v889_v17, 0.0  ;;  %v2537_v60 = vsub.f32 %v1745_v29, %v1750_v34  ;;  %v1910_v17 = vmul.f32 %v1731_v19, %v1731_v19 }
 0x11f   :  { %v1832_v18 = vpop.f32.mrf.mxu1  ;;  %v535_v36 = vadd.f32 %v518_v35, %v501_v3  ;;  %v520_v35 = vmul.f32 %v1741_v26, %v1741_v26  ;;  %v1892_v3 = vand.u32 2147483647, %v2535_v55  ;;  %v536_v41 = vadd.f32 %v519_v32, %v502_v11 }
 0x120   :  { %v1841_v49 = vpop.f32.mrf.mxu0  ;;  %v723_v26 = vadd.f32 %v706_v10, %v689_v43  ;;  %v1906_v0 = vand.u32 2147483647, %v2537_v60  ;;  %v1914_v11 = vmul.f32 %v1766_v54, %v1766_v54  ;;  %1320 = vlog2.f32 %v601_v47 }
 0x121   :  { %v1843_v15 = vpop.f32.mrf.mxu1  ;;  %2536 = vst [vmem:[#allocation8_spill] sm:$0xff] %v1892_v3  ;;  %v537_v5 = vadd.f32 %v520_v35, %v503_v63  ;;  %v1918_v63 = vmax.f32 %v534_v14, 1e-08  ;;  %v707_v29 = vmul.f32 %v1743_v4, %v1743_v4  ;;  %v607_v34 = vand.u32 2147483648, %v1795_v30 }
 0x122   :  { %v1854_v58 = vpop.f32.mrf.mxu0  ;;  %v1307_v27 = vpop.eup %1306  ;;  %2538 = vst [vmem:[#allocation9_spill] sm:$0xff] %v1906_v0  ;;  %v794_v43 = vand.u32 2147483648, %v1818_v59  ;;  %v1925_v10 = vmax.f32 %v721_v38, 1e-08  ;;  %1322 = vrsqrt.f32 %v1901_v20  ;;  %v1930_v35 = vmax.f32 %v535_v36, 1e-08 }
 0x123   :  { %v1856_v13 = vpop.f32.mrf.mxu1  ;;  %v603_v61 = vmul.f32 %v1307_v27, %v1795_v30  ;;  %v690_v14 = vmul.f32 %v1735_v37, %v1735_v37  ;;  %1324 = vlog2.f32 %v1848_v7  ;;  %v614_v38 = vand.u32 2147483648, %v1901_v20 }
 0x124   :  { %v1868_v6 = vpop.f32.mrf.mxu0  ;;  %v1939_v55 = vmax.f32 %v722_v23, 1e-08  ;;  %1326 = vrsqrt.f32 %v1918_v63  ;;  %v1945_v36 = vmax.f32 %v536_v41, 1e-08  ;;  %v1950_v60 = vmax.f32 %v537_v5, 1e-08 }
 0x125   :  { %v1870_v44 = vpop.f32.mrf.mxu1  ;;  %v724_v37 = vadd.f32 %v707_v29, %v690_v14  ;;  %1328 = vrsqrt.f32 %v1925_v10  ;;  %v504_v5 = vmul.f32 %v1754_v12, %v1754_v12  ;;  %v521_v29 = vmul.f32 %v1772_v62, %v1772_v62 }
 0x126   :  { %v299_v24 = vpop.f32.mrf.mxu0  ;;  %1330 = vrsqrt.f32 %v1930_v35  ;;  %vm800_vm15 = vcmp.eq.f32.partialorder %v1837_v28, 0.0  ;;  %v691_v14 = vmul.f32 %v1756_v45, %v1756_v45  ;;  %v505_v62 = vmul.f32 %v1783_v42, %v1783_v42 }
 0x127   :  { %v489_v33 = vpop.f32.mrf.mxu1  ;;  %1332 = vrsqrt.f32 %v1939_v55  ;;  %v538_v12 = vadd.f32 %v521_v29, %v504_v5  ;;  %v709_v45 = vmul.f32 %v1799_v57, %v1799_v57  ;;  %v506_v5 = vmul.f32 %v1806_v48, %v1806_v48 }
 0x128   :  { %v300_v9 = vpop.f32.mrf.mxu0  ;;  %v1309_v33 = vpop.eup %1308  ;;  %1334 = vrsqrt.f32 %v1945_v36  ;;  %v523_v42 = vmul.f32 %v1813_v2, %v1813_v2  ;;  %vm611_vm0 = vcmp.eq.f32.partialorder %v1901_v20, inf  ;;  %vm618_vm1 = vcmp.eq.f32.partialorder %v1918_v63, inf }
 0x129   :  { %v490_v24 = vpop.f32.mrf.mxu1  ;;  %v1311_v32 = vpop.eup %1310  ;;  %v1927_v47 = vmul.f32 0.6931472, %v1309_v33  ;;  %v605_v9 = vsel %vm604_vm10, %v1795_v30, %v603_v61  ;;  %v801_v33 = vand.u32 2147483648, %v1837_v28  ;;  %v621_v61 = vand.u32 2147483648, %v1918_v63 }
 0x12a   :  { %v1313_v54 = vpop.eup %1312  ;;  %v1934_v4 = vmul.f32 0.6931472, %v1311_v32  ;;  %v1960_v41 = vsel %vm606_vm11, %v607_v34, %v605_v9  ;;  %v708_v30 = vmul.f32 %v1774_v50, %v1774_v50  ;;  %v1974_v34 = vmax.f32 %v723_v26, 1e-08 }
 0x12b   :  { %v1315_v27 = vpop.eup %1314  ;;  %v1952_v23 = vmul.f32 0.6931472, %v1313_v54  ;;  %1336 = vrsqrt.f32 %v1950_v60  ;;  %v692_v9 = vmul.f32 %v1785_v22, %v1785_v22  ;;  %v1987_v50 = vmax.f32 %v724_v37, 1e-08 }
 0x12c   :  { %v1317_v24 = vpop.eup %1316  ;;  %v790_v32 = vmul.f32 %v1315_v27, %v1818_v59  ;;  %v725_v27 = vadd.f32 %v708_v30, %v691_v14  ;;  %v1989_v26 = vmax.f32 %v538_v12, 1e-08  ;;  %1338 = vlog2.f32 %v1960_v41 }
 0x12d   :  { %2539 = vst [vmem:[#allocation10_spill] sm:$0xff] %v1952_v23  ;;  %v797_v54 = vmul.f32 %v1317_v24, %v1837_v28  ;;  %v522_v24 = vmul.f32 %v1797_v31, %v1797_v31  ;;  %v1985_v56 = vpop.eup %1318  ;;  %v726_v57 = vadd.f32 %v709_v45, %v692_v9  ;;  %v540_v48 = vadd.f32 %v523_v42, %v506_v5 }
 0x12e   :  { %v1995_v29 = vpop.eup %1320  ;;  %v792_v22 = vsel %vm791_vm12, %v1818_v59, %v790_v32  ;;  %1340 = vrsqrt.f32 %v1989_v26  ;;  %v2003_v14 = vmax.f32 %v725_v27, 1e-08  ;;  %v710_v32 = vmul.f32 %v1815_v53, %v1815_v53 }
 0x12f   :  { %v539_v31 = vadd.f32 %v522_v24, %v505_v62  ;;  %v799_v2 = vsel %vm798_vm13, %v1837_v28, %v797_v54  ;;  %1342 = vrsqrt.f32 %v1974_v34  ;;  %v1323_v12 = vpop.eup %1322  ;;  %v2017_v62 = vsel %vm793_vm14, %v794_v43, %v792_v22 }
 0x130   :  { %1344 = vrsqrt.f32 %v1987_v50  ;;  %v2020_v27 = vmax.f32 %v726_v57, 1e-08  ;;  %v693_v54 = vmul.f32 %v1808_v1, %v1808_v1  ;;  %v2024_v9 = vpop.eup %1324  ;;  %v507_v53 = vmul.f32 %v1830_v25, %v1830_v25 }
 0x131   :  { %v2009_v30 = vmax.f32 %v539_v31, 1e-08  ;;  %v524_v59 = vmul.f32 %v1841_v49, %v1841_v49  ;;  %v711_v43 = vmul.f32 %v1843_v15, %v1843_v15  ;;  %v1327_v24 = vpop.eup %1326  ;;  %v2036_v45 = vsel %vm800_vm15, %v801_v33, %v799_v2 }
 0x132   :  { %v2040_v1 = vmax.f32 %v540_v48, 1e-08  ;;  %v694_v25 = vmul.f32 %v1832_v18, %v1832_v18  ;;  %v1329_v5 = vpop.eup %1328  ;;  %vm625_vm2 = vcmp.eq.f32.partialorder %v1930_v35, inf  ;;  %v727_v49 = vadd.f32 %v710_v32, %v693_v54 }
 0x133   :  { %1346 = vrsqrt.f32 %v2009_v30  ;;  %v541_v42 = vadd.f32 %v524_v59, %v507_v53  ;;  %v508_v15 = vmul.f32 %v1854_v58, %v1854_v58  ;;  %v525_v28 = vmul.f32 %v1868_v6, %v1868_v6  ;;  %v1331_v33 = vpop.eup %1330 }
 0x134   :  { %1348 = vrsqrt.f32 %v2003_v14  ;;  %vm805_vm3 = vcmp.eq.f32.partialorder %v1925_v10, inf  ;;  %v728_v22 = vadd.f32 %v711_v43, %v694_v25  ;;  %v695_v18 = vmul.f32 %v1856_v13, %v1856_v13  ;;  %v1333_v57 = vpop.eup %1332 }
 0x135   :  { %1350 = vrsqrt.f32 %v2020_v27  ;;  %v712_v31 = vmul.f32 %v1870_v44, %v1870_v44  ;;  %vm613_vm5 = vcmp.eq.f32.partialorder %v1901_v20, 0.0  ;;  %vm620_vm6 = vcmp.eq.f32.partialorder %v1918_v63, 0.0  ;;  %v1335_v2 = vpop.eup %1334 }
 0x136   :  { %1352 = vlog2.f32 %v2017_v62  ;;  %v628_v58 = vand.u32 2147483648, %v1930_v35  ;;  %v2059_v6 = vmax.f32 %v541_v42, 1e-08  ;;  %v542_v48 = vadd.f32 %v525_v28, %v508_v15 }
 0x137   :  { %v610_v32 = vmul.f32 %v1323_v12, %v1901_v20  ;;  %1354 = vlog2.f32 %v2036_v45  ;;  %vm627_vm7 = vcmp.eq.f32.partialorder %v1930_v35, 0.0  ;;  %vm812_vm8 = vcmp.eq.f32.partialorder %v1939_v55, inf }
 0x138   :  { %v729_v13 = vadd.f32 %v712_v31, %v695_v18  ;;  %v1337_v44 = vpop.eup %1336  ;;  %v617_v54 = vmul.f32 %v1327_v24, %v1918_v63  ;;  %1356 = vrsqrt.f32 %v2040_v1  ;;  %v2067_v53 = vmax.f32 %v727_v49, 1e-08 }
 0x139   :  { %v2069_v59 = vmax.f32 %v542_v48, 1e-08  ;;  %v624_v43 = vmul.f32 %v1331_v33, %v1930_v35  ;;  %1358 = vrsqrt.f32 %v2059_v6  ;;  %v2073_v12 = vmax.f32 %v728_v22, 1e-08  ;;  %v2081_v49 = vpop.eup %1338 }
 0x13a   :  { %v2075_v25 = vmax.f32 %v729_v13, 1e-08  ;;  %v804_v42 = vmul.f32 %v1329_v5, %v1925_v10  ;;  %v631_v24 = vmul.f32 %v1335_v2, %v1945_v36  ;;  %v612_v28 = vsel %vm611_vm0, %v1901_v20, %v610_v32 }
 0x13b   :  { %1360 = vrsqrt.f32 %v2069_v59  ;;  %v811_v33 = vmul.f32 %v1333_v57, %v1939_v55  ;;  %v638_v22 = vmul.f32 %v1337_v44, %v1950_v60  ;;  %v1341_v18 = vpop.eup %1340  ;;  %v619_v5 = vsel %vm618_vm1, %v1918_v63, %v617_v54 }
 0x13c   :  { %1362 = vrsqrt.f32 %v2075_v25  ;;  %vm807_vm9 = vcmp.eq.f32.partialorder %v1925_v10, 0.0  ;;  %vm632_vm10 = vcmp.eq.f32.partialorder %v1945_v36, inf  ;;  %v635_v31 = vand.u32 2147483648, %v1945_v36  ;;  %v1343_v48 = vpop.eup %1342 }
 0x13d   :  { %1364 = vrsqrt.f32 %v2067_v53  ;;  %v626_v57 = vsel %vm625_vm2, %v1930_v35, %v624_v43  ;;  %vm814_vm11 = vcmp.eq.f32.partialorder %v1939_v55, 0.0  ;;  %vm819_vm12 = vcmp.eq.f32.partialorder %v1974_v34, inf  ;;  %v1345_v32 = vpop.eup %1344 }
 0x13e   :  { %1366 = vrsqrt.f32 %v2073_v12  ;;  %v806_v13 = vsel %vm805_vm3, %v1925_v10, %v804_v42  ;;  %v633_v44 = vsel %vm632_vm10, %v1945_v36, %v631_v24  ;;  %vm639_vm13 = vcmp.eq.f32.partialorder %v1950_v60, inf }
 0x13f   :  { %v645_v54 = vmul.f32 %v1341_v18, %v1989_v26  ;;  %v813_v15 = vsel %vm812_vm8, %v1939_v55, %v811_v33  ;;  %v2116_v2 = vsel %vm613_vm5, %v614_v38, %v612_v28  ;;  %v2122_v42 = vsel %vm620_vm6, %v621_v61, %v619_v5 }
 0x140   :  { %v1347_v43 = vpop.eup %1346  ;;  %v640_v24 = vsel %vm639_vm13, %v1950_v60, %v638_v22  ;;  %v818_v37 = vmul.f32 %v1343_v48, %v1974_v34  ;;  %v2128_v33 = vsel %vm627_vm7, %v628_v58, %v626_v57  ;;  %vm634_vm14 = vcmp.eq.f32.partialorder %v1945_v36, 0.0 }
 0x141   :  { %v1349_v18 = vpop.eup %1348  ;;  %v642_v20 = vand.u32 2147483648, %v1950_v60  ;;  %v825_v38 = vmul.f32 %v1345_v32, %v1987_v50  ;;  %v2133_v28 = vsel %vm634_vm14, %v635_v31, %v633_v44  ;;  %vm641_vm15 = vcmp.eq.f32.partialorder %v1950_v60, 0.0 }
 0x142   :  { %vm646_vm0 = vcmp.eq.f32.partialorder %v1989_v26, inf  ;;  %v1351_v63 = vpop.eup %1350  ;;  %vm648_vm1 = vcmp.eq.f32.partialorder %v1989_v26, 0.0  ;;  %v652_v35 = vmul.f32 %v1347_v43, %v2009_v30  ;;  %v649_v58 = vand.u32 2147483648, %v1989_v26 }
 0x143   :  { %v2137_v61 = vsel %vm641_vm15, %v642_v20, %v640_v24  ;;  %v647_v22 = vsel %vm646_vm0, %v1989_v26, %v645_v54  ;;  %v2142_v36 = vpop.eup %1352  ;;  %vm653_vm2 = vcmp.eq.f32.partialorder %v2009_v30, inf  ;;  %vm655_vm3 = vcmp.eq.f32.partialorder %v2009_v30, 0.0 }
 0x144   :  { %v656_v60 = vand.u32 2147483648, %v2009_v30  ;;  %v2148_v5 = vpop.eup %1354  ;;  %vm660_vm5 = vcmp.eq.f32.partialorder %v2040_v1, inf  ;;  %v832_v57 = vmul.f32 %v1349_v18, %v2003_v14  ;;  %v2154_v44 = vsel %vm648_vm1, %v649_v58, %v647_v22 }
 0x145   :  { %v1357_v32 = vpop.eup %1356  ;;  %v677_v26 = vand.u32 2147483648, %v2069_v59  ;;  %v2540_v54 = vand.u32 2147483648, %v1925_v10  ;;  %v839_v24 = vmul.f32 %v1351_v63, %v2020_v27  ;;  %v654_v31 = vsel %vm653_vm2, %v2009_v30, %v652_v35 }
 0x146   :  { %v1359_v20 = vpop.eup %1358  ;;  %vm674_vm6 = vcmp.eq.f32.partialorder %v2069_v59, inf  ;;  %v2541_v18 = vand.u32 2147483648, %v1939_v55  ;;  %v820_v58 = vsel %vm819_vm12, %v1974_v34, %v818_v37  ;;  %vm826_vm7 = vcmp.eq.f32.partialorder %v1987_v50, inf }
 0x147   :  { %v2161_v43 = vsel %vm807_vm9, %v2540_v54, %v806_v13  ;;  %vm667_vm8 = vcmp.eq.f32.partialorder %v2059_v6, inf  ;;  %vm821_vm9 = vcmp.eq.f32.partialorder %v1974_v34, 0.0  ;;  %v827_v13 = vsel %vm826_vm7, %v1987_v50, %v825_v38 }
 0x148   :  { %v2170_v22 = vsel %vm814_vm11, %v2541_v18, %v813_v15  ;;  %v1361_v10 = vpop.eup %1360  ;;  %vm828_vm10 = vcmp.eq.f32.partialorder %v1987_v50, 0.0  ;;  %vm833_vm13 = vcmp.eq.f32.partialorder %v2003_v14, inf  ;;  %v659_v15 = vmul.f32 %v1357_v32, %v2040_v1 }
 0x149   :  { %v1363_v55 = vpop.eup %1362  ;;  %vm662_vm11 = vcmp.eq.f32.partialorder %v2040_v1, 0.0  ;;  %v829_v37 = vand.u32 2147483648, %v1987_v50  ;;  %v834_v63 = vsel %vm833_vm13, %v2003_v14, %v832_v57  ;;  %vm840_vm12 = vcmp.eq.f32.partialorder %v2020_v27, inf }
 0x14a   :  { %v1365_v35 = vpop.eup %1364  ;;  %v2188_v54 = vsel %vm655_vm3, %v656_v60, %v654_v31  ;;  %vm676_vm14 = vcmp.eq.f32.partialorder %v2069_v59, 0.0  ;;  %v2542_v38 = vand.u32 2147483648, %v1974_v34  ;;  %v836_v32 = vand.u32 2147483648, %v2003_v14 }
 0x14b   :  { %v841_v48 = vsel %vm840_vm12, %v2020_v27, %v839_v24  ;;  %v1367_v0 = vpop.eup %1366  ;;  %v666_v57 = vmul.f32 %v1359_v20, %v2059_v6  ;;  %vm669_vm15 = vcmp.eq.f32.partialorder %v2059_v6, 0.0  ;;  %v2201_v30 = vsel %vm828_vm10, %v829_v37, %v827_v13 }
 0x14c   :  { %v2193_v18 = vsel %vm821_vm9, %v2542_v38, %v820_v58  ;;  %vm835_vm0 = vcmp.eq.f32.partialorder %v2003_v14, 0.0  ;;  %v843_v60 = vand.u32 2147483648, %v2020_v27  ;;  %v673_v34 = vmul.f32 %v1361_v10, %v2069_v59 }
 0x14d   :  { %v2206_v31 = vsel %vm835_vm0, %v836_v32, %v834_v63  ;;  %vm842_vm1 = vcmp.eq.f32.partialorder %v2020_v27, 0.0  ;;  %v860_v24 = vmul.f32 %v1363_v55, %v2075_v25  ;;  %v846_v20 = vmul.f32 %v1365_v35, %v2067_v53 }
 0x14e   :  { %v2210_v58 = vsel %vm842_vm1, %v843_v60, %v841_v48  ;;  %v2215_v50 = vsub.f32 %v2017_v62, %v1960_v41  ;;  %v2219_v14 = vsub.f32 %v2036_v45, %v2116_v2  ;;  %v661_v10 = vsel %vm660_vm5, %v2040_v1, %v659_v15 }
 0x14f   :  { %v853_v27 = vmul.f32 %v1367_v0, %v2073_v12  ;;  %v2227_v48 = vsub.f32 %v2161_v43, %v2122_v42  ;;  %v2231_v13 = vsub.f32 %v2170_v22, %v2128_v33  ;;  %vm861_vm2 = vcmp.eq.f32.partialorder %v2075_v25, inf }
 0x150   :  { %v2236_v41 = vsub.f32 %v2193_v18, %v2133_v28  ;;  %v2240_v55 = vsub.f32 %v2201_v30, %v2137_v61  ;;  %v2244_v0 = vsub.f32 %v2206_v31, %v2154_v44  ;;  %v675_v15 = vsel %vm674_vm6, %v2069_v59, %v673_v34 }
 0x151   :  { %vm847_vm3 = vcmp.eq.f32.partialorder %v2067_v53, inf  ;;  %v862_v37 = vsel %vm861_vm2, %v2075_v25, %v860_v24  ;;  %v2253_v63 = vsub.f32 %v2210_v58, %v2188_v54  ;;  %v668_v35 = vsel %vm667_vm8, %v2059_v6, %v666_v57 }
 0x152   :  { %v848_v38 = vsel %vm847_vm3, %v2067_v53, %v846_v20  ;;  %vm854_vm5 = vcmp.eq.f32.partialorder %v2073_v12, inf  ;;  %v864_v32 = vand.u32 2147483648, %v2075_v25  ;;  %v2543_v60 = vand.u32 2147483648, %v2040_v1 }
 0x153   :  { %v850_v24 = vand.u32 2147483648, %v2067_v53  ;;  %v855_v3 = vsel %vm854_vm5, %v2073_v12, %v853_v27  ;;  %vm863_vm6 = vcmp.eq.f32.partialorder %v2075_v25, 0.0  ;;  %v2272_v57 = vsel %vm676_vm14, %v677_v26, %v675_v15 }
 0x154   :  { %v2265_v34 = vsel %vm662_vm11, %v2543_v60, %v661_v10  ;;  %vm849_vm7 = vcmp.eq.f32.partialorder %v2067_v53, 0.0  ;;  %v857_v20 = vand.u32 2147483648, %v2073_v12  ;;  %v2276_v23 = vsel %vm863_vm6, %v864_v32, %v862_v37 }
 0x155   :  { %v2544_v1 = vand.u32 2147483648, %v2059_v6  ;;  %v2284_v60 = vsel %vm849_vm7, %v850_v24, %v848_v38  ;;  %vm856_vm8 = vcmp.eq.f32.partialorder %v2073_v12, 0.0  ;;  %vm952_vm9 = vcmask 1041408  }
 0x156   :  { %1368 = vlog2.f32 %v2116_v2  ;;  %v2288_v59 = vsel %vm856_vm8, %v857_v20, %v855_v3  ;;  %v1100_v53 = vmul.f32 %v1779_v52, %v1779_v52  ;;  %v1114_v25 = vadd.f32 %v1685_v40, %v1875_v21 }
 0x157   :  { %v2282_v10 = vsel %vm669_vm15, %v2544_v1, %v668_v35  ;;  %1370 = vlog2.f32 %v2122_v42  ;;  %v2296_v6 = vmul.f32 0.6931472, %v1985_v56  ;;  %v2300_v26 = vmul.f32 %v1848_v7, %v1848_v7 }
 0x158   :  { %v2304_v12 = vsub.f32 %v2276_v23, %v2272_v57  ;;  %1372 = vlog2.f32 %v2128_v33  ;;  %v2308_v3 = vmul.f32 0.6931472, %v1995_v29  ;;  %v1101_v40 = vmul.f32 %v1859_v51, %v1859_v51 }
 0x159   :  { %1374 = vlog2.f32 %v2133_v28  ;;  %v1115_v21 = vadd.f32 %v1114_v25, %v1910_v17  ;;  %v2316_v7 = vsub.f32 %v2284_v60, %v2265_v34  ;;  %v2320_v56 = vsub.f32 %v2288_v59, %v2282_v10 }
 0x15a   :  { %1376 = vlog2.f32 %v2137_v61  ;;  %v1102_v29 = vmul.f32 %v2215_v50, %v2215_v50  ;;  %v1103_v2 = vmul.f32 %v2219_v14, %v2219_v14  ;;  %v1104_v17 = vmul.f32 %v2227_v48, %v2227_v48 }
 0x15b   :  { %1378 = vlog2.f32 %v2154_v44  ;;  %v1116_v42 = vadd.f32 %v1115_v21, %v1100_v53  ;;  %v1105_v33 = vmul.f32 %v2231_v13, %v2231_v13  ;;  %v1106_v28 = vmul.f32 %v2236_v41, %v2236_v41 }
 0x15c   :  { %1380 = vlog2.f32 %v2188_v54  ;;  %v1112_v61 = vmul.f32 %v2304_v12, %v2304_v12  ;;  %v924_v27 = vand.u32 2147483647, %v1779_v52  ;;  %v2545_v15 = vand.u32 2147483647, %v1694_v46 }
 0x15d   :  { %1382 = vlog2.f32 %v2161_v43  ;;  %v1117_v44 = vadd.f32 %v1116_v42, %v1101_v40  ;;  %v1107_v54 = vmul.f32 %v2240_v55, %v2240_v55  ;;  %v1108_v35 = vmul.f32 %v2244_v0, %v2244_v0 }
 0x15e   :  { %v938_v37 = vadd.f32 %v1683_v39, %v2545_v15  ;;  %1384 = vlog2.f32 %v2170_v22  ;;  %v2349_v38 = vmul.f32 %v2253_v63, %v2253_v63  ;;  %v925_v52 = vand.u32 2147483647, %v1859_v51 }
 0x15f   :  { %1386 = vlog2.f32 %v2193_v18  ;;  %v1118_v32 = vadd.f32 %v1117_v44, %v1102_v29  ;;  %v2546_v46 = vand.u32 2147483647, %v1731_v19  ;;  %v2358_v24 = vmul.f32 %v2316_v7, %v2316_v7 }
 0x160   :  { %1388 = vlog2.f32 %v2201_v30  ;;  %v926_v20 = vand.u32 2147483647, %v2215_v50  ;;  %v927_v1 = vand.u32 2147483647, %v2219_v14  ;;  %v2364_v25 = vsel %vm952_vm9, %v1112_v61, 0.0 }
 0x161   :  { %v939_v39 = vadd.f32 %v938_v37, %v2546_v46  ;;  %1390 = vlog2.f32 %v2206_v31  ;;  %v1119_v53 = vadd.f32 %v1118_v32, %v1103_v2  ;;  %v928_v19 = vand.u32 2147483647, %v2227_v48 }
 0x162   :  { %1392 = vlog2.f32 %v2210_v58  ;;  %v929_v40 = vand.u32 2147483647, %v2231_v13  ;;  %v930_v21 = vand.u32 2147483647, %v2236_v41  ;;  %v931_v50 = vand.u32 2147483647, %v2240_v55 }
 0x163   :  { %v940_v51 = vadd.f32 %v939_v39, %v924_v27  ;;  %v1369_v29 = vpop.eup %1368  ;;  %v1120_v42 = vadd.f32 %v1119_v53, %v1104_v17  ;;  %v932_v14 = vand.u32 2147483647, %v2244_v0  ;;  %v2374_v61 = vmul.f32 %v2320_v56, %v2320_v56 }
 0x164   :  { %v1371_v2 = vpop.eup %1370  ;;  %v933_v27 = vand.u32 2147483647, %v2253_v63  ;;  %v892_v55 = vmul.f32 %v2017_v62, %v2017_v62  ;;  %v893_v17 = vmul.f32 %v2036_v45, %v2036_v45  ;;  %v894_v46 = vmul.f32 %v2161_v43, %v2161_v43 }
 0x165   :  { %v941_v44 = vadd.f32 %v940_v51, %v925_v52  ;;  %v1373_v15 = vpop.eup %1372  ;;  %v1121_v41 = vadd.f32 %v1120_v42, %v1105_v33  ;;  %v895_v39 = vmul.f32 %v2170_v22, %v2170_v22  ;;  %v896_v53 = vmul.f32 %v2193_v18, %v2193_v18 }
 0x166   :  { %v1375_v32 = vpop.eup %1374  ;;  %v897_v62 = vmul.f32 %v2201_v30, %v2201_v30  ;;  %v907_v45 = vsel %vm885_vm4, %v1914_v11, 0.0  ;;  %v2397_v43 = vmul.f32 %v2206_v31, %v2206_v31  ;;  %v2401_v22 = vmul.f32 %v2210_v58, %v2210_v58 }
 0x167   :  { %v942_v37 = vadd.f32 %v941_v44, %v926_v20  ;;  %v1377_v33 = vpop.eup %1376  ;;  %v1122_v20 = vadd.f32 %v1121_v41, %v1106_v28  ;;  %v908_v18 = vsel %vm885_vm4, %v2300_v26, 0.0  ;;  %v2547_v28 = vld [vmem:[#allocation5_spill] sm:$0xff]  ;;  %v909_v11 = vsel %vm885_vm4, %v892_v55, 0.0 }
 0x168   :  { %v1379_v42 = vpop.eup %1378  ;;  %v1143_v30 = vadd.f32 %v2547_v28, %v1896_v8  ;;  %v910_v31 = vsel %vm885_vm4, %v893_v17, 0.0  ;;  %v911_v58 = vsel %vm885_vm4, %v894_v46, 0.0  ;;  %v912_v13 = vsel %vm885_vm4, %v895_v39, 0.0 }
 0x169   :  { %v943_v51 = vadd.f32 %v942_v37, %v927_v1  ;;  %v1381_v1 = vpop.eup %1380  ;;  %v1123_v44 = vadd.f32 %v1122_v20, %v1107_v54  ;;  %v913_v26 = vsel %vm885_vm4, %v896_v53, 0.0  ;;  %v2419_v20 = vmul.f32 0.6931472, %v2081_v49 }
 0x16a   :  { %v1383_v37 = vpop.eup %1382  ;;  %v1144_v8 = vadd.f32 %v1143_v30, %v907_v45  ;;  %v2421_v55 = vmul.f32 0.6931472, %v1369_v29  ;;  %v2423_v52 = vmul.f32 0.6931472, %v1371_v2  ;;  %v2425_v46 = vmul.f32 0.6931472, %v1373_v15 }
 0x16b   :  { %v944_v41 = vadd.f32 %v943_v51, %v928_v19  ;;  %v1385_v28 = vpop.eup %1384  ;;  %v1124_v54 = vadd.f32 %v1123_v44, %v1108_v35  ;;  %v2427_v48 = vmul.f32 0.6931472, %v1375_v32  ;;  %v2430_v30 = vmul.f32 0.6931472, %v1377_v33 }
 0x16c   :  { %v1387_v17 = vpop.eup %1386  ;;  %v1145_v51 = vadd.f32 %v1144_v8, %v908_v18  ;;  %v2432_v35 = vmul.f32 0.6931472, %v1379_v42  ;;  %v2434_v29 = vmul.f32 0.6931472, %v1381_v1  ;;  %v1011_v18 = vmul.f32 0.6931472, %v2024_v9 }
 0x16d   :  { %v945_v19 = vadd.f32 %v944_v41, %v929_v40  ;;  %v1389_v39 = vpop.eup %1388  ;;  %v1125_v53 = vadd.f32 %v1124_v54, %v2349_v38  ;;  %v2438_v2 = vmul.f32 0.6931472, %v2142_v36  ;;  %v2442_v38 = vmul.f32 0.6931472, %v2148_v5 }
 0x16e   :  { %v1391_v49 = vpop.eup %1390  ;;  %v1146_v40 = vadd.f32 %v1145_v51, %v909_v11  ;;  %v2446_v42 = vmul.f32 0.6931472, %v1385_v28  ;;  %v2448_v41 = vmul.f32 0.6931472, %v1387_v17  ;;  %v2450_v1 = vmul.f32 0.6931472, %v1389_v39 }
 0x16f   :  { %v946_v45 = vadd.f32 %v945_v19, %v930_v21  ;;  %v1393_v15 = vpop.eup %1392  ;;  %v1126_v32 = vadd.f32 %v1125_v53, %v2358_v24  ;;  %v2444_v21 = vmul.f32 0.6931472, %v1383_v37  ;;  %v2455_v11 = vmul.f32 0.6931472, %v1391_v49  ;;  %v2552_v17 = vld [vmem:[#allocation6_spill] sm:$0xff]  ;;  %v2553_v51 = vld [vmem:[#allocation7_spill] sm:$0xff] }
 0x170   :  { %v1147_v33 = vadd.f32 %v1146_v40, %v910_v31  ;;  %v1037_v5 = vsub.f32 %v1927_v47, %v1934_v4  ;;  %v2548_v31 = vld [vmem:[#allocation10_spill] sm:$0xff]  ;;  %v1039_v8 = vsub.f32 %v2308_v3, %v1011_v18  ;;  %v914_v0 = vsel %vm885_vm4, %v897_v62, 0.0 }
 0x171   :  { %v947_v44 = vadd.f32 %v946_v45, %v931_v50  ;;  %v1127_v9 = vadd.f32 %v1126_v32, %v2374_v61  ;;  %v2459_v50 = vmul.f32 0.6931472, %v1393_v15  ;;  %v1038_v37 = vsub.f32 %v2548_v31, %v2296_v6  ;;  %v2556_v45 = vld [vmem:[#allocation9_spill] sm:$0xff] }
 0x172   :  { %v1148_v24 = vadd.f32 %v1147_v33, %v911_v58  ;;  %v1041_v4 = vsub.f32 %v2421_v55, %v2442_v38  ;;  %v1042_v6 = vsub.f32 %v2423_v52, %v2444_v21  ;;  %v1043_v3 = vsub.f32 %v2425_v46, %v2446_v42 }
 0x173   :  { %v948_v36 = vadd.f32 %v947_v44, %v932_v14  ;;  %v1129_v28 = vadd.f32 %v2364_v25, %v1127_v9  ;;  %v1040_v14 = vsub.f32 %v2419_v20, %v2438_v2  ;;  %v2549_v63 = vand.u32 2147483647, %v2316_v7 }
 0x174   :  { %v1149_v47 = vadd.f32 %v1148_v24, %v912_v13  ;;  %v1045_v62 = vsub.f32 %v2430_v30, %v2450_v1  ;;  %v1046_v13 = vsub.f32 %v2432_v35, %v2455_v11  ;;  %1394 = vlog2.f32 %v2265_v34 }
 0x175   :  { %v949_v61 = vadd.f32 %v948_v36, %v933_v27  ;;  %1130 = vadd.xlane.f32.xlu1 %v1129_v28  ;;  %v1044_v27 = vsub.f32 %v2427_v48, %v2448_v41  ;;  %v2550_v52 = vand.u32 2147483647, %v2304_v12  ;;  %v1047_v7 = vsub.f32 %v2434_v29, %v2459_v50 }
 0x176   :  { %v1150_v54 = vadd.f32 %v1149_v47, %v913_v26  ;;  %1396 = vlog2.f32 %v2282_v10  ;;  %v2551_v48 = vand.u32 2147483647, %v2320_v56  ;;  %v900_v20 = vmul.f32 %v2284_v60, %v2284_v60 }
 0x177   :  { %v950_v25 = vadd.f32 %v949_v61, %v2549_v63  ;;  %v953_v58 = vsel %vm952_vm9, %v2550_v52, 0.0  ;;  %v915_v34 = vsel %vm885_vm4, %v2397_v43, 0.0  ;;  %1398 = vlog2.f32 %v2272_v57 }
 0x178   :  { %v901_v12 = vmul.f32 %v2288_v59, %v2288_v59  ;;  %v902_v26 = vmul.f32 %v2276_v23, %v2276_v23  ;;  %v1151_v55 = vadd.f32 %v1150_v54, %v914_v0  ;;  %1400 = vlog2.f32 %v2284_v60  ;;  %v2555_v60 = vld [vmem:[#allocation8_spill] sm:$0xff] }
 0x179   :  { %v951_v19 = vadd.f32 %v950_v25, %v2551_v48  ;;  %v916_v56 = vsel %vm885_vm4, %v2401_v22, 0.0  ;;  %v2554_v46 = vsub.f32 %v2552_v17, %v2553_v51  ;;  %1402 = vlog2.f32 %v2276_v23 }
 0x17a   :  { %v1152_v57 = vadd.f32 %v1151_v55, %v915_v34  ;;  %1404 = vlog2.f32 %v2288_v59  ;;  %v917_v39 = vsel %vm885_vm4, %v900_v20, 0.0  ;;  %v1054_v53 = vand.u32 2147483647, %v1037_v5 }
 0x17b   :  { %v954_v10 = vadd.f32 %v953_v58, %v951_v19  ;;  %v1053_v43 = vand.u32 2147483647, %v2554_v46  ;;  %v1068_v30 = vadd.f32 %v2556_v45, %v2555_v60  ;;  %v919_v22 = vsel %vm885_vm4, %v902_v26, 0.0 }
 0x17c   :  { %v1153_v35 = vadd.f32 %v1152_v57, %v916_v56  ;;  %v918_v49 = vsel %vm885_vm4, %v901_v12, 0.0  ;;  %v1055_v40 = vand.u32 2147483647, %v1038_v37  ;;  %v1156_v59 = vsel %vm952_vm9, %v919_v22, 0.0 }
 0x17d   :  { %955 = vadd.xlane.f32.xlu0 %v954_v10  ;;  %v1069_v23 = vadd.f32 %v1068_v30, %v1053_v43  ;;  %v1056_v18 = vand.u32 2147483647, %v1039_v8  ;;  %v1057_v32 = vand.u32 2147483647, %v1040_v14  ;;  %v1058_v33 = vand.u32 2147483647, %v1041_v4 }
 0x17e   :  { %v1154_v29 = vadd.f32 %v1153_v35, %v917_v39  ;;  %v1059_v9 = vand.u32 2147483647, %v1042_v6  ;;  %v1060_v5 = vand.u32 2147483647, %v1043_v3  ;;  %v1061_v8 = vand.u32 2147483647, %v1044_v27 }
 0x17f   :  { %v1070_v2 = vadd.f32 %v1069_v23, %v1054_v53  ;;  %v1062_v4 = vand.u32 2147483647, %v1045_v62  ;;  %v1063_v52 = vand.u32 2147483647, %v1046_v13  ;;  %v1064_v48 = vand.u32 2147483647, %v1047_v7 }
 0x180   :  { %v1155_v15 = vadd.f32 %v1154_v29, %v918_v49 }
 0x181   :  { %v1071_v44 = vadd.f32 %v1070_v2, %v1055_v40  ;;  %v1395_v21 = vpop.eup %1394 }
 0x182   :  { %v1157_v38 = vadd.f32 %v1156_v59, %v1155_v15  ;;  %v995_v31 = vmul.f32 0.6931472, %v1395_v21 }
 0x183   :  { %v1072_v42 = vadd.f32 %v1071_v44, %v1056_v18  ;;  %v1397_v41 = vpop.eup %1396 }
 0x184   :  { %1158 = vadd.xlane.f32.xlu1 %v1157_v38  ;;  %v1399_v1 = vpop.eup %1398  ;;  %v997_v14 = vmul.f32 0.6931472, %v1397_v41 }
 0x185   :  { %v1073_v16 = vadd.f32 %v1072_v42, %v1057_v32  ;;  %v1401_v36 = vpop.eup %1400  ;;  %v999_v61 = vmul.f32 0.6931472, %v1399_v1 }
 0x186   :  { %v1403_v11 = vpop.eup %1402  ;;  %v1029_v37 = vmul.f32 0.6931472, %v1401_v36 }
 0x187   :  { %v1074_v24 = vadd.f32 %v1073_v16, %v1058_v33  ;;  %v1405_v50 = vpop.eup %1404  ;;  %v1033_v0 = vmul.f32 0.6931472, %v1403_v11 }
 0x188   :  { %v1031_v47 = vmul.f32 0.6931472, %v1405_v50  ;;  %v1048_v25 = vsub.f32 %v995_v31, %v1029_v37 }
 0x189   :  { %v1075_v28 = vadd.f32 %v1074_v24, %v1059_v9  ;;  %v1050_v6 = vsub.f32 %v999_v61, %v1033_v0 }
 0x18a   :  { %v1049_v54 = vsub.f32 %v997_v14, %v1031_v47  ;;  %v1065_v3 = vand.u32 2147483647, %v1048_v25 }
 0x18b   :  { %v1076_v63 = vadd.f32 %v1075_v28, %v1060_v5  ;;  %v1067_v34 = vand.u32 2147483647, %v1050_v6 }
 0x18c   :  { %v1066_v12 = vand.u32 2147483647, %v1049_v54 }
 0x18d   :  { %v1077_v58 = vadd.f32 %v1076_v63, %v1061_v8  ;;  %v1083_v55 = vsel %vm952_vm9, %v1067_v34, 0.0 }
 0x18f   :  { %v1078_v19 = vadd.f32 %v1077_v58, %v1062_v4 }
 0x191   :  { %v1079_v20 = vadd.f32 %v1078_v19, %v1063_v52 }
 0x193   :  { %v1080_v26 = vadd.f32 %v1079_v20, %v1064_v48 }
 0x195   :  { %v1081_v27 = vadd.f32 %v1080_v26, %v1065_v3 }
 0x197   :  { %v1082_v10 = vadd.f32 %v1081_v27, %v1066_v12 }
 0x199   :  { %v1084_v56 = vadd.f32 %v1083_v55, %v1082_v10 }
 0x19b   :  { %1085 = vadd.xlane.f32.xlu0 %v1084_v56 }
 0x1fe   :  { %v1131_v7 = vpop.xlane.xlu1 %1130 }
 0x1ff   :  { %v1132_v53 = vrot.slane %v1131_v7, 4 }
 0x201   :  { %v1133_v45 = vadd.f32 %v1132_v53, %v1131_v7 }
 0x203   :  { %v1134_v22 = vrot.slane %v1133_v45, 2 }
 0x205   :  { %v1135_v29 = vadd.f32 %v1134_v22, %v1133_v45 }
 0x206   :  { %v956_v62 = vpop.xlane.xlu0 %955 }
 0x207   :  { %v957_v17 = vrot.slane %v956_v62, 4  ;;  %v1136_v15 = vrot.slane %v1135_v29, 1 }
 0x209   :  { %v958_v51 = vadd.f32 %v957_v17, %v956_v62  ;;  %v1137_v21 = vadd.f32 %v1136_v15, %v1135_v29 }
 0x20b   :  { %v959_v13 = vrot.slane %v958_v51, 2 }
 0x20d   :  { %v960_v46 = vadd.f32 %v959_v13, %v958_v51  ;;  %v1159_v39 = vpop.xlane.xlu1 %1158 }
 0x20e   :  { %v1160_v60 = vrot.slane %v1159_v39, 4 }
 0x20f   :  { %v961_v43 = vrot.slane %v960_v46, 1 }
 0x210   :  { %v1161_v30 = vadd.f32 %v1160_v60, %v1159_v39 }
 0x211   :  { %v962_v57 = vadd.f32 %v961_v43, %v960_v46 }
 0x212   :  { %v1162_v49 = vrot.slane %v1161_v30, 2 }
 0x213   :  { %1218 = vpush %v962_v57 }
 0x214   :  { %v1163_v59 = vadd.f32 %v1162_v49, %v1161_v30 }
 0x216   :  { %v1164_v44 = vrot.slane %v1163_v59, 1 }
 0x218   :  { %v1165_v33 = vadd.f32 %v1164_v44, %v1163_v59 }
 0x224   :  { %v1086_v35 = vpop.xlane.xlu0 %1085 }
 0x225   :  { %v1087_v40 = vrot.slane %v1086_v35, 4 }
 0x227   :  { %v1088_v23 = vadd.f32 %v1087_v40, %v1086_v35 }
 0x229   :  { %v1089_v18 = vrot.slane %v1088_v23, 2 }
 0x22b   :  { %v1090_v2 = vadd.f32 %v1089_v18, %v1088_v23 }
 0x22d   :  { %v1091_v32 = vrot.slane %v1090_v2, 1 }
 0x22f   :  { %v1092_v38 = vadd.f32 %v1091_v32, %v1090_v2 }
 0x231   :  { %1220 = vpush %v1092_v38 }
 0x232   :  { %1222 = vpush %v1137_v21 }
 0x233   :  { %1224 = vpush %v1165_v33 }
 0x244   :  { %s1219_s0 = spop %1218 }
 0x245   :  { %965 = sst [smem:[#allocation2]] %s1219_s0 }
 0x262   :  { %s1221_s26 = spop %1220 }
 0x263   :  { %1095 = sst [smem:[#allocation2 + $0x1]] %s1221_s26  ;;  %s1223_s27 = spop %1222 }
 0x264   :  { %1140 = sst [smem:[#allocation2 + $0x2]] %s1223_s27  ;;  %s1225_s28 = spop %1224 }
 0x265   :  { %1168 = sst [smem:[#allocation2 + $0x3]] %s1225_s28 }
 0x266   :  { %1417 = shalt.err (!%p1414_p4)
}
 0x267   :  { %s1421_s30 = smov [#allocation2]  }
 0x268   :  { %1178 = dma.smem_to_vmem %s1421_s30, 16, %s1176_s25, [#allocation3]  }
 0x269   :  { %1418 = dma.done.wait [#allocation3], 16  }
 0x26a   :  { %1419 = vsyncadd [#allocation3], 4294967280 }
 0x26b   :  { %1182 = sfence }
 0x26c   :  { %1183 = vsyncpa [#allocation3], 1 }

// kernel: criterion_forward.9
= control target key start
LH: loop header
LB: loop body
LE: loop exit
PB: predicated region body
PF: predicated region fallthrough
CT: control target
= control target key end

     0   :  { %s2325_s0 = inlined_call_operand.vmem [shape: bf16[36,256], index: 0, kind: input, shape index: {}]   ;;  %s2326_s1 = inlined_call_operand.vmem [shape: bf16[36,256], index: 1, kind: input, shape index: {}]   ;;  %s2327_s2 = inlined_call_operand.vmem [shape: bf16[256,512], index: 2, kind: input, shape index: {}]   ;;  %s2328_s3 = inlined_call_operand.vmem [shape: f32[4], index: 3, kind: output, shape index: {}]  }
   0x1   :  { %v1461_v0 = vld [vmem:[%s2327_s2 + $0xe4] ss:$16 sps:$4 sm:$0xff]   ;;  %v1466_v1 = vld [vmem:[%s2327_s2 + $0xec] ss:$16 sps:$4 sm:$0xff]   ;;  %v1472_v2 = vld [vmem:[%s2327_s2 + $0xe0] ss:$16 sps:$4 sm:$0xff]  }
   0x2   :  { %431 = vmatprep.subr.bf16.mxu0 %v1461_v0  ;;  %v1477_v3 = vld [vmem:[%s2327_s2 + $0xe8] ss:$16 sps:$4 sm:$0xff]   ;;  %492 = vmatprep.subr.bf16.mxu1 %v1466_v1  ;;  %v1483_v4 = vld [vmem:[%s2327_s2 + $0xc4] ss:$16 sps:$4 sm:$0xff]   ;;  %v1490_v5 = vld [vmem:[%s2327_s2 + $0xcc] ss:$16 sps:$4 sm:$0xff]  }
   0x3   :  { %432 = vmatpush1.bf16.msra.mxu0 %v1472_v2  ;;  %493 = vmatpush1.bf16.msra.mxu1 %v1477_v3  ;;  %v1495_v6 = vld [vmem:[%s2327_s2 + $0xc0] ss:$16 sps:$4 sm:$0xff]   ;;  %v1501_v7 = vld [vmem:[%s2327_s2 + $0xc8] ss:$16 sps:$4 sm:$0xff]   ;;  %v1507_v8 = vld [vmem:[%s2327_s2 + $0xa4] ss:$16 sps:$4 sm:$0xff]  }
   0x4   :  { %433 = vmatprep.subr.bf16.mxu0 %v1483_v4  ;;  %494 = vmatprep.subr.bf16.mxu1 %v1490_v5  ;;  %v1512_v9 = vld [vmem:[%s2327_s2 + $0xac] ss:$16 sps:$4 sm:$0xff]   ;;  %v1517_v10 = vld [vmem:[%s2327_s2 + $0xa0] ss:$16 sps:$4 sm:$0xff]   ;;  %v1522_v11 = vld [vmem:[%s2327_s2 + $0xa8] ss:$16 sps:$4 sm:$0xff]  }
   0x5   :  { %v1529_v12 = vld [vmem:[%s2327_s2 + $0x84] ss:$16 sps:$4 sm:$0xff]   ;;  %v1536_v13 = vld [vmem:[%s2327_s2 + $0x8c] ss:$16 sps:$4 sm:$0xff]   ;;  %v1541_v14 = vld [vmem:[%s2327_s2 + $0x80] ss:$16 sps:$4 sm:$0xff]  }
   0x6   :  { %v1548_v15 = vld [vmem:[%s2327_s2 + $0x88] ss:$16 sps:$4 sm:$0xff]   ;;  %v1553_v16 = vld [vmem:[%s2327_s2 + $0x64] ss:$16 sps:$4 sm:$0xff]   ;;  %v1560_v17 = vld [vmem:[%s2327_s2 + $0x6c] ss:$16 sps:$4 sm:$0xff]  }
   0x7   :  { %434 = vmatpush1.bf16.msra.mxu0 %v1495_v6  ;;  %495 = vmatpush1.bf16.msra.mxu1 %v1501_v7  ;;  %v1565_v18 = vld [vmem:[%s2327_s2 + $0x60] ss:$16 sps:$4 sm:$0xff]   ;;  %v1570_v19 = vld [vmem:[%s2327_s2 + $0x68] ss:$16 sps:$4 sm:$0xff]   ;;  %v1577_v20 = vld [vmem:[%s2327_s2 + $0x44] ss:$16 sps:$4 sm:$0xff]  }
   0x8   :  { %435 = vmatprep.subr.bf16.mxu0 %v1507_v8  ;;  %496 = vmatprep.subr.bf16.mxu1 %v1512_v9  ;;  %v1584_v21 = vld [vmem:[%s2327_s2 + $0x4c] ss:$16 sps:$4 sm:$0xff]   ;;  %v1589_v22 = vld [vmem:[%s2327_s2 + $0x40] ss:$16 sps:$4 sm:$0xff]   ;;  %v1596_v23 = vld [vmem:[%s2327_s2 + $0x48] ss:$16 sps:$4 sm:$0xff]  }
   0x9   :  { %v1601_v24 = vld [vmem:[%s2327_s2 + $0x24] ss:$16 sps:$4 sm:$0xff]   ;;  %v1608_v25 = vld [vmem:[%s2327_s2 + $0x2c] ss:$16 sps:$4 sm:$0xff]   ;;  %v1613_v26 = vld [vmem:[%s2327_s2 + $0x20] ss:$16 sps:$4 sm:$0xff]  }
   0xa   :  { %v1618_v27 = vld [vmem:[%s2327_s2 + $0x28] ss:$16 sps:$4 sm:$0xff]   ;;  %v1625_v28 = vld [vmem:[%s2327_s2 + $0x4] ss:$16 sps:$4 sm:$0xff]   ;;  %v1632_v29 = vld [vmem:[%s2327_s2 + $0xc] ss:$16 sps:$4 sm:$0xff]  }
   0xb   :  { %436 = vmatpush1.bf16.msra.mxu0 %v1517_v10  ;;  %497 = vmatpush1.bf16.msra.mxu1 %v1522_v11  ;;  %v1637_v30 = vld [vmem:[%s2327_s2] ss:$16 sps:$4 sm:$0xff]   ;;  %v1644_v31 = vld [vmem:[%s2327_s2 + $0x8] ss:$16 sps:$4 sm:$0xff]   ;;  %v1649_v32 = vld [vmem:[%s2327_s2 + $0x1e4] ss:$16 sps:$4 sm:$0xff]  }
   0xc   :  { %437 = vmatprep.subr.bf16.mxu0 %v1529_v12  ;;  %498 = vmatprep.subr.bf16.mxu1 %v1536_v13  ;;  %v1656_v33 = vld [vmem:[%s2327_s2 + $0x1ec] ss:$16 sps:$4 sm:$0xff]   ;;  %v1661_v34 = vld [vmem:[%s2327_s2 + $0x1e0] ss:$16 sps:$4 sm:$0xff]   ;;  %v1666_v35 = vld [vmem:[%s2327_s2 + $0x1e8] ss:$16 sps:$4 sm:$0xff]  }
   0xd   :  { %v1673_v36 = vld [vmem:[%s2327_s2 + $0x1c4] ss:$16 sps:$4 sm:$0xff]   ;;  %v1680_v37 = vld [vmem:[%s2327_s2 + $0x1cc] ss:$16 sps:$4 sm:$0xff]   ;;  %v1685_v38 = vld [vmem:[%s2327_s2 + $0x1c0] ss:$16 sps:$4 sm:$0xff]  }
   0xe   :  { %v1692_v39 = vld [vmem:[%s2327_s2 + $0x1c8] ss:$16 sps:$4 sm:$0xff]   ;;  %v1697_v40 = vld [vmem:[%s2327_s2 + $0x1a4] ss:$16 sps:$4 sm:$0xff]   ;;  %v1704_v41 = vld [vmem:[%s2327_s2 + $0x1ac] ss:$16 sps:$4 sm:$0xff]  }
   0xf   :  { %438 = vmatpush1.bf16.msra.mxu0 %v1541_v14  ;;  %499 = vmatpush1.bf16.msra.mxu1 %v1548_v15  ;;  %v1709_v42 = vld [vmem:[%s2327_s2 + $0x1a0] ss:$16 sps:$4 sm:$0xff]   ;;  %v1714_v43 = vld [vmem:[%s2327_s2 + $0x1a8] ss:$16 sps:$4 sm:$0xff]   ;;  %v1721_v44 = vld [vmem:[%s2327_s2 + $0x184] ss:$16 sps:$4 sm:$0xff]  }
  0x10   :  { %439 = vmatprep.subr.bf16.mxu0 %v1553_v16  ;;  %500 = vmatprep.subr.bf16.mxu1 %v1560_v17  ;;  %v1728_v45 = vld [vmem:[%s2327_s2 + $0x18c] ss:$16 sps:$4 sm:$0xff]   ;;  %v1733_v46 = vld [vmem:[%s2327_s2 + $0x180] ss:$16 sps:$4 sm:$0xff]   ;;  %v1743_v48 = vld [vmem:[%s2327_s2 + $0x188] ss:$16 sps:$4 sm:$0xff]  }
  0x11   :  { %v1329_v47 = vld [vmem:[%s2325_s0 + $0x4] ss:$8 sps:$4 sm:$0xff]   ;;  %v1762_v51 = vld [vmem:[%s2327_s2 + $0x160] ss:$16 sps:$4 sm:$0xff]   ;;  %v1767_v52 = vld [vmem:[%s2327_s2 + $0x168] ss:$16 sps:$4 sm:$0xff]  }
  0x12   :  { %v1750_v49 = vld [vmem:[%s2327_s2 + $0x164] ss:$16 sps:$4 sm:$0xff]   ;;  %v1755_v50 = vld [vmem:[%s2327_s2 + $0x16c] ss:$16 sps:$4 sm:$0xff]   ;;  %463 = vmatprep.mubr.bf16.mxu0 %v1329_v47  ;;  %524 = vmatprep.mubr.bf16.mxu1 %v1329_v47 }
  0x13   :  { %440 = vmatpush1.bf16.msra.mxu0 %v1565_v18  ;;  %501 = vmatpush1.bf16.msra.mxu1 %v1570_v19 }
  0x14   :  { %441 = vmatprep.subr.bf16.mxu0 %v1577_v20  ;;  %502 = vmatprep.subr.bf16.mxu1 %v1584_v21 }
  0x17   :  { %442 = vmatpush1.bf16.msra.mxu0 %v1589_v22  ;;  %503 = vmatpush1.bf16.msra.mxu1 %v1596_v23 }
  0x18   :  { %443 = vmatprep.subr.bf16.mxu0 %v1601_v24  ;;  %504 = vmatprep.subr.bf16.mxu1 %v1608_v25 }
  0x1b   :  { %444 = vmatpush1.bf16.msra.mxu0 %v1613_v26  ;;  %505 = vmatpush1.bf16.msra.mxu1 %v1618_v27 }
  0x1c   :  { %445 = vmatprep.subr.bf16.mxu0 %v1625_v28  ;;  %506 = vmatprep.subr.bf16.mxu1 %v1632_v29 }
  0x1f   :  { %446 = vmatpush1.bf16.msra.mxu0 %v1637_v30  ;;  %507 = vmatpush1.bf16.msra.mxu1 %v1644_v31 }
  0x20   :  { %447 = vmatprep.subr.bf16.mxu0 %v1649_v32  ;;  %508 = vmatprep.subr.bf16.mxu1 %v1656_v33 }
  0x23   :  { %448 = vmatpush2.bf16.msra.mxu0 %v1661_v34  ;;  %509 = vmatpush2.bf16.msra.mxu1 %v1666_v35 }
  0x24   :  { %449 = vmatprep.subr.bf16.mxu0 %v1673_v36  ;;  %510 = vmatprep.subr.bf16.mxu1 %v1680_v37 }
  0x27   :  { %450 = vmatpush2.bf16.msra.mxu0 %v1685_v38  ;;  %511 = vmatpush2.bf16.msra.mxu1 %v1692_v39 }
  0x28   :  { %451 = vmatprep.subr.bf16.mxu0 %v1697_v40  ;;  %512 = vmatprep.subr.bf16.mxu1 %v1704_v41 }
  0x2b   :  { %452 = vmatpush2.bf16.msra.mxu0 %v1709_v42  ;;  %513 = vmatpush2.bf16.msra.mxu1 %v1714_v43 }
  0x2c   :  { %453 = vmatprep.subr.bf16.mxu0 %v1721_v44  ;;  %514 = vmatprep.subr.bf16.mxu1 %v1728_v45 }
  0x2f   :  { %454 = vmatpush2.bf16.msra.mxu0 %v1733_v46  ;;  %515 = vmatpush2.bf16.msra.mxu1 %v1743_v48 }
  0x30   :  { %8 = vsyncpa [#allocation3], 0  ;;  %455 = vmatprep.subr.bf16.mxu0 %v1750_v49  ;;  %516 = vmatprep.subr.bf16.mxu1 %v1755_v50  ;;  %v1774_v53 = vld [vmem:[%s2327_s2 + $0x144] ss:$16 sps:$4 sm:$0xff]   ;;  %v1779_v54 = vld [vmem:[%s2327_s2 + $0x14c] ss:$16 sps:$4 sm:$0xff]  }
  0x31   :  { %v1786_v55 = vld [vmem:[%s2327_s2 + $0x140] ss:$16 sps:$4 sm:$0xff]   ;;  %v1791_v56 = vld [vmem:[%s2327_s2 + $0x148] ss:$16 sps:$4 sm:$0xff]   ;;  %v1798_v57 = vld [vmem:[%s2327_s2 + $0x124] ss:$16 sps:$4 sm:$0xff]  }
  0x32   :  { %v1803_v58 = vld [vmem:[%s2327_s2 + $0x12c] ss:$16 sps:$4 sm:$0xff]   ;;  %v1810_v59 = vld [vmem:[%s2327_s2 + $0x120] ss:$16 sps:$4 sm:$0xff]   ;;  %v1815_v60 = vld [vmem:[%s2327_s2 + $0x128] ss:$16 sps:$4 sm:$0xff]  }
  0x33   :  { %456 = vmatpush2.bf16.msra.mxu0 %v1762_v51  ;;  %517 = vmatpush2.bf16.msra.mxu1 %v1767_v52  ;;  %2331 = vst [vmem:[#allocation5_spill] sm:$0xff] %v1810_v59  ;;  %2332 = vst [vmem:[#allocation6_spill] sm:$0xff] %v1815_v60  ;;  %v1822_v61 = vld [vmem:[%s2327_s2 + $0x104] ss:$16 sps:$4 sm:$0xff]   ;;  %v1827_v62 = vld [vmem:[%s2327_s2 + $0x10c] ss:$16 sps:$4 sm:$0xff]  }
  0x34   :  { %457 = vmatprep.subr.bf16.mxu0 %v1774_v53  ;;  %518 = vmatprep.subr.bf16.mxu1 %v1779_v54  ;;  %v1834_v63 = vld [vmem:[%s2327_s2 + $0x100] ss:$16 sps:$4 sm:$0xff]   ;;  %v1839_v47 = vld [vmem:[%s2327_s2 + $0x108] ss:$16 sps:$4 sm:$0xff]   ;;  %s1137_s25 = sshll.u32 %s2328_s3, 4  ;;  %s1138_s25 = int_to_ptr.vmem [resolvable:$true] %s1137_s25 }
  0x35   :  { %s1423_s29 = scalar_lea.vmem %s1138_s25, 16  ;;  %p1428_p1 = scmp.lt.s32.totalorder %s1138_s25, %s1138_s25 }
  0x36   :  { %p1424_p0 = scmp.ne.s32.totalorder %s1138_s25, %s1423_s29  ;;  %p1429_p2 = scmp.lt.s32.totalorder %s1423_s29, %s1423_s29 }
  0x37   :  { %458 = vmatpush2.bf16.msra.mxu0 %v1786_v55  ;;  %519 = vmatpush2.bf16.msra.mxu1 %v1791_v56 }
  0x38   :  { %459 = vmatprep.subr.bf16.mxu0 %v1798_v57  ;;  %520 = vmatprep.subr.bf16.mxu1 %v1803_v58  ;;  %p1430_p3 = por %p1429_p2, %p1428_p1 }
  0x3a   :  { %p1431_p4 = pnand %p1430_p3, %p1424_p0 }
  0x3b   :  { %460 = vmatpush2.bf16.msra.mxu0 %v1810_v59  ;;  %521 = vmatpush2.bf16.msra.mxu1 %v1815_v60  ;;  %v1327_v59 = vld [vmem:[%s2325_s0] ss:$8 sps:$4 sm:$0xff]   ;;  %v1330_v60 = vld [vmem:[%s2325_s0 + $0x14] ss:$8 sps:$4 sm:$0xff]  }
  0x3c   :  { %461 = vmatprep.subr.bf16.mxu0 %v1822_v61  ;;  %522 = vmatprep.subr.bf16.mxu1 %v1827_v62 }
  0x3f   :  { %462 = vmatpush2.bf16.msra.mxu0 %v1834_v63  ;;  %523 = vmatpush2.bf16.msra.mxu1 %v1839_v47 }
  0x40   :  { %585 = vmatprep.subr.bf16.mxu0 %v1461_v0  ;;  %646 = vmatprep.subr.bf16.mxu1 %v1466_v1  ;;  %v1332_v0 = vld [vmem:[%s2325_s0 + $0x10] ss:$8 sps:$4 sm:$0xff]   ;;  %v83_v1 = vld [vmem:[%s2325_s0 + $0x20] sm:$0x33] }
  0x42   :  { %464 = vmatmul.mubr.bf16.vlgmr.msra.gmra.mxu0 %v1327_v59  ;;  %525 = vmatmul.mubr.bf16.vlgmr.msra.gmra.mxu1 %v1327_v59 }
  0x43   :  { %586 = vmatpush1.bf16.msra.mxu0 %v1472_v2  ;;  %647 = vmatpush1.bf16.msra.mxu1 %v1477_v3  ;;  %v1151_v2 = vcombine.high %v83_v1, %v83_v1  ;;  %v1150_v3 = vcombine.low %v83_v1, %v83_v1 }
  0x44   :  { %587 = vmatprep.subr.bf16.mxu0 %v1483_v4  ;;  %648 = vmatprep.subr.bf16.mxu1 %v1490_v5  ;;  %v1337_v4 = vld [vmem:[%s2326_s1 + $0x4] ss:$8 sps:$4 sm:$0xff]  }
  0x45   :  { %473 = vmatprep.mubr.bf16.mxu0 %v1330_v60  ;;  %534 = vmatprep.mubr.bf16.mxu1 %v1330_v60  ;;  %v2333_v5 = vld [vmem:[#allocation5_spill] sm:$0xff] }
  0x47   :  { %588 = vmatpush1.bf16.msra.mxu0 %v1495_v6  ;;  %649 = vmatpush1.bf16.msra.mxu1 %v1501_v7  ;;  %v2334_v6 = vld [vmem:[#allocation6_spill] sm:$0xff] }
  0x48   :  { %589 = vmatprep.subr.bf16.mxu0 %v1507_v8  ;;  %650 = vmatprep.subr.bf16.mxu1 %v1512_v9  ;;  %v1335_v7 = vld [vmem:[%s2326_s1] ss:$8 sps:$4 sm:$0xff]   ;;  %v1338_v8 = vld [vmem:[%s2326_s1 + $0x14] ss:$8 sps:$4 sm:$0xff]  }
  0x49   :  { %v557_v9 = vld [vmem:[%s2326_s1 + $0x20] sm:$0x33] }
  0x4a   :  { %474 = vmatmul.mubr.bf16.gmra.mxu0 %v1332_v0  ;;  %535 = vmatmul.mubr.bf16.gmra.mxu1 %v1332_v0 }
  0x4b   :  { %590 = vmatpush1.bf16.msra.mxu0 %v1517_v10  ;;  %651 = vmatpush1.bf16.msra.mxu1 %v1522_v11  ;;  %v1340_v10 = vld [vmem:[%s2326_s1 + $0x10] ss:$8 sps:$4 sm:$0xff]   ;;  %v1221_v11 = vcombine.high %v557_v9, %v557_v9 }
  0x4c   :  { %591 = vmatprep.subr.bf16.mxu0 %v1529_v12  ;;  %652 = vmatprep.subr.bf16.mxu1 %v1536_v13  ;;  %v1220_v12 = vcombine.low %v557_v9, %v557_v9 }
  0x4d   :  { %483 = vmatprep.mubr.bf16.mxu0 %v1151_v2  ;;  %544 = vmatprep.mubr.bf16.mxu1 %v1151_v2 }
  0x4f   :  { %592 = vmatpush1.bf16.msra.mxu0 %v1541_v14  ;;  %653 = vmatpush1.bf16.msra.mxu1 %v1548_v15 }
  0x50   :  { %593 = vmatprep.subr.bf16.mxu0 %v1553_v16  ;;  %654 = vmatprep.subr.bf16.mxu1 %v1560_v17 }
  0x52   :  { %484 = vmatmul.mubr.bf16.gmra.mxu0 %v1150_v3  ;;  %545 = vmatmul.mubr.bf16.gmra.mxu1 %v1150_v3 }
  0x53   :  { %594 = vmatpush1.bf16.msra.mxu0 %v1565_v18  ;;  %655 = vmatpush1.bf16.msra.mxu1 %v1570_v19 }
  0x54   :  { %595 = vmatprep.subr.bf16.mxu0 %v1577_v20  ;;  %656 = vmatprep.subr.bf16.mxu1 %v1584_v21 }
  0x55   :  { %617 = vmatprep.mubr.bf16.mxu0 %v1337_v4  ;;  %678 = vmatprep.mubr.bf16.mxu1 %v1337_v4 }
  0x57   :  { %596 = vmatpush1.bf16.msra.mxu0 %v1589_v22  ;;  %657 = vmatpush1.bf16.msra.mxu1 %v1596_v23 }
  0x58   :  { %597 = vmatprep.subr.bf16.mxu0 %v1601_v24  ;;  %658 = vmatprep.subr.bf16.mxu1 %v1608_v25 }
  0x5b   :  { %598 = vmatpush1.bf16.msra.mxu0 %v1613_v26  ;;  %659 = vmatpush1.bf16.msra.mxu1 %v1618_v27 }
  0x5c   :  { %599 = vmatprep.subr.bf16.mxu0 %v1625_v28  ;;  %660 = vmatprep.subr.bf16.mxu1 %v1632_v29 }
  0x5f   :  { %600 = vmatpush1.bf16.msra.mxu0 %v1637_v30  ;;  %661 = vmatpush1.bf16.msra.mxu1 %v1644_v31 }
  0x60   :  { %601 = vmatprep.subr.bf16.mxu0 %v1649_v32  ;;  %662 = vmatprep.subr.bf16.mxu1 %v1656_v33 }
  0x63   :  { %602 = vmatpush2.bf16.msra.mxu0 %v1661_v34  ;;  %663 = vmatpush2.bf16.msra.mxu1 %v1666_v35 }
  0x64   :  { %603 = vmatprep.subr.bf16.mxu0 %v1673_v36  ;;  %664 = vmatprep.subr.bf16.mxu1 %v1680_v37 }
  0x67   :  { %604 = vmatpush2.bf16.msra.mxu0 %v1685_v38  ;;  %665 = vmatpush2.bf16.msra.mxu1 %v1692_v39 }
  0x68   :  { %605 = vmatprep.subr.bf16.mxu0 %v1697_v40  ;;  %666 = vmatprep.subr.bf16.mxu1 %v1704_v41 }
  0x6b   :  { %606 = vmatpush2.bf16.msra.mxu0 %v1709_v42  ;;  %667 = vmatpush2.bf16.msra.mxu1 %v1714_v43 }
  0x6c   :  { %607 = vmatprep.subr.bf16.mxu0 %v1721_v44  ;;  %668 = vmatprep.subr.bf16.mxu1 %v1728_v45 }
  0x6f   :  { %608 = vmatpush2.bf16.msra.mxu0 %v1733_v46  ;;  %669 = vmatpush2.bf16.msra.mxu1 %v1743_v48 }
  0x70   :  { %609 = vmatprep.subr.bf16.mxu0 %v1750_v49  ;;  %670 = vmatprep.subr.bf16.mxu1 %v1755_v50 }
  0x73   :  { %610 = vmatpush2.bf16.msra.mxu0 %v1762_v51  ;;  %671 = vmatpush2.bf16.msra.mxu1 %v1767_v52 }
  0x74   :  { %611 = vmatprep.subr.bf16.mxu0 %v1774_v53  ;;  %672 = vmatprep.subr.bf16.mxu1 %v1779_v54 }
  0x77   :  { %612 = vmatpush2.bf16.msra.mxu0 %v1786_v55  ;;  %673 = vmatpush2.bf16.msra.mxu1 %v1791_v56 }
  0x78   :  { %613 = vmatprep.subr.bf16.mxu0 %v1798_v57  ;;  %674 = vmatprep.subr.bf16.mxu1 %v1803_v58 }
  0x7b   :  { %614 = vmatpush2.bf16.msra.mxu0 %v2333_v5  ;;  %675 = vmatpush2.bf16.msra.mxu1 %v2334_v6 }
  0x7c   :  { %615 = vmatprep.subr.bf16.mxu0 %v1822_v61  ;;  %676 = vmatprep.subr.bf16.mxu1 %v1827_v62 }
  0x7f   :  { %616 = vmatpush2.bf16.msra.mxu0 %v1834_v63  ;;  %677 = vmatpush2.bf16.msra.mxu1 %v1839_v47 }
  0x82   :  { %618 = vmatmul.mubr.bf16.vlgmr.msra.gmra.mxu0 %v1335_v7  ;;  %679 = vmatmul.mubr.bf16.vlgmr.msra.gmra.mxu1 %v1335_v7 }
  0x83   :  { %627 = vmatprep.mubr.bf16.mxu0 %v1338_v8  ;;  %688 = vmatprep.mubr.bf16.mxu1 %v1338_v8 }
  0x8a   :  { %628 = vmatmul.mubr.bf16.gmra.mxu0 %v1340_v10  ;;  %689 = vmatmul.mubr.bf16.gmra.mxu1 %v1340_v10 }
  0x8b   :  { %637 = vmatprep.mubr.bf16.mxu0 %v1221_v11  ;;  %698 = vmatprep.mubr.bf16.mxu1 %v1221_v11 }
  0x92   :  { %638 = vmatmul.mubr.bf16.gmra.mxu0 %v1220_v12  ;;  %699 = vmatmul.mubr.bf16.gmra.mxu1 %v1220_v12 }
 0x102   :  { %v465_v13 = vpop.f32.mrf.mxu0  ;;  %v526_v14 = vpop.f32.mrf.mxu1 }
 0x103   :  { %v707_v15 = vmul.f32 %v465_v13, %v465_v13  ;;  %v717_v16 = vmul.f32 %v526_v14, %v526_v14 }
 0x104   :  { %v467_v17 = vpop.f32.mrf.mxu0  ;;  %v528_v18 = vpop.f32.mrf.mxu1 }
 0x105   :  { %v727_v19 = vadd.f32 %v717_v16, %v707_v15  ;;  %v708_v20 = vmul.f32 %v467_v17, %v467_v17  ;;  %v718_v21 = vmul.f32 %v528_v18, %v528_v18 }
 0x106   :  { %v469_v22 = vpop.f32.mrf.mxu0  ;;  %v530_v23 = vpop.f32.mrf.mxu1 }
 0x107   :  { %v728_v24 = vadd.f32 %v718_v21, %v708_v20  ;;  %v709_v25 = vmul.f32 %v469_v22, %v469_v22  ;;  %v719_v26 = vmul.f32 %v530_v23, %v530_v23  ;;  %v737_v3 = vmax.f32 %v727_v19, 1e-08 }
 0x108   :  { %v471_v27 = vpop.f32.mrf.mxu0  ;;  %v532_v28 = vpop.f32.mrf.mxu1 }
 0x109   :  { %v729_v29 = vadd.f32 %v719_v26, %v709_v25  ;;  %v710_v30 = vmul.f32 %v471_v27, %v471_v27  ;;  %v720_v31 = vmul.f32 %v532_v28, %v532_v28  ;;  %v738_v4 = vmax.f32 %v728_v24, 1e-08 }
 0x10a   :  { %v475_v32 = vpop.f32.mrf.mxu0  ;;  %v536_v33 = vpop.f32.mrf.mxu1  ;;  %1343 = vrsqrt.f32 %v737_v3  ;;  %vm749_vm0 = vcmp.eq.f32.partialorder %v737_v3, inf  ;;  %vm751_vm1 = vcmp.eq.f32.partialorder %v737_v3, 0.0  ;;  %v752_v21 = vand.u32 2147483648, %v737_v3 }
 0x10b   :  { %v711_v34 = vmul.f32 %v475_v32, %v475_v32  ;;  %v721_v35 = vmul.f32 %v536_v33, %v536_v33  ;;  %v730_v38 = vadd.f32 %v720_v31, %v710_v30  ;;  %v739_v5 = vmax.f32 %v729_v29, 1e-08 }
 0x10c   :  { %v477_v36 = vpop.f32.mrf.mxu0  ;;  %v538_v37 = vpop.f32.mrf.mxu1  ;;  %1345 = vrsqrt.f32 %v738_v4  ;;  %vm756_vm2 = vcmp.eq.f32.partialorder %v738_v4, inf  ;;  %vm758_vm3 = vcmp.eq.f32.partialorder %v738_v4, 0.0  ;;  %v759_v23 = vand.u32 2147483648, %v738_v4 }
 0x10d   :  { %v731_v39 = vadd.f32 %v721_v35, %v711_v34  ;;  %v712_v40 = vmul.f32 %v477_v36, %v477_v36  ;;  %v722_v41 = vmul.f32 %v538_v37, %v538_v37  ;;  %v1936_v6 = vmax.f32 %v730_v38, 1e-08 }
 0x10e   :  { %v479_v42 = vpop.f32.mrf.mxu0  ;;  %v540_v43 = vpop.f32.mrf.mxu1  ;;  %1347 = vrsqrt.f32 %v739_v5  ;;  %vm763_vm4 = vcmp.eq.f32.partialorder %v739_v5, inf  ;;  %vm765_vm5 = vcmp.eq.f32.partialorder %v739_v5, 0.0  ;;  %v766_v27 = vand.u32 2147483648, %v739_v5 }
 0x10f   :  { %v732_v44 = vadd.f32 %v722_v41, %v712_v40  ;;  %v713_v45 = vmul.f32 %v479_v42, %v479_v42  ;;  %v723_v49 = vmul.f32 %v540_v43, %v540_v43  ;;  %v1938_v7 = vmax.f32 %v731_v39, 1e-08 }
 0x110   :  { %v481_v46 = vpop.f32.mrf.mxu0  ;;  %v542_v48 = vpop.f32.mrf.mxu1  ;;  %1349 = vrsqrt.f32 %v1936_v6  ;;  %vm770_vm6 = vcmp.eq.f32.partialorder %v1936_v6, inf  ;;  %v773_v30 = vand.u32 2147483648, %v1936_v6  ;;  %vm772_vm8 = vcmp.eq.f32.partialorder %v1936_v6, 0.0 }
 0x111   :  { %v714_v50 = vmul.f32 %v481_v46, %v481_v46  ;;  %v724_v51 = vmul.f32 %v542_v48, %v542_v48  ;;  %v733_v54 = vadd.f32 %v723_v49, %v713_v45  ;;  %v1940_v8 = vmax.f32 %v732_v44, 1e-08 }
 0x112   :  { %v485_v52 = vpop.f32.mrf.mxu0  ;;  %v546_v53 = vpop.f32.mrf.mxu1  ;;  %1351 = vrsqrt.f32 %v1938_v7  ;;  %vm777_vm7 = vcmp.eq.f32.partialorder %v1938_v7, inf  ;;  %vm779_vm9 = vcmp.eq.f32.partialorder %v1938_v7, 0.0  ;;  %v780_v36 = vand.u32 2147483648, %v1938_v7 }
 0x113   :  { %v734_v55 = vadd.f32 %v724_v51, %v714_v50  ;;  %v715_v56 = vmul.f32 %v485_v52, %v485_v52  ;;  %v725_v57 = vmul.f32 %v546_v53, %v546_v53  ;;  %v1943_v9 = vmax.f32 %v733_v54, 1e-08 }
 0x114   :  { %v487_v58 = vpop.f32.mrf.mxu0  ;;  %v548_v59 = vpop.f32.mrf.mxu1  ;;  %1353 = vrsqrt.f32 %v1940_v8  ;;  %vm784_vm10 = vcmp.eq.f32.partialorder %v1940_v8, inf  ;;  %v787_v40 = vand.u32 2147483648, %v1940_v8  ;;  %vm786_vm12 = vcmp.eq.f32.partialorder %v1940_v8, 0.0 }
 0x115   :  { %v716_v60 = vmul.f32 %v487_v58, %v487_v58  ;;  %v726_v61 = vmul.f32 %v548_v59, %v548_v59  ;;  %v735_v62 = vadd.f32 %v725_v57, %v715_v56  ;;  %v1947_v10 = vmax.f32 %v734_v55, 1e-08 }
 0x116   :  { %v489_v63 = vpop.f32.mrf.mxu0  ;;  %v550_v47 = vpop.f32.mrf.mxu1  ;;  %1355 = vrsqrt.f32 %v1943_v9  ;;  %vm791_vm11 = vcmp.eq.f32.partialorder %v1943_v9, inf  ;;  %v794_v45 = vand.u32 2147483648, %v1943_v9  ;;  %vm793_vm14 = vcmp.eq.f32.partialorder %v1943_v9, 0.0 }
 0x117   :  { %v736_v0 = vadd.f32 %v726_v61, %v716_v60  ;;  %1357 = vrsqrt.f32 %v1947_v10  ;;  %v1951_v11 = vmax.f32 %v735_v62, 1e-08  ;;  %v1344_v12 = vpop.eup %1343  ;;  %vm798_vm13 = vcmp.eq.f32.partialorder %v1947_v10, inf }
 0x118   :  { %v490_v1 = vpop.f32.mrf.mxu0  ;;  %v551_v2 = vpop.f32.mrf.mxu1  ;;  %v748_v17 = vmul.f32 %v1344_v12, %v737_v3  ;;  %v801_v51 = vand.u32 2147483648, %v1947_v10  ;;  %vm800_vm15 = vcmp.eq.f32.partialorder %v1947_v10, 0.0  ;;  %v937_v62 = vlaneseq }
 0x119   :  { %v1953_v13 = vmax.f32 %v736_v0, 1e-08  ;;  %v1346_v14 = vpop.eup %1345  ;;  %1359 = vrsqrt.f32 %v1951_v11 }
 0x11a   :  { %v755_v19 = vmul.f32 %v1346_v14, %v738_v4  ;;  %v750_v26 = vsel %vm749_vm0, %v737_v3, %v748_v17  ;;  %vm805_vm0 = vcmp.eq.f32.partialorder %v1951_v11, inf }
 0x11b   :  { %v1348_v15 = vpop.eup %1347  ;;  %1361 = vrsqrt.f32 %v1953_v13  ;;  %v1967_v34 = vsel %vm751_vm1, %v752_v21, %v750_v26  ;;  %vm807_vm1 = vcmp.eq.f32.partialorder %v1951_v11, 0.0 }
 0x11c   :  { %v762_v22 = vmul.f32 %v1348_v15, %v739_v5  ;;  %v757_v29 = vsel %vm756_vm2, %v738_v4, %v755_v19  ;;  %1363 = vlog2.f32 %v1967_v34  ;;  %v808_v4 = vand.u32 2147483648, %v1951_v11 }
 0x11d   :  { %v1350_v16 = vpop.eup %1349  ;;  %v1973_v38 = vsel %vm758_vm3, %v759_v23, %v757_v29  ;;  %vm812_vm2 = vcmp.eq.f32.partialorder %v1953_v13, inf  ;;  %vm814_vm3 = vcmp.eq.f32.partialorder %v1953_v13, 0.0  ;;  %v815_v15 = vand.u32 2147483648, %v1953_v13 }
 0x11e   :  { %v769_v24 = vmul.f32 %v1350_v16, %v1936_v6  ;;  %v764_v33 = vsel %vm763_vm4, %v739_v5, %v762_v22  ;;  %1365 = vlog2.f32 %v1973_v38  ;;  %v938_v16 = vand.u32 127, %v937_v62 }
 0x11f   :  { %v1352_v18 = vpop.eup %1351  ;;  %v1979_v41 = vsel %vm765_vm5, %v766_v27, %v764_v33 }
 0x120   :  { %v776_v28 = vmul.f32 %v1352_v18, %v1938_v7  ;;  %v771_v35 = vsel %vm770_vm6, %v1936_v6, %v769_v24  ;;  %1367 = vlog2.f32 %v1979_v41 }
 0x121   :  { %v1354_v20 = vpop.eup %1353  ;;  %v1984_v44 = vsel %vm772_vm8, %v773_v30, %v771_v35 }
 0x122   :  { %v783_v31 = vmul.f32 %v1354_v20, %v1940_v8  ;;  %v778_v39 = vsel %vm777_vm7, %v1938_v7, %v776_v28  ;;  %1369 = vlog2.f32 %v1984_v44 }
 0x123   :  { %v1356_v25 = vpop.eup %1355  ;;  %v1991_v46 = vsel %vm779_vm9, %v780_v36, %v778_v39 }
 0x124   :  { %v1358_v32 = vpop.eup %1357  ;;  %v790_v37 = vmul.f32 %v1356_v25, %v1943_v9  ;;  %v785_v42 = vsel %vm784_vm10, %v1940_v8, %v783_v31  ;;  %1371 = vlog2.f32 %v1991_v46 }
 0x125   :  { %v797_v43 = vmul.f32 %v1358_v32, %v1947_v10  ;;  %v1996_v50 = vsel %vm786_vm12, %v787_v40, %v785_v42 }
 0x126   :  { %v792_v48 = vsel %vm791_vm11, %v1943_v9, %v790_v37  ;;  %v1360_v49 = vpop.eup %1359  ;;  %1373 = vlog2.f32 %v1996_v50 }
 0x127   :  { %v799_v54 = vsel %vm798_vm13, %v1947_v10, %v797_v43  ;;  %v2003_v58 = vsel %vm793_vm14, %v794_v45, %v792_v48  ;;  %v804_v61 = vmul.f32 %v1360_v49, %v1951_v11  ;;  %v2041_v43 = vadd.s32 128, %v938_v16 }
 0x128   :  { %v1362_v55 = vpop.eup %1361  ;;  %v2011_v1 = vsel %vm800_vm15, %v801_v51, %v799_v54  ;;  %1375 = vlog2.f32 %v2003_v58 }
 0x129   :  { %v811_v5 = vmul.f32 %v1362_v55, %v1953_v13  ;;  %v806_v10 = vsel %vm805_vm0, %v1951_v11, %v804_v61  ;;  %1377 = vlog2.f32 %v2011_v1  ;;  %v1364_v26 = vpop.eup %1363 }
 0x12a   :  { %v2029_v24 = vsel %vm807_vm1, %v808_v4, %v806_v10  ;;  %v2055_v62 = vmul.f32 0.6931472, %v1364_v26 }
 0x12b   :  { %v813_v25 = vsel %vm812_vm2, %v1953_v13, %v811_v5  ;;  %v1366_v29 = vpop.eup %1365 }
 0x12c   :  { %v2037_v40 = vsel %vm814_vm3, %v815_v15, %v813_v25 }
 0x12d   :  { %v1368_v35 = vpop.eup %1367 }
 0x12f   :  { %v1370_v42 = vpop.eup %1369 }
 0x131   :  { %v2043_v45 = vpop.eup %1371 }
 0x133   :  { %v2049_v13 = vpop.eup %1373 }
 0x142   :  { %v619_v52 = vpop.f32.mrf.mxu0  ;;  %v680_v53 = vpop.f32.mrf.mxu1 }
 0x143   :  { %v817_v56 = vmul.f32 %v619_v52, %v619_v52  ;;  %v827_v57 = vmul.f32 %v680_v53, %v680_v53 }
 0x144   :  { %v621_v59 = vpop.f32.mrf.mxu0  ;;  %v682_v60 = vpop.f32.mrf.mxu1 }
 0x145   :  { %v837_v63 = vadd.f32 %v827_v57, %v817_v56  ;;  %v818_v47 = vmul.f32 %v621_v59, %v621_v59  ;;  %v828_v0 = vmul.f32 %v682_v60, %v682_v60 }
 0x146   :  { %v623_v2 = vpop.f32.mrf.mxu0  ;;  %v684_v3 = vpop.f32.mrf.mxu1 }
 0x147   :  { %v2016_v6 = vmax.f32 %v837_v63, 1e-08  ;;  %v838_v7 = vadd.f32 %v828_v0, %v818_v47  ;;  %v819_v8 = vmul.f32 %v623_v2, %v623_v2  ;;  %v829_v9 = vmul.f32 %v684_v3, %v684_v3  ;;  %v2059_v47 = vpop.eup %1375 }
 0x148   :  { %v625_v12 = vpop.f32.mrf.mxu0  ;;  %v686_v14 = vpop.f32.mrf.mxu1  ;;  %v2057_v63 = vmul.f32 0.6931472, %v1366_v29 }
 0x149   :  { %1379 = vrsqrt.f32 %v2016_v6  ;;  %v2027_v17 = vmax.f32 %v838_v7, 1e-08  ;;  %v839_v18 = vadd.f32 %v829_v9, %v819_v8  ;;  %v820_v19 = vmul.f32 %v625_v12, %v625_v12  ;;  %v2067_v12 = vpop.eup %1377 }
 0x14a   :  { %v830_v20 = vmul.f32 %v686_v14, %v686_v14  ;;  %v629_v21 = vpop.f32.mrf.mxu0  ;;  %v690_v22 = vpop.f32.mrf.mxu1  ;;  %v2063_v8 = vmul.f32 0.6931472, %v1368_v35  ;;  %v2065_v9 = vmul.f32 0.6931472, %v1370_v42  ;;  %vm859_vm4 = vcmp.eq.f32.partialorder %v2016_v6, inf }
 0x14b   :  { %v821_v23 = vmul.f32 %v629_v21, %v629_v21  ;;  %v831_v11 = vmul.f32 %v690_v22, %v690_v22  ;;  %1381 = vrsqrt.f32 %v2027_v17  ;;  %v2033_v30 = vmax.f32 %v839_v18, 1e-08 }
 0x14c   :  { %v631_v27 = vpop.f32.mrf.mxu0  ;;  %v692_v28 = vpop.f32.mrf.mxu1  ;;  %v840_v31 = vadd.f32 %v830_v20, %v820_v19  ;;  %1383 = vlog2.f32 %v2029_v24  ;;  %vm861_vm5 = vcmp.eq.f32.partialorder %v2016_v6, 0.0  ;;  %v862_v19 = vand.u32 2147483648, %v2016_v6 }
 0x14d   :  { %v841_v32 = vadd.f32 %v831_v11, %v821_v23  ;;  %v822_v33 = vmul.f32 %v631_v27, %v631_v27  ;;  %v832_v36 = vmul.f32 %v692_v28, %v692_v28  ;;  %1385 = vrsqrt.f32 %v2033_v30 }
 0x14e   :  { %v633_v37 = vpop.f32.mrf.mxu0  ;;  %v694_v39 = vpop.f32.mrf.mxu1  ;;  %v2045_v48 = vmax.f32 %v840_v31, 1e-08  ;;  %1387 = vlog2.f32 %v2037_v40  ;;  %vm866_vm6 = vcmp.eq.f32.partialorder %v2027_v17, inf  ;;  %vm868_vm7 = vcmp.eq.f32.partialorder %v2027_v17, 0.0 }
 0x14f   :  { %v2047_v49 = vmax.f32 %v841_v32, 1e-08  ;;  %v842_v51 = vadd.f32 %v832_v36, %v822_v33  ;;  %v823_v52 = vmul.f32 %v633_v37, %v633_v37  ;;  %v833_v55 = vmul.f32 %v694_v39, %v694_v39 }
 0x150   :  { %v635_v53 = vpop.f32.mrf.mxu0  ;;  %v696_v54 = vpop.f32.mrf.mxu1  ;;  %1389 = vrsqrt.f32 %v2045_v48  ;;  %v869_v25 = vand.u32 2147483648, %v2027_v17  ;;  %vm873_vm8 = vcmp.eq.f32.partialorder %v2033_v30, inf  ;;  %vm875_vm9 = vcmp.eq.f32.partialorder %v2033_v30, 0.0 }
 0x151   :  { %v824_v56 = vmul.f32 %v635_v53, %v635_v53  ;;  %v834_v57 = vmul.f32 %v696_v54, %v696_v54  ;;  %v2053_v59 = vmax.f32 %v842_v51, 1e-08  ;;  %1391 = vrsqrt.f32 %v2047_v49 }
 0x152   :  { %v639_v60 = vpop.f32.mrf.mxu0  ;;  %v700_v61 = vpop.f32.mrf.mxu1  ;;  %v843_v0 = vadd.f32 %v833_v55, %v823_v52  ;;  %v876_v35 = vand.u32 2147483648, %v2033_v30  ;;  %vm880_vm10 = vcmp.eq.f32.partialorder %v2045_v48, inf  ;;  %v883_v37 = vand.u32 2147483648, %v2045_v48 }
 0x153   :  { %v844_v2 = vadd.f32 %v834_v57, %v824_v56  ;;  %v825_v3 = vmul.f32 %v639_v60, %v639_v60  ;;  %1393 = vrsqrt.f32 %v2053_v59  ;;  %v835_v4 = vmul.f32 %v700_v61, %v700_v61 }
 0x154   :  { %v641_v5 = vpop.f32.mrf.mxu0  ;;  %v702_v7 = vpop.f32.mrf.mxu1  ;;  %v2069_v14 = vmax.f32 %v843_v0, 1e-08  ;;  %vm882_vm11 = vcmp.eq.f32.partialorder %v2045_v48, 0.0  ;;  %vm887_vm12 = vcmp.eq.f32.partialorder %v2047_v49, inf  ;;  %vm889_vm13 = vcmp.eq.f32.partialorder %v2047_v49, 0.0 }
 0x155   :  { %v2071_v10 = vmax.f32 %v844_v2, 1e-08  ;;  %v826_v15 = vmul.f32 %v641_v5, %v641_v5  ;;  %v836_v16 = vmul.f32 %v702_v7, %v702_v7  ;;  %v845_v20 = vadd.f32 %v835_v4, %v825_v3 }
 0x156   :  { %v1380_v18 = vpop.eup %1379  ;;  %v643_v21 = vpop.f32.mrf.mxu0  ;;  %1395 = vrsqrt.f32 %v2069_v14  ;;  %v890_v52 = vand.u32 2147483648, %v2047_v49  ;;  %vm894_vm14 = vcmp.eq.f32.partialorder %v2053_v59, inf  ;;  %vm896_vm15 = vcmp.eq.f32.partialorder %v2053_v59, 0.0 }
 0x157   :  { %v704_v22 = vpop.f32.mrf.mxu1  ;;  %v858_v23 = vmul.f32 %v1380_v18, %v2016_v6  ;;  %v846_v11 = vadd.f32 %v836_v16, %v826_v15  ;;  %1397 = vrsqrt.f32 %v2071_v10  ;;  %v2082_v26 = vmax.f32 %v845_v20, 1e-08 }
 0x158   :  { %v644_v27 = vpop.f32.mrf.mxu0  ;;  %v1382_v29 = vpop.eup %1381  ;;  %v897_v55 = vand.u32 2147483648, %v2053_v59  ;;  %vm901_vm0 = vcmp.eq.f32.partialorder %v2069_v14, inf  ;;  %vm903_vm1 = vcmp.eq.f32.partialorder %v2069_v14, 0.0  ;;  %v904_v61 = vand.u32 2147483648, %v2069_v14 }
 0x159   :  { %v705_v28 = vpop.f32.mrf.mxu1  ;;  %v860_v31 = vsel %vm859_vm4, %v2016_v6, %v858_v23  ;;  %v2089_v32 = vmax.f32 %v846_v11, 1e-08  ;;  %v865_v33 = vmul.f32 %v1382_v29, %v2027_v17  ;;  %1399 = vrsqrt.f32 %v2082_v26  ;;  %v2095_v36 = vpop.eup %1383 }
 0x15a   :  { %v2101_v39 = vsel %vm861_vm5, %v862_v19, %v860_v31  ;;  %v1386_v42 = vpop.eup %1385  ;;  %vm908_vm2 = vcmp.eq.f32.partialorder %v2071_v10, inf  ;;  %v911_v0 = vand.u32 2147483648, %v2071_v10  ;;  %vm910_vm3 = vcmp.eq.f32.partialorder %v2071_v10, 0.0 }
 0x15b   :  { %1401 = vrsqrt.f32 %v2089_v32  ;;  %v867_v51 = vsel %vm866_vm6, %v2027_v17, %v865_v33  ;;  %v872_v53 = vmul.f32 %v1386_v42, %v2033_v30  ;;  %v2117_v54 = vpop.eup %1387  ;;  %v2123_v56 = vsub.f32 %v2101_v39, %v1967_v34 }
 0x15c   :  { %v2113_v6 = vsel %vm868_vm7, %v869_v25, %v867_v51  ;;  %vm915_vm4 = vcmp.eq.f32.partialorder %v2082_v26, inf  ;;  %v918_v15 = vand.u32 2147483648, %v2082_v26  ;;  %vm917_vm5 = vcmp.eq.f32.partialorder %v2082_v26, 0.0 }
 0x15d   :  { %v2127_v57 = vsub.f32 %v2113_v6, %v1973_v38  ;;  %v1390_v17 = vpop.eup %1389  ;;  %v874_v60 = vsel %vm873_vm8, %v2033_v30, %v872_v53  ;;  %v1077_v3 = vmul.f32 %v2123_v56, %v2123_v56  ;;  %vm922_vm6 = vcmp.eq.f32.partialorder %v2089_v32, inf }
 0x15e   :  { %v1392_v2 = vpop.eup %1391  ;;  %v879_v34 = vmul.f32 %v1390_v17, %v2045_v48  ;;  %v2139_v38 = vsel %vm875_vm9, %v876_v35, %v874_v60  ;;  %vm924_vm7 = vcmp.eq.f32.partialorder %v2089_v32, 0.0  ;;  %1403 = vlog2.f32 %v2101_v39 }
 0x15f   :  { %v1078_v4 = vmul.f32 %v2127_v57, %v2127_v57  ;;  %v886_v7 = vmul.f32 %v1392_v2, %v2047_v49  ;;  %v2151_v30 = vsub.f32 %v2139_v38, %v1979_v41  ;;  %1405 = vlog2.f32 %v2113_v6 }
 0x160   :  { %v1394_v5 = vpop.eup %1393  ;;  %v881_v16 = vsel %vm880_vm10, %v2045_v48, %v879_v34  ;;  %1407 = vlog2.f32 %v2139_v38  ;;  %vm979_vm8 = vcmask 1043456   ;;  %vm941_vm9 = vcmp.lt.s32.totalorder %v2041_v43, 129 }
 0x161   :  { %v893_v18 = vmul.f32 %v1394_v5, %v2053_v59  ;;  %v1087_v19 = vadd.f32 %v1078_v4, %v1077_v3  ;;  %v2161_v20 = vsel %vm882_vm11, %v883_v37, %v881_v16  ;;  %v888_v41 = vsel %vm887_vm12, %v2047_v49, %v886_v7 }
 0x162   :  { %v1079_v21 = vmul.f32 %v2151_v30, %v2151_v30  ;;  %v2171_v23 = vsel %vm889_vm13, %v890_v52, %v888_v41  ;;  %v2178_v11 = vsub.f32 %v2161_v20, %v1984_v44  ;;  %v925_v44 = vand.u32 2147483648, %v2089_v32 }
 0x163   :  { %v1396_v22 = vpop.eup %1395  ;;  %v895_v48 = vsel %vm894_vm14, %v2053_v59, %v893_v18  ;;  %v2188_v49 = vsub.f32 %v2171_v23, %v1991_v46  ;;  %v962_v37 = vand.u32 2147483647, %v2123_v56  ;;  %1409 = vlog2.f32 %v2161_v20 }
 0x164   :  { %v1398_v25 = vpop.eup %1397  ;;  %v2183_v27 = vsel %vm896_vm15, %v897_v55, %v895_v48  ;;  %v900_v28 = vmul.f32 %v1396_v22, %v2069_v14  ;;  %v1080_v31 = vmul.f32 %v2178_v11, %v2178_v11  ;;  %v1088_v35 = vadd.f32 %v1087_v19, %v1079_v21 }
 0x165   :  { %v907_v29 = vmul.f32 %v1398_v25, %v2071_v10  ;;  %v2201_v46 = vsub.f32 %v2183_v27, %v1996_v50  ;;  %1411 = vlog2.f32 %v2171_v23  ;;  %v963_v60 = vand.u32 2147483647, %v2127_v57 }
 0x166   :  { %v1400_v59 = vpop.eup %1399  ;;  %v902_v33 = vsel %vm901_vm0, %v2069_v14, %v900_v28  ;;  %v1081_v14 = vmul.f32 %v2188_v49, %v2188_v49  ;;  %1413 = vlog2.f32 %v2183_v27  ;;  %v2257_v7 = vmul.f32 0.6931472, %v2043_v45 }
 0x167   :  { %v2206_v51 = vsel %vm903_vm1, %v904_v61, %v902_v33  ;;  %v909_v52 = vsel %vm908_vm2, %v2071_v10, %v907_v29  ;;  %v914_v53 = vmul.f32 %v1400_v59, %v2082_v26  ;;  %v1089_v10 = vadd.f32 %v1088_v35, %v1080_v31 }
 0x168   :  { %v1402_v42 = vpop.eup %1401  ;;  %v2215_v50 = vsel %vm910_vm3, %v911_v0, %v909_v52  ;;  %v2220_v56 = vsub.f32 %v2206_v51, %v2003_v58  ;;  %v1082_v2 = vmul.f32 %v2201_v46, %v2201_v46  ;;  %1415 = vlog2.f32 %v2206_v51 }
 0x169   :  { %v921_v55 = vmul.f32 %v1402_v42, %v2089_v32  ;;  %v916_v17 = vsel %vm915_vm4, %v2082_v26, %v914_v53  ;;  %v2239_v0 = vsub.f32 %v2215_v50, %v2011_v1  ;;  %v964_v26 = vand.u32 2147483647, %v2151_v30 }
 0x16a   :  { %v2232_v61 = vsel %vm917_vm5, %v918_v15, %v916_v17  ;;  %v1083_v1 = vmul.f32 %v2220_v56, %v2220_v56  ;;  %v1090_v4 = vadd.f32 %v1089_v10, %v1081_v14  ;;  %v972_v30 = vadd.f32 %v963_v60, %v962_v37 }
 0x16b   :  { %v923_v58 = vsel %vm922_vm6, %v2089_v32, %v921_v55  ;;  %v935_v57 = vsub.f32 %v2232_v61, %v2029_v24  ;;  %v965_v32 = vand.u32 2147483647, %v2178_v11  ;;  %v2260_v24 = vmul.f32 0.6931472, %v2049_v13  ;;  %v1404_v13 = vpop.eup %1403 }
 0x16c   :  { %v926_v34 = vsel %vm924_vm7, %v925_v44, %v923_v58  ;;  %1417 = vlog2.f32 %v2232_v61  ;;  %v1091_v15 = vadd.f32 %v1090_v4, %v1082_v2  ;;  %v943_v18 = vmul.f32 %v2113_v6, %v2113_v6  ;;  %v1406_v22 = vpop.eup %1405 }
 0x16d   :  { %v2250_v3 = vsub.f32 %v926_v34, %v2037_v40  ;;  %v1085_v5 = vmul.f32 %v935_v57, %v935_v57  ;;  %v1084_v40 = vmul.f32 %v2239_v0, %v2239_v0  ;;  %1419 = vlog2.f32 %v2215_v50  ;;  %v1408_v28 = vpop.eup %1407 }
 0x16e   :  { %v2271_v45 = vmul.f32 0.6931472, %v2059_v47  ;;  %1421 = vlog2.f32 %v926_v34  ;;  %v1092_v19 = vadd.f32 %v1091_v15, %v1083_v1  ;;  %v966_v41 = vand.u32 2147483647, %v2188_v49 }
 0x16f   :  { %v1086_v16 = vmul.f32 %v2250_v3, %v2250_v3  ;;  %v973_v21 = vadd.f32 %v972_v30, %v964_v26  ;;  %v1094_v48 = vsel %vm979_vm8, %v1085_v5, 0.0  ;;  %v967_v11 = vand.u32 2147483647, %v2201_v46 }
 0x170   :  { %v942_v25 = vmul.f32 %v2101_v39, %v2101_v39  ;;  %v945_v6 = vmul.f32 %v2161_v20, %v2161_v20  ;;  %v1093_v47 = vadd.f32 %v1092_v19, %v1084_v40  ;;  %v968_v29 = vand.u32 2147483647, %v2220_v56  ;;  %v1410_v39 = vpop.eup %1409 }
 0x171   :  { %v974_v44 = vadd.f32 %v973_v21, %v965_v32  ;;  %v944_v49 = vmul.f32 %v2139_v38, %v2139_v38  ;;  %v1096_v31 = vsel %vm979_vm8, %v1086_v16, 0.0  ;;  %v969_v59 = vand.u32 2147483647, %v2239_v0 }
 0x172   :  { %v970_v33 = vand.u32 2147483647, %v935_v57  ;;  %v953_v46 = vsel %vm941_vm9, %v943_v18, 0.0  ;;  %v1095_v35 = vadd.f32 %v1094_v48, %v1093_v47  ;;  %v947_v20 = vmul.f32 %v2183_v27, %v2183_v27  ;;  %v1412_v56 = vpop.eup %1411 }
 0x173   :  { %v975_v37 = vadd.f32 %v974_v44, %v966_v41  ;;  %v1109_v42 = vadd.f32 %v953_v46, %v942_v25  ;;  %v946_v52 = vmul.f32 %v2171_v23, %v2171_v23  ;;  %v955_v38 = vsel %vm941_vm9, %v945_v6, 0.0  ;;  %v1414_v57 = vpop.eup %1413 }
 0x174   :  { %v1016_v53 = vmul.f32 0.6931472, %v1404_v13  ;;  %v1018_v55 = vmul.f32 0.6931472, %v1406_v22  ;;  %v1097_v14 = vadd.f32 %v1096_v31, %v1095_v35  ;;  %v1020_v60 = vmul.f32 0.6931472, %v1408_v28 }
 0x175   :  { %v976_v17 = vadd.f32 %v975_v37, %v967_v11  ;;  %v1110_v10 = vadd.f32 %v1109_v42, %v944_v49  ;;  %v971_v58 = vand.u32 2147483647, %v2250_v3  ;;  %v980_v0 = vsel %vm979_vm8, %v970_v33, 0.0  ;;  %v1416_v5 = vpop.eup %1415 }
 0x176   :  { %v949_v27 = vmul.f32 %v2215_v50, %v2215_v50  ;;  %v1022_v2 = vmul.f32 0.6931472, %v1410_v39  ;;  %1098 = vadd.xlane.f32.xlu1 %v1097_v14  ;;  %v951_v26 = vmul.f32 %v926_v34, %v926_v34  ;;  %v957_v1 = vsel %vm941_vm9, %v947_v20, 0.0 }
 0x177   :  { %v977_v23 = vadd.f32 %v976_v17, %v968_v29  ;;  %v1111_v4 = vadd.f32 %v1110_v10, %v955_v38  ;;  %v1024_v32 = vmul.f32 0.6931472, %v1412_v56  ;;  %v1035_v40 = vsub.f32 %v2055_v62, %v1016_v53 }
 0x178   :  { %v1036_v3 = vsub.f32 %v2057_v63, %v1018_v55  ;;  %v1037_v15 = vsub.f32 %v2063_v8, %v1020_v60  ;;  %v948_v50 = vmul.f32 %v2206_v51, %v2206_v51  ;;  %v950_v16 = vmul.f32 %v2232_v61, %v2232_v61 }
 0x179   :  { %v978_v30 = vadd.f32 %v977_v23, %v969_v59  ;;  %v1112_v34 = vadd.f32 %v1111_v4, %v946_v52  ;;  %v1418_v18 = vpop.eup %1417  ;;  %v982_v13 = vsel %vm979_vm8, %v971_v58, 0.0  ;;  %v959_v19 = vsel %vm941_vm9, %v949_v27, 0.0 }
 0x17a   :  { %v1026_v41 = vmul.f32 0.6931472, %v1414_v57  ;;  %v1038_v62 = vsub.f32 %v2065_v9, %v1022_v2  ;;  %v1420_v63 = vpop.eup %1419  ;;  %v961_v8 = vsel %vm941_vm9, %v951_v26, 0.0  ;;  %v1028_v51 = vmul.f32 0.6931472, %v1416_v5 }
 0x17b   :  { %v981_v21 = vadd.f32 %v980_v0, %v978_v30  ;;  %v1113_v22 = vadd.f32 %v1112_v34, %v957_v1  ;;  %v1422_v48 = vpop.eup %1421  ;;  %v1039_v61 = vsub.f32 %v2257_v7, %v1024_v32  ;;  %v1045_v11 = vand.u32 2147483647, %v1035_v40 }
 0x17c   :  { %v1046_v25 = vand.u32 2147483647, %v1036_v3  ;;  %v1047_v6 = vand.u32 2147483647, %v1037_v15  ;;  %v1116_v29 = vsel %vm979_vm8, %v950_v16, 0.0  ;;  %v1040_v9 = vsub.f32 %v2260_v24, %v1026_v41 }
 0x17d   :  { %v983_v28 = vadd.f32 %v982_v13, %v981_v21  ;;  %v1114_v47 = vadd.f32 %v1113_v22, %v948_v50  ;;  %v1032_v44 = vmul.f32 0.6931472, %v1418_v18  ;;  %v1030_v49 = vmul.f32 0.6931472, %v1420_v63 }
 0x17e   :  { %v1048_v31 = vand.u32 2147483647, %v1038_v62  ;;  %v1055_v59 = vadd.f32 %v1046_v25, %v1045_v11  ;;  %v1010_v33 = vmul.f32 0.6931472, %v2067_v12  ;;  %v1012_v46 = vmul.f32 0.6931472, %v2095_v36 }
 0x17f   :  { %984 = vadd.xlane.f32.xlu0 %v983_v28  ;;  %v1115_v43 = vadd.f32 %v1114_v47, %v959_v19  ;;  %v1034_v7 = vmul.f32 0.6931472, %v1422_v48  ;;  %v1118_v39 = vsel %vm979_vm8, %v961_v8, 0.0  ;;  %v1041_v35 = vsub.f32 %v2271_v45, %v1028_v51 }
 0x180   :  { %v1049_v37 = vand.u32 2147483647, %v1039_v61  ;;  %v1056_v20 = vadd.f32 %v1055_v59, %v1047_v6  ;;  %v1014_v52 = vmul.f32 0.6931472, %v2117_v54  ;;  %v1043_v38 = vsub.f32 %v1012_v46, %v1032_v44 }
 0x181   :  { %v1117_v42 = vadd.f32 %v1116_v29, %v1115_v43  ;;  %v1042_v24 = vsub.f32 %v1010_v33, %v1030_v49  ;;  %v1050_v53 = vand.u32 2147483647, %v1040_v9  ;;  %v1051_v17 = vand.u32 2147483647, %v1041_v35 }
 0x182   :  { %v1057_v55 = vadd.f32 %v1056_v20, %v1048_v31  ;;  %v1044_v14 = vsub.f32 %v1014_v52, %v1034_v7  ;;  %v1053_v36 = vand.u32 2147483647, %v1043_v38 }
 0x183   :  { %v1119_v56 = vadd.f32 %v1118_v39, %v1117_v42  ;;  %v1052_v10 = vand.u32 2147483647, %v1042_v24 }
 0x184   :  { %v1058_v12 = vadd.f32 %v1057_v55, %v1049_v37  ;;  %v1054_v58 = vand.u32 2147483647, %v1044_v14  ;;  %v1062_v45 = vsel %vm979_vm8, %v1053_v36, 0.0 }
 0x185   :  { %1120 = vadd.xlane.f32.xlu1 %v1119_v56 }
 0x186   :  { %v1059_v60 = vadd.f32 %v1058_v12, %v1050_v53  ;;  %v1064_v2 = vsel %vm979_vm8, %v1054_v58, 0.0 }
 0x188   :  { %v1060_v0 = vadd.f32 %v1059_v60, %v1051_v17 }
 0x18a   :  { %v1061_v27 = vadd.f32 %v1060_v0, %v1052_v10 }
 0x18c   :  { %v1063_v54 = vadd.f32 %v1062_v45, %v1061_v27 }
 0x18e   :  { %v1065_v57 = vadd.f32 %v1064_v2, %v1063_v54 }
 0x190   :  { %1066 = vadd.xlane.f32.xlu0 %v1065_v57 }
 0x1ff   :  { %v1099_v26 = vpop.xlane.xlu1 %1098 }
 0x200   :  { %v1100_v3 = vrot.slane %v1099_v26, 4 }
 0x202   :  { %v1101_v16 = vadd.f32 %v1100_v3, %v1099_v26 }
 0x204   :  { %v1102_v18 = vrot.slane %v1101_v16, 2 }
 0x206   :  { %v1103_v63 = vadd.f32 %v1102_v18, %v1101_v16 }
 0x208   :  { %v985_v23 = vpop.xlane.xlu0 %984  ;;  %v1104_v51 = vrot.slane %v1103_v63, 1 }
 0x209   :  { %v986_v1 = vrot.slane %v985_v23, 4 }
 0x20a   :  { %v1105_v25 = vadd.f32 %v1104_v51, %v1103_v63 }
 0x20b   :  { %v987_v4 = vadd.f32 %v986_v1, %v985_v23 }
 0x20d   :  { %v988_v5 = vrot.slane %v987_v4, 2 }
 0x20e   :  { %v1121_v32 = vpop.xlane.xlu1 %1120 }
 0x20f   :  { %v989_v40 = vadd.f32 %v988_v5, %v987_v4  ;;  %v1122_v30 = vrot.slane %v1121_v32, 4 }
 0x211   :  { %v990_v15 = vrot.slane %v989_v40, 1  ;;  %v1123_v34 = vadd.f32 %v1122_v30, %v1121_v32 }
 0x213   :  { %v991_v50 = vadd.f32 %v990_v15, %v989_v40  ;;  %v1124_v19 = vrot.slane %v1123_v34, 2 }
 0x215   :  { %1222 = vpush %v991_v50  ;;  %v1125_v21 = vadd.f32 %v1124_v19, %v1123_v34 }
 0x217   :  { %v1126_v61 = vrot.slane %v1125_v21, 1 }
 0x219   :  { %v1067_v13 = vpop.xlane.xlu0 %1066  ;;  %v1127_v6 = vadd.f32 %v1126_v61, %v1125_v21 }
 0x21a   :  { %v1068_v41 = vrot.slane %v1067_v13, 4 }
 0x21c   :  { %v1069_v62 = vadd.f32 %v1068_v41, %v1067_v13 }
 0x21e   :  { %v1070_v8 = vrot.slane %v1069_v62, 2 }
 0x220   :  { %v1071_v22 = vadd.f32 %v1070_v8, %v1069_v62 }
 0x222   :  { %v1072_v48 = vrot.slane %v1071_v22, 1 }
 0x224   :  { %v1073_v11 = vadd.f32 %v1072_v48, %v1071_v22 }
 0x226   :  { %1224 = vpush %v1073_v11 }
 0x227   :  { %1226 = vpush %v1105_v25 }
 0x228   :  { %1228 = vpush %v1127_v6 }
 0x246   :  { %s1223_s1 = spop %1222 }
 0x247   :  { %994 = sst [smem:[#allocation2]] %s1223_s1 }
 0x257   :  { %s1225_s26 = spop %1224 }
 0x258   :  { %1076 = sst [smem:[#allocation2 + $0x1]] %s1225_s26  ;;  %s1227_s27 = spop %1226 }
 0x259   :  { %1108 = sst [smem:[#allocation2 + $0x2]] %s1227_s27  ;;  %s1229_s28 = spop %1228 }
 0x25a   :  { %1130 = sst [smem:[#allocation2 + $0x3]] %s1229_s28 }
 0x25b   :  { %1434 = shalt.err (!%p1431_p4)
}
 0x25c   :  { %s1437_s30 = smov [#allocation2]  }
 0x25d   :  { %1140 = dma.smem_to_vmem %s1437_s30, 16, %s1138_s25, [#allocation3]  }
 0x25e   :  { %1435 = dma.done.wait [#allocation3], 16  }
 0x25f   :  { %1436 = vsyncadd [#allocation3], 4294967280 }
 0x260   :  { %1144 = sfence }
 0x261   :  { %1145 = vsyncpa [#allocation3], 1 }

// kernel: criterion_forward.8
= control target key start
LH: loop header
LB: loop body
LE: loop exit
PB: predicated region body
PF: predicated region fallthrough
CT: control target
= control target key end

     0   :  { %s4692_s0 = inlined_call_operand.vmem [shape: bf16[18,512], index: 0, kind: input, shape index: {}]   ;;  %s4693_s1 = inlined_call_operand.vmem [shape: bf16[18,512], index: 1, kind: input, shape index: {}]   ;;  %s4694_s2 = inlined_call_operand.vmem [shape: bf16[512,768], index: 2, kind: input, shape index: {}]   ;;  %s4695_s3 = inlined_call_operand.vmem [shape: f32[4], index: 3, kind: output, shape index: {}]  }
   0x1   :  { %v2484_v0 = vld [vmem:[%s4694_s2 + $0x154] ss:$24 sps:$4 sm:$0xff]   ;;  %v2488_v2 = vld [vmem:[%s4694_s2 + $0x150] ss:$24 sps:$4 sm:$0xff]   ;;  %v2490_v4 = vld [vmem:[%s4694_s2 + $0x124] ss:$24 sps:$4 sm:$0xff]  }
   0x2   :  { %v2486_v1 = vld [vmem:[%s4694_s2 + $0x454] ss:$24 sps:$4 sm:$0xff]   ;;  %1207 = vmatprep.subr.bf16.mxu0 %v2484_v0  ;;  %v2489_v3 = vld [vmem:[%s4694_s2 + $0x450] ss:$24 sps:$4 sm:$0xff]   ;;  %v2492_v5 = vld [vmem:[%s4694_s2 + $0x424] ss:$24 sps:$4 sm:$0xff]  }
   0x3   :  { %1258 = vmatprep.subr.bf16.mxu1 %v2486_v1  ;;  %1208 = vmatpush1.bf16.msra.mxu0 %v2488_v2  ;;  %v2494_v6 = vld [vmem:[%s4694_s2 + $0x120] ss:$24 sps:$4 sm:$0xff]   ;;  %v2496_v8 = vld [vmem:[%s4694_s2 + $0xf4] ss:$24 sps:$4 sm:$0xff]   ;;  %v2500_v10 = vld [vmem:[%s4694_s2 + $0xf0] ss:$24 sps:$4 sm:$0xff]  }
   0x4   :  { %1259 = vmatpush1.bf16.msra.mxu1 %v2489_v3  ;;  %1209 = vmatprep.subr.bf16.mxu0 %v2490_v4  ;;  %v2495_v7 = vld [vmem:[%s4694_s2 + $0x420] ss:$24 sps:$4 sm:$0xff]   ;;  %v2498_v9 = vld [vmem:[%s4694_s2 + $0x3f4] ss:$24 sps:$4 sm:$0xff]   ;;  %v2501_v11 = vld [vmem:[%s4694_s2 + $0x3f0] ss:$24 sps:$4 sm:$0xff]  }
   0x5   :  { %1260 = vmatprep.subr.bf16.mxu1 %v2492_v5  ;;  %v2502_v12 = vld [vmem:[%s4694_s2 + $0xc4] ss:$24 sps:$4 sm:$0xff]   ;;  %v2506_v14 = vld [vmem:[%s4694_s2 + $0xc0] ss:$24 sps:$4 sm:$0xff]   ;;  %v2508_v16 = vld [vmem:[%s4694_s2 + $0x94] ss:$24 sps:$4 sm:$0xff]  }
   0x6   :  { %v2504_v13 = vld [vmem:[%s4694_s2 + $0x3c4] ss:$24 sps:$4 sm:$0xff]   ;;  %v2507_v15 = vld [vmem:[%s4694_s2 + $0x3c0] ss:$24 sps:$4 sm:$0xff]   ;;  %v2510_v17 = vld [vmem:[%s4694_s2 + $0x394] ss:$24 sps:$4 sm:$0xff]  }
   0x7   :  { %1210 = vmatpush1.bf16.msra.mxu0 %v2494_v6  ;;  %v2512_v18 = vld [vmem:[%s4694_s2 + $0x90] ss:$24 sps:$4 sm:$0xff]   ;;  %v2514_v20 = vld [vmem:[%s4694_s2 + $0x64] ss:$24 sps:$4 sm:$0xff]   ;;  %v2518_v22 = vld [vmem:[%s4694_s2 + $0x60] ss:$24 sps:$4 sm:$0xff]  }
   0x8   :  { %1261 = vmatpush1.bf16.msra.mxu1 %v2495_v7  ;;  %1211 = vmatprep.subr.bf16.mxu0 %v2496_v8  ;;  %v2513_v19 = vld [vmem:[%s4694_s2 + $0x390] ss:$24 sps:$4 sm:$0xff]   ;;  %v2516_v21 = vld [vmem:[%s4694_s2 + $0x364] ss:$24 sps:$4 sm:$0xff]   ;;  %v2519_v23 = vld [vmem:[%s4694_s2 + $0x360] ss:$24 sps:$4 sm:$0xff]  }
   0x9   :  { %1262 = vmatprep.subr.bf16.mxu1 %v2498_v9  ;;  %v2520_v24 = vld [vmem:[%s4694_s2 + $0x34] ss:$24 sps:$4 sm:$0xff]   ;;  %v2524_v26 = vld [vmem:[%s4694_s2 + $0x30] ss:$24 sps:$4 sm:$0xff]   ;;  %v2526_v28 = vld [vmem:[%s4694_s2 + $0x4] ss:$24 sps:$4 sm:$0xff]  }
   0xa   :  { %v2522_v25 = vld [vmem:[%s4694_s2 + $0x334] ss:$24 sps:$4 sm:$0xff]   ;;  %v2525_v27 = vld [vmem:[%s4694_s2 + $0x330] ss:$24 sps:$4 sm:$0xff]   ;;  %v2528_v29 = vld [vmem:[%s4694_s2 + $0x304] ss:$24 sps:$4 sm:$0xff]  }
   0xb   :  { %1212 = vmatpush1.bf16.msra.mxu0 %v2500_v10  ;;  %v2530_v30 = vld [vmem:[%s4694_s2] ss:$24 sps:$4 sm:$0xff]   ;;  %v2532_v32 = vld [vmem:[%s4694_s2 + $0x2d4] ss:$24 sps:$4 sm:$0xff]   ;;  %v2536_v34 = vld [vmem:[%s4694_s2 + $0x2d0] ss:$24 sps:$4 sm:$0xff]  }
   0xc   :  { %1263 = vmatpush1.bf16.msra.mxu1 %v2501_v11  ;;  %1213 = vmatprep.subr.bf16.mxu0 %v2502_v12  ;;  %v2531_v31 = vld [vmem:[%s4694_s2 + $0x300] ss:$24 sps:$4 sm:$0xff]   ;;  %v2534_v33 = vld [vmem:[%s4694_s2 + $0x5d4] ss:$24 sps:$4 sm:$0xff]   ;;  %v2537_v35 = vld [vmem:[%s4694_s2 + $0x5d0] ss:$24 sps:$4 sm:$0xff]  }
   0xd   :  { %1264 = vmatprep.subr.bf16.mxu1 %v2504_v13  ;;  %v2538_v36 = vld [vmem:[%s4694_s2 + $0x2a4] ss:$24 sps:$4 sm:$0xff]   ;;  %v2542_v38 = vld [vmem:[%s4694_s2 + $0x2a0] ss:$24 sps:$4 sm:$0xff]   ;;  %v2544_v40 = vld [vmem:[%s4694_s2 + $0x274] ss:$24 sps:$4 sm:$0xff]  }
   0xe   :  { %v2540_v37 = vld [vmem:[%s4694_s2 + $0x5a4] ss:$24 sps:$4 sm:$0xff]   ;;  %v2543_v39 = vld [vmem:[%s4694_s2 + $0x5a0] ss:$24 sps:$4 sm:$0xff]   ;;  %v2546_v41 = vld [vmem:[%s4694_s2 + $0x574] ss:$24 sps:$4 sm:$0xff]  }
   0xf   :  { %1214 = vmatpush1.bf16.msra.mxu0 %v2506_v14  ;;  %v2548_v42 = vld [vmem:[%s4694_s2 + $0x270] ss:$24 sps:$4 sm:$0xff]   ;;  %v2550_v44 = vld [vmem:[%s4694_s2 + $0x244] ss:$24 sps:$4 sm:$0xff]   ;;  %v2554_v46 = vld [vmem:[%s4694_s2 + $0x240] ss:$24 sps:$4 sm:$0xff]  }
  0x10   :  { %1265 = vmatpush1.bf16.msra.mxu1 %v2507_v15  ;;  %1215 = vmatprep.subr.bf16.mxu0 %v2508_v16  ;;  %v2549_v43 = vld [vmem:[%s4694_s2 + $0x570] ss:$24 sps:$4 sm:$0xff]   ;;  %v2552_v45 = vld [vmem:[%s4694_s2 + $0x544] ss:$24 sps:$4 sm:$0xff]   ;;  %v2555_v47 = vld [vmem:[%s4694_s2 + $0x540] ss:$24 sps:$4 sm:$0xff]  }
  0x11   :  { %1266 = vmatprep.subr.bf16.mxu1 %v2510_v17  ;;  %v3094_v48 = vld [vmem:[%s4692_s0 + $0x4] ss:$16 sps:$4 sm:$0xff]   ;;  %v3104_v50 = vld [vmem:[%s4692_s0 + $0xc] ss:$16 sps:$4 sm:$0xff]   ;;  %v3116_v52 = vld [vmem:[%s4694_s2 + $0x210] ss:$24 sps:$4 sm:$0xff]  }
  0x12   :  { %v3099_v49 = vld [vmem:[%s4694_s2 + $0x214] ss:$24 sps:$4 sm:$0xff]   ;;  %1239 = vmatprep.mubr.bf16.mxu0 %v3094_v48  ;;  %1290 = vmatprep.mubr.bf16.mxu1 %v3104_v50  ;;  %v3121_v53 = vld [vmem:[%s4694_s2 + $0x510] ss:$24 sps:$4 sm:$0xff]   ;;  %v3126_v54 = vld [vmem:[%s4694_s2 + $0x1e4] ss:$24 sps:$4 sm:$0xff]  }
  0x13   :  { %1216 = vmatpush1.bf16.msra.mxu0 %v2512_v18  ;;  %v3109_v51 = vld [vmem:[%s4694_s2 + $0x514] ss:$24 sps:$4 sm:$0xff]   ;;  %v3133_v55 = vld [vmem:[%s4694_s2 + $0x4e4] ss:$24 sps:$4 sm:$0xff]   ;;  %v3138_v56 = vld [vmem:[%s4694_s2 + $0x1e0] ss:$24 sps:$4 sm:$0xff]  }
  0x14   :  { %1267 = vmatpush1.bf16.msra.mxu1 %v2513_v19  ;;  %1217 = vmatprep.subr.bf16.mxu0 %v2514_v20  ;;  %v3143_v57 = vld [vmem:[%s4694_s2 + $0x4e0] ss:$24 sps:$4 sm:$0xff]   ;;  %v3150_v58 = vld [vmem:[%s4694_s2 + $0x1b4] ss:$24 sps:$4 sm:$0xff]   ;;  %v3162_v60 = vld [vmem:[%s4694_s2 + $0x1b0] ss:$24 sps:$4 sm:$0xff]  }
  0x15   :  { %1268 = vmatprep.subr.bf16.mxu1 %v2516_v21  ;;  %v3157_v59 = vld [vmem:[%s4694_s2 + $0x4b4] ss:$24 sps:$4 sm:$0xff]   ;;  %v3167_v61 = vld [vmem:[%s4694_s2 + $0x4b0] ss:$24 sps:$4 sm:$0xff]   ;;  %v3174_v62 = vld [vmem:[%s4694_s2 + $0x184] ss:$24 sps:$4 sm:$0xff]  }
  0x16   :  { %v3181_v63 = vld [vmem:[%s4694_s2 + $0x484] ss:$24 sps:$4 sm:$0xff]   ;;  %v3186_v0 = vld [vmem:[%s4694_s2 + $0x180] ss:$24 sps:$4 sm:$0xff]  }
  0x17   :  { %1218 = vmatpush1.bf16.msra.mxu0 %v2518_v22  ;;  %v3191_v1 = vld [vmem:[%s4694_s2 + $0x480] ss:$24 sps:$4 sm:$0xff]   ;;  %v3198_v2 = vld [vmem:[%s4694_s2 + $0x15c] ss:$24 sps:$4 sm:$0xff]   ;;  %v3232_v8 = vld [vmem:[%s4694_s2 + $0x12c] ss:$24 sps:$4 sm:$0xff]  }
  0x18   :  { %1269 = vmatpush1.bf16.msra.mxu1 %v2519_v23  ;;  %1219 = vmatprep.subr.bf16.mxu0 %v2520_v24  ;;  %v3205_v3 = vld [vmem:[%s4694_s2 + $0x45c] ss:$24 sps:$4 sm:$0xff]   ;;  %v3210_v4 = vld [vmem:[%s4692_s0] ss:$16 sps:$4 sm:$0xff]   ;;  %v3215_v5 = vld [vmem:[%s4692_s0 + $0x8] ss:$16 sps:$4 sm:$0xff]  }
  0x19   :  { %1270 = vmatprep.subr.bf16.mxu1 %v2522_v25  ;;  %v3220_v6 = vld [vmem:[%s4694_s2 + $0x158] ss:$24 sps:$4 sm:$0xff]   ;;  %v3239_v9 = vld [vmem:[%s4694_s2 + $0x42c] ss:$24 sps:$4 sm:$0xff]   ;;  %v3246_v10 = vld [vmem:[%s4694_s2 + $0x128] ss:$24 sps:$4 sm:$0xff]  }
  0x1a   :  { %v3225_v7 = vld [vmem:[%s4694_s2 + $0x458] ss:$24 sps:$4 sm:$0xff]   ;;  %v3251_v11 = vld [vmem:[%s4694_s2 + $0x428] ss:$24 sps:$4 sm:$0xff]   ;;  %v3258_v12 = vld [vmem:[%s4694_s2 + $0xfc] ss:$24 sps:$4 sm:$0xff]  }
  0x1b   :  { %1220 = vmatpush1.bf16.msra.mxu0 %v2524_v26  ;;  %v3265_v13 = vld [vmem:[%s4694_s2 + $0x3fc] ss:$24 sps:$4 sm:$0xff]   ;;  %v3270_v14 = vld [vmem:[%s4694_s2 + $0xf8] ss:$24 sps:$4 sm:$0xff]   ;;  %v3282_v16 = vld [vmem:[%s4694_s2 + $0xcc] ss:$24 sps:$4 sm:$0xff]  }
  0x1c   :  { %1271 = vmatpush1.bf16.msra.mxu1 %v2525_v27  ;;  %1221 = vmatprep.subr.bf16.mxu0 %v2526_v28  ;;  %v3275_v15 = vld [vmem:[%s4694_s2 + $0x3f8] ss:$24 sps:$4 sm:$0xff]   ;;  %v3289_v17 = vld [vmem:[%s4694_s2 + $0x3cc] ss:$24 sps:$4 sm:$0xff]   ;;  %v3294_v18 = vld [vmem:[%s4694_s2 + $0xc8] ss:$24 sps:$4 sm:$0xff]  }
  0x1d   :  { %1272 = vmatprep.subr.bf16.mxu1 %v2528_v29  ;;  %v3299_v19 = vld [vmem:[%s4694_s2 + $0x3c8] ss:$24 sps:$4 sm:$0xff]   ;;  %v3306_v20 = vld [vmem:[%s4694_s2 + $0x9c] ss:$24 sps:$4 sm:$0xff]   ;;  %v3318_v22 = vld [vmem:[%s4694_s2 + $0x98] ss:$24 sps:$4 sm:$0xff]  }
  0x1e   :  { %v3313_v21 = vld [vmem:[%s4694_s2 + $0x39c] ss:$24 sps:$4 sm:$0xff]   ;;  %v3323_v23 = vld [vmem:[%s4694_s2 + $0x398] ss:$24 sps:$4 sm:$0xff]   ;;  %v211_v24 = vld [vmem:[%s4692_s0 + $0x20] sm:$0x11] }
  0x1f   :  { %1222 = vmatpush1.bf16.msra.mxu0 %v2530_v30  ;;  %v212_v25 = vld [vmem:[%s4692_s0 + $0x28] sm:$0x11]  ;;  %v3345_v28 = vcombine.high %v211_v24, %v211_v24  ;;  %v3349_v30 = vcombine.low %v211_v24, %v211_v24 }
  0x20   :  { %1273 = vmatpush1.bf16.msra.mxu1 %v2531_v31  ;;  %1223 = vmatprep.subr.bf16.mxu0 %v2532_v32  ;;  %v3338_v26 = vld [vmem:[%s4694_s2 + $0x6c] ss:$24 sps:$4 sm:$0xff]   ;;  %v3347_v29 = vcombine.high %v212_v25, %v212_v25  ;;  %v3351_v31 = vcombine.low %v212_v25, %v212_v25  ;;  %v3360_v32 = vld [vmem:[%s4694_s2 + $0x68] ss:$24 sps:$4 sm:$0xff]  }
  0x21   :  { %1274 = vmatprep.subr.bf16.mxu1 %v2534_v33  ;;  %v3343_v27 = vld [vmem:[%s4694_s2 + $0x36c] ss:$24 sps:$4 sm:$0xff]   ;;  %v3365_v33 = vld [vmem:[%s4694_s2 + $0x368] ss:$24 sps:$4 sm:$0xff]  }
  0x22   :  { %v3460_v24 = vld [vmem:[%s4694_s2 + $0x2a8] ss:$24 sps:$4 sm:$0xff]  }
  0x23   :  { %1224 = vmatpush2.bf16.msra.mxu0 %v2536_v34  ;;  %v3372_v34 = vld [vmem:[%s4694_s2 + $0x3c] ss:$24 sps:$4 sm:$0xff]   ;;  %4790 = vst [vmem:[#allocation9_spill] sm:$0xff] %v3460_v24  ;;  %v3465_v25 = vld [vmem:[%s4694_s2 + $0x5a8] ss:$24 sps:$4 sm:$0xff]  }
  0x24   :  { %1275 = vmatpush2.bf16.msra.mxu1 %v2537_v35  ;;  %1225 = vmatprep.subr.bf16.mxu0 %v2538_v36  ;;  %v3377_v35 = vld [vmem:[%s4694_s2 + $0x33c] ss:$24 sps:$4 sm:$0xff]   ;;  %v3388_v36 = vld [vmem:[%s4694_s2 + $0x38] ss:$24 sps:$4 sm:$0xff]   ;;  %4791 = vst [vmem:[#allocation10_spill] sm:$0xff] %v3465_v25 }
  0x25   :  { %1276 = vmatprep.subr.bf16.mxu1 %v2540_v37  ;;  %v3393_v37 = vld [vmem:[%s4694_s2 + $0x338] ss:$24 sps:$4 sm:$0xff]  }
  0x27   :  { %1226 = vmatpush2.bf16.msra.mxu0 %v2542_v38  ;;  %v3400_v38 = vld [vmem:[%s4694_s2 + $0xc] ss:$24 sps:$4 sm:$0xff]  }
  0x28   :  { %1277 = vmatpush2.bf16.msra.mxu1 %v2543_v39  ;;  %1227 = vmatprep.subr.bf16.mxu0 %v2544_v40  ;;  %v3405_v39 = vld [vmem:[%s4694_s2 + $0x30c] ss:$24 sps:$4 sm:$0xff]   ;;  %v3412_v40 = vld [vmem:[%s4694_s2 + $0x8] ss:$24 sps:$4 sm:$0xff]  }
  0x29   :  { %1278 = vmatprep.subr.bf16.mxu1 %v2546_v41  ;;  %v3417_v41 = vld [vmem:[%s4694_s2 + $0x308] ss:$24 sps:$4 sm:$0xff]  }
  0x2b   :  { %1228 = vmatpush2.bf16.msra.mxu0 %v2548_v42  ;;  %v3424_v42 = vld [vmem:[%s4694_s2 + $0x2dc] ss:$24 sps:$4 sm:$0xff]  }
  0x2c   :  { %1279 = vmatpush2.bf16.msra.mxu1 %v2549_v43  ;;  %1229 = vmatprep.subr.bf16.mxu0 %v2550_v44  ;;  %v3429_v43 = vld [vmem:[%s4694_s2 + $0x5dc] ss:$24 sps:$4 sm:$0xff]   ;;  %v3436_v44 = vld [vmem:[%s4694_s2 + $0x2d8] ss:$24 sps:$4 sm:$0xff]  }
  0x2d   :  { %1280 = vmatprep.subr.bf16.mxu1 %v2552_v45  ;;  %4786 = vst [vmem:[#allocation5_spill] sm:$0xff] %v3436_v44  ;;  %v3441_v45 = vld [vmem:[%s4694_s2 + $0x5d8] ss:$24 sps:$4 sm:$0xff]  }
  0x2e   :  { %4787 = vst [vmem:[#allocation6_spill] sm:$0xff] %v3441_v45 }
  0x2f   :  { %1230 = vmatpush2.bf16.msra.mxu0 %v2554_v46  ;;  %v3448_v46 = vld [vmem:[%s4694_s2 + $0x2ac] ss:$24 sps:$4 sm:$0xff]  }
  0x30   :  { %1281 = vmatpush2.bf16.msra.mxu1 %v2555_v47  ;;  %1231 = vmatprep.subr.bf16.mxu0 %v3099_v49  ;;  %4788 = vst [vmem:[#allocation7_spill] sm:$0xff] %v3448_v46  ;;  %v3453_v47 = vld [vmem:[%s4694_s2 + $0x5ac] ss:$24 sps:$4 sm:$0xff]  }
  0x31   :  { %1282 = vmatprep.subr.bf16.mxu1 %v3109_v51  ;;  %4789 = vst [vmem:[#allocation8_spill] sm:$0xff] %v3453_v47 }
  0x33   :  { %1232 = vmatpush2.bf16.msra.mxu0 %v3116_v52 }
  0x34   :  { %1283 = vmatpush2.bf16.msra.mxu1 %v3121_v53  ;;  %1233 = vmatprep.subr.bf16.mxu0 %v3126_v54 }
  0x35   :  { %1284 = vmatprep.subr.bf16.mxu1 %v3133_v55 }
  0x37   :  { %1234 = vmatpush2.bf16.msra.mxu0 %v3138_v56 }
  0x38   :  { %1285 = vmatpush2.bf16.msra.mxu1 %v3143_v57  ;;  %1235 = vmatprep.subr.bf16.mxu0 %v3150_v58 }
  0x39   :  { %1286 = vmatprep.subr.bf16.mxu1 %v3157_v59 }
  0x3b   :  { %1236 = vmatpush2.bf16.msra.mxu0 %v3162_v60 }
  0x3c   :  { %1287 = vmatpush2.bf16.msra.mxu1 %v3167_v61  ;;  %1237 = vmatprep.subr.bf16.mxu0 %v3174_v62 }
  0x3d   :  { %1288 = vmatprep.subr.bf16.mxu1 %v3181_v63 }
  0x3f   :  { %1238 = vmatpush2.bf16.msra.mxu0 %v3186_v0 }
  0x40   :  { %1289 = vmatpush2.bf16.msra.mxu1 %v3191_v1  ;;  %1309 = vmatprep.subr.bf16.mxu0 %v3198_v2 }
  0x41   :  { %1360 = vmatprep.subr.bf16.mxu1 %v3205_v3 }
  0x42   :  { %1240 = vmatmul.mubr.bf16.vlgmr.msra.gmra.mxu0 %v3210_v4 }
  0x43   :  { %1291 = vmatmul.mubr.bf16.vlgmr.msra.gmra.mxu1 %v3215_v5  ;;  %1310 = vmatpush1.bf16.msra.mxu0 %v3220_v6 }
  0x44   :  { %1361 = vmatpush1.bf16.msra.mxu1 %v3225_v7  ;;  %1311 = vmatprep.subr.bf16.mxu0 %v3232_v8 }
  0x45   :  { %1362 = vmatprep.subr.bf16.mxu1 %v3239_v9  ;;  %1249 = vmatprep.mubr.bf16.mxu0 %v3345_v28 }
  0x46   :  { %1300 = vmatprep.mubr.bf16.mxu1 %v3347_v29 }
  0x47   :  { %1312 = vmatpush1.bf16.msra.mxu0 %v3246_v10 }
  0x48   :  { %1363 = vmatpush1.bf16.msra.mxu1 %v3251_v11  ;;  %1313 = vmatprep.subr.bf16.mxu0 %v3258_v12 }
  0x49   :  { %1364 = vmatprep.subr.bf16.mxu1 %v3265_v13 }
  0x4a   :  { %1250 = vmatmul.mubr.bf16.gmra.mxu0 %v3349_v30 }
  0x4b   :  { %1314 = vmatpush1.bf16.msra.mxu0 %v3270_v14  ;;  %1301 = vmatmul.mubr.bf16.gmra.mxu1 %v3351_v31 }
  0x4c   :  { %1365 = vmatpush1.bf16.msra.mxu1 %v3275_v15  ;;  %1315 = vmatprep.subr.bf16.mxu0 %v3282_v16 }
  0x4d   :  { %1366 = vmatprep.subr.bf16.mxu1 %v3289_v17  ;;  %1341 = vmatprep.mubr.bf16.mxu0 %v3094_v48 }
  0x4e   :  { %1392 = vmatprep.mubr.bf16.mxu1 %v3104_v50 }
  0x4f   :  { %1316 = vmatpush1.bf16.msra.mxu0 %v3294_v18 }
  0x50   :  { %1367 = vmatpush1.bf16.msra.mxu1 %v3299_v19  ;;  %1317 = vmatprep.subr.bf16.mxu0 %v3306_v20 }
  0x51   :  { %1368 = vmatprep.subr.bf16.mxu1 %v3313_v21 }
  0x53   :  { %1318 = vmatpush1.bf16.msra.mxu0 %v3318_v22 }
  0x54   :  { %1369 = vmatpush1.bf16.msra.mxu1 %v3323_v23  ;;  %1319 = vmatprep.subr.bf16.mxu0 %v3338_v26 }
  0x55   :  { %1370 = vmatprep.subr.bf16.mxu1 %v3343_v27 }
  0x57   :  { %1320 = vmatpush1.bf16.msra.mxu0 %v3360_v32 }
  0x58   :  { %1371 = vmatpush1.bf16.msra.mxu1 %v3365_v33  ;;  %1321 = vmatprep.subr.bf16.mxu0 %v3372_v34 }
  0x59   :  { %1372 = vmatprep.subr.bf16.mxu1 %v3377_v35 }
  0x5b   :  { %1322 = vmatpush1.bf16.msra.mxu0 %v3388_v36 }
  0x5c   :  { %1373 = vmatpush1.bf16.msra.mxu1 %v3393_v37  ;;  %1323 = vmatprep.subr.bf16.mxu0 %v3400_v38 }
  0x5d   :  { %1374 = vmatprep.subr.bf16.mxu1 %v3405_v39 }
  0x5f   :  { %1324 = vmatpush1.bf16.msra.mxu0 %v3412_v40 }
  0x60   :  { %1375 = vmatpush1.bf16.msra.mxu1 %v3417_v41  ;;  %1325 = vmatprep.subr.bf16.mxu0 %v3424_v42 }
  0x61   :  { %1376 = vmatprep.subr.bf16.mxu1 %v3429_v43 }
  0x63   :  { %1326 = vmatpush2.bf16.msra.mxu0 %v3436_v44  ;;  %v3472_v44 = vld [vmem:[%s4694_s2 + $0x27c] ss:$24 sps:$4 sm:$0xff]  }
  0x64   :  { %1377 = vmatpush2.bf16.msra.mxu1 %v3441_v45  ;;  %1327 = vmatprep.subr.bf16.mxu0 %v3448_v46  ;;  %4792 = vst [vmem:[#allocation11_spill] sm:$0xff] %v3472_v44  ;;  %v3477_v45 = vld [vmem:[%s4694_s2 + $0x57c] ss:$24 sps:$4 sm:$0xff]   ;;  %v3484_v46 = vld [vmem:[%s4694_s2 + $0x278] ss:$24 sps:$4 sm:$0xff]  }
  0x65   :  { %1378 = vmatprep.subr.bf16.mxu1 %v3453_v47  ;;  %4793 = vst [vmem:[#allocation12_spill] sm:$0xff] %v3477_v45  ;;  %4794 = vst [vmem:[#allocation13_spill] sm:$0xff] %v3484_v46  ;;  %v3489_v47 = vld [vmem:[%s4694_s2 + $0x578] ss:$24 sps:$4 sm:$0xff]  }
  0x66   :  { %4795 = vst [vmem:[#allocation14_spill] sm:$0xff] %v3489_v47 }
  0x67   :  { %1328 = vmatpush2.bf16.msra.mxu0 %v3460_v24  ;;  %v3496_v24 = vld [vmem:[%s4694_s2 + $0x24c] ss:$24 sps:$4 sm:$0xff]  }
  0x68   :  { %1379 = vmatpush2.bf16.msra.mxu1 %v3465_v25  ;;  %1329 = vmatprep.subr.bf16.mxu0 %v3472_v44  ;;  %4796 = vst [vmem:[#allocation15_spill] sm:$0xff] %v3496_v24  ;;  %v3501_v25 = vld [vmem:[%s4694_s2 + $0x54c] ss:$24 sps:$4 sm:$0xff]   ;;  %v3508_v44 = vld [vmem:[%s4694_s2 + $0x248] ss:$24 sps:$4 sm:$0xff]  }
  0x69   :  { %1380 = vmatprep.subr.bf16.mxu1 %v3477_v45  ;;  %4797 = vst [vmem:[#allocation16_spill] sm:$0xff] %v3501_v25  ;;  %4798 = vst [vmem:[#allocation17_spill] sm:$0xff] %v3508_v44  ;;  %v3513_v45 = vld [vmem:[%s4694_s2 + $0x548] ss:$24 sps:$4 sm:$0xff]  }
  0x6a   :  { %4799 = vst [vmem:[#allocation18_spill] sm:$0xff] %v3513_v45 }
  0x6b   :  { %1330 = vmatpush2.bf16.msra.mxu0 %v3484_v46  ;;  %v3520_v46 = vld [vmem:[%s4694_s2 + $0x21c] ss:$24 sps:$4 sm:$0xff]  }
  0x6c   :  { %1381 = vmatpush2.bf16.msra.mxu1 %v3489_v47  ;;  %1331 = vmatprep.subr.bf16.mxu0 %v3496_v24  ;;  %4800 = vst [vmem:[#allocation19_spill] sm:$0xff] %v3520_v46  ;;  %v3525_v47 = vld [vmem:[%s4694_s2 + $0x51c] ss:$24 sps:$4 sm:$0xff]   ;;  %v3532_v24 = vld [vmem:[%s4694_s2 + $0x218] ss:$24 sps:$4 sm:$0xff]  }
  0x6d   :  { %1382 = vmatprep.subr.bf16.mxu1 %v3501_v25  ;;  %4801 = vst [vmem:[#allocation20_spill] sm:$0xff] %v3525_v47  ;;  %4802 = vst [vmem:[#allocation21_spill] sm:$0xff] %v3532_v24  ;;  %v3537_v25 = vld [vmem:[%s4694_s2 + $0x518] ss:$24 sps:$4 sm:$0xff]  }
  0x6e   :  { %4803 = vst [vmem:[#allocation22_spill] sm:$0xff] %v3537_v25 }
  0x6f   :  { %1332 = vmatpush2.bf16.msra.mxu0 %v3508_v44  ;;  %v3544_v44 = vld [vmem:[%s4694_s2 + $0x1ec] ss:$24 sps:$4 sm:$0xff]  }
  0x70   :  { %1383 = vmatpush2.bf16.msra.mxu1 %v3513_v45  ;;  %1333 = vmatprep.subr.bf16.mxu0 %v3520_v46  ;;  %4804 = vst [vmem:[#allocation23_spill] sm:$0xff] %v3544_v44  ;;  %v3549_v45 = vld [vmem:[%s4694_s2 + $0x4ec] ss:$24 sps:$4 sm:$0xff]   ;;  %v3556_v46 = vld [vmem:[%s4694_s2 + $0x1e8] ss:$24 sps:$4 sm:$0xff]  }
  0x71   :  { %1384 = vmatprep.subr.bf16.mxu1 %v3525_v47  ;;  %4805 = vst [vmem:[#allocation24_spill] sm:$0xff] %v3549_v45  ;;  %4806 = vst [vmem:[#allocation25_spill] sm:$0xff] %v3556_v46  ;;  %v3561_v47 = vld [vmem:[%s4694_s2 + $0x4e8] ss:$24 sps:$4 sm:$0xff]  }
  0x72   :  { %4807 = vst [vmem:[#allocation26_spill] sm:$0xff] %v3561_v47 }
  0x73   :  { %1334 = vmatpush2.bf16.msra.mxu0 %v3532_v24  ;;  %v3568_v24 = vld [vmem:[%s4694_s2 + $0x1bc] ss:$24 sps:$4 sm:$0xff]  }
  0x74   :  { %1385 = vmatpush2.bf16.msra.mxu1 %v3537_v25  ;;  %1335 = vmatprep.subr.bf16.mxu0 %v3544_v44  ;;  %4808 = vst [vmem:[#allocation27_spill] sm:$0xff] %v3568_v24  ;;  %v3573_v25 = vld [vmem:[%s4694_s2 + $0x4bc] ss:$24 sps:$4 sm:$0xff]   ;;  %v3580_v44 = vld [vmem:[%s4694_s2 + $0x1b8] ss:$24 sps:$4 sm:$0xff]  }
  0x75   :  { %1386 = vmatprep.subr.bf16.mxu1 %v3549_v45  ;;  %4809 = vst [vmem:[#allocation28_spill] sm:$0xff] %v3573_v25  ;;  %4810 = vst [vmem:[#allocation29_spill] sm:$0xff] %v3580_v44  ;;  %v3585_v45 = vld [vmem:[%s4694_s2 + $0x4b8] ss:$24 sps:$4 sm:$0xff]  }
  0x76   :  { %4811 = vst [vmem:[#allocation30_spill] sm:$0xff] %v3585_v45 }
  0x77   :  { %1336 = vmatpush2.bf16.msra.mxu0 %v3556_v46  ;;  %v3592_v46 = vld [vmem:[%s4694_s2 + $0x18c] ss:$24 sps:$4 sm:$0xff]  }
  0x78   :  { %1387 = vmatpush2.bf16.msra.mxu1 %v3561_v47  ;;  %1337 = vmatprep.subr.bf16.mxu0 %v3568_v24  ;;  %4812 = vst [vmem:[#allocation31_spill] sm:$0xff] %v3592_v46  ;;  %v3597_v47 = vld [vmem:[%s4694_s2 + $0x48c] ss:$24 sps:$4 sm:$0xff]   ;;  %v3604_v24 = vld [vmem:[%s4694_s2 + $0x188] ss:$24 sps:$4 sm:$0xff]  }
  0x79   :  { %1388 = vmatprep.subr.bf16.mxu1 %v3573_v25  ;;  %4813 = vst [vmem:[#allocation32_spill] sm:$0xff] %v3597_v47  ;;  %4814 = vst [vmem:[#allocation33_spill] sm:$0xff] %v3604_v24  ;;  %v3609_v25 = vld [vmem:[%s4694_s2 + $0x488] ss:$24 sps:$4 sm:$0xff]  }
  0x7a   :  { %4815 = vst [vmem:[#allocation34_spill] sm:$0xff] %v3609_v25 }
  0x7b   :  { %1338 = vmatpush2.bf16.msra.mxu0 %v3580_v44  ;;  %v3616_v44 = vld [vmem:[%s4694_s2 + $0x164] ss:$24 sps:$4 sm:$0xff]  }
  0x7c   :  { %1389 = vmatpush2.bf16.msra.mxu1 %v3585_v45  ;;  %1339 = vmatprep.subr.bf16.mxu0 %v3592_v46  ;;  %4816 = vst [vmem:[#allocation35_spill] sm:$0xff] %v3616_v44  ;;  %v3621_v45 = vld [vmem:[%s4694_s2 + $0x464] ss:$24 sps:$4 sm:$0xff]   ;;  %v3628_v46 = vld [vmem:[%s4694_s2 + $0x160] ss:$24 sps:$4 sm:$0xff]  }
  0x7d   :  { %1390 = vmatprep.subr.bf16.mxu1 %v3597_v47  ;;  %4817 = vst [vmem:[#allocation36_spill] sm:$0xff] %v3621_v45  ;;  %4818 = vst [vmem:[#allocation37_spill] sm:$0xff] %v3628_v46  ;;  %v3633_v47 = vld [vmem:[%s4694_s2 + $0x460] ss:$24 sps:$4 sm:$0xff]  }
  0x7e   :  { %4819 = vst [vmem:[#allocation38_spill] sm:$0xff] %v3633_v47 }
  0x7f   :  { %1340 = vmatpush2.bf16.msra.mxu0 %v3604_v24  ;;  %v3640_v24 = vld [vmem:[%s4694_s2 + $0x134] ss:$24 sps:$4 sm:$0xff]  }
  0x80   :  { %1391 = vmatpush2.bf16.msra.mxu1 %v3609_v25  ;;  %1411 = vmatprep.subr.bf16.mxu0 %v3616_v44  ;;  %4820 = vst [vmem:[#allocation39_spill] sm:$0xff] %v3640_v24  ;;  %v3645_v25 = vld [vmem:[%s4694_s2 + $0x434] ss:$24 sps:$4 sm:$0xff]   ;;  %v3659_v44 = vld [vmem:[%s4694_s2 + $0x430] ss:$24 sps:$4 sm:$0xff]  }
  0x81   :  { %1462 = vmatprep.subr.bf16.mxu1 %v3621_v45  ;;  %4821 = vst [vmem:[#allocation40_spill] sm:$0xff] %v3645_v25  ;;  %v3654_v45 = vld [vmem:[%s4694_s2 + $0x130] ss:$24 sps:$4 sm:$0xff]   ;;  %4823 = vst [vmem:[#allocation42_spill] sm:$0xff] %v3659_v44 }
  0x82   :  { %1342 = vmatmul.mubr.bf16.vlgmr.msra.gmra.mxu0 %v3210_v4  ;;  %4822 = vst [vmem:[#allocation41_spill] sm:$0xff] %v3654_v45 }
  0x83   :  { %1393 = vmatmul.mubr.bf16.vlgmr.msra.gmra.mxu1 %v3215_v5  ;;  %1412 = vmatpush1.bf16.msra.mxu0 %v3628_v46  ;;  %v3666_v46 = vld [vmem:[%s4694_s2 + $0x104] ss:$24 sps:$4 sm:$0xff]  }
  0x84   :  { %1463 = vmatpush1.bf16.msra.mxu1 %v3633_v47  ;;  %1413 = vmatprep.subr.bf16.mxu0 %v3640_v24  ;;  %4824 = vst [vmem:[#allocation43_spill] sm:$0xff] %v3666_v46  ;;  %v3671_v47 = vld [vmem:[%s4694_s2 + $0x404] ss:$24 sps:$4 sm:$0xff]  }
  0x85   :  { %1464 = vmatprep.subr.bf16.mxu1 %v3645_v25  ;;  %4825 = vst [vmem:[#allocation44_spill] sm:$0xff] %v3671_v47  ;;  %1351 = vmatprep.mubr.bf16.mxu0 %v3345_v28 }
  0x86   :  { %1402 = vmatprep.mubr.bf16.mxu1 %v3347_v29 }
  0x87   :  { %8 = vsyncpa [#allocation3], 0  ;;  %1414 = vmatpush1.bf16.msra.mxu0 %v3654_v45  ;;  %v3680_v25 = vld [vmem:[%s4694_s2 + $0x100] ss:$24 sps:$4 sm:$0xff]   ;;  %v3692_v45 = vld [vmem:[%s4694_s2 + $0xd4] ss:$24 sps:$4 sm:$0xff]  }
  0x88   :  { %1465 = vmatpush1.bf16.msra.mxu1 %v3659_v44  ;;  %4826 = vst [vmem:[#allocation45_spill] sm:$0xff] %v3680_v25  ;;  %v3685_v24 = vld [vmem:[%s4694_s2 + $0x400] ss:$24 sps:$4 sm:$0xff]   ;;  %1415 = vmatprep.subr.bf16.mxu0 %v3666_v46  ;;  %4828 = vst [vmem:[#allocation47_spill] sm:$0xff] %v3692_v45  ;;  %v3697_v44 = vld [vmem:[%s4694_s2 + $0x3d4] ss:$24 sps:$4 sm:$0xff]  }
  0x89   :  { %4827 = vst [vmem:[#allocation46_spill] sm:$0xff] %v3685_v24  ;;  %1466 = vmatprep.subr.bf16.mxu1 %v3671_v47  ;;  %4829 = vst [vmem:[#allocation48_spill] sm:$0xff] %v3697_v44  ;;  %v3706_v47 = vld [vmem:[%s4694_s2 + $0xd0] ss:$24 sps:$4 sm:$0xff]   ;;  %s2258_s19 = sshll.u32 %s4695_s3, 4  ;;  %s2259_s19 = int_to_ptr.vmem [resolvable:$true] %s2258_s19 }
  0x8a   :  { %1352 = vmatmul.mubr.bf16.gmra.mxu0 %v3349_v30  ;;  %v3711_v46 = vld [vmem:[%s4694_s2 + $0x3d0] ss:$24 sps:$4 sm:$0xff]   ;;  %s2912_s23 = scalar_lea.vmem %s2259_s19, 16  ;;  %p2917_p1 = scmp.lt.s32.totalorder %s2259_s19, %s2259_s19 }
  0x8b   :  { %1403 = vmatmul.mubr.bf16.gmra.mxu1 %v3351_v31  ;;  %1416 = vmatpush1.bf16.msra.mxu0 %v3680_v25  ;;  %v3718_v25 = vld [vmem:[%s4694_s2 + $0xa4] ss:$24 sps:$4 sm:$0xff]   ;;  %p2913_p0 = scmp.ne.s32.totalorder %s2259_s19, %s2912_s23  ;;  %p2918_p2 = scmp.lt.s32.totalorder %s2912_s23, %s2912_s23 }
  0x8c   :  { %1467 = vmatpush1.bf16.msra.mxu1 %v3685_v24  ;;  %1417 = vmatprep.subr.bf16.mxu0 %v3692_v45  ;;  %4830 = vst [vmem:[#allocation49_spill] sm:$0xff] %v3718_v25  ;;  %v3723_v24 = vld [vmem:[%s4694_s2 + $0x3a4] ss:$24 sps:$4 sm:$0xff]   ;;  %v3737_v45 = vld [vmem:[%s4694_s2 + $0x3a0] ss:$24 sps:$4 sm:$0xff]  }
  0x8d   :  { %1468 = vmatprep.subr.bf16.mxu1 %v3697_v44  ;;  %4831 = vst [vmem:[#allocation50_spill] sm:$0xff] %v3723_v24  ;;  %1443 = vmatprep.mubr.bf16.mxu0 %v3094_v48  ;;  %v3732_v44 = vld [vmem:[%s4694_s2 + $0xa0] ss:$24 sps:$4 sm:$0xff]   ;;  %4833 = vst [vmem:[#allocation52_spill] sm:$0xff] %v3737_v45  ;;  %v3744_v48 = vld [vmem:[%s4694_s2 + $0x74] ss:$24 sps:$4 sm:$0xff]   ;;  %p2919_p3 = por %p2918_p2, %p2917_p1 }
  0x8e   :  { %1494 = vmatprep.mubr.bf16.mxu1 %v3104_v50  ;;  %4832 = vst [vmem:[#allocation51_spill] sm:$0xff] %v3732_v44  ;;  %4834 = vst [vmem:[#allocation53_spill] sm:$0xff] %v3744_v48  ;;  %v3749_v50 = vld [vmem:[%s4694_s2 + $0x374] ss:$24 sps:$4 sm:$0xff]  }
  0x8f   :  { %1418 = vmatpush1.bf16.msra.mxu0 %v3706_v47  ;;  %4835 = vst [vmem:[#allocation54_spill] sm:$0xff] %v3749_v50  ;;  %p2920_p4 = pnand %p2919_p3, %p2913_p0 }
  0x90   :  { %1469 = vmatpush1.bf16.msra.mxu1 %v3711_v46  ;;  %1419 = vmatprep.subr.bf16.mxu0 %v3718_v25  ;;  %v3756_v25 = vld [vmem:[%s4694_s2 + $0x70] ss:$24 sps:$4 sm:$0xff]  }
  0x91   :  { %1470 = vmatprep.subr.bf16.mxu1 %v3723_v24  ;;  %4836 = vst [vmem:[#allocation55_spill] sm:$0xff] %v3756_v25  ;;  %v3761_v24 = vld [vmem:[%s4694_s2 + $0x370] ss:$24 sps:$4 sm:$0xff]  }
  0x92   :  { %4837 = vst [vmem:[#allocation56_spill] sm:$0xff] %v3761_v24 }
  0x93   :  { %1420 = vmatpush1.bf16.msra.mxu0 %v3732_v44  ;;  %v3768_v44 = vld [vmem:[%s4694_s2 + $0x44] ss:$24 sps:$4 sm:$0xff]  }
  0x94   :  { %1471 = vmatpush1.bf16.msra.mxu1 %v3737_v45  ;;  %1421 = vmatprep.subr.bf16.mxu0 %v3744_v48  ;;  %4838 = vst [vmem:[#allocation57_spill] sm:$0xff] %v3768_v44  ;;  %v3773_v45 = vld [vmem:[%s4694_s2 + $0x344] ss:$24 sps:$4 sm:$0xff]   ;;  %v3780_v48 = vld [vmem:[%s4694_s2 + $0x40] ss:$24 sps:$4 sm:$0xff]  }
  0x95   :  { %1472 = vmatprep.subr.bf16.mxu1 %v3749_v50  ;;  %4839 = vst [vmem:[#allocation58_spill] sm:$0xff] %v3773_v45  ;;  %4840 = vst [vmem:[#allocation59_spill] sm:$0xff] %v3780_v48  ;;  %v3785_v50 = vld [vmem:[%s4694_s2 + $0x340] ss:$24 sps:$4 sm:$0xff]  }
  0x96   :  { %4841 = vst [vmem:[#allocation60_spill] sm:$0xff] %v3785_v50 }
  0x97   :  { %1422 = vmatpush1.bf16.msra.mxu0 %v3756_v25  ;;  %v3792_v25 = vld [vmem:[%s4694_s2 + $0x14] ss:$24 sps:$4 sm:$0xff]  }
  0x98   :  { %1473 = vmatpush1.bf16.msra.mxu1 %v3761_v24  ;;  %1423 = vmatprep.subr.bf16.mxu0 %v3768_v44  ;;  %4842 = vst [vmem:[#allocation61_spill] sm:$0xff] %v3792_v25  ;;  %v3797_v24 = vld [vmem:[%s4694_s2 + $0x314] ss:$24 sps:$4 sm:$0xff]   ;;  %v3804_v44 = vld [vmem:[%s4694_s2 + $0x10] ss:$24 sps:$4 sm:$0xff]  }
  0x99   :  { %1474 = vmatprep.subr.bf16.mxu1 %v3773_v45  ;;  %4843 = vst [vmem:[#allocation62_spill] sm:$0xff] %v3797_v24  ;;  %4844 = vst [vmem:[#allocation63_spill] sm:$0xff] %v3804_v44  ;;  %v3809_v45 = vld [vmem:[%s4694_s2 + $0x310] ss:$24 sps:$4 sm:$0xff]  }
  0x9a   :  { %4845 = vst [vmem:[#allocation64_spill] sm:$0xff] %v3809_v45 }
  0x9b   :  { %1424 = vmatpush1.bf16.msra.mxu0 %v3780_v48  ;;  %v3816_v48 = vld [vmem:[%s4694_s2 + $0x2e4] ss:$24 sps:$4 sm:$0xff]  }
  0x9c   :  { %1475 = vmatpush1.bf16.msra.mxu1 %v3785_v50  ;;  %1425 = vmatprep.subr.bf16.mxu0 %v3792_v25  ;;  %4846 = vst [vmem:[#allocation65_spill] sm:$0xff] %v3816_v48  ;;  %v3821_v50 = vld [vmem:[%s4694_s2 + $0x5e4] ss:$24 sps:$4 sm:$0xff]   ;;  %v3828_v25 = vld [vmem:[%s4694_s2 + $0x2e0] ss:$24 sps:$4 sm:$0xff]  }
  0x9d   :  { %1476 = vmatprep.subr.bf16.mxu1 %v3797_v24  ;;  %4847 = vst [vmem:[#allocation66_spill] sm:$0xff] %v3821_v50  ;;  %4848 = vst [vmem:[#allocation67_spill] sm:$0xff] %v3828_v25  ;;  %v3833_v24 = vld [vmem:[%s4694_s2 + $0x5e0] ss:$24 sps:$4 sm:$0xff]  }
  0x9e   :  { %4849 = vst [vmem:[#allocation68_spill] sm:$0xff] %v3833_v24 }
  0x9f   :  { %1426 = vmatpush1.bf16.msra.mxu0 %v3804_v44  ;;  %v3840_v44 = vld [vmem:[%s4694_s2 + $0x2b4] ss:$24 sps:$4 sm:$0xff]  }
  0xa0   :  { %1477 = vmatpush1.bf16.msra.mxu1 %v3809_v45  ;;  %1427 = vmatprep.subr.bf16.mxu0 %v3816_v48  ;;  %4850 = vst [vmem:[#allocation69_spill] sm:$0xff] %v3840_v44  ;;  %v3845_v45 = vld [vmem:[%s4694_s2 + $0x5b4] ss:$24 sps:$4 sm:$0xff]   ;;  %v3852_v48 = vld [vmem:[%s4694_s2 + $0x2b0] ss:$24 sps:$4 sm:$0xff]  }
  0xa1   :  { %1478 = vmatprep.subr.bf16.mxu1 %v3821_v50  ;;  %4851 = vst [vmem:[#allocation70_spill] sm:$0xff] %v3845_v45  ;;  %4852 = vst [vmem:[#allocation71_spill] sm:$0xff] %v3852_v48  ;;  %v3857_v50 = vld [vmem:[%s4694_s2 + $0x5b0] ss:$24 sps:$4 sm:$0xff]  }
  0xa2   :  { %4853 = vst [vmem:[#allocation72_spill] sm:$0xff] %v3857_v50 }
  0xa3   :  { %1428 = vmatpush2.bf16.msra.mxu0 %v3828_v25  ;;  %v3864_v25 = vld [vmem:[%s4694_s2 + $0x284] ss:$24 sps:$4 sm:$0xff]  }
  0xa4   :  { %1479 = vmatpush2.bf16.msra.mxu1 %v3833_v24  ;;  %1429 = vmatprep.subr.bf16.mxu0 %v3840_v44  ;;  %4854 = vst [vmem:[#allocation73_spill] sm:$0xff] %v3864_v25  ;;  %v3869_v24 = vld [vmem:[%s4694_s2 + $0x584] ss:$24 sps:$4 sm:$0xff]   ;;  %v3876_v44 = vld [vmem:[%s4694_s2 + $0x280] ss:$24 sps:$4 sm:$0xff]  }
  0xa5   :  { %1480 = vmatprep.subr.bf16.mxu1 %v3845_v45  ;;  %4855 = vst [vmem:[#allocation74_spill] sm:$0xff] %v3869_v24  ;;  %4856 = vst [vmem:[#allocation75_spill] sm:$0xff] %v3876_v44  ;;  %v3881_v45 = vld [vmem:[%s4694_s2 + $0x580] ss:$24 sps:$4 sm:$0xff]  }
  0xa6   :  { %4857 = vst [vmem:[#allocation76_spill] sm:$0xff] %v3881_v45 }
  0xa7   :  { %1430 = vmatpush2.bf16.msra.mxu0 %v3852_v48  ;;  %v3888_v48 = vld [vmem:[%s4694_s2 + $0x254] ss:$24 sps:$4 sm:$0xff]  }
  0xa8   :  { %1481 = vmatpush2.bf16.msra.mxu1 %v3857_v50  ;;  %1431 = vmatprep.subr.bf16.mxu0 %v3864_v25  ;;  %4858 = vst [vmem:[#allocation77_spill] sm:$0xff] %v3888_v48  ;;  %v3893_v50 = vld [vmem:[%s4694_s2 + $0x554] ss:$24 sps:$4 sm:$0xff]   ;;  %v3900_v25 = vld [vmem:[%s4694_s2 + $0x250] ss:$24 sps:$4 sm:$0xff]  }
  0xa9   :  { %1482 = vmatprep.subr.bf16.mxu1 %v3869_v24  ;;  %4859 = vst [vmem:[#allocation78_spill] sm:$0xff] %v3893_v50  ;;  %4860 = vst [vmem:[#allocation79_spill] sm:$0xff] %v3900_v25  ;;  %v3905_v24 = vld [vmem:[%s4694_s2 + $0x550] ss:$24 sps:$4 sm:$0xff]  }
  0xaa   :  { %4861 = vst [vmem:[#allocation80_spill] sm:$0xff] %v3905_v24 }
  0xab   :  { %1432 = vmatpush2.bf16.msra.mxu0 %v3876_v44  ;;  %v3912_v44 = vld [vmem:[%s4694_s2 + $0x224] ss:$24 sps:$4 sm:$0xff]  }
  0xac   :  { %1483 = vmatpush2.bf16.msra.mxu1 %v3881_v45  ;;  %1433 = vmatprep.subr.bf16.mxu0 %v3888_v48  ;;  %4862 = vst [vmem:[#allocation81_spill] sm:$0xff] %v3912_v44  ;;  %v3917_v45 = vld [vmem:[%s4694_s2 + $0x524] ss:$24 sps:$4 sm:$0xff]   ;;  %v3924_v48 = vld [vmem:[%s4694_s2 + $0x220] ss:$24 sps:$4 sm:$0xff]  }
  0xad   :  { %1484 = vmatprep.subr.bf16.mxu1 %v3893_v50  ;;  %4863 = vst [vmem:[#allocation82_spill] sm:$0xff] %v3917_v45  ;;  %4864 = vst [vmem:[#allocation83_spill] sm:$0xff] %v3924_v48  ;;  %v3929_v50 = vld [vmem:[%s4694_s2 + $0x520] ss:$24 sps:$4 sm:$0xff]  }
  0xae   :  { %4865 = vst [vmem:[#allocation84_spill] sm:$0xff] %v3929_v50 }
  0xaf   :  { %1434 = vmatpush2.bf16.msra.mxu0 %v3900_v25  ;;  %v3936_v25 = vld [vmem:[%s4694_s2 + $0x1f4] ss:$24 sps:$4 sm:$0xff]  }
  0xb0   :  { %1485 = vmatpush2.bf16.msra.mxu1 %v3905_v24  ;;  %1435 = vmatprep.subr.bf16.mxu0 %v3912_v44  ;;  %4866 = vst [vmem:[#allocation85_spill] sm:$0xff] %v3936_v25  ;;  %v3941_v24 = vld [vmem:[%s4694_s2 + $0x4f4] ss:$24 sps:$4 sm:$0xff]   ;;  %v3948_v44 = vld [vmem:[%s4694_s2 + $0x1f0] ss:$24 sps:$4 sm:$0xff]  }
  0xb1   :  { %1486 = vmatprep.subr.bf16.mxu1 %v3917_v45  ;;  %4867 = vst [vmem:[#allocation86_spill] sm:$0xff] %v3941_v24  ;;  %4868 = vst [vmem:[#allocation87_spill] sm:$0xff] %v3948_v44  ;;  %v3953_v45 = vld [vmem:[%s4694_s2 + $0x4f0] ss:$24 sps:$4 sm:$0xff]  }
  0xb2   :  { %4869 = vst [vmem:[#allocation88_spill] sm:$0xff] %v3953_v45 }
  0xb3   :  { %1436 = vmatpush2.bf16.msra.mxu0 %v3924_v48  ;;  %v3960_v48 = vld [vmem:[%s4694_s2 + $0x1c4] ss:$24 sps:$4 sm:$0xff]  }
  0xb4   :  { %1487 = vmatpush2.bf16.msra.mxu1 %v3929_v50  ;;  %1437 = vmatprep.subr.bf16.mxu0 %v3936_v25  ;;  %4870 = vst [vmem:[#allocation89_spill] sm:$0xff] %v3960_v48  ;;  %v3965_v50 = vld [vmem:[%s4694_s2 + $0x4c4] ss:$24 sps:$4 sm:$0xff]   ;;  %v3972_v25 = vld [vmem:[%s4694_s2 + $0x1c0] ss:$24 sps:$4 sm:$0xff]  }
  0xb5   :  { %1488 = vmatprep.subr.bf16.mxu1 %v3941_v24  ;;  %4871 = vst [vmem:[#allocation90_spill] sm:$0xff] %v3965_v50  ;;  %4872 = vst [vmem:[#allocation91_spill] sm:$0xff] %v3972_v25  ;;  %v3977_v24 = vld [vmem:[%s4694_s2 + $0x4c0] ss:$24 sps:$4 sm:$0xff]  }
  0xb6   :  { %4873 = vst [vmem:[#allocation92_spill] sm:$0xff] %v3977_v24 }
  0xb7   :  { %1438 = vmatpush2.bf16.msra.mxu0 %v3948_v44  ;;  %v3984_v44 = vld [vmem:[%s4694_s2 + $0x194] ss:$24 sps:$4 sm:$0xff]  }
  0xb8   :  { %1489 = vmatpush2.bf16.msra.mxu1 %v3953_v45  ;;  %1439 = vmatprep.subr.bf16.mxu0 %v3960_v48  ;;  %v3989_v45 = vld [vmem:[%s4694_s2 + $0x494] ss:$24 sps:$4 sm:$0xff]   ;;  %v3996_v48 = vld [vmem:[%s4694_s2 + $0x190] ss:$24 sps:$4 sm:$0xff]  }
  0xb9   :  { %1490 = vmatprep.subr.bf16.mxu1 %v3965_v50  ;;  %4874 = vst [vmem:[#allocation93_spill] sm:$0xff] %v3996_v48  ;;  %v4001_v50 = vld [vmem:[%s4694_s2 + $0x490] ss:$24 sps:$4 sm:$0xff]  }
  0xba   :  { %4875 = vst [vmem:[#allocation94_spill] sm:$0xff] %v4001_v50 }
  0xbb   :  { %1440 = vmatpush2.bf16.msra.mxu0 %v3972_v25  ;;  %v2865_v25 = vld [vmem:[%s4694_s2 + $0x454] ss:$24 sps:$4 sm:$0xff]  }
  0xbc   :  { %1491 = vmatpush2.bf16.msra.mxu1 %v3977_v24  ;;  %1441 = vmatprep.subr.bf16.mxu0 %v3984_v44  ;;  %v2864_v24 = vld [vmem:[%s4694_s2 + $0x154] ss:$24 sps:$4 sm:$0xff]  }
  0xbd   :  { %1492 = vmatprep.subr.bf16.mxu1 %v3989_v45 }
  0xbf   :  { %1442 = vmatpush2.bf16.msra.mxu0 %v3996_v48  ;;  %v2866_v48 = vld [vmem:[%s4694_s2 + $0x150] ss:$24 sps:$4 sm:$0xff]  }
  0xc0   :  { %1493 = vmatpush2.bf16.msra.mxu1 %v4001_v50  ;;  %1553 = vmatprep.subr.bf16.mxu0 %v2864_v24  ;;  %v2867_v50 = vld [vmem:[%s4694_s2 + $0x450] ss:$24 sps:$4 sm:$0xff]   ;;  %v2868_v24 = vld [vmem:[%s4694_s2 + $0x124] ss:$24 sps:$4 sm:$0xff]  }
  0xc1   :  { %1604 = vmatprep.subr.bf16.mxu1 %v2865_v25  ;;  %v2871_v25 = vld [vmem:[%s4694_s2 + $0x420] ss:$24 sps:$4 sm:$0xff]  }
  0xc2   :  { %1444 = vmatmul.mubr.bf16.vlgmr.msra.gmra.mxu0 %v3210_v4  ;;  %v2869_v4 = vld [vmem:[%s4694_s2 + $0x424] ss:$24 sps:$4 sm:$0xff]  }
  0xc3   :  { %1495 = vmatmul.mubr.bf16.vlgmr.msra.gmra.mxu1 %v3215_v5  ;;  %1554 = vmatpush1.bf16.msra.mxu0 %v2866_v48  ;;  %v2870_v5 = vld [vmem:[%s4694_s2 + $0x120] ss:$24 sps:$4 sm:$0xff]   ;;  %v2872_v48 = vld [vmem:[%s4694_s2 + $0xf4] ss:$24 sps:$4 sm:$0xff]  }
  0xc4   :  { %1605 = vmatpush1.bf16.msra.mxu1 %v2867_v50  ;;  %1555 = vmatprep.subr.bf16.mxu0 %v2868_v24  ;;  %v4049_v50 = vld [vmem:[%s4693_s1 + $0xc] ss:$16 sps:$4 sm:$0xff]   ;;  %v2874_v24 = vld [vmem:[%s4694_s2 + $0xf0] ss:$24 sps:$4 sm:$0xff]  }
  0xc5   :  { %1606 = vmatprep.subr.bf16.mxu1 %v2869_v4  ;;  %1453 = vmatprep.mubr.bf16.mxu0 %v3345_v28  ;;  %v2873_v28 = vld [vmem:[%s4694_s2 + $0x3f4] ss:$24 sps:$4 sm:$0xff]   ;;  %v2875_v4 = vld [vmem:[%s4694_s2 + $0x3f0] ss:$24 sps:$4 sm:$0xff]  }
  0xc6   :  { %1504 = vmatprep.mubr.bf16.mxu1 %v3347_v29  ;;  %v4044_v29 = vld [vmem:[%s4693_s1 + $0x4] ss:$16 sps:$4 sm:$0xff]  }
  0xc7   :  { %1556 = vmatpush1.bf16.msra.mxu0 %v2870_v5  ;;  %v2876_v5 = vld [vmem:[%s4694_s2 + $0xc4] ss:$24 sps:$4 sm:$0xff]  }
  0xc8   :  { %1607 = vmatpush1.bf16.msra.mxu1 %v2871_v25  ;;  %1557 = vmatprep.subr.bf16.mxu0 %v2872_v48  ;;  %v2879_v25 = vld [vmem:[%s4694_s2 + $0x3c0] ss:$24 sps:$4 sm:$0xff]   ;;  %v2880_v48 = vld [vmem:[%s4694_s2 + $0x94] ss:$24 sps:$4 sm:$0xff]  }
  0xc9   :  { %1608 = vmatprep.subr.bf16.mxu1 %v2873_v28  ;;  %v2881_v28 = vld [vmem:[%s4694_s2 + $0x394] ss:$24 sps:$4 sm:$0xff]  }
  0xca   :  { %1454 = vmatmul.mubr.bf16.gmra.mxu0 %v3349_v30  ;;  %v2877_v30 = vld [vmem:[%s4694_s2 + $0x3c4] ss:$24 sps:$4 sm:$0xff]  }
  0xcb   :  { %1505 = vmatmul.mubr.bf16.gmra.mxu1 %v3351_v31  ;;  %1558 = vmatpush1.bf16.msra.mxu0 %v2874_v24  ;;  %v2878_v31 = vld [vmem:[%s4694_s2 + $0xc0] ss:$24 sps:$4 sm:$0xff]   ;;  %v2882_v24 = vld [vmem:[%s4694_s2 + $0x90] ss:$24 sps:$4 sm:$0xff]  }
  0xcc   :  { %1609 = vmatpush1.bf16.msra.mxu1 %v2875_v4  ;;  %1559 = vmatprep.subr.bf16.mxu0 %v2876_v5  ;;  %v2883_v4 = vld [vmem:[%s4694_s2 + $0x390] ss:$24 sps:$4 sm:$0xff]   ;;  %v2884_v5 = vld [vmem:[%s4694_s2 + $0x64] ss:$24 sps:$4 sm:$0xff]  }
  0xcd   :  { %1610 = vmatprep.subr.bf16.mxu1 %v2877_v30  ;;  %1585 = vmatprep.mubr.bf16.mxu0 %v4044_v29  ;;  %v2885_v30 = vld [vmem:[%s4694_s2 + $0x364] ss:$24 sps:$4 sm:$0xff]  }
  0xce   :  { %1636 = vmatprep.mubr.bf16.mxu1 %v4049_v50 }
  0xcf   :  { %1560 = vmatpush1.bf16.msra.mxu0 %v2878_v31  ;;  %v2886_v31 = vld [vmem:[%s4694_s2 + $0x60] ss:$24 sps:$4 sm:$0xff]  }
  0xd0   :  { %1611 = vmatpush1.bf16.msra.mxu1 %v2879_v25  ;;  %1561 = vmatprep.subr.bf16.mxu0 %v2880_v48  ;;  %v2887_v25 = vld [vmem:[%s4694_s2 + $0x360] ss:$24 sps:$4 sm:$0xff]   ;;  %v2888_v48 = vld [vmem:[%s4694_s2 + $0x34] ss:$24 sps:$4 sm:$0xff]  }
  0xd1   :  { %1612 = vmatprep.subr.bf16.mxu1 %v2881_v28  ;;  %v2889_v28 = vld [vmem:[%s4694_s2 + $0x334] ss:$24 sps:$4 sm:$0xff]  }
  0xd3   :  { %1562 = vmatpush1.bf16.msra.mxu0 %v2882_v24  ;;  %v2890_v24 = vld [vmem:[%s4694_s2 + $0x30] ss:$24 sps:$4 sm:$0xff]  }
  0xd4   :  { %1613 = vmatpush1.bf16.msra.mxu1 %v2883_v4  ;;  %1563 = vmatprep.subr.bf16.mxu0 %v2884_v5  ;;  %v2891_v4 = vld [vmem:[%s4694_s2 + $0x330] ss:$24 sps:$4 sm:$0xff]   ;;  %v2892_v5 = vld [vmem:[%s4694_s2 + $0x4] ss:$24 sps:$4 sm:$0xff]  }
  0xd5   :  { %1614 = vmatprep.subr.bf16.mxu1 %v2885_v30  ;;  %v2893_v30 = vld [vmem:[%s4694_s2 + $0x304] ss:$24 sps:$4 sm:$0xff]  }
  0xd7   :  { %1564 = vmatpush1.bf16.msra.mxu0 %v2886_v31  ;;  %v2894_v31 = vld [vmem:[%s4694_s2] ss:$24 sps:$4 sm:$0xff]  }
  0xd8   :  { %1615 = vmatpush1.bf16.msra.mxu1 %v2887_v25  ;;  %1565 = vmatprep.subr.bf16.mxu0 %v2888_v48  ;;  %v2895_v25 = vld [vmem:[%s4694_s2 + $0x300] ss:$24 sps:$4 sm:$0xff]   ;;  %v2896_v48 = vld [vmem:[%s4694_s2 + $0x2d4] ss:$24 sps:$4 sm:$0xff]  }
  0xd9   :  { %1616 = vmatprep.subr.bf16.mxu1 %v2889_v28  ;;  %v2897_v28 = vld [vmem:[%s4694_s2 + $0x5d4] ss:$24 sps:$4 sm:$0xff]  }
  0xdb   :  { %1566 = vmatpush1.bf16.msra.mxu0 %v2890_v24  ;;  %v2898_v24 = vld [vmem:[%s4694_s2 + $0x2d0] ss:$24 sps:$4 sm:$0xff]  }
  0xdc   :  { %1617 = vmatpush1.bf16.msra.mxu1 %v2891_v4  ;;  %1567 = vmatprep.subr.bf16.mxu0 %v2892_v5  ;;  %v2899_v4 = vld [vmem:[%s4694_s2 + $0x5d0] ss:$24 sps:$4 sm:$0xff]   ;;  %v2900_v5 = vld [vmem:[%s4694_s2 + $0x2a4] ss:$24 sps:$4 sm:$0xff]  }
  0xdd   :  { %1618 = vmatprep.subr.bf16.mxu1 %v2893_v30  ;;  %v2901_v30 = vld [vmem:[%s4694_s2 + $0x5a4] ss:$24 sps:$4 sm:$0xff]  }
  0xdf   :  { %1568 = vmatpush1.bf16.msra.mxu0 %v2894_v31  ;;  %v2902_v31 = vld [vmem:[%s4694_s2 + $0x2a0] ss:$24 sps:$4 sm:$0xff]  }
  0xe0   :  { %1619 = vmatpush1.bf16.msra.mxu1 %v2895_v25  ;;  %1569 = vmatprep.subr.bf16.mxu0 %v2896_v48  ;;  %v2903_v25 = vld [vmem:[%s4694_s2 + $0x5a0] ss:$24 sps:$4 sm:$0xff]   ;;  %v2904_v48 = vld [vmem:[%s4694_s2 + $0x274] ss:$24 sps:$4 sm:$0xff]  }
  0xe1   :  { %1620 = vmatprep.subr.bf16.mxu1 %v2897_v28  ;;  %v2905_v28 = vld [vmem:[%s4694_s2 + $0x574] ss:$24 sps:$4 sm:$0xff]  }
  0xe3   :  { %1570 = vmatpush2.bf16.msra.mxu0 %v2898_v24  ;;  %v2906_v24 = vld [vmem:[%s4694_s2 + $0x270] ss:$24 sps:$4 sm:$0xff]  }
  0xe4   :  { %1621 = vmatpush2.bf16.msra.mxu1 %v2899_v4  ;;  %1571 = vmatprep.subr.bf16.mxu0 %v2900_v5  ;;  %v2907_v4 = vld [vmem:[%s4694_s2 + $0x570] ss:$24 sps:$4 sm:$0xff]   ;;  %v2908_v5 = vld [vmem:[%s4694_s2 + $0x244] ss:$24 sps:$4 sm:$0xff]  }
  0xe5   :  { %1622 = vmatprep.subr.bf16.mxu1 %v2901_v30  ;;  %v2909_v30 = vld [vmem:[%s4694_s2 + $0x544] ss:$24 sps:$4 sm:$0xff]  }
  0xe7   :  { %1572 = vmatpush2.bf16.msra.mxu0 %v2902_v31  ;;  %v2910_v31 = vld [vmem:[%s4694_s2 + $0x240] ss:$24 sps:$4 sm:$0xff]  }
  0xe8   :  { %1623 = vmatpush2.bf16.msra.mxu1 %v2903_v25  ;;  %1573 = vmatprep.subr.bf16.mxu0 %v2904_v48  ;;  %v2911_v25 = vld [vmem:[%s4694_s2 + $0x540] ss:$24 sps:$4 sm:$0xff]  }
  0xe9   :  { %1624 = vmatprep.subr.bf16.mxu1 %v2905_v28  ;;  %v4896_v48 = vld [vmem:[#allocation25_spill] sm:$0xff]  ;;  %v4897_v28 = vld [vmem:[#allocation26_spill] sm:$0xff] }
  0xeb   :  { %1574 = vmatpush2.bf16.msra.mxu0 %v2906_v24  ;;  %v4898_v24 = vld [vmem:[#allocation27_spill] sm:$0xff] }
  0xec   :  { %1625 = vmatpush2.bf16.msra.mxu1 %v2907_v4  ;;  %1575 = vmatprep.subr.bf16.mxu0 %v2908_v5  ;;  %v4899_v4 = vld [vmem:[#allocation28_spill] sm:$0xff]  ;;  %v4900_v5 = vld [vmem:[#allocation29_spill] sm:$0xff] }
  0xed   :  { %1626 = vmatprep.subr.bf16.mxu1 %v2909_v30  ;;  %v4901_v30 = vld [vmem:[#allocation30_spill] sm:$0xff] }
  0xef   :  { %1576 = vmatpush2.bf16.msra.mxu0 %v2910_v31  ;;  %v4902_v31 = vld [vmem:[#allocation31_spill] sm:$0xff] }
  0xf0   :  { %1627 = vmatpush2.bf16.msra.mxu1 %v2911_v25  ;;  %1577 = vmatprep.subr.bf16.mxu0 %v3099_v49  ;;  %v4186_v49 = vld [vmem:[%s4693_s1] ss:$16 sps:$4 sm:$0xff]   ;;  %v4903_v25 = vld [vmem:[#allocation32_spill] sm:$0xff] }
  0xf1   :  { %1628 = vmatprep.subr.bf16.mxu1 %v3109_v51  ;;  %v4191_v51 = vld [vmem:[%s4693_s1 + $0x8] ss:$16 sps:$4 sm:$0xff]  }
  0xf3   :  { %1578 = vmatpush2.bf16.msra.mxu0 %v3116_v52  ;;  %v1517_v52 = vld [vmem:[%s4693_s1 + $0x20] sm:$0x11] }
  0xf4   :  { %1629 = vmatpush2.bf16.msra.mxu1 %v3121_v53  ;;  %1579 = vmatprep.subr.bf16.mxu0 %v3126_v54  ;;  %v1518_v53 = vld [vmem:[%s4693_s1 + $0x28] sm:$0x11]  ;;  %v4203_v54 = vcombine.high %v1517_v52, %v1517_v52 }
  0xf5   :  { %1630 = vmatprep.subr.bf16.mxu1 %v3133_v55  ;;  %v4205_v55 = vcombine.high %v1518_v53, %v1518_v53 }
  0xf7   :  { %1580 = vmatpush2.bf16.msra.mxu0 %v3138_v56 }
  0xf8   :  { %1631 = vmatpush2.bf16.msra.mxu1 %v3143_v57  ;;  %1581 = vmatprep.subr.bf16.mxu0 %v3150_v58 }
  0xf9   :  { %1632 = vmatprep.subr.bf16.mxu1 %v3157_v59 }
  0xfb   :  { %1582 = vmatpush2.bf16.msra.mxu0 %v3162_v60 }
  0xfc   :  { %1633 = vmatpush2.bf16.msra.mxu1 %v3167_v61  ;;  %1583 = vmatprep.subr.bf16.mxu0 %v3174_v62 }
  0xfd   :  { %1634 = vmatprep.subr.bf16.mxu1 %v3181_v63 }
  0xff   :  { %1584 = vmatpush2.bf16.msra.mxu0 %v3186_v0  ;;  %v4219_v0 = vcombine.low %v1517_v52, %v1517_v52  ;;  %v4904_v52 = vld [vmem:[#allocation33_spill] sm:$0xff] }
 0x100   :  { %1635 = vmatpush2.bf16.msra.mxu1 %v3191_v1  ;;  %1655 = vmatprep.subr.bf16.mxu0 %v3198_v2  ;;  %v4221_v1 = vcombine.low %v1518_v53, %v1518_v53  ;;  %v4905_v53 = vld [vmem:[#allocation34_spill] sm:$0xff] }
 0x101   :  { %1706 = vmatprep.subr.bf16.mxu1 %v3205_v3 }
 0x102   :  { %v1241_v56 = vpop.f32.mrf.mxu0  ;;  %1586 = vmatmul.mubr.bf16.vlgmr.msra.gmra.mxu0 %v4186_v49 }
 0x103   :  { %v1292_v57 = vpop.f32.mrf.mxu1  ;;  %1637 = vmatmul.mubr.bf16.vlgmr.msra.gmra.mxu1 %v4191_v51  ;;  %1656 = vmatpush1.bf16.msra.mxu0 %v3220_v6 }
 0x104   :  { %v4209_v58 = vadd.f32 %v1292_v57, %v1241_v56  ;;  %1707 = vmatpush1.bf16.msra.mxu1 %v3225_v7  ;;  %v1243_v59 = vpop.f32.mrf.mxu0  ;;  %1657 = vmatprep.subr.bf16.mxu0 %v3232_v8  ;;  %v4906_v56 = vld [vmem:[#allocation35_spill] sm:$0xff]  ;;  %v4907_v57 = vld [vmem:[#allocation36_spill] sm:$0xff] }
 0x105   :  { %v1294_v60 = vpop.f32.mrf.mxu1  ;;  %1708 = vmatprep.subr.bf16.mxu1 %v3239_v9  ;;  %1595 = vmatprep.mubr.bf16.mxu0 %v4203_v54 }
 0x106   :  { %v4215_v61 = vadd.f32 %v1294_v60, %v1243_v59  ;;  %1646 = vmatprep.mubr.bf16.mxu1 %v4205_v55  ;;  %v1245_v62 = vpop.f32.mrf.mxu0 }
 0x107   :  { %v1296_v63 = vpop.f32.mrf.mxu1  ;;  %1658 = vmatpush1.bf16.msra.mxu0 %v3246_v10 }
 0x108   :  { %v4223_v2 = vadd.f32 %v1296_v63, %v1245_v62  ;;  %1709 = vmatpush1.bf16.msra.mxu1 %v3251_v11  ;;  %v1247_v3 = vpop.f32.mrf.mxu0  ;;  %1659 = vmatprep.subr.bf16.mxu0 %v3258_v12  ;;  %v4908_v63 = vld [vmem:[#allocation37_spill] sm:$0xff] }
 0x109   :  { %v1298_v6 = vpop.f32.mrf.mxu1  ;;  %1710 = vmatprep.subr.bf16.mxu1 %v3265_v13 }
 0x10a   :  { %v4229_v7 = vadd.f32 %v1298_v6, %v1247_v3  ;;  %1596 = vmatmul.mubr.bf16.gmra.mxu0 %v4219_v0  ;;  %v1251_v8 = vpop.f32.mrf.mxu0  ;;  %v4909_v3 = vld [vmem:[#allocation38_spill] sm:$0xff] }
 0x10b   :  { %1647 = vmatmul.mubr.bf16.gmra.mxu1 %v4221_v1  ;;  %1660 = vmatpush1.bf16.msra.mxu0 %v3270_v14  ;;  %v1302_v9 = vpop.f32.mrf.mxu1 }
 0x10c   :  { %1711 = vmatpush1.bf16.msra.mxu1 %v3275_v15  ;;  %1661 = vmatprep.subr.bf16.mxu0 %v3282_v16  ;;  %v4247_v10 = vadd.f32 %v1302_v9, %v1251_v8  ;;  %v1253_v11 = vpop.f32.mrf.mxu0  ;;  %v4910_v9 = vld [vmem:[#allocation39_spill] sm:$0xff] }
 0x10d   :  { %1712 = vmatprep.subr.bf16.mxu1 %v3289_v17  ;;  %1687 = vmatprep.mubr.bf16.mxu0 %v4044_v29  ;;  %v1304_v12 = vpop.f32.mrf.mxu1 }
 0x10e   :  { %1738 = vmatprep.mubr.bf16.mxu1 %v4049_v50  ;;  %v4253_v13 = vadd.f32 %v1304_v12, %v1253_v11  ;;  %v1255_v14 = vpop.f32.mrf.mxu0  ;;  %v4911_v11 = vld [vmem:[#allocation40_spill] sm:$0xff] }
 0x10f   :  { %1662 = vmatpush1.bf16.msra.mxu0 %v3294_v18  ;;  %v1306_v15 = vpop.f32.mrf.mxu1  ;;  %v4876_v18 = vld [vmem:[#allocation5_spill] sm:$0xff] }
 0x110   :  { %1713 = vmatpush1.bf16.msra.mxu1 %v3299_v19  ;;  %1663 = vmatprep.subr.bf16.mxu0 %v3306_v20  ;;  %v1256_v16 = vpop.f32.mrf.mxu0  ;;  %v4877_v19 = vld [vmem:[#allocation6_spill] sm:$0xff]  ;;  %v4878_v20 = vld [vmem:[#allocation7_spill] sm:$0xff] }
 0x111   :  { %1714 = vmatprep.subr.bf16.mxu1 %v3313_v21  ;;  %v1307_v17 = vpop.f32.mrf.mxu1  ;;  %v4879_v21 = vld [vmem:[#allocation8_spill] sm:$0xff]  ;;  %v1859_v16 = vmul.f32 %v4209_v58, %v4209_v58  ;;  %v1862_v58 = vmul.f32 %v4223_v2, %v4223_v2 }
 0x113   :  { %1664 = vmatpush1.bf16.msra.mxu0 %v3318_v22  ;;  %v4880_v22 = vld [vmem:[#allocation9_spill] sm:$0xff] }
 0x114   :  { %1715 = vmatpush1.bf16.msra.mxu1 %v3323_v23  ;;  %1665 = vmatprep.subr.bf16.mxu0 %v3338_v26  ;;  %v4881_v23 = vld [vmem:[#allocation10_spill] sm:$0xff]  ;;  %v4882_v26 = vld [vmem:[#allocation11_spill] sm:$0xff] }
 0x115   :  { %1716 = vmatprep.subr.bf16.mxu1 %v3343_v27  ;;  %v4883_v27 = vld [vmem:[#allocation12_spill] sm:$0xff] }
 0x117   :  { %1666 = vmatpush1.bf16.msra.mxu0 %v3360_v32  ;;  %v4884_v32 = vld [vmem:[#allocation13_spill] sm:$0xff] }
 0x118   :  { %1717 = vmatpush1.bf16.msra.mxu1 %v3365_v33  ;;  %1667 = vmatprep.subr.bf16.mxu0 %v3372_v34  ;;  %v4885_v33 = vld [vmem:[#allocation14_spill] sm:$0xff]  ;;  %v4886_v34 = vld [vmem:[#allocation15_spill] sm:$0xff] }
 0x119   :  { %1718 = vmatprep.subr.bf16.mxu1 %v3377_v35  ;;  %v4887_v35 = vld [vmem:[#allocation16_spill] sm:$0xff] }
 0x11b   :  { %1668 = vmatpush1.bf16.msra.mxu0 %v3388_v36  ;;  %v4888_v36 = vld [vmem:[#allocation17_spill] sm:$0xff] }
 0x11c   :  { %1719 = vmatpush1.bf16.msra.mxu1 %v3393_v37  ;;  %1669 = vmatprep.subr.bf16.mxu0 %v3400_v38  ;;  %v4889_v37 = vld [vmem:[#allocation18_spill] sm:$0xff]  ;;  %v4890_v38 = vld [vmem:[#allocation19_spill] sm:$0xff] }
 0x11d   :  { %1720 = vmatprep.subr.bf16.mxu1 %v3405_v39  ;;  %v4891_v39 = vld [vmem:[#allocation20_spill] sm:$0xff] }
 0x11f   :  { %1670 = vmatpush1.bf16.msra.mxu0 %v3412_v40  ;;  %v4892_v40 = vld [vmem:[#allocation21_spill] sm:$0xff] }
 0x120   :  { %1721 = vmatpush1.bf16.msra.mxu1 %v3417_v41  ;;  %1671 = vmatprep.subr.bf16.mxu0 %v3424_v42  ;;  %v4893_v41 = vld [vmem:[#allocation22_spill] sm:$0xff]  ;;  %v4894_v42 = vld [vmem:[#allocation23_spill] sm:$0xff] }
 0x121   :  { %1722 = vmatprep.subr.bf16.mxu1 %v3429_v43  ;;  %v4895_v43 = vld [vmem:[#allocation24_spill] sm:$0xff] }
 0x123   :  { %1672 = vmatpush2.bf16.msra.mxu0 %v4876_v18 }
 0x124   :  { %1723 = vmatpush2.bf16.msra.mxu1 %v4877_v19  ;;  %1673 = vmatprep.subr.bf16.mxu0 %v4878_v20  ;;  %v4912_v19 = vld [vmem:[#allocation41_spill] sm:$0xff]  ;;  %v4913_v20 = vld [vmem:[#allocation42_spill] sm:$0xff] }
 0x125   :  { %1724 = vmatprep.subr.bf16.mxu1 %v4879_v21 }
 0x127   :  { %1674 = vmatpush2.bf16.msra.mxu0 %v4880_v22 }
 0x128   :  { %1725 = vmatpush2.bf16.msra.mxu1 %v4881_v23  ;;  %1675 = vmatprep.subr.bf16.mxu0 %v4882_v26  ;;  %v4914_v23 = vld [vmem:[#allocation43_spill] sm:$0xff]  ;;  %v4915_v26 = vld [vmem:[#allocation44_spill] sm:$0xff] }
 0x129   :  { %1726 = vmatprep.subr.bf16.mxu1 %v4883_v27 }
 0x12b   :  { %1676 = vmatpush2.bf16.msra.mxu0 %v4884_v32 }
 0x12c   :  { %1727 = vmatpush2.bf16.msra.mxu1 %v4885_v33  ;;  %1677 = vmatprep.subr.bf16.mxu0 %v4886_v34 }
 0x12d   :  { %1728 = vmatprep.subr.bf16.mxu1 %v4887_v35 }
 0x12f   :  { %1678 = vmatpush2.bf16.msra.mxu0 %v4888_v36 }
 0x130   :  { %1729 = vmatpush2.bf16.msra.mxu1 %v4889_v37  ;;  %1679 = vmatprep.subr.bf16.mxu0 %v4890_v38  ;;  %v4916_v37 = vld [vmem:[#allocation45_spill] sm:$0xff]  ;;  %v4917_v38 = vld [vmem:[#allocation46_spill] sm:$0xff] }
 0x131   :  { %1730 = vmatprep.subr.bf16.mxu1 %v4891_v39 }
 0x133   :  { %1680 = vmatpush2.bf16.msra.mxu0 %v4892_v40 }
 0x134   :  { %1731 = vmatpush2.bf16.msra.mxu1 %v4893_v41  ;;  %1681 = vmatprep.subr.bf16.mxu0 %v4894_v42  ;;  %v4918_v41 = vld [vmem:[#allocation47_spill] sm:$0xff]  ;;  %v4919_v42 = vld [vmem:[#allocation48_spill] sm:$0xff] }
 0x135   :  { %1732 = vmatprep.subr.bf16.mxu1 %v4895_v43 }
 0x137   :  { %1682 = vmatpush2.bf16.msra.mxu0 %v4896_v48 }
 0x138   :  { %1733 = vmatpush2.bf16.msra.mxu1 %v4897_v28  ;;  %1683 = vmatprep.subr.bf16.mxu0 %v4898_v24  ;;  %v1865_v24 = vmul.f32 %v4247_v10, %v4247_v10  ;;  %v4927_v10 = vld [vmem:[#allocation56_spill] sm:$0xff] }
 0x139   :  { %1734 = vmatprep.subr.bf16.mxu1 %v4899_v4 }
 0x13b   :  { %1684 = vmatpush2.bf16.msra.mxu0 %v4900_v5  ;;  %v4920_v5 = vld [vmem:[#allocation49_spill] sm:$0xff] }
 0x13c   :  { %1735 = vmatpush2.bf16.msra.mxu1 %v4901_v30  ;;  %1685 = vmatprep.subr.bf16.mxu0 %v4902_v31  ;;  %v4921_v30 = vld [vmem:[#allocation50_spill] sm:$0xff] }
 0x13d   :  { %1736 = vmatprep.subr.bf16.mxu1 %v4903_v25 }
 0x13f   :  { %1686 = vmatpush2.bf16.msra.mxu0 %v4904_v52  ;;  %v4923_v52 = vld [vmem:[#allocation52_spill] sm:$0xff] }
 0x140   :  { %1737 = vmatpush2.bf16.msra.mxu1 %v4905_v53  ;;  %1757 = vmatprep.subr.bf16.mxu0 %v4906_v56  ;;  %v4924_v53 = vld [vmem:[#allocation53_spill] sm:$0xff] }
 0x141   :  { %1808 = vmatprep.subr.bf16.mxu1 %v4907_v57  ;;  %v4928_v56 = vld [vmem:[#allocation57_spill] sm:$0xff]  ;;  %v4929_v57 = vld [vmem:[#allocation58_spill] sm:$0xff] }
 0x142   :  { %v1343_v59 = vpop.f32.mrf.mxu0  ;;  %1688 = vmatmul.mubr.bf16.vlgmr.msra.gmra.mxu0 %v4186_v49 }
 0x143   :  { %v1394_v60 = vpop.f32.mrf.mxu1  ;;  %1739 = vmatmul.mubr.bf16.vlgmr.msra.gmra.mxu1 %v4191_v51  ;;  %1758 = vmatpush1.bf16.msra.mxu0 %v4908_v63  ;;  %v4932_v63 = vld [vmem:[#allocation61_spill] sm:$0xff] }
 0x144   :  { %v4297_v62 = vadd.f32 %v1394_v60, %v1343_v59  ;;  %1809 = vmatpush1.bf16.msra.mxu1 %v4909_v3  ;;  %v1345_v6 = vpop.f32.mrf.mxu0  ;;  %1759 = vmatprep.subr.bf16.mxu0 %v4910_v9  ;;  %v4930_v59 = vld [vmem:[#allocation59_spill] sm:$0xff]  ;;  %v4931_v60 = vld [vmem:[#allocation60_spill] sm:$0xff]  ;;  %v4933_v3 = vld [vmem:[#allocation62_spill] sm:$0xff] }
 0x145   :  { %v1396_v8 = vpop.f32.mrf.mxu1  ;;  %1810 = vmatprep.subr.bf16.mxu1 %v4911_v11  ;;  %1697 = vmatprep.mubr.bf16.mxu0 %v4203_v54  ;;  %v4936_v9 = vld [vmem:[#allocation65_spill] sm:$0xff]  ;;  %v4937_v11 = vld [vmem:[#allocation66_spill] sm:$0xff] }
 0x146   :  { %v1397_v12 = vadd.f32 %v1396_v8, %v1345_v6  ;;  %1748 = vmatprep.mubr.bf16.mxu1 %v4205_v55  ;;  %v1347_v14 = vpop.f32.mrf.mxu0  ;;  %v4934_v6 = vld [vmem:[#allocation63_spill] sm:$0xff]  ;;  %v4935_v8 = vld [vmem:[#allocation64_spill] sm:$0xff] }
 0x147   :  { %v1398_v15 = vpop.f32.mrf.mxu1  ;;  %1760 = vmatpush1.bf16.msra.mxu0 %v4912_v19  ;;  %v4943_v19 = vld [vmem:[#allocation72_spill] sm:$0xff] }
 0x148   :  { %v1868_v17 = vmul.f32 %v1397_v12, %v1397_v12  ;;  %v4307_v18 = vadd.f32 %v1398_v15, %v1347_v14  ;;  %1811 = vmatpush1.bf16.msra.mxu1 %v4913_v20  ;;  %v1349_v21 = vpop.f32.mrf.mxu0  ;;  %1761 = vmatprep.subr.bf16.mxu0 %v4914_v23  ;;  %v4938_v12 = vld [vmem:[#allocation67_spill] sm:$0xff]  ;;  %v4939_v14 = vld [vmem:[#allocation68_spill] sm:$0xff]  ;;  %v4940_v15 = vld [vmem:[#allocation69_spill] sm:$0xff] }
 0x149   :  { %v1400_v22 = vpop.f32.mrf.mxu1  ;;  %1812 = vmatprep.subr.bf16.mxu1 %v4915_v26  ;;  %v4944_v20 = vld [vmem:[#allocation73_spill] sm:$0xff]  ;;  %v4947_v23 = vld [vmem:[#allocation76_spill] sm:$0xff] }
 0x14a   :  { %v4313_v27 = vadd.f32 %v1868_v17, %v1859_v16  ;;  %v1401_v32 = vadd.f32 %v1400_v22, %v1349_v21  ;;  %v1353_v33 = vpop.f32.mrf.mxu0  ;;  %1698 = vmatmul.mubr.bf16.gmra.mxu0 %v4219_v0  ;;  %v4941_v16 = vld [vmem:[#allocation70_spill] sm:$0xff]  ;;  %v4942_v17 = vld [vmem:[#allocation71_spill] sm:$0xff]  ;;  %v4948_v26 = vld [vmem:[#allocation77_spill] sm:$0xff] }
 0x14b   :  { %v1404_v34 = vpop.f32.mrf.mxu1  ;;  %1749 = vmatmul.mubr.bf16.gmra.mxu1 %v4221_v1  ;;  %1762 = vmatpush1.bf16.msra.mxu0 %v4916_v37  ;;  %v4945_v21 = vld [vmem:[#allocation74_spill] sm:$0xff]  ;;  %v4946_v22 = vld [vmem:[#allocation75_spill] sm:$0xff] }
 0x14c   :  { %v1871_v35 = vmul.f32 %v1401_v32, %v1401_v32  ;;  %v4319_v36 = vadd.f32 %v1404_v34, %v1353_v33  ;;  %1813 = vmatpush1.bf16.msra.mxu1 %v4917_v38  ;;  %v1355_v39 = vpop.f32.mrf.mxu0  ;;  %1763 = vmatprep.subr.bf16.mxu0 %v4918_v41  ;;  %v4949_v32 = vld [vmem:[#allocation78_spill] sm:$0xff]  ;;  %v4950_v33 = vld [vmem:[#allocation79_spill] sm:$0xff]  ;;  %v4951_v34 = vld [vmem:[#allocation80_spill] sm:$0xff] }
 0x14d   :  { %v1406_v40 = vpop.f32.mrf.mxu1  ;;  %1814 = vmatprep.subr.bf16.mxu1 %v4919_v42  ;;  %1789 = vmatprep.mubr.bf16.mxu0 %v4044_v29  ;;  %v4954_v37 = vld [vmem:[#allocation83_spill] sm:$0xff]  ;;  %v4955_v38 = vld [vmem:[#allocation84_spill] sm:$0xff] }
 0x14e   :  { %v4325_v43 = vadd.f32 %v1871_v35, %v1862_v58  ;;  %1840 = vmatprep.mubr.bf16.mxu1 %v4049_v50  ;;  %v1407_v2 = vadd.f32 %v1406_v40, %v1355_v39  ;;  %v1357_v48 = vpop.f32.mrf.mxu0  ;;  %v4922_v50 = vld [vmem:[#allocation51_spill] sm:$0xff]  ;;  %v4952_v58 = vld [vmem:[#allocation81_spill] sm:$0xff]  ;;  %v4953_v35 = vld [vmem:[#allocation82_spill] sm:$0xff] }
 0x14f   :  { %v1408_v28 = vpop.f32.mrf.mxu1  ;;  %1764 = vmatpush1.bf16.msra.mxu0 %v3706_v47  ;;  %v4925_v47 = vld [vmem:[#allocation54_spill] sm:$0xff]  ;;  %v4956_v39 = vld [vmem:[#allocation85_spill] sm:$0xff]  ;;  %v4958_v41 = vld [vmem:[#allocation87_spill] sm:$0xff] }
 0x150   :  { %1815 = vmatpush1.bf16.msra.mxu1 %v3711_v46  ;;  %v1874_v4 = vmul.f32 %v1407_v2, %v1407_v2  ;;  %1765 = vmatprep.subr.bf16.mxu0 %v4920_v5  ;;  %v1358_v31 = vpop.f32.mrf.mxu0  ;;  %v4926_v46 = vld [vmem:[#allocation55_spill] sm:$0xff]  ;;  %v4957_v40 = vld [vmem:[#allocation86_spill] sm:$0xff]  ;;  %v4959_v42 = vld [vmem:[#allocation88_spill] sm:$0xff] }
 0x151   :  { %1816 = vmatprep.subr.bf16.mxu1 %v4921_v30  ;;  %v1409_v25 = vpop.f32.mrf.mxu1  ;;  %v4960_v2 = vld [vmem:[#allocation89_spill] sm:$0xff]  ;;  %v4961_v48 = vld [vmem:[#allocation90_spill] sm:$0xff]  ;;  %v4962_v28 = vld [vmem:[#allocation91_spill] sm:$0xff] }
 0x152   :  { %v4335_v29 = vadd.f32 %v1874_v4, %v1865_v24  ;;  %v4963_v24 = vld [vmem:[#allocation92_spill] sm:$0xff]  ;;  %v4964_v4 = vld [vmem:[#allocation93_spill] sm:$0xff]  ;;  %v4965_v5 = vld [vmem:[#allocation94_spill] sm:$0xff] }
 0x153   :  { %1766 = vmatpush1.bf16.msra.mxu0 %v4922_v50 }
 0x154   :  { %1817 = vmatpush1.bf16.msra.mxu1 %v4923_v52  ;;  %1767 = vmatprep.subr.bf16.mxu0 %v4924_v53 }
 0x155   :  { %1818 = vmatprep.subr.bf16.mxu1 %v4925_v47 }
 0x157   :  { %1768 = vmatpush1.bf16.msra.mxu0 %v4926_v46 }
 0x158   :  { %1819 = vmatpush1.bf16.msra.mxu1 %v4927_v10  ;;  %1769 = vmatprep.subr.bf16.mxu0 %v4928_v56  ;;  %v1861_v10 = vmul.f32 %v4297_v62, %v4297_v62  ;;  %v1864_v62 = vmul.f32 %v4307_v18, %v4307_v18 }
 0x159   :  { %1820 = vmatprep.subr.bf16.mxu1 %v4929_v57 }
 0x15b   :  { %1770 = vmatpush1.bf16.msra.mxu0 %v4930_v59 }
 0x15c   :  { %1821 = vmatpush1.bf16.msra.mxu1 %v4931_v60  ;;  %1771 = vmatprep.subr.bf16.mxu0 %v4932_v63 }
 0x15d   :  { %1822 = vmatprep.subr.bf16.mxu1 %v4933_v3 }
 0x15f   :  { %1772 = vmatpush1.bf16.msra.mxu0 %v4934_v6 }
 0x160   :  { %1823 = vmatpush1.bf16.msra.mxu1 %v4935_v8  ;;  %1773 = vmatprep.subr.bf16.mxu0 %v4936_v9 }
 0x161   :  { %1824 = vmatprep.subr.bf16.mxu1 %v4937_v11 }
 0x163   :  { %1774 = vmatpush2.bf16.msra.mxu0 %v4938_v12 }
 0x164   :  { %1825 = vmatpush2.bf16.msra.mxu1 %v4939_v14  ;;  %1775 = vmatprep.subr.bf16.mxu0 %v4940_v15  ;;  %v1866_v15 = vmul.f32 %v4253_v13, %v4253_v13 }
 0x165   :  { %1826 = vmatprep.subr.bf16.mxu1 %v4941_v16 }
 0x167   :  { %1776 = vmatpush2.bf16.msra.mxu0 %v4942_v17 }
 0x168   :  { %1827 = vmatpush2.bf16.msra.mxu1 %v4943_v19  ;;  %1777 = vmatprep.subr.bf16.mxu0 %v4944_v20 }
 0x169   :  { %1828 = vmatprep.subr.bf16.mxu1 %v4945_v21 }
 0x16b   :  { %1778 = vmatpush2.bf16.msra.mxu0 %v4946_v22 }
 0x16c   :  { %1829 = vmatpush2.bf16.msra.mxu1 %v4947_v23  ;;  %1779 = vmatprep.subr.bf16.mxu0 %v4948_v26 }
 0x16d   :  { %1830 = vmatprep.subr.bf16.mxu1 %v4949_v32 }
 0x16f   :  { %1780 = vmatpush2.bf16.msra.mxu0 %v4950_v33 }
 0x170   :  { %1831 = vmatpush2.bf16.msra.mxu1 %v4951_v34  ;;  %1781 = vmatprep.subr.bf16.mxu0 %v4952_v58 }
 0x171   :  { %1832 = vmatprep.subr.bf16.mxu1 %v4953_v35 }
 0x173   :  { %1782 = vmatpush2.bf16.msra.mxu0 %v4954_v37 }
 0x174   :  { %1833 = vmatpush2.bf16.msra.mxu1 %v4955_v38  ;;  %1783 = vmatprep.subr.bf16.mxu0 %v4956_v39 }
 0x175   :  { %1834 = vmatprep.subr.bf16.mxu1 %v4957_v40 }
 0x177   :  { %1784 = vmatpush2.bf16.msra.mxu0 %v4958_v41 }
 0x178   :  { %1835 = vmatpush2.bf16.msra.mxu1 %v4959_v42  ;;  %1785 = vmatprep.subr.bf16.mxu0 %v4960_v2 }
 0x179   :  { %1836 = vmatprep.subr.bf16.mxu1 %v4961_v48 }
 0x17b   :  { %1786 = vmatpush2.bf16.msra.mxu0 %v4962_v28 }
 0x17c   :  { %1837 = vmatpush2.bf16.msra.mxu1 %v4963_v24  ;;  %1787 = vmatprep.subr.bf16.mxu0 %v3984_v44  ;;  %v1860_v44 = vmul.f32 %v4215_v61, %v4215_v61  ;;  %v1863_v61 = vmul.f32 %v4229_v7, %v4229_v7 }
 0x17d   :  { %1838 = vmatprep.subr.bf16.mxu1 %v3989_v45 }
 0x17f   :  { %1788 = vmatpush2.bf16.msra.mxu0 %v4964_v4 }
 0x180   :  { %1839 = vmatpush2.bf16.msra.mxu1 %v4965_v5 }
 0x182   :  { %v1445_v30 = vpop.f32.mrf.mxu0  ;;  %1790 = vmatmul.mubr.bf16.vlgmr.msra.gmra.mxu0 %v4186_v49 }
 0x183   :  { %v1496_v31 = vpop.f32.mrf.mxu1  ;;  %1841 = vmatmul.mubr.bf16.vlgmr.msra.gmra.mxu1 %v4191_v51  ;;  %1799 = vmatprep.mubr.bf16.mxu0 %v4203_v54 }
 0x184   :  { %v1497_v25 = vadd.f32 %v1496_v31, %v1445_v30  ;;  %1850 = vmatprep.mubr.bf16.mxu1 %v4205_v55  ;;  %v1447_v50 = vpop.f32.mrf.mxu0  ;;  %v1886_v31 = vmax.f32 %v4313_v27, 1e-08  ;;  %v4429_v27 = vmax.f32 %v4335_v29, 1e-08 }
 0x185   :  { %v1498_v52 = vpop.f32.mrf.mxu1 }
 0x186   :  { %v1869_v45 = vmul.f32 %v1497_v25, %v1497_v25  ;;  %v1499_v53 = vadd.f32 %v1498_v52, %v1447_v50  ;;  %v1449_v47 = vpop.f32.mrf.mxu0  ;;  %2792 = vrsqrt.f32 %v1886_v31  ;;  %vm1897_vm0 = vcmp.eq.f32.partialorder %v1886_v31, inf }
 0x187   :  { %v1500_v46 = vpop.f32.mrf.mxu1  ;;  %vm1899_vm1 = vcmp.eq.f32.partialorder %v1886_v31, 0.0  ;;  %vm1939_vm6 = vcmp.eq.f32.partialorder %v4429_v27, inf  ;;  %vm1941_vm8 = vcmp.eq.f32.partialorder %v4429_v27, 0.0 }
 0x188   :  { %v4391_v49 = vadd.f32 %v1869_v45, %v1860_v44  ;;  %v1870_v51 = vmul.f32 %v1499_v53, %v1499_v53  ;;  %v1501_v56 = vadd.f32 %v1500_v46, %v1449_v47  ;;  %v1451_v57 = vpop.f32.mrf.mxu0  ;;  %v4423_v44 = vmax.f32 %v4325_v43, 1e-08 }
 0x189   :  { %v1502_v54 = vpop.f32.mrf.mxu1 }
 0x18a   :  { %v4393_v59 = vadd.f32 %v1870_v51, %v1861_v10  ;;  %v1872_v55 = vmul.f32 %v1501_v56, %v1501_v56  ;;  %v1503_v60 = vadd.f32 %v1502_v54, %v1451_v57  ;;  %v1455_v63 = vpop.f32.mrf.mxu0  ;;  %1800 = vmatmul.mubr.bf16.gmra.mxu0 %v4219_v0  ;;  %2794 = vrsqrt.f32 %v4423_v44 }
 0x18b   :  { %v1506_v3 = vpop.f32.mrf.mxu1  ;;  %1851 = vmatmul.mubr.bf16.gmra.mxu1 %v4221_v1  ;;  %v1867_v1 = vmul.f32 %v4319_v36, %v4319_v36  ;;  %2796 = vrsqrt.f32 %v4429_v27  ;;  %vm1918_vm2 = vcmp.eq.f32.partialorder %v4423_v44, inf  ;;  %vm1920_vm5 = vcmp.eq.f32.partialorder %v4423_v44, 0.0 }
 0x18c   :  { %v4401_v6 = vadd.f32 %v1872_v55, %v1863_v61  ;;  %v1873_v8 = vmul.f32 %v1503_v60, %v1503_v60  ;;  %v1507_v9 = vadd.f32 %v1506_v3, %v1455_v63  ;;  %v1457_v11 = vpop.f32.mrf.mxu0 }
 0x18d   :  { %v1508_v12 = vpop.f32.mrf.mxu1 }
 0x18e   :  { %v1509_v14 = vadd.f32 %v1508_v12, %v1457_v11  ;;  %v4405_v7 = vadd.f32 %v1873_v8, %v1864_v62  ;;  %v1875_v16 = vmul.f32 %v1507_v9, %v1507_v9  ;;  %v1459_v17 = vpop.f32.mrf.mxu0 }
 0x18f   :  { %v1510_v0 = vpop.f32.mrf.mxu1 }
 0x190   :  { %v1876_v19 = vmul.f32 %v1509_v14, %v1509_v14  ;;  %v4409_v18 = vadd.f32 %v1875_v16, %v1866_v15  ;;  %v1460_v20 = vpop.f32.mrf.mxu0 }
 0x191   :  { %v1511_v21 = vpop.f32.mrf.mxu1 }
 0x192   :  { %v4411_v22 = vadd.f32 %v1876_v19, %v1867_v1 }
 0x193   :  { %v2793_v17 = vpop.eup %2792 }
 0x1c2   :  { %v1587_v23 = vpop.f32.mrf.mxu0 }
 0x1c3   :  { %v1638_v26 = vpop.f32.mrf.mxu1 }
 0x1c4   :  { %v1639_v32 = vadd.f32 %v1638_v26, %v1587_v23  ;;  %v1589_v33 = vpop.f32.mrf.mxu0  ;;  %v1896_v26 = vmul.f32 %v2793_v17, %v1886_v31 }
 0x1c5   :  { %v1640_v13 = vpop.f32.mrf.mxu1 }
 0x1c6   :  { %v4413_v34 = vadd.f32 %v1640_v13, %v1589_v33  ;;  %v1591_v58 = vpop.f32.mrf.mxu0  ;;  %v1958_v51 = vmul.f32 %v1639_v32, %v1639_v32  ;;  %v2795_v33 = vpop.eup %2794  ;;  %v1898_v13 = vsel %vm1897_vm0, %v1886_v31, %v1896_v26 }
 0x1c7   :  { %v1642_v35 = vpop.f32.mrf.mxu1 }
 0x1c8   :  { %v1643_v37 = vadd.f32 %v1642_v35, %v1591_v58  ;;  %v1593_v38 = vpop.f32.mrf.mxu0  ;;  %v1900_v58 = vand.u32 2147483648, %v1886_v31  ;;  %v1917_v35 = vmul.f32 %v2795_v33, %v4423_v44 }
 0x1c9   :  { %v1644_v39 = vpop.f32.mrf.mxu1 }
 0x1ca   :  { %v4415_v36 = vadd.f32 %v1644_v39, %v1593_v38  ;;  %v1597_v40 = vpop.f32.mrf.mxu0  ;;  %v1961_v9 = vmul.f32 %v1643_v37, %v1643_v37  ;;  %v2797_v37 = vpop.eup %2796  ;;  %v1901_v39 = vsel %vm1899_vm1, %v1900_v58, %v1898_v13 }
 0x1cb   :  { %v1648_v41 = vpop.f32.mrf.mxu1 }
 0x1cc   :  { %v1649_v42 = vadd.f32 %v1648_v41, %v1597_v40  ;;  %v1599_v2 = vpop.f32.mrf.mxu0 }
 0x1cd   :  { %v1650_v48 = vpop.f32.mrf.mxu1 }
 0x1ce   :  { %v4417_v28 = vadd.f32 %v1650_v48, %v1599_v2  ;;  %v1601_v24 = vpop.f32.mrf.mxu0  ;;  %v1964_v0 = vmul.f32 %v1649_v42, %v1649_v42  ;;  %v1919_v42 = vsel %vm1918_vm2, %v4423_v44, %v1917_v35  ;;  %v1938_v2 = vmul.f32 %v2797_v37, %v4429_v27 }
 0x1cf   :  { %v1652_v4 = vpop.f32.mrf.mxu1  ;;  %v1921_v24 = vand.u32 2147483648, %v4423_v44 }
 0x1d0   :  { %v1602_v5 = vpop.f32.mrf.mxu0 }
 0x1d1   :  { %v1653_v30 = vpop.f32.mrf.mxu1 }
 0x1d2   :  { %v1922_v30 = vsel %vm1920_vm5, %v1921_v24, %v1919_v42 }
 0x202   :  { %v1689_v25 = vpop.f32.mrf.mxu0 }
 0x203   :  { %v1740_v50 = vpop.f32.mrf.mxu1 }
 0x204   :  { %v4420_v52 = vadd.f32 %v1740_v50, %v1689_v25  ;;  %v1691_v45 = vpop.f32.mrf.mxu0  ;;  %v1940_v50 = vsel %vm1939_vm6, %v4429_v27, %v1938_v2 }
 0x205   :  { %v1742_v53 = vpop.f32.mrf.mxu1 }
 0x206   :  { %v1743_v47 = vadd.f32 %v1742_v53, %v1691_v45  ;;  %v1693_v46 = vpop.f32.mrf.mxu0  ;;  %v1942_v45 = vand.u32 2147483648, %v4429_v27  ;;  %v1888_v27 = vmax.f32 %v4393_v59, 1e-08 }
 0x207   :  { %v1744_v10 = vpop.f32.mrf.mxu1 }
 0x208   :  { %v1967_v56 = vmul.f32 %v1743_v47, %v1743_v47  ;;  %v4425_v57 = vadd.f32 %v1744_v10, %v1693_v46  ;;  %v1695_v54 = vpop.f32.mrf.mxu0  ;;  %v1943_v46 = vsel %vm1941_vm8, %v1942_v45, %v1940_v50  ;;  %vm1911_vm13 = vcmp.eq.f32.partialorder %v1888_v27, inf }
 0x209   :  { %v1746_v55 = vpop.f32.mrf.mxu1  ;;  %vm1913_vm0 = vcmp.eq.f32.partialorder %v1888_v27, 0.0 }
 0x20a   :  { %v1976_v60 = vadd.f32 %v1967_v56, %v1958_v51  ;;  %v1747_v61 = vadd.f32 %v1746_v55, %v1695_v54  ;;  %v1699_v43 = vpop.f32.mrf.mxu0  ;;  %v1887_v55 = vmax.f32 %v4391_v49, 1e-08 }
 0x20b   :  { %v1750_v63 = vpop.f32.mrf.mxu1 }
 0x20c   :  { %v1985_v3 = vmax.f32 %v1976_v60, 1e-08  ;;  %v1970_v62 = vmul.f32 %v1747_v61, %v1747_v61  ;;  %v4431_v8 = vadd.f32 %v1750_v63, %v1699_v43  ;;  %v1701_v11 = vpop.f32.mrf.mxu0  ;;  %v1890_v43 = vmax.f32 %v4401_v6, 1e-08 }
 0x20d   :  { %v1752_v12 = vpop.f32.mrf.mxu1  ;;  %vm1904_vm12 = vcmp.eq.f32.partialorder %v1887_v55, inf  ;;  %v1907_v58 = vand.u32 2147483648, %v1887_v55  ;;  %vm1906_vm15 = vcmp.eq.f32.partialorder %v1887_v55, 0.0 }
 0x20e   :  { %2798 = vrsqrt.f32 %v1985_v3  ;;  %v1979_v14 = vadd.f32 %v1970_v62, %v1961_v9  ;;  %v1753_v15 = vadd.f32 %v1752_v12, %v1701_v11  ;;  %v1703_v29 = vpop.f32.mrf.mxu0  ;;  %vm1996_vm3 = vcmp.eq.f32.partialorder %v1985_v3, inf }
 0x20f   :  { %v1754_v16 = vpop.f32.mrf.mxu1  ;;  %v1999_v41 = vand.u32 2147483648, %v1985_v3  ;;  %vm1998_vm4 = vcmp.eq.f32.partialorder %v1985_v3, 0.0  ;;  %v4466_v62 = vmax.f32 %v4405_v7, 1e-08  ;;  %vm1925_vm14 = vcmp.eq.f32.partialorder %v1890_v43, inf }
 0x210   :  { %v1988_v1 = vmax.f32 %v1979_v14, 1e-08  ;;  %v1973_v19 = vmul.f32 %v1753_v15, %v1753_v15  ;;  %v1704_v20 = vpop.f32.mrf.mxu0  ;;  %v4476_v14 = vmax.f32 %v4409_v18, 1e-08  ;;  %v4483_v16 = vmax.f32 %v4411_v22, 1e-08 }
 0x211   :  { %v1755_v21 = vpop.f32.mrf.mxu1  ;;  %vm1927_vm1 = vcmp.eq.f32.partialorder %v1890_v43, 0.0  ;;  %vm1932_vm2 = vcmp.eq.f32.partialorder %v4466_v62, inf }
 0x212   :  { %2800 = vrsqrt.f32 %v1988_v1  ;;  %v1982_v23 = vadd.f32 %v1973_v19, %v1964_v0  ;;  %vm2017_vm7 = vcmp.eq.f32.partialorder %v1988_v1, inf  ;;  %v2020_v53 = vand.u32 2147483648, %v1988_v1 }
 0x213   :  { %vm2019_vm9 = vcmp.eq.f32.partialorder %v1988_v1, 0.0  ;;  %vm1948_vm5 = vcmp.eq.f32.partialorder %v4476_v14, 0.0  ;;  %vm1953_vm6 = vcmp.eq.f32.partialorder %v4483_v16, inf }
 0x214   :  { %v1991_v32 = vmax.f32 %v1982_v23, 1e-08 }
 0x216   :  { %2802 = vrsqrt.f32 %v1991_v32  ;;  %vm2038_vm10 = vcmp.eq.f32.partialorder %v1991_v32, inf  ;;  %v2041_v54 = vand.u32 2147483648, %v1991_v32  ;;  %vm2040_vm11 = vcmp.eq.f32.partialorder %v1991_v32, 0.0 }
 0x217   :  { %2804 = vlog2.f32 %v1901_v39 }
 0x21b   :  { %v2799_v38 = vpop.eup %2798 }
 0x21c   :  { %v1995_v40 = vmul.f32 %v2799_v38, %v1985_v3  ;;  %v1914_v38 = vand.u32 2147483648, %v1888_v27 }
 0x21e   :  { %v1997_v48 = vsel %vm1996_vm3, %v1985_v3, %v1995_v40  ;;  %vm1934_vm3 = vcmp.eq.f32.partialorder %v4466_v62, 0.0 }
 0x21f   :  { %v4440_v4 = vsel %vm1998_vm4, %v1999_v41, %v1997_v48  ;;  %v2801_v5 = vpop.eup %2800  ;;  %v1928_v41 = vand.u32 2147483648, %v1890_v43  ;;  %vm1946_vm4 = vcmp.eq.f32.partialorder %v4476_v14, inf }
 0x220   :  { %v4444_v31 = vsub.f32 %v4440_v4, %v1901_v39  ;;  %2806 = vlog2.f32 %v4440_v4  ;;  %v2016_v25 = vmul.f32 %v2801_v5, %v1988_v1 }
 0x221   :  { %2808 = vlog2.f32 %v1922_v30 }
 0x222   :  { %v2018_v44 = vsel %vm2017_vm7, %v1988_v1, %v2016_v25  ;;  %vm1955_vm7 = vcmp.eq.f32.partialorder %v4483_v16, 0.0 }
 0x223   :  { %v2803_v47 = vpop.eup %2802  ;;  %v4450_v10 = vsel %vm2019_vm9, %v2020_v53, %v2018_v44  ;;  %v1935_v53 = vand.u32 2147483648, %v4466_v62 }
 0x224   :  { %v2037_v51 = vmul.f32 %v2803_v47, %v1991_v32  ;;  %v4453_v56 = vsub.f32 %v4450_v10, %v1922_v30  ;;  %2810 = vlog2.f32 %v4450_v10  ;;  %v2805_v3 = vpop.eup %2804  ;;  %v1959_v47 = vmul.f32 %v4413_v34, %v4413_v34 }
 0x225   :  { %2812 = vlog2.f32 %v1943_v46  ;;  %v4468_v9 = vmul.f32 0.6931472, %v2805_v3 }
 0x226   :  { %v2039_v60 = vsel %vm2038_vm10, %v1991_v32, %v2037_v51 }
 0x227   :  { %v4458_v61 = vsel %vm2040_vm11, %v2041_v54, %v2039_v60 }
 0x228   :  { %v4462_v63 = vsub.f32 %v4458_v61, %v1943_v46  ;;  %2814 = vlog2.f32 %v4458_v61 }
 0x229   :  { %2816 = vrsqrt.f32 %v1887_v55 }
 0x22a   :  { %2818 = vrsqrt.f32 %v1888_v27 }
 0x22b   :  { %2820 = vrsqrt.f32 %v1890_v43 }
 0x22c   :  { %2822 = vrsqrt.f32 %v4466_v62 }
 0x22d   :  { %v2807_v49 = vpop.eup %2806  ;;  %2824 = vrsqrt.f32 %v4476_v14 }
 0x22e   :  { %v4470_v59 = vmul.f32 0.6931472, %v2807_v49  ;;  %v2809_v11 = vpop.eup %2808  ;;  %2826 = vrsqrt.f32 %v4483_v16 }
 0x22f   :  { %v4478_v15 = vmul.f32 0.6931472, %v2809_v11 }
 0x230   :  { %v2159_v6 = vsub.f32 %v4468_v9, %v4470_v59 }
 0x231   :  { %v2811_v12 = vpop.eup %2810 }
 0x232   :  { %v4480_v7 = vmul.f32 0.6931472, %v2811_v12  ;;  %v2813_v29 = vpop.eup %2812 }
 0x233   :  { %v4488_v1 = vmul.f32 0.6931472, %v2813_v29 }
 0x234   :  { %v2162_v17 = vsub.f32 %v4478_v15, %v4480_v7 }
 0x235   :  { %v2815_v0 = vpop.eup %2814 }
 0x236   :  { %v4490_v19 = vmul.f32 0.6931472, %v2815_v0  ;;  %v2817_v18 = vpop.eup %2816 }
 0x237   :  { %v2819_v20 = vpop.eup %2818  ;;  %v1903_v22 = vmul.f32 %v2817_v18, %v1887_v55 }
 0x238   :  { %v2165_v21 = vsub.f32 %v4488_v1, %v4490_v19  ;;  %v2821_v23 = vpop.eup %2820  ;;  %v1910_v26 = vmul.f32 %v2819_v20, %v1888_v27 }
 0x239   :  { %v2823_v32 = vpop.eup %2822  ;;  %v1924_v33 = vmul.f32 %v2821_v23, %v1890_v43  ;;  %v1905_v13 = vsel %vm1904_vm12, %v1887_v55, %v1903_v22  ;;  %v1962_v23 = vmul.f32 %v4415_v36, %v4415_v36 }
 0x23a   :  { %v1912_v35 = vsel %vm1911_vm13, %v1888_v27, %v1910_v26  ;;  %v1931_v37 = vmul.f32 %v2823_v32, %v4466_v62  ;;  %v4496_v40 = vsel %vm1906_vm15, %v1907_v58, %v1905_v13  ;;  %v2825_v24 = vpop.eup %2824  ;;  %v1949_v32 = vand.u32 2147483648, %v4476_v14 }
 0x23b   :  { %v1926_v39 = vsel %vm1925_vm14, %v1890_v43, %v1924_v33  ;;  %v4498_v48 = vsel %vm1913_vm0, %v1914_v38, %v1912_v35  ;;  %2828 = vlog2.f32 %v4496_v40  ;;  %v2827_v44 = vpop.eup %2826  ;;  %v1945_v27 = vmul.f32 %v2825_v24, %v4476_v14 }
 0x23c   :  { %v4501_v30 = vsel %vm1927_vm1, %v1928_v41, %v1926_v39  ;;  %v1933_v25 = vsel %vm1932_vm2, %v4466_v62, %v1931_v37  ;;  %2830 = vlog2.f32 %v4498_v48  ;;  %v1960_v43 = vmul.f32 %v4420_v52, %v4420_v52 }
 0x23d   :  { %v4510_v60 = vsel %vm1934_vm3, %v1935_v53, %v1933_v25  ;;  %2832 = vlog2.f32 %v4501_v30  ;;  %v1952_v12 = vmul.f32 %v2827_v44, %v4483_v16  ;;  %v1947_v52 = vsel %vm1946_vm4, %v4476_v14, %v1945_v27 }
 0x23e   :  { %2834 = vlog2.f32 %v4510_v60  ;;  %v1956_v33 = vand.u32 2147483648, %v4483_v16  ;;  %v1963_v39 = vmul.f32 %v4425_v57, %v4425_v57  ;;  %v1965_v14 = vmul.f32 %v4417_v28, %v4417_v28 }
 0x23f   :  { %vm2105_vm4 = vcmask 1041408  }
 0x242   :  { %v1791_v42 = vpop.f32.mrf.mxu0 }
 0x243   :  { %v1842_v2 = vpop.f32.mrf.mxu1 }
 0x244   :  { %v1843_v5 = vadd.f32 %v1842_v2, %v1791_v42  ;;  %v1793_v50 = vpop.f32.mrf.mxu0  ;;  %v4533_v42 = vsel %vm1948_vm5, %v1949_v32, %v1947_v52  ;;  %v1954_v2 = vsel %vm1953_vm6, %v4483_v16, %v1952_v12  ;;  %v4579_v52 = vmul.f32 %v4462_v63, %v4462_v63 }
 0x245   :  { %v1844_v45 = vpop.f32.mrf.mxu1  ;;  %v4547_v27 = vsel %vm1955_vm7, %v1956_v33, %v1954_v2  ;;  %v2097_v32 = vand.u32 2147483647, %v4462_v63  ;;  %v4584_v33 = vmul.f32 %v4450_v10, %v4450_v10 }
 0x246   :  { %v1968_v46 = vmul.f32 %v1843_v5, %v1843_v5  ;;  %v1845_v51 = vadd.f32 %v1844_v45, %v1793_v50  ;;  %v1795_v54 = vpop.f32.mrf.mxu0  ;;  %v2066_v50 = vlaneseq  ;;  %v1966_v45 = vmul.f32 %v4431_v8, %v4431_v8 }
 0x247   :  { %v1846_v55 = vpop.f32.mrf.mxu1 }
 0x248   :  { %v1977_v3 = vadd.f32 %v1968_v46, %v1959_v47  ;;  %v1969_v62 = vmul.f32 %v1845_v51, %v1845_v51  ;;  %v1847_v49 = vadd.f32 %v1846_v55, %v1795_v54  ;;  %v1797_v11 = vpop.f32.mrf.mxu0  ;;  %v2829_v28 = vpop.eup %2828 }
 0x249   :  { %v1848_v34 = vpop.f32.mrf.mxu1  ;;  %v4558_v16 = vmul.f32 0.6931472, %v2829_v28 }
 0x24a   :  { %v4518_v29 = vmax.f32 %v1977_v3, 1e-08  ;;  %v1978_v0 = vadd.f32 %v1969_v62, %v1960_v43  ;;  %v1971_v18 = vmul.f32 %v1847_v49, %v1847_v49  ;;  %v1849_v20 = vadd.f32 %v1848_v34, %v1797_v11  ;;  %v1801_v22 = vpop.f32.mrf.mxu0  ;;  %v2831_v43 = vpop.eup %2830 }
 0x24b   :  { %v1852_v26 = vpop.f32.mrf.mxu1  ;;  %v2833_v8 = vpop.eup %2832  ;;  %v2067_v49 = vand.u32 127, %v2066_v50  ;;  %v4560_v11 = vmul.f32 0.6931472, %v2831_v43 }
 0x24c   :  { %2836 = vrsqrt.f32 %v4518_v29  ;;  %v4529_v13 = vmax.f32 %v1978_v0, 1e-08  ;;  %v1980_v58 = vadd.f32 %v1971_v18, %v1962_v23  ;;  %v1972_v36 = vmul.f32 %v1849_v20, %v1849_v20  ;;  %v1803_v37 = vpop.f32.mrf.mxu0  ;;  %v4564_v12 = vpop.eup %2834 }
 0x24d   :  { %v1853_v35 = vadd.f32 %v1852_v26, %v1801_v22  ;;  %v1854_v38 = vpop.f32.mrf.mxu1  ;;  %v4562_v34 = vmul.f32 0.6931472, %v2833_v8  ;;  %v2199_v0 = vmul.f32 %v4444_v31, %v4444_v31  ;;  %v2091_v18 = vand.u32 2147483647, %v4444_v31 }
 0x24e   :  { %v1855_v41 = vadd.f32 %v1854_v38, %v1803_v37  ;;  %2838 = vrsqrt.f32 %v4529_v13  ;;  %v4539_v24 = vmax.f32 %v1980_v58, 1e-08  ;;  %v1805_v5 = vpop.f32.mrf.mxu0  ;;  %v1981_v53 = vadd.f32 %v1972_v36, %v1963_v39 }
 0x24f   :  { %v1856_v25 = vpop.f32.mrf.mxu1  ;;  %v1974_v57 = vmul.f32 %v1853_v35, %v1853_v35  ;;  %v4569_v20 = vadd.s32 256, %v2067_v49  ;;  %v2073_v23 = vmul.f32 %v4440_v4, %v4440_v4  ;;  %v4575_v26 = vmul.f32 %v4453_v56, %v4453_v56 }
 0x250   :  { %v1975_v44 = vmul.f32 %v1855_v41, %v1855_v41  ;;  %2840 = vrsqrt.f32 %v4539_v24  ;;  %v1806_v47 = vpop.f32.mrf.mxu0  ;;  %v4545_v51 = vmax.f32 %v1981_v53, 1e-08  ;;  %vm2003_vm8 = vcmp.eq.f32.partialorder %v4518_v29, inf }
 0x251   :  { %v1857_v46 = vpop.f32.mrf.mxu1  ;;  %v1983_v54 = vadd.f32 %v1974_v57, %v1965_v14  ;;  %2842 = vlog2.f32 %v4533_v42  ;;  %vm2005_vm9 = vcmp.eq.f32.partialorder %v4518_v29, 0.0  ;;  %v2006_v4 = vand.u32 2147483648, %v4518_v29 }
 0x252   :  { %v1984_v55 = vadd.f32 %v1975_v44, %v1966_v45  ;;  %2844 = vrsqrt.f32 %v4545_v51  ;;  %vm2010_vm10 = vcmp.eq.f32.partialorder %v4529_v13, inf  ;;  %v2013_v58 = vand.u32 2147483648, %v4529_v13 }
 0x253   :  { %v4551_v3 = vmax.f32 %v1983_v54, 1e-08  ;;  %2846 = vlog2.f32 %v4547_v27  ;;  %vm2012_vm11 = vcmp.eq.f32.partialorder %v4529_v13, 0.0  ;;  %vm2024_vm12 = vcmp.eq.f32.partialorder %v4539_v24, inf }
 0x254   :  { %v4553_v62 = vmax.f32 %v1984_v55, 1e-08  ;;  %vm2026_vm13 = vcmp.eq.f32.partialorder %v4539_v24, 0.0  ;;  %v2027_v35 = vand.u32 2147483648, %v4539_v24  ;;  %vm2031_vm14 = vcmp.eq.f32.partialorder %v4545_v51, inf }
 0x255   :  { %2848 = vrsqrt.f32 %v4551_v3  ;;  %vm2033_vm15 = vcmp.eq.f32.partialorder %v4545_v51, 0.0  ;;  %v2034_v39 = vand.u32 2147483648, %v4545_v51  ;;  %vm2045_vm0 = vcmp.eq.f32.partialorder %v4551_v3, inf }
 0x256   :  { %2850 = vrsqrt.f32 %v4553_v62  ;;  %vm2047_vm1 = vcmp.eq.f32.partialorder %v4551_v3, 0.0  ;;  %v2048_v25 = vand.u32 2147483648, %v4551_v3  ;;  %vm2072_vm2 = vcmp.lt.s32.totalorder %v4569_v20, 257 }
 0x257   :  { %vm2052_vm3 = vcmp.eq.f32.partialorder %v4553_v62, inf  ;;  %vm2054_vm5 = vcmp.eq.f32.partialorder %v4553_v62, 0.0 }
 0x259   :  { %v2837_v22 = vpop.eup %2836 }
 0x25a   :  { %v2002_v31 = vmul.f32 %v2837_v22, %v4518_v29 }
 0x25b   :  { %v2839_v36 = vpop.eup %2838 }
 0x25c   :  { %v2004_v10 = vsel %vm2003_vm8, %v4518_v29, %v2002_v31  ;;  %v2009_v37 = vmul.f32 %v2839_v36, %v4529_v13 }
 0x25d   :  { %v2007_v38 = vsel %vm2005_vm9, %v2006_v4, %v2004_v10  ;;  %v2841_v41 = vpop.eup %2840 }
 0x25e   :  { %v2058_v29 = vsub.f32 %v2007_v38, %v4496_v40  ;;  %v2074_v2 = vmul.f32 %v2007_v38, %v2007_v38  ;;  %v2011_v14 = vsel %vm2010_vm10, %v4529_v13, %v2009_v37  ;;  %v2023_v5 = vmul.f32 %v2841_v41, %v4539_v24  ;;  %v4609_v50 = vpop.eup %2842 }
 0x25f   :  { %2852 = vlog2.f32 %v2007_v38  ;;  %v2014_v45 = vsel %vm2012_vm11, %v2013_v58, %v2011_v14  ;;  %v2845_v44 = vpop.eup %2844 }
 0x260   :  { %v2200_v53 = vmul.f32 %v2058_v29, %v2058_v29  ;;  %v2092_v57 = vand.u32 2147483647, %v2058_v29  ;;  %v4614_v40 = vadd.f32 %v2074_v2, %v2073_v23  ;;  %v2025_v47 = vsel %vm2024_vm12, %v4539_v24, %v2023_v5  ;;  %v4621_v28 = vpop.eup %2846 }
 0x261   :  { %v2059_v46 = vsub.f32 %v2014_v45, %v4498_v48  ;;  %2854 = vlog2.f32 %v2014_v45  ;;  %v2028_v13 = vsel %vm2026_vm13, %v2027_v35, %v2025_v47  ;;  %v2030_v54 = vmul.f32 %v2845_v44, %v4545_v51 }
 0x262   :  { %v2208_v55 = vadd.f32 %v2200_v53, %v2199_v0  ;;  %v2100_v43 = vadd.f32 %v2092_v57, %v2091_v18  ;;  %v2849_v8 = vpop.eup %2848  ;;  %v2061_v49 = vsub.f32 %v2028_v13, %v4501_v30  ;;  %2856 = vlog2.f32 %v2028_v13 }
 0x263   :  { %v2201_v23 = vmul.f32 %v2059_v46, %v2059_v46  ;;  %v2093_v22 = vand.u32 2147483647, %v2059_v46  ;;  %v2851_v31 = vpop.eup %2850  ;;  %v2032_v48 = vsel %vm2031_vm14, %v4545_v51, %v2030_v54  ;;  %v2044_v4 = vmul.f32 %v2849_v8, %v4551_v3 }
 0x264   :  { %v2055_v24 = vand.u32 2147483648, %v4553_v62  ;;  %v2035_v0 = vsel %vm2033_vm15, %v2034_v39, %v2032_v48  ;;  %v2051_v18 = vmul.f32 %v2851_v31, %v4553_v62  ;;  %v2075_v58 = vmul.f32 %v2014_v45, %v2014_v45 }
 0x265   :  { %v2209_v30 = vadd.f32 %v2208_v55, %v2201_v23  ;;  %v2046_v36 = vsel %vm2045_vm0, %v4551_v3, %v2044_v4  ;;  %v2062_v10 = vsub.f32 %v2035_v0, %v4510_v60  ;;  %2858 = vlog2.f32 %v2035_v0 }
 0x266   :  { %v2203_v35 = vmul.f32 %v2061_v49, %v2061_v49  ;;  %v2049_v37 = vsel %vm2047_vm1, %v2048_v25, %v2046_v36  ;;  %v2053_v51 = vsel %vm2052_vm3, %v4553_v62, %v2051_v18  ;;  %v2101_v39 = vadd.f32 %v2100_v43, %v2093_v22 }
 0x267   :  { %v2210_v38 = vadd.f32 %v2209_v30, %v4575_v26  ;;  %v2056_v41 = vsel %vm2054_vm5, %v2055_v24, %v2053_v51  ;;  %v2064_v29 = vsub.f32 %v2049_v37, %v4533_v42  ;;  %2860 = vlog2.f32 %v2049_v37 }
 0x268   :  { %v2094_v2 = vand.u32 2147483647, %v4453_v56  ;;  %v2065_v60 = vsub.f32 %v2056_v41, %v4547_v27  ;;  %2862 = vlog2.f32 %v2056_v41  ;;  %v2204_v14 = vmul.f32 %v2062_v10, %v2062_v10 }
 0x269   :  { %v2211_v5 = vadd.f32 %v2210_v38, %v2203_v35  ;;  %v2206_v3 = vmul.f32 %v2064_v29, %v2064_v29  ;;  %v2095_v25 = vand.u32 2147483647, %v2061_v49  ;;  %v2079_v62 = vmul.f32 %v4458_v61, %v4458_v61 }
 0x26a   :  { %v2102_v45 = vadd.f32 %v2101_v39, %v2094_v2  ;;  %v2213_v26 = vsel %vm2105_vm4, %v4579_v52, 0.0  ;;  %v2106_v42 = vsel %vm2105_vm4, %v2097_v32, 0.0  ;;  %v2084_v56 = vsel %vm2072_vm2, %v2075_v58, 0.0 }
 0x26b   :  { %v2212_v53 = vadd.f32 %v2211_v5, %v2204_v14  ;;  %v2207_v57 = vmul.f32 %v2065_v60, %v2065_v60  ;;  %v2096_v44 = vand.u32 2147483647, %v2062_v10  ;;  %v2098_v47 = vand.u32 2147483647, %v2064_v29 }
 0x26c   :  { %v2853_v27 = vpop.eup %2852  ;;  %v2103_v46 = vadd.f32 %v2102_v45, %v2095_v25  ;;  %v2077_v55 = vmul.f32 %v2028_v13, %v2028_v13  ;;  %v2078_v43 = vmul.f32 %v2035_v0, %v2035_v0  ;;  %v2168_v61 = vand.u32 2147483647, %v2159_v6 }
 0x26d   :  { %v2214_v54 = vadd.f32 %v2213_v26, %v2212_v53  ;;  %v2215_v63 = vsel %vm2105_vm4, %v2206_v3, 0.0  ;;  %v2099_v8 = vand.u32 2147483647, %v2065_v60  ;;  %v2231_v49 = vadd.f32 %v4614_v40, %v2084_v56 }
 0x26e   :  { %v2855_v52 = vpop.eup %2854  ;;  %v2104_v32 = vadd.f32 %v2103_v46, %v2096_v44  ;;  %v2080_v22 = vmul.f32 %v2049_v37, %v2049_v37  ;;  %v2144_v31 = vmul.f32 0.6931472, %v2853_v27  ;;  %v2217_v24 = vsel %vm2105_vm4, %v2207_v57, 0.0 }
 0x26f   :  { %v2216_v23 = vadd.f32 %v2215_v63, %v2214_v54  ;;  %v2146_v48 = vmul.f32 0.6931472, %v2855_v52  ;;  %v2857_v4 = vpop.eup %2856  ;;  %v2108_v0 = vsel %vm2105_vm4, %v2098_v47, 0.0  ;;  %v2232_v9 = vadd.f32 %v2231_v49, %v4584_v33 }
 0x270   :  { %v2107_v13 = vadd.f32 %v2106_v42, %v2104_v32  ;;  %v2150_v6 = vmul.f32 0.6931472, %v2857_v4  ;;  %v2160_v18 = vsub.f32 %v4558_v16, %v2144_v31  ;;  %v2110_v40 = vsel %vm2105_vm4, %v2099_v8, 0.0 }
 0x271   :  { %v2218_v59 = vadd.f32 %v2217_v24, %v2216_v23  ;;  %v2161_v30 = vsub.f32 %v4560_v11, %v2146_v48  ;;  %v2081_v36 = vmul.f32 %v2056_v41, %v2056_v41  ;;  %v2233_v10 = vadd.f32 %v2232_v9, %v2077_v55 }
 0x272   :  { %v2109_v58 = vadd.f32 %v2108_v0, %v2107_v13  ;;  %v2859_v35 = vpop.eup %2858  ;;  %v2087_v37 = vsel %vm2072_vm2, %v2078_v43, 0.0  ;;  %v2163_v51 = vsub.f32 %v4562_v34, %v2150_v6  ;;  %v2169_v38 = vand.u32 2147483647, %v2160_v18 }
 0x273   :  { %2219 = vadd.xlane.f32.xlu1 %v2218_v59  ;;  %v2170_v33 = vand.u32 2147483647, %v2161_v30  ;;  %v2234_v29 = vadd.f32 %v2233_v10, %v2087_v37  ;;  %v2134_v16 = vmul.f32 0.6931472, %v4564_v12  ;;  %v2152_v2 = vmul.f32 0.6931472, %v2859_v35 }
 0x274   :  { %v2111_v39 = vadd.f32 %v2110_v40, %v2109_v58  ;;  %v2861_v11 = vpop.eup %2860  ;;  %v2235_v60 = vsel %vm2105_vm4, %v2079_v62, 0.0  ;;  %v2138_v41 = vmul.f32 0.6931472, %v4609_v50  ;;  %v2140_v14 = vmul.f32 0.6931472, %v4621_v28 }
 0x275   :  { %v2177_v5 = vadd.f32 %v2169_v38, %v2168_v61  ;;  %v2863_v3 = vpop.eup %2862  ;;  %v2090_v34 = vsel %vm2072_vm2, %v2081_v36, 0.0  ;;  %v2236_v25 = vadd.f32 %v2235_v60, %v2234_v29  ;;  %v2156_v45 = vmul.f32 0.6931472, %v2861_v11 }
 0x276   :  { %2112 = vadd.xlane.f32.xlu0 %v2111_v39  ;;  %v2164_v53 = vsub.f32 %v2134_v16, %v2152_v2  ;;  %v2237_v26 = vsel %vm2105_vm4, %v2080_v22, 0.0  ;;  %v2158_v12 = vmul.f32 0.6931472, %v2863_v3  ;;  %v2171_v62 = vand.u32 2147483647, %v2162_v17 }
 0x277   :  { %v2178_v42 = vadd.f32 %v2177_v5, %v2170_v33  ;;  %v2238_v50 = vadd.f32 %v2237_v26, %v2236_v25  ;;  %v2166_v56 = vsub.f32 %v2138_v41, %v2156_v45  ;;  %v2239_v28 = vsel %vm2105_vm4, %v2090_v34, 0.0 }
 0x278   :  { %v2167_v27 = vsub.f32 %v2140_v14, %v2158_v12  ;;  %v2172_v57 = vand.u32 2147483647, %v2163_v51  ;;  %v2174_v47 = vand.u32 2147483647, %v2165_v21  ;;  %v2173_v46 = vand.u32 2147483647, %v2164_v53 }
 0x279   :  { %v2179_v44 = vadd.f32 %v2178_v42, %v2171_v62  ;;  %v2240_v20 = vadd.f32 %v2239_v28, %v2238_v50  ;;  %v2175_v55 = vand.u32 2147483647, %v2166_v56 }
 0x27a   :  { %v2176_v15 = vand.u32 2147483647, %v2167_v27  ;;  %v2182_v7 = vsel %vm2105_vm4, %v2174_v47, 0.0 }
 0x27b   :  { %v2180_v54 = vadd.f32 %v2179_v44, %v2172_v57  ;;  %2241 = vadd.xlane.f32.xlu1 %v2240_v20  ;;  %v2184_v61 = vsel %vm2105_vm4, %v2175_v55, 0.0 }
 0x27c   :  { %v2186_v63 = vsel %vm2105_vm4, %v2176_v15, 0.0 }
 0x27d   :  { %v2181_v43 = vadd.f32 %v2180_v54, %v2173_v46 }
 0x27f   :  { %v2183_v17 = vadd.f32 %v2182_v7, %v2181_v43 }
 0x281   :  { %v2185_v52 = vadd.f32 %v2184_v61, %v2183_v17 }
 0x283   :  { %v2187_v8 = vadd.f32 %v2186_v63, %v2185_v52 }
 0x285   :  { %2188 = vadd.xlane.f32.xlu0 %v2187_v8 }
 0x2fc   :  { %v2220_v32 = vpop.xlane.xlu1 %2219 }
 0x2fd   :  { %v2221_v22 = vrot.slane %v2220_v32, 4 }
 0x2ff   :  { %v2113_v49 = vpop.xlane.xlu0 %2112  ;;  %v2222_v24 = vadd.f32 %v2221_v22, %v2220_v32 }
 0x300   :  { %v2114_v1 = vrot.slane %v2113_v49, 4 }
 0x301   :  { %v2223_v9 = vrot.slane %v2222_v24, 2 }
 0x302   :  { %v2115_v19 = vadd.f32 %v2114_v1, %v2113_v49 }
 0x303   :  { %v2224_v58 = vadd.f32 %v2223_v9, %v2222_v24 }
 0x304   :  { %v2116_v21 = vrot.slane %v2115_v19, 2  ;;  %v2242_v23 = vpop.xlane.xlu1 %2241 }
 0x305   :  { %v2243_v48 = vrot.slane %v2242_v23, 4  ;;  %v2225_v35 = vrot.slane %v2224_v58, 1 }
 0x306   :  { %v2117_v31 = vadd.f32 %v2116_v21, %v2115_v19 }
 0x307   :  { %v2244_v0 = vadd.f32 %v2243_v48, %v2242_v23  ;;  %v2226_v33 = vadd.f32 %v2225_v35, %v2224_v58 }
 0x308   :  { %v2118_v4 = vrot.slane %v2117_v31, 1 }
 0x309   :  { %v2245_v6 = vrot.slane %v2244_v0, 2 }
 0x30a   :  { %v2119_v13 = vadd.f32 %v2118_v4, %v2117_v31 }
 0x30b   :  { %v2246_v40 = vadd.f32 %v2245_v6, %v2244_v0 }
 0x30c   :  { %2475 = vpush %v2119_v13 }
 0x30d   :  { %v2247_v51 = vrot.slane %v2246_v40, 1 }
 0x30e   :  { %v2189_v59 = vpop.xlane.xlu0 %2188 }
 0x30f   :  { %v2190_v18 = vrot.slane %v2189_v59, 4  ;;  %v2248_v39 = vadd.f32 %v2247_v51, %v2246_v40 }
 0x311   :  { %v2191_v30 = vadd.f32 %v2190_v18, %v2189_v59 }
 0x313   :  { %v2192_v36 = vrot.slane %v2191_v30, 2 }
 0x315   :  { %v2193_v10 = vadd.f32 %v2192_v36, %v2191_v30 }
 0x317   :  { %v2194_v37 = vrot.slane %v2193_v10, 1 }
 0x319   :  { %v2195_v38 = vadd.f32 %v2194_v37, %v2193_v10 }
 0x31b   :  { %2477 = vpush %v2195_v38 }
 0x31c   :  { %2479 = vpush %v2226_v33 }
 0x31d   :  { %2481 = vpush %v2248_v39 }
 0x33d   :  { %s2476_s1 = spop %2475 }
 0x33e   :  { %2122 = sst [smem:[#allocation2]] %s2476_s1 }
 0x34c   :  { %s2478_s20 = spop %2477 }
 0x34d   :  { %2198 = sst [smem:[#allocation2 + $0x1]] %s2478_s20  ;;  %s2480_s21 = spop %2479 }
 0x34e   :  { %2229 = sst [smem:[#allocation2 + $0x2]] %s2480_s21  ;;  %s2482_s22 = spop %2481 }
 0x34f   :  { %2251 = sst [smem:[#allocation2 + $0x3]] %s2482_s22 }
 0x350   :  { %2923 = shalt.err (!%p2920_p4)
}
 0x351   :  { %s2926_s24 = smov [#allocation2]  }
 0x352   :  { %2261 = dma.smem_to_vmem %s2926_s24, 16, %s2259_s19, [#allocation3]  }
 0x353   :  { %2924 = dma.done.wait [#allocation3], 16  }
 0x354   :  { %2925 = vsyncadd [#allocation3], 4294967280 }
 0x355   :  { %2265 = sfence }
 0x356   :  { %2266 = vsyncpa [#allocation3], 1 }

// kernel: criterion_forward.7
= control target key start
LH: loop header
LB: loop body
LE: loop exit
PB: predicated region body
PF: predicated region fallthrough
CT: control target
= control target key end

     0   :  { %vm666_vm0 = vcmask 1041408   ;;  %vm676_vm1 = vcmask 7168   ;;  %vm679_vm2 = vcmask 1024   ;;  %s1418_s2 = inlined_call_operand.vmem [shape: bf16[256,512], index: 2, kind: input, shape index: {}]   ;;  %s1419_s0 = inlined_call_operand.vmem [shape: bf16[18,256], index: 0, kind: input, shape index: {}]   ;;  %s1420_s1 = inlined_call_operand.vmem [shape: bf16[18,256], index: 1, kind: input, shape index: {}]   ;;  %s1421_s3 = inlined_call_operand.vmem [shape: f32[18,1], index: 3, kind: output, shape index: {0}]   ;;  %s1422_s4 = inlined_call_operand.vmem [shape: f32[18,1], index: 4, kind: output, shape index: {1}]  }
   0x1   :  { %v929_v0 = vld [vmem:[%s1418_s2 + $0xe4] ss:$16 sps:$4 sm:$0xff]   ;;  %v934_v1 = vld [vmem:[%s1418_s2 + $0xec] ss:$16 sps:$4 sm:$0xff]   ;;  %v940_v2 = vld [vmem:[%s1418_s2 + $0xe0] ss:$16 sps:$4 sm:$0xff]  }
   0x2   :  { %420 = vmatprep.subr.bf16.mxu0 %v929_v0  ;;  %v945_v3 = vld [vmem:[%s1418_s2 + $0xe8] ss:$16 sps:$4 sm:$0xff]   ;;  %471 = vmatprep.subr.bf16.mxu1 %v934_v1  ;;  %v951_v4 = vld [vmem:[%s1418_s2 + $0xc4] ss:$16 sps:$4 sm:$0xff]   ;;  %v958_v5 = vld [vmem:[%s1418_s2 + $0xcc] ss:$16 sps:$4 sm:$0xff]  }
   0x3   :  { %421 = vmatpush1.bf16.msra.mxu0 %v940_v2  ;;  %472 = vmatpush1.bf16.msra.mxu1 %v945_v3  ;;  %v963_v6 = vld [vmem:[%s1418_s2 + $0xc0] ss:$16 sps:$4 sm:$0xff]   ;;  %v969_v7 = vld [vmem:[%s1418_s2 + $0xc8] ss:$16 sps:$4 sm:$0xff]   ;;  %v975_v8 = vld [vmem:[%s1418_s2 + $0xa4] ss:$16 sps:$4 sm:$0xff]  }
   0x4   :  { %422 = vmatprep.subr.bf16.mxu0 %v951_v4  ;;  %473 = vmatprep.subr.bf16.mxu1 %v958_v5  ;;  %v980_v9 = vld [vmem:[%s1418_s2 + $0xac] ss:$16 sps:$4 sm:$0xff]   ;;  %v985_v10 = vld [vmem:[%s1418_s2 + $0xa0] ss:$16 sps:$4 sm:$0xff]   ;;  %v990_v11 = vld [vmem:[%s1418_s2 + $0xa8] ss:$16 sps:$4 sm:$0xff]  }
   0x5   :  { %v997_v12 = vld [vmem:[%s1418_s2 + $0x84] ss:$16 sps:$4 sm:$0xff]   ;;  %v1004_v13 = vld [vmem:[%s1418_s2 + $0x8c] ss:$16 sps:$4 sm:$0xff]   ;;  %v1009_v14 = vld [vmem:[%s1418_s2 + $0x80] ss:$16 sps:$4 sm:$0xff]  }
   0x6   :  { %v1016_v15 = vld [vmem:[%s1418_s2 + $0x88] ss:$16 sps:$4 sm:$0xff]   ;;  %v1021_v16 = vld [vmem:[%s1418_s2 + $0x64] ss:$16 sps:$4 sm:$0xff]   ;;  %v1028_v17 = vld [vmem:[%s1418_s2 + $0x6c] ss:$16 sps:$4 sm:$0xff]  }
   0x7   :  { %423 = vmatpush1.bf16.msra.mxu0 %v963_v6  ;;  %474 = vmatpush1.bf16.msra.mxu1 %v969_v7  ;;  %v1033_v18 = vld [vmem:[%s1418_s2 + $0x60] ss:$16 sps:$4 sm:$0xff]   ;;  %v1038_v19 = vld [vmem:[%s1418_s2 + $0x68] ss:$16 sps:$4 sm:$0xff]   ;;  %v1045_v20 = vld [vmem:[%s1418_s2 + $0x44] ss:$16 sps:$4 sm:$0xff]  }
   0x8   :  { %424 = vmatprep.subr.bf16.mxu0 %v975_v8  ;;  %475 = vmatprep.subr.bf16.mxu1 %v980_v9  ;;  %v1052_v21 = vld [vmem:[%s1418_s2 + $0x4c] ss:$16 sps:$4 sm:$0xff]   ;;  %v1057_v22 = vld [vmem:[%s1418_s2 + $0x40] ss:$16 sps:$4 sm:$0xff]   ;;  %v1064_v23 = vld [vmem:[%s1418_s2 + $0x48] ss:$16 sps:$4 sm:$0xff]  }
   0x9   :  { %v1069_v24 = vld [vmem:[%s1418_s2 + $0x24] ss:$16 sps:$4 sm:$0xff]   ;;  %v1076_v25 = vld [vmem:[%s1418_s2 + $0x2c] ss:$16 sps:$4 sm:$0xff]   ;;  %v1081_v26 = vld [vmem:[%s1418_s2 + $0x20] ss:$16 sps:$4 sm:$0xff]  }
   0xa   :  { %v1086_v27 = vld [vmem:[%s1418_s2 + $0x28] ss:$16 sps:$4 sm:$0xff]   ;;  %v1093_v28 = vld [vmem:[%s1418_s2 + $0x4] ss:$16 sps:$4 sm:$0xff]   ;;  %v1100_v29 = vld [vmem:[%s1418_s2 + $0xc] ss:$16 sps:$4 sm:$0xff]  }
   0xb   :  { %425 = vmatpush1.bf16.msra.mxu0 %v985_v10  ;;  %476 = vmatpush1.bf16.msra.mxu1 %v990_v11  ;;  %v1105_v30 = vld [vmem:[%s1418_s2] ss:$16 sps:$4 sm:$0xff]   ;;  %v1112_v31 = vld [vmem:[%s1418_s2 + $0x8] ss:$16 sps:$4 sm:$0xff]   ;;  %v1117_v32 = vld [vmem:[%s1418_s2 + $0x1e4] ss:$16 sps:$4 sm:$0xff]  }
   0xc   :  { %426 = vmatprep.subr.bf16.mxu0 %v997_v12  ;;  %477 = vmatprep.subr.bf16.mxu1 %v1004_v13  ;;  %v1124_v33 = vld [vmem:[%s1418_s2 + $0x1ec] ss:$16 sps:$4 sm:$0xff]   ;;  %v1129_v34 = vld [vmem:[%s1418_s2 + $0x1e0] ss:$16 sps:$4 sm:$0xff]   ;;  %v1134_v35 = vld [vmem:[%s1418_s2 + $0x1e8] ss:$16 sps:$4 sm:$0xff]  }
   0xd   :  { %v1141_v36 = vld [vmem:[%s1418_s2 + $0x1c4] ss:$16 sps:$4 sm:$0xff]   ;;  %v1148_v37 = vld [vmem:[%s1418_s2 + $0x1cc] ss:$16 sps:$4 sm:$0xff]   ;;  %v1153_v38 = vld [vmem:[%s1418_s2 + $0x1c0] ss:$16 sps:$4 sm:$0xff]  }
   0xe   :  { %v1160_v39 = vld [vmem:[%s1418_s2 + $0x1c8] ss:$16 sps:$4 sm:$0xff]   ;;  %v1165_v40 = vld [vmem:[%s1418_s2 + $0x1a4] ss:$16 sps:$4 sm:$0xff]   ;;  %v1172_v41 = vld [vmem:[%s1418_s2 + $0x1ac] ss:$16 sps:$4 sm:$0xff]  }
   0xf   :  { %427 = vmatpush1.bf16.msra.mxu0 %v1009_v14  ;;  %478 = vmatpush1.bf16.msra.mxu1 %v1016_v15  ;;  %v1177_v42 = vld [vmem:[%s1418_s2 + $0x1a0] ss:$16 sps:$4 sm:$0xff]   ;;  %v1182_v43 = vld [vmem:[%s1418_s2 + $0x1a8] ss:$16 sps:$4 sm:$0xff]   ;;  %v1189_v44 = vld [vmem:[%s1418_s2 + $0x184] ss:$16 sps:$4 sm:$0xff]  }
  0x10   :  { %428 = vmatprep.subr.bf16.mxu0 %v1021_v16  ;;  %479 = vmatprep.subr.bf16.mxu1 %v1028_v17  ;;  %v1196_v45 = vld [vmem:[%s1418_s2 + $0x18c] ss:$16 sps:$4 sm:$0xff]   ;;  %v1201_v46 = vld [vmem:[%s1418_s2 + $0x180] ss:$16 sps:$4 sm:$0xff]   ;;  %v1211_v48 = vld [vmem:[%s1418_s2 + $0x188] ss:$16 sps:$4 sm:$0xff]  }
  0x11   :  { %v893_v47 = vld [vmem:[%s1419_s0 + $0x4] ss:$8 sps:$4 sm:$0xff]   ;;  %v1230_v51 = vld [vmem:[%s1418_s2 + $0x160] ss:$16 sps:$4 sm:$0xff]   ;;  %v1235_v52 = vld [vmem:[%s1418_s2 + $0x168] ss:$16 sps:$4 sm:$0xff]  }
  0x12   :  { %v1218_v49 = vld [vmem:[%s1418_s2 + $0x164] ss:$16 sps:$4 sm:$0xff]   ;;  %v1223_v50 = vld [vmem:[%s1418_s2 + $0x16c] ss:$16 sps:$4 sm:$0xff]   ;;  %452 = vmatprep.mubr.bf16.mxu0 %v893_v47  ;;  %503 = vmatprep.mubr.bf16.mxu1 %v893_v47  ;;  %v1254_v55 = vld [vmem:[%s1418_s2 + $0x140] ss:$16 sps:$4 sm:$0xff]  }
  0x13   :  { %429 = vmatpush1.bf16.msra.mxu0 %v1033_v18  ;;  %480 = vmatpush1.bf16.msra.mxu1 %v1038_v19  ;;  %v1242_v53 = vld [vmem:[%s1418_s2 + $0x144] ss:$16 sps:$4 sm:$0xff]   ;;  %v1247_v54 = vld [vmem:[%s1418_s2 + $0x14c] ss:$16 sps:$4 sm:$0xff]   ;;  %v1259_v56 = vld [vmem:[%s1418_s2 + $0x148] ss:$16 sps:$4 sm:$0xff]  }
  0x14   :  { %430 = vmatprep.subr.bf16.mxu0 %v1045_v20  ;;  %481 = vmatprep.subr.bf16.mxu1 %v1052_v21  ;;  %v1266_v57 = vld [vmem:[%s1418_s2 + $0x124] ss:$16 sps:$4 sm:$0xff]   ;;  %v1271_v58 = vld [vmem:[%s1418_s2 + $0x12c] ss:$16 sps:$4 sm:$0xff]   ;;  %v1278_v59 = vld [vmem:[%s1418_s2 + $0x120] ss:$16 sps:$4 sm:$0xff]  }
  0x15   :  { %1427 = vst [vmem:[#allocation2_spill] sm:$0xff] %v1271_v58  ;;  %1428 = vst [vmem:[#allocation3_spill] sm:$0xff] %v1278_v59  ;;  %v1283_v60 = vld [vmem:[%s1418_s2 + $0x128] ss:$16 sps:$4 sm:$0xff]   ;;  %v1290_v61 = vld [vmem:[%s1418_s2 + $0x104] ss:$16 sps:$4 sm:$0xff]  }
  0x16   :  { %1429 = vst [vmem:[#allocation4_spill] sm:$0xff] %v1283_v60  ;;  %v1295_v62 = vld [vmem:[%s1418_s2 + $0x10c] ss:$16 sps:$4 sm:$0xff]   ;;  %v1302_v63 = vld [vmem:[%s1418_s2 + $0x100] ss:$16 sps:$4 sm:$0xff]  }
  0x17   :  { %431 = vmatpush1.bf16.msra.mxu0 %v1057_v22  ;;  %482 = vmatpush1.bf16.msra.mxu1 %v1064_v23  ;;  %1430 = vst [vmem:[#allocation5_spill] sm:$0xff] %v1302_v63  ;;  %v1307_v47 = vld [vmem:[%s1418_s2 + $0x108] ss:$16 sps:$4 sm:$0xff]  }
  0x18   :  { %432 = vmatprep.subr.bf16.mxu0 %v1069_v24  ;;  %483 = vmatprep.subr.bf16.mxu1 %v1076_v25 }
  0x1b   :  { %433 = vmatpush1.bf16.msra.mxu0 %v1081_v26  ;;  %484 = vmatpush1.bf16.msra.mxu1 %v1086_v27 }
  0x1c   :  { %434 = vmatprep.subr.bf16.mxu0 %v1093_v28  ;;  %485 = vmatprep.subr.bf16.mxu1 %v1100_v29 }
  0x1f   :  { %435 = vmatpush1.bf16.msra.mxu0 %v1105_v30  ;;  %486 = vmatpush1.bf16.msra.mxu1 %v1112_v31 }
  0x20   :  { %436 = vmatprep.subr.bf16.mxu0 %v1117_v32  ;;  %487 = vmatprep.subr.bf16.mxu1 %v1124_v33 }
  0x23   :  { %437 = vmatpush2.bf16.msra.mxu0 %v1129_v34  ;;  %488 = vmatpush2.bf16.msra.mxu1 %v1134_v35 }
  0x24   :  { %438 = vmatprep.subr.bf16.mxu0 %v1141_v36  ;;  %489 = vmatprep.subr.bf16.mxu1 %v1148_v37 }
  0x27   :  { %439 = vmatpush2.bf16.msra.mxu0 %v1153_v38  ;;  %490 = vmatpush2.bf16.msra.mxu1 %v1160_v39 }
  0x28   :  { %440 = vmatprep.subr.bf16.mxu0 %v1165_v40  ;;  %491 = vmatprep.subr.bf16.mxu1 %v1172_v41 }
  0x2b   :  { %441 = vmatpush2.bf16.msra.mxu0 %v1177_v42  ;;  %492 = vmatpush2.bf16.msra.mxu1 %v1182_v43 }
  0x2c   :  { %442 = vmatprep.subr.bf16.mxu0 %v1189_v44  ;;  %493 = vmatprep.subr.bf16.mxu1 %v1196_v45 }
  0x2f   :  { %443 = vmatpush2.bf16.msra.mxu0 %v1201_v46  ;;  %494 = vmatpush2.bf16.msra.mxu1 %v1211_v48 }
  0x30   :  { %444 = vmatprep.subr.bf16.mxu0 %v1218_v49  ;;  %495 = vmatprep.subr.bf16.mxu1 %v1223_v50 }
  0x33   :  { %445 = vmatpush2.bf16.msra.mxu0 %v1230_v51  ;;  %496 = vmatpush2.bf16.msra.mxu1 %v1235_v52 }
  0x34   :  { %446 = vmatprep.subr.bf16.mxu0 %v1242_v53  ;;  %497 = vmatprep.subr.bf16.mxu1 %v1247_v54 }
  0x37   :  { %447 = vmatpush2.bf16.msra.mxu0 %v1254_v55  ;;  %498 = vmatpush2.bf16.msra.mxu1 %v1259_v56 }
  0x38   :  { %448 = vmatprep.subr.bf16.mxu0 %v1266_v57  ;;  %499 = vmatprep.subr.bf16.mxu1 %v1271_v58 }
  0x3b   :  { %449 = vmatpush2.bf16.msra.mxu0 %v1278_v59  ;;  %500 = vmatpush2.bf16.msra.mxu1 %v1283_v60  ;;  %v891_v59 = vld [vmem:[%s1419_s0] ss:$8 sps:$4 sm:$0xff]   ;;  %v82_v60 = vld [vmem:[%s1419_s0 + $0x10] sm:$0x11] }
  0x3c   :  { %450 = vmatprep.subr.bf16.mxu0 %v1290_v61  ;;  %501 = vmatprep.subr.bf16.mxu1 %v1295_v62  ;;  %v726_v58 = vcombine.high %v82_v60, %v82_v60 }
  0x3f   :  { %451 = vmatpush2.bf16.msra.mxu0 %v1302_v63  ;;  %502 = vmatpush2.bf16.msra.mxu1 %v1307_v47  ;;  %v725_v63 = vcombine.low %v82_v60, %v82_v60 }
  0x40   :  { %542 = vmatprep.subr.bf16.mxu0 %v929_v0  ;;  %593 = vmatprep.subr.bf16.mxu1 %v934_v1  ;;  %v898_v0 = vld [vmem:[%s1420_s1 + $0x4] ss:$8 sps:$4 sm:$0xff]  }
  0x41   :  { %v1431_v1 = vld [vmem:[#allocation2_spill] sm:$0xff] }
  0x42   :  { %453 = vmatmul.mubr.bf16.vlgmr.msra.gmra.mxu0 %v891_v59  ;;  %504 = vmatmul.mubr.bf16.vlgmr.msra.gmra.mxu1 %v891_v59 }
  0x43   :  { %543 = vmatpush1.bf16.msra.mxu0 %v940_v2  ;;  %594 = vmatpush1.bf16.msra.mxu1 %v945_v3  ;;  %v1432_v2 = vld [vmem:[#allocation3_spill] sm:$0xff]  ;;  %v1433_v3 = vld [vmem:[#allocation4_spill] sm:$0xff] }
  0x44   :  { %544 = vmatprep.subr.bf16.mxu0 %v951_v4  ;;  %595 = vmatprep.subr.bf16.mxu1 %v958_v5  ;;  %v524_v4 = vld [vmem:[%s1420_s1 + $0x10] sm:$0x11]  ;;  %v896_v5 = vld [vmem:[%s1420_s1] ss:$8 sps:$4 sm:$0xff]  }
  0x45   :  { %462 = vmatprep.mubr.bf16.mxu0 %v726_v58  ;;  %513 = vmatprep.mubr.bf16.mxu1 %v726_v58 }
  0x47   :  { %545 = vmatpush1.bf16.msra.mxu0 %v963_v6  ;;  %596 = vmatpush1.bf16.msra.mxu1 %v969_v7  ;;  %v1434_v6 = vld [vmem:[#allocation5_spill] sm:$0xff]  ;;  %v794_v7 = vcombine.high %v524_v4, %v524_v4 }
  0x48   :  { %546 = vmatprep.subr.bf16.mxu0 %v975_v8  ;;  %597 = vmatprep.subr.bf16.mxu1 %v980_v9  ;;  %v793_v8 = vcombine.low %v524_v4, %v524_v4 }
  0x4a   :  { %463 = vmatmul.mubr.bf16.gmra.mxu0 %v725_v63  ;;  %514 = vmatmul.mubr.bf16.gmra.mxu1 %v725_v63 }
  0x4b   :  { %547 = vmatpush1.bf16.msra.mxu0 %v985_v10  ;;  %598 = vmatpush1.bf16.msra.mxu1 %v990_v11 }
  0x4c   :  { %548 = vmatprep.subr.bf16.mxu0 %v997_v12  ;;  %599 = vmatprep.subr.bf16.mxu1 %v1004_v13 }
  0x4d   :  { %574 = vmatprep.mubr.bf16.mxu0 %v898_v0  ;;  %625 = vmatprep.mubr.bf16.mxu1 %v898_v0 }
  0x4f   :  { %549 = vmatpush1.bf16.msra.mxu0 %v1009_v14  ;;  %600 = vmatpush1.bf16.msra.mxu1 %v1016_v15 }
  0x50   :  { %550 = vmatprep.subr.bf16.mxu0 %v1021_v16  ;;  %601 = vmatprep.subr.bf16.mxu1 %v1028_v17 }
  0x53   :  { %551 = vmatpush1.bf16.msra.mxu0 %v1033_v18  ;;  %602 = vmatpush1.bf16.msra.mxu1 %v1038_v19 }
  0x54   :  { %552 = vmatprep.subr.bf16.mxu0 %v1045_v20  ;;  %603 = vmatprep.subr.bf16.mxu1 %v1052_v21 }
  0x57   :  { %553 = vmatpush1.bf16.msra.mxu0 %v1057_v22  ;;  %604 = vmatpush1.bf16.msra.mxu1 %v1064_v23 }
  0x58   :  { %554 = vmatprep.subr.bf16.mxu0 %v1069_v24  ;;  %605 = vmatprep.subr.bf16.mxu1 %v1076_v25 }
  0x5b   :  { %555 = vmatpush1.bf16.msra.mxu0 %v1081_v26  ;;  %606 = vmatpush1.bf16.msra.mxu1 %v1086_v27 }
  0x5c   :  { %556 = vmatprep.subr.bf16.mxu0 %v1093_v28  ;;  %607 = vmatprep.subr.bf16.mxu1 %v1100_v29 }
  0x5f   :  { %557 = vmatpush1.bf16.msra.mxu0 %v1105_v30  ;;  %608 = vmatpush1.bf16.msra.mxu1 %v1112_v31 }
  0x60   :  { %558 = vmatprep.subr.bf16.mxu0 %v1117_v32  ;;  %609 = vmatprep.subr.bf16.mxu1 %v1124_v33 }
  0x63   :  { %559 = vmatpush2.bf16.msra.mxu0 %v1129_v34  ;;  %610 = vmatpush2.bf16.msra.mxu1 %v1134_v35 }
  0x64   :  { %560 = vmatprep.subr.bf16.mxu0 %v1141_v36  ;;  %611 = vmatprep.subr.bf16.mxu1 %v1148_v37 }
  0x67   :  { %561 = vmatpush2.bf16.msra.mxu0 %v1153_v38  ;;  %612 = vmatpush2.bf16.msra.mxu1 %v1160_v39 }
  0x68   :  { %562 = vmatprep.subr.bf16.mxu0 %v1165_v40  ;;  %613 = vmatprep.subr.bf16.mxu1 %v1172_v41 }
  0x6b   :  { %563 = vmatpush2.bf16.msra.mxu0 %v1177_v42  ;;  %614 = vmatpush2.bf16.msra.mxu1 %v1182_v43 }
  0x6c   :  { %564 = vmatprep.subr.bf16.mxu0 %v1189_v44  ;;  %615 = vmatprep.subr.bf16.mxu1 %v1196_v45 }
  0x6f   :  { %565 = vmatpush2.bf16.msra.mxu0 %v1201_v46  ;;  %616 = vmatpush2.bf16.msra.mxu1 %v1211_v48 }
  0x70   :  { %566 = vmatprep.subr.bf16.mxu0 %v1218_v49  ;;  %617 = vmatprep.subr.bf16.mxu1 %v1223_v50 }
  0x73   :  { %567 = vmatpush2.bf16.msra.mxu0 %v1230_v51  ;;  %618 = vmatpush2.bf16.msra.mxu1 %v1235_v52 }
  0x74   :  { %568 = vmatprep.subr.bf16.mxu0 %v1242_v53  ;;  %619 = vmatprep.subr.bf16.mxu1 %v1247_v54 }
  0x77   :  { %569 = vmatpush2.bf16.msra.mxu0 %v1254_v55  ;;  %620 = vmatpush2.bf16.msra.mxu1 %v1259_v56 }
  0x78   :  { %570 = vmatprep.subr.bf16.mxu0 %v1266_v57  ;;  %621 = vmatprep.subr.bf16.mxu1 %v1431_v1 }
  0x7b   :  { %571 = vmatpush2.bf16.msra.mxu0 %v1432_v2  ;;  %622 = vmatpush2.bf16.msra.mxu1 %v1433_v3 }
  0x7c   :  { %572 = vmatprep.subr.bf16.mxu0 %v1290_v61  ;;  %623 = vmatprep.subr.bf16.mxu1 %v1295_v62 }
  0x7f   :  { %573 = vmatpush2.bf16.msra.mxu0 %v1434_v6  ;;  %624 = vmatpush2.bf16.msra.mxu1 %v1307_v47 }
  0x82   :  { %575 = vmatmul.mubr.bf16.vlgmr.msra.gmra.mxu0 %v896_v5  ;;  %626 = vmatmul.mubr.bf16.vlgmr.msra.gmra.mxu1 %v896_v5 }
  0x83   :  { %584 = vmatprep.mubr.bf16.mxu0 %v794_v7  ;;  %635 = vmatprep.mubr.bf16.mxu1 %v794_v7 }
  0x8a   :  { %585 = vmatmul.mubr.bf16.gmra.mxu0 %v793_v8  ;;  %636 = vmatmul.mubr.bf16.gmra.mxu1 %v793_v8 }
 0x102   :  { %v454_v9 = vpop.f32.mrf.mxu0  ;;  %v505_v10 = vpop.f32.mrf.mxu1 }
 0x103   :  { %v644_v11 = vmul.f32 %v454_v9, %v454_v9  ;;  %v646_v14 = vmul.f32 %v505_v10, %v505_v10 }
 0x104   :  { %v456_v12 = vpop.f32.mrf.mxu0  ;;  %v507_v13 = vpop.f32.mrf.mxu1 }
 0x105   :  { %v645_v15 = vmul.f32 %v456_v12, %v456_v12  ;;  %v647_v19 = vmul.f32 %v507_v13, %v507_v13 }
 0x106   :  { %v458_v16 = vpop.f32.mrf.mxu0  ;;  %v509_v17 = vpop.f32.mrf.mxu1 }
 0x107   :  { %v656_v18 = vadd.f32 %v645_v15, %v644_v11  ;;  %v648_v22 = vmul.f32 %v458_v16, %v458_v16  ;;  %v650_v25 = vmul.f32 %v509_v17, %v509_v17 }
 0x108   :  { %v460_v20 = vpop.f32.mrf.mxu0  ;;  %v511_v21 = vpop.f32.mrf.mxu1 }
 0x109   :  { %v649_v23 = vmul.f32 %v460_v20, %v460_v20  ;;  %v657_v24 = vadd.f32 %v656_v18, %v646_v14  ;;  %v651_v34 = vmul.f32 %v511_v21, %v511_v21 }
 0x10a   :  { %v464_v26 = vpop.f32.mrf.mxu0  ;;  %v515_v27 = vpop.f32.mrf.mxu1 }
 0x10b   :  { %v661_v28 = vadd.f32 %v649_v23, %v648_v22  ;;  %v658_v29 = vadd.f32 %v657_v24, %v647_v19  ;;  %v652_v30 = vmul.f32 %v464_v26, %v464_v26  ;;  %v654_v31 = vmul.f32 %v515_v27, %v515_v27 }
 0x10c   :  { %v466_v32 = vpop.f32.mrf.mxu0  ;;  %v517_v33 = vpop.f32.mrf.mxu1 }
 0x10d   :  { %659 = vadd.xlane.f32.xlu0 %v658_v29  ;;  %v662_v35 = vadd.f32 %v661_v28, %v650_v25  ;;  %v667_v36 = vsel %vm666_vm0, %v652_v30, 0.0  ;;  %v653_v37 = vmul.f32 %v466_v32, %v466_v32  ;;  %v655_v39 = vmul.f32 %v517_v33, %v517_v33 }
 0x10e   :  { %v468_v38 = vpop.f32.mrf.mxu0  ;;  %v519_v40 = vpop.f32.mrf.mxu1  ;;  %v670_v43 = vsel %vm666_vm0, %v654_v31, 0.0 }
 0x10f   :  { %v663_v41 = vadd.f32 %v662_v35, %v651_v34  ;;  %v668_v42 = vsel %vm666_vm0, %v653_v37, 0.0  ;;  %v672_v48 = vsel %vm666_vm0, %v655_v39, 0.0 }
 0x110   :  { %v669_v44 = vadd.f32 %v668_v42, %v667_v36  ;;  %v469_v45 = vpop.f32.mrf.mxu0  ;;  %v520_v46 = vpop.f32.mrf.mxu1 }
 0x111   :  { %664 = vadd.xlane.f32.xlu0 %v663_v41 }
 0x112   :  { %v671_v49 = vadd.f32 %v670_v43, %v669_v44 }
 0x114   :  { %v673_v50 = vadd.f32 %v672_v48, %v671_v49 }
 0x116   :  { %674 = vadd.xlane.f32.xlu1 %v673_v50 }
 0x142   :  { %v576_v51 = vpop.f32.mrf.mxu0  ;;  %v627_v52 = vpop.f32.mrf.mxu1 }
 0x143   :  { %v681_v55 = vmul.f32 %v576_v51, %v576_v51  ;;  %v683_v56 = vmul.f32 %v627_v52, %v627_v52 }
 0x144   :  { %v629_v53 = vpop.f32.mrf.mxu1  ;;  %v578_v54 = vpop.f32.mrf.mxu0 }
 0x145   :  { %v682_v57 = vmul.f32 %v578_v54, %v578_v54  ;;  %v684_v63 = vmul.f32 %v629_v53, %v629_v53 }
 0x146   :  { %v580_v58 = vpop.f32.mrf.mxu0  ;;  %v631_v59 = vpop.f32.mrf.mxu1 }
 0x147   :  { %v693_v60 = vadd.f32 %v682_v57, %v681_v55  ;;  %v685_v47 = vmul.f32 %v580_v58, %v580_v58  ;;  %v687_v8 = vmul.f32 %v631_v59, %v631_v59 }
 0x148   :  { %v582_v61 = vpop.f32.mrf.mxu0  ;;  %v633_v62 = vpop.f32.mrf.mxu1 }
 0x149   :  { %v686_v0 = vmul.f32 %v582_v61, %v582_v61  ;;  %v694_v1 = vadd.f32 %v693_v60, %v683_v56  ;;  %v688_v12 = vmul.f32 %v633_v62, %v633_v62 }
 0x14a   :  { %v586_v2 = vpop.f32.mrf.mxu0  ;;  %v637_v3 = vpop.f32.mrf.mxu1 }
 0x14b   :  { %v698_v4 = vadd.f32 %v686_v0, %v685_v47  ;;  %v689_v5 = vmul.f32 %v586_v2, %v586_v2  ;;  %v691_v6 = vmul.f32 %v637_v3, %v637_v3  ;;  %v695_v7 = vadd.f32 %v694_v1, %v684_v63 }
 0x14c   :  { %v588_v9 = vpop.f32.mrf.mxu0  ;;  %v639_v10 = vpop.f32.mrf.mxu1 }
 0x14d   :  { %v690_v11 = vmul.f32 %v588_v9, %v588_v9  ;;  %696 = vadd.xlane.f32.xlu1 %v695_v7  ;;  %v699_v15 = vadd.f32 %v698_v4, %v687_v8  ;;  %v703_v16 = vsel %vm666_vm0, %v689_v5, 0.0  ;;  %v706_v17 = vsel %vm666_vm0, %v691_v6, 0.0 }
 0x14e   :  { %v590_v13 = vpop.f32.mrf.mxu0  ;;  %v641_v14 = vpop.f32.mrf.mxu1  ;;  %v692_v19 = vmul.f32 %v639_v10, %v639_v10 }
 0x14f   :  { %v704_v18 = vsel %vm666_vm0, %v690_v11, 0.0  ;;  %v700_v23 = vadd.f32 %v699_v15, %v688_v12 }
 0x150   :  { %v705_v20 = vadd.f32 %v704_v18, %v703_v16  ;;  %v591_v21 = vpop.f32.mrf.mxu0  ;;  %v642_v22 = vpop.f32.mrf.mxu1  ;;  %v708_v25 = vsel %vm666_vm0, %v692_v19, 0.0 }
 0x151   :  { %701 = vadd.xlane.f32.xlu0 %v700_v23 }
 0x152   :  { %v707_v24 = vadd.f32 %v706_v17, %v705_v20 }
 0x154   :  { %v709_v26 = vadd.f32 %v708_v25, %v707_v24 }
 0x156   :  { %710 = vadd.xlane.f32.xlu1 %v709_v26 }
 0x196   :  { %v660_v27 = vpop.xlane.xlu0 %659 }
 0x197   :  { %677 = vst.msk [vmem:[%s1421_s3] sm:$0xff] %vm676_vm1, %v660_v27 }
 0x19a   :  { %v665_v28 = vpop.xlane.xlu0 %664 }
 0x19b   :  { %678 = vst.msk [vmem:[%s1421_s3 + $0x8] sm:$0xff] %vm676_vm1, %v665_v28 }
 0x19f   :  { %v675_v29 = vpop.xlane.xlu1 %674 }
 0x1a0   :  { %680 = vst.msk [vmem:[%s1421_s3 + $0x10] sm:$0x3] %vm679_vm2, %v675_v29 }
 0x1d6   :  { %v697_v30 = vpop.xlane.xlu1 %696 }
 0x1d7   :  { %712 = vst.msk [vmem:[%s1422_s4] sm:$0xff] %vm676_vm1, %v697_v30 }
 0x1da   :  { %v702_v31 = vpop.xlane.xlu0 %701 }
 0x1db   :  { %713 = vst.msk [vmem:[%s1422_s4 + $0x8] sm:$0xff] %vm676_vm1, %v702_v31 }
 0x1df   :  { %v711_v32 = vpop.xlane.xlu1 %710 }
 0x1e0   :  { %714 = vst.msk [vmem:[%s1422_s4 + $0x10] sm:$0x3] %vm679_vm2, %v711_v32 }

// kernel: integer_pow.3
= control target key start
LH: loop header
LB: loop body
LE: loop exit
PB: predicated region body
PF: predicated region fallthrough
CT: control target
= control target key end

     0   :  { %s34_s0 = inlined_call_operand.vmem [shape: f32[2,9], index: 0, kind: input, shape index: {}, may-alias: {0,1}]   ;;  %s35_s1 = inlined_call_operand.vmem [shape: f32[2,9], index: 1, kind: input, shape index: {}, may-alias: {0,1}]   ;;  %s36_s2 = inlined_call_operand.vmem [shape: f32[2,9], index: 2, kind: output, shape index: {}]  }
   0x1   :  { %v3_v0 = vld [vmem:[%s34_s0] sm:$0x3] }
   0x2   :  { %v4_v1 = vld [vmem:[%s35_s1] sm:$0x3] }
   0x3   :  { %v7_v2 = vmul.f32 %v4_v1, %v3_v0 }
   0x5   :  { %9 = vst [vmem:[%s36_s2] sm:$0x3] %v7_v2 }

</bundles_post_ra>
